<compile_context>
chip_gen: v5e
topology: v5e:2x2
jax: 0.10.0
libtpu: 0.0.40
codegen_flags: <defaults>
</compile_context>

<pallas_src>
from functools import partial

import jax
import jax.numpy as jnp
from jax.experimental import pallas as pl
from jax.experimental.pallas import tpu as pltpu


def _round_up(v, m):
    return (v + m - 1) // m * m


def _pack_weight(w, k, cin, k_pad):
    """(Cout, Cin, kh, kw) -> (k_pad, Cout) bf16, rows ordered (kh, kw, cin).

    Rows beyond k*k*cin are zero, so the matching (zero-initialised) pad
    columns of the im2col patch contribute nothing to the matmul."""
    cout = w.shape[0]
    wt = jnp.transpose(w, (2, 3, 1, 0)).reshape(k * k * cin, cout)
    wt = jnp.pad(wt, ((0, k_pad - k * k * cin), (0, 0)))
    return wt.astype(jnp.bfloat16)


def _make_fused_kernel(*, k, stride, padding, H, W, Cin,
                       Ho1, Wo1, C1, Ho2, Wo2, C2):
    """Fused conv1+bias+ReLU -> conv2+bias+ReLU for one NHWC sample."""

    def im2col(xp_ref, patch_ref, Ho, Wo, C):
        # Scatter the k*k taps into the packed (Ho*Wo, k*k*C) patch columns.
        for kh in range(k):
            for kw in range(k):
                if stride == 1:
                    xs = xp_ref[pl.ds(kh, Ho), pl.ds(kw, Wo), :]
                else:
                    # TODO(synk): for stride>1 gather the subsampled rows once
                    # instead of a sublane-strided pl.ds in every tap.
                    xs = xp_ref[pl.ds(kh, Ho, stride), pl.ds(kw, Wo, stride), :]
                t = kh * k + kw
                patch_ref[:, pl.ds(t * C, C)] = xs.reshape(Ho * Wo, C)

    def kernel(x_ref, w1_ref, b1_ref, w2_ref, b2_ref, o_ref, xp1, xp2, p1, p2):
        # Re-zero the scratches every step (cheap: a few dozen vector stores).
        # This provides the spatial zero-padding border and keeps the K-pad
        # patch columns finite, and unlike a program_id==0 init it remains
        # correct when the parallel batch axis is split across TensorCores.
        xp1[...] = jnp.zeros_like(xp1)
        xp2[...] = jnp.zeros_like(xp2)
        p1[...] = jnp.zeros_like(p1)
        p2[...] = jnp.zeros_like(p2)

        # ---- conv1 + bias + ReLU: one MXU matmul, K = k*k*Cin ----
        xp1[pl.ds(padding, H), pl.ds(padding, W), :] = x_ref[...].astype(xp1.dtype)
        im2col(xp1, p1, Ho1, Wo1, Cin)
        y1 = jnp.dot(p1[...], w1_ref[...], preferred_element_type=jnp.float32)
        y1 = jnp.maximum(y1 + b1_ref[...], 0.0)                  # (Ho1*Wo1, C1)

        # ---- conv2 + bias + ReLU: intermediate activation never leaves VMEM ----
        xp2[pl.ds(padding, Ho1), pl.ds(padding, Wo1), :] = (
            y1.astype(xp2.dtype).reshape(Ho1, Wo1, C1))
        im2col(xp2, p2, Ho2, Wo2, C1)
        y2 = jnp.dot(p2[...], w2_ref[...], preferred_element_type=jnp.float32)
        y2 = jnp.maximum(y2 + b2_ref[...], 0.0)                  # (Ho2*Wo2, C2)
        o_ref[...] = y2.reshape(Ho2, Wo2, C2).astype(o_ref.dtype)

    return kernel


def _fused_double_conv(x_nhwc, w1p, b1, w2p, b2, *, k, stride, padding, C1, C2):
    """x_nhwc: (N, H, W, Cin) f32 (true channel count; cast to bf16 in-kernel)."""
    N, H, W, Cin = x_nhwc.shape
    Hp1, Wp1 = H + 2 * padding, W + 2 * padding
    Ho1, Wo1 = (Hp1 - k) // stride + 1, (Wp1 - k) // stride + 1
    Hp2, Wp2 = Ho1 + 2 * padding, Wo1 + 2 * padding
    Ho2, Wo2 = (Hp2 - k) // stride + 1, (Wp2 - k) // stride + 1
    K1p, K2p = w1p.shape[0], w2p.shape[0]

    kernel = _make_fused_kernel(k=k, stride=stride, padding=padding, H=H, W=W,
                                Cin=Cin, Ho1=Ho1, Wo1=Wo1, C1=C1,
                                Ho2=Ho2, Wo2=Wo2, C2=C2)

    # TODO(synk): tile H (with a k-1 row halo) and/or Cout when the full-sample
    # working set outgrows the per-generation scoped VMEM budget.
    return pl.pallas_call(
        kernel,
        out_shape=jax.ShapeDtypeStruct((N, Ho2, Wo2, C2), jnp.float32),
        grid_spec=pltpu.PrefetchScalarGridSpec(
            num_scalar_prefetch=0,
            grid=(N,),
            in_specs=[
                pl.BlockSpec((None, H, W, Cin), lambda n: (n, 0, 0, 0)),
                pl.BlockSpec((K1p, C1), lambda n: (0, 0)),
                pl.BlockSpec((1, C1), lambda n: (0, 0)),
                pl.BlockSpec((K2p, C2), lambda n: (0, 0)),
                pl.BlockSpec((1, C2), lambda n: (0, 0)),
            ],
            out_specs=pl.BlockSpec((None, Ho2, Wo2, C2), lambda n: (n, 0, 0, 0)),
            scratch_shapes=[
                pltpu.VMEM((Hp1, Wp1, Cin), jnp.bfloat16),    # padded input sample
                pltpu.VMEM((Hp2, Wp2, C1), jnp.bfloat16),     # padded conv1 activation
                pltpu.VMEM((Ho1 * Wo1, K1p), jnp.bfloat16),   # conv1 im2col patch
                pltpu.VMEM((Ho2 * Wo2, K2p), jnp.bfloat16),   # conv2 im2col patch
            ],
        ),
        compiler_params=pltpu.CompilerParams(
            dimension_semantics=("parallel",),   # samples shard across cores
            vmem_limit_bytes=32 * 1024 * 1024,
        ),
    )(x_nhwc, w1p, b1, w2p, b2)


@partial(jax.jit, static_argnames=("kernel_size", "padding", "stride"))
def base_conv_forward(x, w1, b1, w2, b2, *, kernel_size, padding, stride):
    """x: (N, Cin, H, W) f32; w: (Cout, Cin, k, k); b: (Cout,) -> (N, Cout, Ho, Wo) f32."""
    # Mirror nn.Conv2d's positional order: the module's `padding` arg is the
    # conv stride and its `stride` arg is the conv padding.
    conv_stride = padding
    conv_padding = stride

    N, Cin, H, W = x.shape
    C1, C2 = w1.shape[0], w2.shape[0]
    k = kernel_size

    K1p = _round_up(k * k * Cin, 128)
    K2p = _round_up(k * k * C1, 128)
    w1p = _pack_weight(w1, k, Cin, K1p)
    w2p = _pack_weight(w2, k, C1, K2p)
    b1p = b1.reshape(1, C1).astype(jnp.float32)
    b2p = b2.reshape(1, C2).astype(jnp.float32)

    # NCHW -> NHWC once at the model boundary; keep f32 + true Cin in HBM
    # (cast to bf16 only after the block lands in VMEM).
    x_nhwc = jnp.transpose(x, (0, 2, 3, 1))

    out_nhwc = _fused_double_conv(x_nhwc, w1p, b1p, w2p, b2p,
                                  k=k, stride=conv_stride, padding=conv_padding,
                                  C1=C1, C2=C2)
    return jnp.transpose(out_nhwc, (0, 3, 1, 2))


def base_conv_reference(x, w1, b1, w2, b2, *, kernel_size, padding, stride):
    """Pure-JAX f32 reference (same arg-order semantics as the PyTorch module)."""
    conv_stride = padding
    conv_padding = stride

    def conv_relu(h, w, b):
        y = jax.lax.conv_general_dilated(
            h, w, window_strides=(conv_stride, conv_stride),
            padding=[(conv_padding, conv_padding)] * 2,
            dimension_numbers=("NCHW", "OIHW", "NCHW"))
        return jnp.maximum(y + b.reshape(1, -1, 1, 1), 0.0)

    return conv_relu(conv_relu(x, w1, b1), w2, b2)


if __name__ == "__main__":
    key = jax.random.PRNGKey(0)
    k1, k2, k3, k4, k5 = jax.random.split(key, 5)

    N, Cin, H, W = 2, 4, 16, 16
    Cout = 8
    ksize, padding, stride = 3, 1, 1   # BaseConv(4, 8, kernel_size=3, padding=1, stride=1)

    x = jax.random.normal(k1, (N, Cin, H, W), dtype=jnp.float32)
    fan1 = Cin * ksize * ksize
    w1 = jax.random.normal(k2, (Cout, Cin, ksize, ksize), jnp.float32) / jnp.sqrt(fan1)
    b1 = 0.1 * jax.random.normal(k3, (Cout,), jnp.float32)
    fan2 = Cout * ksize * ksize
    w2 = jax.random.normal(k4, (Cout, Cout, ksize, ksize), jnp.float32) / jnp.sqrt(fan2)
    b2 = 0.1 * jax.random.normal(k5, (Cout,), jnp.float32)

    out = base_conv_forward(x, w1, b1, w2, b2,
                            kernel_size=ksize, padding=padding, stride=stride)
    out = jax.block_until_ready(out)

    ref = base_conv_reference(x, w1, b1, w2, b2,
                              kernel_size=ksize, padding=padding, stride=stride)

    assert out.shape == ref.shape == (N, Cout, H, W), (out.shape, ref.shape)
    rel = jnp.linalg.norm(out - ref) / (jnp.linalg.norm(ref) + 1e-8)
    assert float(rel) < 2e-2, f"relative L2 error too large: {float(rel)}"
    assert jnp.allclose(out, ref, atol=1e-1, rtol=1e-1), "elementwise mismatch"

    print("KERNEL_OK")
</pallas_src>

<mosaic_0001>
module attributes {stable_mosaic.version = 11 : i64} {
  func.func @kernel(%arg0: i32, %arg1: memref<1x16x16x4xf32, #tpu.memory_space<vmem>>, %arg2: memref<128x8xbf16, #tpu.memory_space<vmem>>, %arg3: memref<1x8xf32, #tpu.memory_space<vmem>>, %arg4: memref<128x8xbf16, #tpu.memory_space<vmem>>, %arg5: memref<1x8xf32, #tpu.memory_space<vmem>>, %arg6: memref<1x16x16x8xf32, #tpu.memory_space<vmem>>, %arg7: memref<18x18x4xbf16, #tpu.memory_space<vmem>>, %arg8: memref<18x18x8xbf16, #tpu.memory_space<vmem>>, %arg9: memref<256x128xbf16, #tpu.memory_space<vmem>>, %arg10: memref<256x128xbf16, #tpu.memory_space<vmem>>) attributes {dimension_semantics = [#tpu.dimension_semantics<parallel>], iteration_bounds = array<i64: 2>, scalar_prefetch = 0 : i64, scratch_operands = 4 : i64, tpu.core_type = #tpu.core_type<tc>, window_params = [{transform_indices = @transform_0, window_bounds = array<i64: 1, 16, 16, 4>}, {pipeline_mode = #tpu.pipeline_mode<synchronous>, transform_indices = @transform_1, window_bounds = array<i64: 128, 8>}, {pipeline_mode = #tpu.pipeline_mode<synchronous>, transform_indices = @transform_2, window_bounds = array<i64: 1, 8>}, {pipeline_mode = #tpu.pipeline_mode<synchronous>, transform_indices = @transform_3, window_bounds = array<i64: 128, 8>}, {pipeline_mode = #tpu.pipeline_mode<synchronous>, transform_indices = @transform_4, window_bounds = array<i64: 1, 8>}, {transform_indices = @transform_5, window_bounds = array<i64: 1, 16, 16, 8>}]} {
    %cst = arith.constant 0.000000e+00 : bf16
    %0 = vector.broadcast %cst : bf16 to vector<18x18x4xbf16>
    %c0 = arith.constant 0 : index
    %c0_0 = arith.constant 0 : index
    %c0_1 = arith.constant 0 : index
    %1 = vector.load %arg7[%c0, %c0_0, %c0_1] : memref<18x18x4xbf16, #tpu.memory_space<vmem>>, vector<18x18x4xbf16>
    tpu.vector_store %arg7[%c0, %c0_0, %c0_1], %0 {strides = array<i32>} : memref<18x18x4xbf16, #tpu.memory_space<vmem>>, vector<18x18x4xbf16>,
    %cst_2 = arith.constant 0.000000e+00 : bf16
    %2 = vector.broadcast %cst_2 : bf16 to vector<18x18x8xbf16>
    %c0_3 = arith.constant 0 : index
    %c0_4 = arith.constant 0 : index
    %c0_5 = arith.constant 0 : index
    %3 = vector.load %arg8[%c0_3, %c0_4, %c0_5] : memref<18x18x8xbf16, #tpu.memory_space<vmem>>, vector<18x18x8xbf16>
    tpu.vector_store %arg8[%c0_3, %c0_4, %c0_5], %2 {strides = array<i32>} : memref<18x18x8xbf16, #tpu.memory_space<vmem>>, vector<18x18x8xbf16>,
    %cst_6 = arith.constant 0.000000e+00 : bf16
    %4 = vector.broadcast %cst_6 : bf16 to vector<256x128xbf16>
    %c0_7 = arith.constant 0 : index
    %c0_8 = arith.constant 0 : index
    %5 = vector.load %arg9[%c0_7, %c0_8] : memref<256x128xbf16, #tpu.memory_space<vmem>>, vector<256x128xbf16>
    tpu.vector_store %arg9[%c0_7, %c0_8], %4 {strides = array<i32>} : memref<256x128xbf16, #tpu.memory_space<vmem>>, vector<256x128xbf16>,
    %cst_9 = arith.constant 0.000000e+00 : bf16
    %6 = vector.broadcast %cst_9 : bf16 to vector<256x128xbf16>
    %c0_10 = arith.constant 0 : index
    %c0_11 = arith.constant 0 : index
    %7 = vector.load %arg10[%c0_10, %c0_11] : memref<256x128xbf16, #tpu.memory_space<vmem>>, vector<256x128xbf16>
    tpu.vector_store %arg10[%c0_10, %c0_11], %6 {strides = array<i32>} : memref<256x128xbf16, #tpu.memory_space<vmem>>, vector<256x128xbf16>,
    %c0_12 = arith.constant 0 : index
    %c0_13 = arith.constant 0 : index
    %c0_14 = arith.constant 0 : index
    %c0_15 = arith.constant 0 : index
    %8 = vector.load %arg1[%c0_12, %c0_13, %c0_14, %c0_15] : memref<1x16x16x4xf32, #tpu.memory_space<vmem>>, vector<1x16x16x4xf32>
    %9 = vector.shape_cast %8 : vector<1x16x16x4xf32> to vector<16x16x4xf32>
    %10 = arith.truncf %9 : vector<16x16x4xf32> to vector<16x16x4xbf16>
    %c1 = arith.constant 1 : index
    %c1_16 = arith.constant 1 : index
    %c0_17 = arith.constant 0 : index
    %11 = vector.load %arg7[%c1, %c1_16, %c0_17] : memref<18x18x4xbf16, #tpu.memory_space<vmem>>, vector<16x16x4xbf16>
    tpu.vector_store %arg7[%c1, %c1_16, %c0_17], %10 {strides = array<i32>} : memref<18x18x4xbf16, #tpu.memory_space<vmem>>, vector<16x16x4xbf16>,
    %c0_18 = arith.constant 0 : index
    %c0_19 = arith.constant 0 : index
    %c0_20 = arith.constant 0 : index
    %12 = vector.load %arg7[%c0_18, %c0_19, %c0_20] : memref<18x18x4xbf16, #tpu.memory_space<vmem>>, vector<16x16x4xbf16>
    %13 = vector.shape_cast %12 : vector<16x16x4xbf16> to vector<256x4xbf16>
    %c0_21 = arith.constant 0 : index
    %c0_22 = arith.constant 0 : index
    %14 = vector.load %arg9[%c0_21, %c0_22] : memref<256x128xbf16, #tpu.memory_space<vmem>>, vector<256x4xbf16>
    tpu.vector_store %arg9[%c0_21, %c0_22], %13 {strides = array<i32>} : memref<256x128xbf16, #tpu.memory_space<vmem>>, vector<256x4xbf16>,
    %c0_23 = arith.constant 0 : index
    %c1_24 = arith.constant 1 : index
    %c0_25 = arith.constant 0 : index
    %15 = vector.load %arg7[%c0_23, %c1_24, %c0_25] : memref<18x18x4xbf16, #tpu.memory_space<vmem>>, vector<16x16x4xbf16>
    %16 = vector.shape_cast %15 : vector<16x16x4xbf16> to vector<256x4xbf16>
    %c0_26 = arith.constant 0 : index
    %c4 = arith.constant 4 : index
    %17 = vector.load %arg9[%c0_26, %c4] : memref<256x128xbf16, #tpu.memory_space<vmem>>, vector<256x4xbf16>
    tpu.vector_store %arg9[%c0_26, %c4], %16 {strides = array<i32>} : memref<256x128xbf16, #tpu.memory_space<vmem>>, vector<256x4xbf16>,
    %c0_27 = arith.constant 0 : index
    %c2 = arith.constant 2 : index
    %c0_28 = arith.constant 0 : index
    %18 = vector.load %arg7[%c0_27, %c2, %c0_28] : memref<18x18x4xbf16, #tpu.memory_space<vmem>>, vector<16x16x4xbf16>
    %19 = vector.shape_cast %18 : vector<16x16x4xbf16> to vector<256x4xbf16>
    %c0_29 = arith.constant 0 : index
    %c8 = arith.constant 8 : index
    %20 = vector.load %arg9[%c0_29, %c8] : memref<256x128xbf16, #tpu.memory_space<vmem>>, vector<256x4xbf16>
    tpu.vector_store %arg9[%c0_29, %c8], %19 {strides = array<i32>} : memref<256x128xbf16, #tpu.memory_space<vmem>>, vector<256x4xbf16>,
    %c1_30 = arith.constant 1 : index
    %c0_31 = arith.constant 0 : index
    %c0_32 = arith.constant 0 : index
    %21 = vector.load %arg7[%c1_30, %c0_31, %c0_32] : memref<18x18x4xbf16, #tpu.memory_space<vmem>>, vector<16x16x4xbf16>
    %22 = vector.shape_cast %21 : vector<16x16x4xbf16> to vector<256x4xbf16>
    %c0_33 = arith.constant 0 : index
    %c12 = arith.constant 12 : index
    %23 = vector.load %arg9[%c0_33, %c12] : memref<256x128xbf16, #tpu.memory_space<vmem>>, vector<256x4xbf16>
    tpu.vector_store %arg9[%c0_33, %c12], %22 {strides = array<i32>} : memref<256x128xbf16, #tpu.memory_space<vmem>>, vector<256x4xbf16>,
    %c1_34 = arith.constant 1 : index
    %c1_35 = arith.constant 1 : index
    %c0_36 = arith.constant 0 : index
    %24 = vector.load %arg7[%c1_34, %c1_35, %c0_36] : memref<18x18x4xbf16, #tpu.memory_space<vmem>>, vector<16x16x4xbf16>
    %25 = vector.shape_cast %24 : vector<16x16x4xbf16> to vector<256x4xbf16>
    %c0_37 = arith.constant 0 : index
    %c16 = arith.constant 16 : index
    %26 = vector.load %arg9[%c0_37, %c16] : memref<256x128xbf16, #tpu.memory_space<vmem>>, vector<256x4xbf16>
    tpu.vector_store %arg9[%c0_37, %c16], %25 {strides = array<i32>} : memref<256x128xbf16, #tpu.memory_space<vmem>>, vector<256x4xbf16>,
    %c1_38 = arith.constant 1 : index
    %c2_39 = arith.constant 2 : index
    %c0_40 = arith.constant 0 : index
    %27 = vector.load %arg7[%c1_38, %c2_39, %c0_40] : memref<18x18x4xbf16, #tpu.memory_space<vmem>>, vector<16x16x4xbf16>
    %28 = vector.shape_cast %27 : vector<16x16x4xbf16> to vector<256x4xbf16>
    %c0_41 = arith.constant 0 : index
    %c20 = arith.constant 20 : index
    %29 = vector.load %arg9[%c0_41, %c20] : memref<256x128xbf16, #tpu.memory_space<vmem>>, vector<256x4xbf16>
    tpu.vector_store %arg9[%c0_41, %c20], %28 {strides = array<i32>} : memref<256x128xbf16, #tpu.memory_space<vmem>>, vector<256x4xbf16>,
    %c2_42 = arith.constant 2 : index
    %c0_43 = arith.constant 0 : index
    %c0_44 = arith.constant 0 : index
    %30 = vector.load %arg7[%c2_42, %c0_43, %c0_44] : memref<18x18x4xbf16, #tpu.memory_space<vmem>>, vector<16x16x4xbf16>
    %31 = vector.shape_cast %30 : vector<16x16x4xbf16> to vector<256x4xbf16>
    %c0_45 = arith.constant 0 : index
    %c24 = arith.constant 24 : index
    %32 = vector.load %arg9[%c0_45, %c24] : memref<256x128xbf16, #tpu.memory_space<vmem>>, vector<256x4xbf16>
    tpu.vector_store %arg9[%c0_45, %c24], %31 {strides = array<i32>} : memref<256x128xbf16, #tpu.memory_space<vmem>>, vector<256x4xbf16>,
    %c2_46 = arith.constant 2 : index
    %c1_47 = arith.constant 1 : index
    %c0_48 = arith.constant 0 : index
    %33 = vector.load %arg7[%c2_46, %c1_47, %c0_48] : memref<18x18x4xbf16, #tpu.memory_space<vmem>>, vector<16x16x4xbf16>
    %34 = vector.shape_cast %33 : vector<16x16x4xbf16> to vector<256x4xbf16>
    %c0_49 = arith.constant 0 : index
    %c28 = arith.constant 28 : index
    %35 = vector.load %arg9[%c0_49, %c28] : memref<256x128xbf16, #tpu.memory_space<vmem>>, vector<256x4xbf16>
    tpu.vector_store %arg9[%c0_49, %c28], %34 {strides = array<i32>} : memref<256x128xbf16, #tpu.memory_space<vmem>>, vector<256x4xbf16>,
    %c2_50 = arith.constant 2 : index
    %c2_51 = arith.constant 2 : index
    %c0_52 = arith.constant 0 : index
    %36 = vector.load %arg7[%c2_50, %c2_51, %c0_52] : memref<18x18x4xbf16, #tpu.memory_space<vmem>>, vector<16x16x4xbf16>
    %37 = vector.shape_cast %36 : vector<16x16x4xbf16> to vector<256x4xbf16>
    %c0_53 = arith.constant 0 : index
    %c32 = arith.constant 32 : index
    %38 = vector.load %arg9[%c0_53, %c32] : memref<256x128xbf16, #tpu.memory_space<vmem>>, vector<256x4xbf16>
    tpu.vector_store %arg9[%c0_53, %c32], %37 {strides = array<i32>} : memref<256x128xbf16, #tpu.memory_space<vmem>>, vector<256x4xbf16>,
    %c0_54 = arith.constant 0 : index
    %c0_55 = arith.constant 0 : index
    %39 = vector.load %arg9[%c0_54, %c0_55] : memref<256x128xbf16, #tpu.memory_space<vmem>>, vector<256x128xbf16>
    %c0_56 = arith.constant 0 : index
    %c0_57 = arith.constant 0 : index
    %40 = vector.load %arg2[%c0_56, %c0_57] : memref<128x8xbf16, #tpu.memory_space<vmem>>, vector<128x8xbf16>
    %cst_58 = arith.constant dense<0.000000e+00> : vector<256x8xf32>
    %41 = tpu.matmul %39, %40, %cst_58 {dimension_numbers = #tpu.dot_dimension_numbers<[1], [0], [0], [1], [0, 0, 1, 1], [], []>} : vector<256x128xbf16>, vector<128x8xbf16>, vector<256x8xf32> -> vector<256x8xf32>
    %c0_59 = arith.constant 0 : index
    %c0_60 = arith.constant 0 : index
    %42 = vector.load %arg3[%c0_59, %c0_60] : memref<1x8xf32, #tpu.memory_space<vmem>>, vector<1x8xf32>
    %43 = vector.broadcast %42 : vector<1x8xf32> to vector<256x8xf32>
    %44 = arith.addf %41, %43 : vector<256x8xf32>
    %cst_61 = arith.constant 0.000000e+00 : f32
    %45 = vector.broadcast %cst_61 : f32 to vector<256x8xf32>
    %46 = arith.maximumf %44, %45 : vector<256x8xf32>
    %47 = arith.truncf %46 : vector<256x8xf32> to vector<256x8xbf16>
    %48 = vector.shape_cast %47 : vector<256x8xbf16> to vector<16x16x8xbf16>
    %c1_62 = arith.constant 1 : index
    %c1_63 = arith.constant 1 : index
    %c0_64 = arith.constant 0 : index
    %49 = vector.load %arg8[%c1_62, %c1_63, %c0_64] : memref<18x18x8xbf16, #tpu.memory_space<vmem>>, vector<16x16x8xbf16>
    tpu.vector_store %arg8[%c1_62, %c1_63, %c0_64], %48 {strides = array<i32>} : memref<18x18x8xbf16, #tpu.memory_space<vmem>>, vector<16x16x8xbf16>,
    %c0_65 = arith.constant 0 : index
    %c0_66 = arith.constant 0 : index
    %c0_67 = arith.constant 0 : index
    %50 = vector.load %arg8[%c0_65, %c0_66, %c0_67] : memref<18x18x8xbf16, #tpu.memory_space<vmem>>, vector<16x16x8xbf16>
    %51 = vector.shape_cast %50 : vector<16x16x8xbf16> to vector<256x8xbf16>
    %c0_68 = arith.constant 0 : index
    %c0_69 = arith.constant 0 : index
    %52 = vector.load %arg10[%c0_68, %c0_69] : memref<256x128xbf16, #tpu.memory_space<vmem>>, vector<256x8xbf16>
    tpu.vector_store %arg10[%c0_68, %c0_69], %51 {strides = array<i32>} : memref<256x128xbf16, #tpu.memory_space<vmem>>, vector<256x8xbf16>,
    %c0_70 = arith.constant 0 : index
    %c1_71 = arith.constant 1 : index
    %c0_72 = arith.constant 0 : index
    %53 = vector.load %arg8[%c0_70, %c1_71, %c0_72] : memref<18x18x8xbf16, #tpu.memory_space<vmem>>, vector<16x16x8xbf16>
    %54 = vector.shape_cast %53 : vector<16x16x8xbf16> to vector<256x8xbf16>
    %c0_73 = arith.constant 0 : index
    %c8_74 = arith.constant 8 : index
    %55 = vector.load %arg10[%c0_73, %c8_74] : memref<256x128xbf16, #tpu.memory_space<vmem>>, vector<256x8xbf16>
    tpu.vector_store %arg10[%c0_73, %c8_74], %54 {strides = array<i32>} : memref<256x128xbf16, #tpu.memory_space<vmem>>, vector<256x8xbf16>,
    %c0_75 = arith.constant 0 : index
    %c2_76 = arith.constant 2 : index
    %c0_77 = arith.constant 0 : index
    %56 = vector.load %arg8[%c0_75, %c2_76, %c0_77] : memref<18x18x8xbf16, #tpu.memory_space<vmem>>, vector<16x16x8xbf16>
    %57 = vector.shape_cast %56 : vector<16x16x8xbf16> to vector<256x8xbf16>
    %c0_78 = arith.constant 0 : index
    %c16_79 = arith.constant 16 : index
    %58 = vector.load %arg10[%c0_78, %c16_79] : memref<256x128xbf16, #tpu.memory_space<vmem>>, vector<256x8xbf16>
    tpu.vector_store %arg10[%c0_78, %c16_79], %57 {strides = array<i32>} : memref<256x128xbf16, #tpu.memory_space<vmem>>, vector<256x8xbf16>,
    %c1_80 = arith.constant 1 : index
    %c0_81 = arith.constant 0 : index
    %c0_82 = arith.constant 0 : index
    %59 = vector.load %arg8[%c1_80, %c0_81, %c0_82] : memref<18x18x8xbf16, #tpu.memory_space<vmem>>, vector<16x16x8xbf16>
    %60 = vector.shape_cast %59 : vector<16x16x8xbf16> to vector<256x8xbf16>
    %c0_83 = arith.constant 0 : index
    %c24_84 = arith.constant 24 : index
    %61 = vector.load %arg10[%c0_83, %c24_84] : memref<256x128xbf16, #tpu.memory_space<vmem>>, vector<256x8xbf16>
    tpu.vector_store %arg10[%c0_83, %c24_84], %60 {strides = array<i32>} : memref<256x128xbf16, #tpu.memory_space<vmem>>, vector<256x8xbf16>,
    %c1_85 = arith.constant 1 : index
    %c1_86 = arith.constant 1 : index
    %c0_87 = arith.constant 0 : index
    %62 = vector.load %arg8[%c1_85, %c1_86, %c0_87] : memref<18x18x8xbf16, #tpu.memory_space<vmem>>, vector<16x16x8xbf16>
    %63 = vector.shape_cast %62 : vector<16x16x8xbf16> to vector<256x8xbf16>
    %c0_88 = arith.constant 0 : index
    %c32_89 = arith.constant 32 : index
    %64 = vector.load %arg10[%c0_88, %c32_89] : memref<256x128xbf16, #tpu.memory_space<vmem>>, vector<256x8xbf16>
    tpu.vector_store %arg10[%c0_88, %c32_89], %63 {strides = array<i32>} : memref<256x128xbf16, #tpu.memory_space<vmem>>, vector<256x8xbf16>,
    %c1_90 = arith.constant 1 : index
    %c2_91 = arith.constant 2 : index
    %c0_92 = arith.constant 0 : index
    %65 = vector.load %arg8[%c1_90, %c2_91, %c0_92] : memref<18x18x8xbf16, #tpu.memory_space<vmem>>, vector<16x16x8xbf16>
    %66 = vector.shape_cast %65 : vector<16x16x8xbf16> to vector<256x8xbf16>
    %c0_93 = arith.constant 0 : index
    %c40 = arith.constant 40 : index
    %67 = vector.load %arg10[%c0_93, %c40] : memref<256x128xbf16, #tpu.memory_space<vmem>>, vector<256x8xbf16>
    tpu.vector_store %arg10[%c0_93, %c40], %66 {strides = array<i32>} : memref<256x128xbf16, #tpu.memory_space<vmem>>, vector<256x8xbf16>,
    %c2_94 = arith.constant 2 : index
    %c0_95 = arith.constant 0 : index
    %c0_96 = arith.constant 0 : index
    %68 = vector.load %arg8[%c2_94, %c0_95, %c0_96] : memref<18x18x8xbf16, #tpu.memory_space<vmem>>, vector<16x16x8xbf16>
    %69 = vector.shape_cast %68 : vector<16x16x8xbf16> to vector<256x8xbf16>
    %c0_97 = arith.constant 0 : index
    %c48 = arith.constant 48 : index
    %70 = vector.load %arg10[%c0_97, %c48] : memref<256x128xbf16, #tpu.memory_space<vmem>>, vector<256x8xbf16>
    tpu.vector_store %arg10[%c0_97, %c48], %69 {strides = array<i32>} : memref<256x128xbf16, #tpu.memory_space<vmem>>, vector<256x8xbf16>,
    %c2_98 = arith.constant 2 : index
    %c1_99 = arith.constant 1 : index
    %c0_100 = arith.constant 0 : index
    %71 = vector.load %arg8[%c2_98, %c1_99, %c0_100] : memref<18x18x8xbf16, #tpu.memory_space<vmem>>, vector<16x16x8xbf16>
    %72 = vector.shape_cast %71 : vector<16x16x8xbf16> to vector<256x8xbf16>
    %c0_101 = arith.constant 0 : index
    %c56 = arith.constant 56 : index
    %73 = vector.load %arg10[%c0_101, %c56] : memref<256x128xbf16, #tpu.memory_space<vmem>>, vector<256x8xbf16>
    tpu.vector_store %arg10[%c0_101, %c56], %72 {strides = array<i32>} : memref<256x128xbf16, #tpu.memory_space<vmem>>, vector<256x8xbf16>,
    %c2_102 = arith.constant 2 : index
    %c2_103 = arith.constant 2 : index
    %c0_104 = arith.constant 0 : index
    %74 = vector.load %arg8[%c2_102, %c2_103, %c0_104] : memref<18x18x8xbf16, #tpu.memory_space<vmem>>, vector<16x16x8xbf16>
    %75 = vector.shape_cast %74 : vector<16x16x8xbf16> to vector<256x8xbf16>
    %c0_105 = arith.constant 0 : index
    %c64 = arith.constant 64 : index
    %76 = vector.load %arg10[%c0_105, %c64] : memref<256x128xbf16, #tpu.memory_space<vmem>>, vector<256x8xbf16>
    tpu.vector_store %arg10[%c0_105, %c64], %75 {strides = array<i32>} : memref<256x128xbf16, #tpu.memory_space<vmem>>, vector<256x8xbf16>,
    %c0_106 = arith.constant 0 : index
    %c0_107 = arith.constant 0 : index
    %77 = vector.load %arg10[%c0_106, %c0_107] : memref<256x128xbf16, #tpu.memory_space<vmem>>, vector<256x128xbf16>
    %c0_108 = arith.constant 0 : index
    %c0_109 = arith.constant 0 : index
    %78 = vector.load %arg4[%c0_108, %c0_109] : memref<128x8xbf16, #tpu.memory_space<vmem>>, vector<128x8xbf16>
    %cst_110 = arith.constant dense<0.000000e+00> : vector<256x8xf32>
    %79 = tpu.matmul %77, %78, %cst_110 {dimension_numbers = #tpu.dot_dimension_numbers<[1], [0], [0], [1], [0, 0, 1, 1], [], []>} : vector<256x128xbf16>, vector<128x8xbf16>, vector<256x8xf32> -> vector<256x8xf32>
    %c0_111 = arith.constant 0 : index
    %c0_112 = arith.constant 0 : index
    %80 = vector.load %arg5[%c0_111, %c0_112] : memref<1x8xf32, #tpu.memory_space<vmem>>, vector<1x8xf32>
    %81 = vector.broadcast %80 : vector<1x8xf32> to vector<256x8xf32>
    %82 = arith.addf %79, %81 : vector<256x8xf32>
    %cst_113 = arith.constant 0.000000e+00 : f32
    %83 = vector.broadcast %cst_113 : f32 to vector<256x8xf32>
    %84 = arith.maximumf %82, %83 : vector<256x8xf32>
    %85 = vector.shape_cast %84 : vector<256x8xf32> to vector<16x16x8xf32>
    %c0_114 = arith.constant 0 : index
    %c0_115 = arith.constant 0 : index
    %c0_116 = arith.constant 0 : index
    %c0_117 = arith.constant 0 : index
    %86 = vector.load %arg6[%c0_114, %c0_115, %c0_116, %c0_117] : memref<1x16x16x8xf32, #tpu.memory_space<vmem>>, vector<1x16x16x8xf32>
    %87 = vector.shape_cast %86 : vector<1x16x16x8xf32> to vector<16x16x8xf32>
    %88 = vector.shape_cast %85 : vector<16x16x8xf32> to vector<1x16x16x8xf32>
    tpu.vector_store %arg6[%c0_114, %c0_115, %c0_116, %c0_117], %88 {strides = array<i32>} : memref<1x16x16x8xf32, #tpu.memory_space<vmem>>, vector<1x16x16x8xf32>,
    return
  }
  func.func @transform_0(%arg0: i32) -> (i32, i32, i32, i32) {
    %c0_i32 = arith.constant 0 : i32
    %c0_i32_0 = arith.constant 0 : i32
    %c0_i32_1 = arith.constant 0 : i32
    %c0_i32_2 = arith.constant 0 : i32
    return %arg0, %c0_i32, %c0_i32_0, %c0_i32_1 : i32, i32, i32, i32
  }
  func.func @transform_1(%arg0: i32) -> (i32, i32) {
    %c0_i32 = arith.constant 0 : i32
    %c0_i32_0 = arith.constant 0 : i32
    %c0_i32_1 = arith.constant 0 : i32
    return %c0_i32, %c0_i32_0 : i32, i32
  }
  func.func @transform_2(%arg0: i32) -> (i32, i32) {
    %c0_i32 = arith.constant 0 : i32
    %c0_i32_0 = arith.constant 0 : i32
    %c0_i32_1 = arith.constant 0 : i32
    return %c0_i32, %c0_i32_0 : i32, i32
  }
  func.func @transform_3(%arg0: i32) -> (i32, i32) {
    %c0_i32 = arith.constant 0 : i32
    %c0_i32_0 = arith.constant 0 : i32
    %c0_i32_1 = arith.constant 0 : i32
    return %c0_i32, %c0_i32_0 : i32, i32
  }
  func.func @transform_4(%arg0: i32) -> (i32, i32) {
    %c0_i32 = arith.constant 0 : i32
    %c0_i32_0 = arith.constant 0 : i32
    %c0_i32_1 = arith.constant 0 : i32
    return %c0_i32, %c0_i32_0 : i32, i32
  }
  func.func @transform_5(%arg0: i32) -> (i32, i32, i32, i32) {
    %c0_i32 = arith.constant 0 : i32
    %c0_i32_0 = arith.constant 0 : i32
    %c0_i32_1 = arith.constant 0 : i32
    %c0_i32_2 = arith.constant 0 : i32
    return %arg0, %c0_i32, %c0_i32_0, %c0_i32_1 : i32, i32, i32, i32
  }
}

</mosaic_0001>

<bundles_post_ra>
// kernel: base_conv_forward.1
= control target key start
LH: loop header
LB: loop body
LE: loop exit
PB: predicated region body
PF: predicated region fallthrough
CT: control target
= control target key end

     0   :  { %s8835_s18 = smov 0   ;;  %s12341_s0 = inlined_call_operand.vmem [shape: f32[2,16,16,4], index: 0, kind: input, shape index: {}]   ;;  %s12342_s1 = inlined_call_operand.vmem [shape: bf16[128,8], index: 1, kind: input, shape index: {}]   ;;  %s12343_s2 = inlined_call_operand.vmem [shape: f32[1,8], index: 2, kind: input, shape index: {}]   ;;  %s12344_s3 = inlined_call_operand.vmem [shape: bf16[128,8], index: 3, kind: input, shape index: {}]   ;;  %s12345_s4 = inlined_call_operand.vmem [shape: f32[1,8], index: 4, kind: input, shape index: {}]   ;;  %s12346_s5 = inlined_call_operand.vmem [shape: f32[2,16,16,8], index: 5, kind: output, shape index: {}]  }
   0x1 LB: > { %s8394_s19 = sadd.s32 4294967295, %s8790_s18   ;;  %p8398_p0 = scmp.ge.s32.totalorder %s8790_s18, 1  ;;  %s8790_s18 = sphi %s8835_s18, %s15_s18  }
   0x2   : > { %p187_p1 = scmp.lt.s32.totalorder %s8790_s18, 3 }
   0x4   : > { %p188_p2 = pnand %p8398_p0, %p187_p1 }
   0x5   : > { %s8793_s20 = smov (!%p188_p2), 4   ;;  %p215_p3 = scmp.lt.s32.totalorder (!%p188_p2), %s8394_s19, 1 }
   0x6   : > { %191 = sbr.rel (%p188_p2) target bundleno = 2043 (0x7fb), region = 40  ;;  %s8794_s25 = smov (!%p188_p2), 8  }
   0x7   : > { %s8795_s26 = smov (!%p188_p2), 12   ;;  %s8796_s27 = smov (!%p188_p2), 16  }
   0x8   : > { %s8797_s28 = smov (!%p188_p2), 20   ;;  %s8798_s29 = smov (!%p188_p2), 24  }
   0x9   : > { %s8799_s30 = smov (!%p188_p2), 28   ;;  %s8800_s6 = smov (!%p188_p2), 32  }
   0xa   : > { %s8803_s9 = smov (!%p188_p2), 64   ;;  %s8804_s10 = smov (!%p188_p2), 56  }
   0xb   : > { %vm226_vm0 = vcmask 27648   ;;  %v12347_v0 = vmov 0   ;;  %vm1019_vm1 = vsmask.f32 3328  ;;  %vm1020_vm2 = vsmask.f32 7440 }
   0xc   : > { %227 = vst.msk [vmem:[#allocation2] sm:$0xf] %vm226_vm0, %v12347_v0  ;;  %vm8874_vm3 = vmor %vm1019_vm1, %vm1020_vm2  ;;  %s12367_s19 = smov (!%p215_p3, %s8394_s19), 1  ;;  %vm229_vm4 = vcmask 24576   ;;  %vm791_vm5 = vsmask.f32 7938 }
   0xd   : > { %228 = vst.msk [vmem:[#allocation2 + $0x4] sm:$0xf] %vm226_vm0, %v12347_v0  ;;  %s8693_s21 = sshll.u32 %s12367_s19, 8  ;;  %vm466_vm6 = vsmask.f32 256  ;;  %vm9038_vm8 = vmand %vm226_vm0, %vm791_vm5  ;;  %vm1631_vm11 = vcmask 1042432  }
   0xe   : > { %231 = vst.msk [vmem:[#allocation2 + $0xc] sm:$0xf] %vm226_vm0, %v12347_v0  ;;  %s8989_s24 = scalar_lea.vmem %s12341_s0, %s8693_s21  ;;  %vm467_vm7 = vsmask.f32 4368  ;;  %vm9185_vm10 = vmand %vm229_vm4, %vm466_vm6  ;;  %vm1632_vm12 = vcmask 1046532   ;;  %vm1502_vm14 = vcmask 60448  }
   0xf   : > { %232 = vst.msk [vmem:[#allocation2 + $0x10] sm:$0xf] %vm226_vm0, %v12347_v0  ;;  %v402_v16 = vld [vmem:[%s8989_s24] sm:$0xff]  ;;  %v403_v17 = vld [vmem:[%s8989_s24 + $0x8] sm:$0xff]  ;;  %v408_v24 = vld [vmem:[%s8989_s24 + $0x30] sm:$0xff]  ;;  %vm1842_vm15 = vcmask 93248  }
  0x10   : > { %234 = vst.msk [vmem:[#allocation2 + $0x18] sm:$0xf] %vm226_vm0, %v12347_v0  ;;  %v434_v18 = vpack.c.bf16 %v402_v16, %v402_v16  ;;  %v435_v19 = vpack.c.bf16 %v403_v17, %v403_v17  ;;  %v406_v22 = vld [vmem:[%s8989_s24 + $0x20] sm:$0xff]  ;;  %v407_v23 = vld [vmem:[%s8989_s24 + $0x28] sm:$0xff]  ;;  %v409_v25 = vld [vmem:[%s8989_s24 + $0x38] sm:$0xff]  ;;  %v9016_v32 = vpack.c.bf16 %v408_v24, %v408_v24  ;;  %vm2596_vm1 = vcmask 158848  }
  0x11   : > { %235 = vst.msk [vmem:[#allocation2 + $0x1c] sm:$0xf] %vm226_vm0, %v12347_v0  ;;  %v438_v28 = vpack.c.bf16 %v406_v22, %v406_v22  ;;  %v9011_v29 = vpack.c.bf16 %v407_v23, %v407_v23  ;;  %v412_v33 = vld [vmem:[%s8989_s24 + $0x50] sm:$0xff]  ;;  %v9021_v35 = vpack.c.bf16 %v409_v25, %v409_v25  ;;  %v413_v45 = vld [vmem:[%s8989_s24 + $0x58] sm:$0xff]  ;;  %vm9060_vm9 = vmor %vm466_vm6, %vm467_vm7  ;;  %vm2933_vm2 = vcmask 191648  }
  0x12   : > { %237 = vst.msk [vmem:[#allocation2 + $0x24] sm:$0xf] %vm226_vm0, %v12347_v0  ;;  %v470_v20 = vshrl.u32 %v434_v18, 16  ;;  %v478_v21 = vshrl.u32 %v435_v19, 16  ;;  %v473_v27 = vshll.u32 %v434_v18, 16  ;;  %v481_v31 = vshll.u32 %v435_v19, 16  ;;  %vm9676_vm13 = vmor %vm1631_vm11, %vm1632_vm12 }
  0x13   : > { %v971_v1 = vld [vmem:[#allocation2] sm:$0xf]  ;;  %238 = vst.msk [vmem:[#allocation2 + $0x28] sm:$0xf] %vm226_vm0, %v12347_v0  ;;  %v404_v34 = vld [vmem:[%s8989_s24 + $0x10] sm:$0xff]  ;;  %v9026_v37 = vpack.c.bf16 %v412_v33, %v412_v33  ;;  %v504_v40 = vshrl.u32 %v438_v28, 16  ;;  %v9047_v49 = vpack.c.bf16 %v413_v45, %v413_v45 }
  0x14   : > { %v8859_v2 = vld [vmem:[#allocation2 + $0x4] sm:$0xf]  ;;  %v1023_v3 = vshrl.u32 %v971_v1, 16  ;;  %v1026_v4 = vshll.u32 %v971_v1, 16  ;;  %240 = vst.msk [vmem:[#allocation2 + $0x30] sm:$0xf] %vm226_vm0, %v12347_v0  ;;  %v9028_v38 = vpack.c.bf16 %v404_v34, %v404_v34 }
  0x15   : > { %v1032_v5 = vshll.u32 %v8859_v2, 16  ;;  %241 = vst.msk [vmem:[#allocation2 + $0x34] sm:$0xf] %vm226_vm0, %v12347_v0  ;;  %v1036_v13 = vshrl.u32 %v8859_v2, 16  ;;  %v472_v26 = vrot.slane %v470_v20, 7  ;;  %v9014_v30 = vrot.slane %v478_v21, 7 }
  0x16   : > { %v1025_v6 = vrot.slane %v1023_v3, 4  ;;  %v1028_v7 = vrot.slane %v1026_v4, 5  ;;  %243 = vst.msk [vmem:[#allocation2 + $0x3c] sm:$0xf] %vm226_vm0, %v12347_v0  ;;  %v9024_v36 = vld [vmem:[#allocation2 + $0xc] sm:$0xf] }
  0x17   : > { %244 = vst.msk [vmem:[#allocation2 + $0x40] sm:$0xf] %vm226_vm0, %v12347_v0  ;;  %v8870_v9 = vrot.slane %v1032_v5, 5  ;;  %v8966_v14 = vrot.slane %v1036_v13, 4  ;;  %v9031_v39 = vor.u32 %v473_v27, %v472_v26  ;;  %v512_v41 = vshrl.u32 %v9011_v29, 16  ;;  %v405_v46 = vld [vmem:[%s8989_s24 + $0x18] sm:$0xff] }
  0x18   : > { %v1029_v8 = vor.u32 %v1028_v7, %v1025_v6  ;;  %246 = vst.msk [vmem:[#allocation2 + $0x48] sm:$0xf] %vm226_vm0, %v12347_v0  ;;  %v483_v42 = vor.u32 %v481_v31, %v9014_v30  ;;  %v521_v44 = vshrl.u32 %v9016_v32, 16  ;;  %v476_v47 = vrot.slane %v472_v26, 4  ;;  %v410_v59 = vld [vmem:[%s8989_s24 + $0x40] sm:$0xff]  ;;  %v411_v13 = vld [vmem:[%s8989_s24 + $0x48] sm:$0xff] }
  0x19   : > { %247 = vst.msk [vmem:[#allocation2 + $0x4c] sm:$0xf] %vm226_vm0, %v12347_v0  ;;  %v1039_v15 = vor.u32 %v8966_v14, %v8870_v9  ;;  %v529_v48 = vshrl.u32 %v9021_v35, 16  ;;  %v9049_v50 = vpack.c.bf16 %v405_v46, %v405_v46  ;;  %v555_v53 = vshrl.u32 %v9026_v37, 16  ;;  %v414_v5 = vld [vmem:[%s8989_s24 + $0x60] sm:$0xff] }
  0x1a   : > { %v1030_v11 = vrot.slane %v1029_v8, 4  ;;  %249 = vst.msk [vmem:[#allocation2 + $0x54] sm:$0xf] %vm226_vm0, %v12347_v0  ;;  %v487_v54 = vshrl.u32 %v9028_v38, 16  ;;  %v794_v55 = vsel %vm9038_vm8, %v9031_v39, %v9024_v36  ;;  %v9072_v56 = vrot.slane %v504_v40, 7  ;;  %v420_v36 = vld [vmem:[%s8989_s24 + $0x90] sm:$0xff] }
  0x1b   : > { %250 = vst.msk [vmem:[#allocation2 + $0x58] sm:$0xf] %vm226_vm0, %v12347_v0  ;;  %v9056_v51 = vrot.slane %v1039_v15, 4  ;;  %v507_v57 = vshll.u32 %v438_v28, 16  ;;  %v9074_v58 = vrot.slane %v512_v41, 7  ;;  %v515_v60 = vshll.u32 %v9011_v29, 16 }
  0x1c   : > { %v1035_v12 = vsel %vm8874_vm3, %v1030_v11, %v8870_v9  ;;  %252 = vst.msk [vmem:[#allocation2 + $0x60] sm:$0xf] %vm226_vm0, %v12347_v0  ;;  %v9080_v61 = vrot.slane %v521_v44, 7  ;;  %v563_v62 = vshrl.u32 %v9047_v49, 16  ;;  %v9083_v63 = vpack.c.bf16 %v410_v59, %v410_v59  ;;  %v415_v15 = vld [vmem:[%s8989_s24 + $0x68] sm:$0xff]  ;;  %v421_v39 = vld [vmem:[%s8989_s24 + $0x98] sm:$0xff] }
  0x1d   : > { %1406 = vrot.lane.b32.xlu0 %v1035_v12, %s8793_s20  ;;  %253 = vst.msk [vmem:[#allocation2 + $0x64] sm:$0xf] %vm226_vm0, %v12347_v0  ;;  %v9089_v1 = vsel %vm9060_vm9, %v476_v47, %v483_v42  ;;  %v9091_v2 = vrot.slane %v529_v48, 7  ;;  %v532_v3 = vshll.u32 %v9021_v35, 16  ;;  %v495_v4 = vshrl.u32 %v9049_v50, 16 }
  0x1e   : > { %255 = vst.msk [vmem:[#allocation2 + $0x6c] sm:$0xf] %vm226_vm0, %v12347_v0  ;;  %v510_v6 = vrot.slane %v9072_v56, 4  ;;  %v9099_v7 = vrot.slane %v555_v53, 7  ;;  %v558_v8 = vshll.u32 %v9026_v37, 16  ;;  %v9102_v9 = vrot.slane %v487_v54, 7 }
  0x1f   : > { %256 = vst.msk [vmem:[#allocation2 + $0x70] sm:$0xf] %vm226_vm0, %v12347_v0  ;;  %v9107_v11 = vor.u32 %v507_v57, %v9072_v56  ;;  %v490_v12 = vshll.u32 %v9028_v38, 16  ;;  %v538_v14 = vshrl.u32 %v9083_v63, 16  ;;  %v9113_v16 = vpack.c.bf16 %v414_v5, %v414_v5  ;;  %v9132_v27 = vld [vmem:[#allocation2 + $0x24] sm:$0xf] }
  0x20   : > { %258 = vst.msk [vmem:[#allocation2 + $0x78] sm:$0xf] %vm226_vm0, %v12347_v0  ;;  %v527_v17 = vrot.slane %v9080_v61, 4  ;;  %v9118_v18 = vrot.slane %v563_v62, 7  ;;  %v566_v19 = vshll.u32 %v9047_v49, 16  ;;  %v9121_v20 = vpack.c.bf16 %v411_v13, %v411_v13  ;;  %v418_v57 = vld [vmem:[%s8989_s24 + $0x80] sm:$0xff] }
  0x21   : > { %259 = vst.msk [vmem:[#allocation2 + $0x7c] sm:$0xf] %vm226_vm0, %v12347_v0  ;;  %v517_v22 = vor.u32 %v515_v60, %v9074_v58  ;;  %v534_v23 = vor.u32 %v532_v3, %v9091_v2  ;;  %v9127_v24 = vrot.slane %v495_v4, 7  ;;  %v498_v25 = vshll.u32 %v9049_v50, 16  ;;  %v9142_v33 = vld [vmem:[#allocation2 + $0x48] sm:$0xf] }
  0x22   : > { %261 = vst.msk [vmem:[#allocation2 + $0x84] sm:$0xf] %vm226_vm0, %v12347_v0  ;;  %v485_v28 = vrot.slane %v9014_v30, 4  ;;  %v9136_v29 = vor.u32 %v558_v8, %v9099_v7  ;;  %v9138_v31 = vpack.c.bf16 %v415_v15, %v415_v15  ;;  %v9145_v34 = vor.u32 %v490_v12, %v9102_v9  ;;  %v9165_v48 = vld [vmem:[#allocation2 + $0x18] sm:$0xf] }
  0x23   : > { %262 = vst.msk [vmem:[#allocation2 + $0x88] sm:$0xf] %vm226_vm0, %v12347_v0  ;;  %v9147_v35 = vrot.slane %v538_v14, 7  ;;  %v541_v37 = vshll.u32 %v9083_v63, 16  ;;  %v572_v38 = vshrl.u32 %v9113_v16, 16  ;;  %v561_v40 = vrot.slane %v9099_v7, 4 }
  0x24   : > { %264 = vst.msk [vmem:[#allocation2 + $0x90] sm:$0xf] %vm226_vm0, %v12347_v0  ;;  %v568_v41 = vor.u32 %v566_v19, %v9118_v18  ;;  %v546_v42 = vshrl.u32 %v9121_v20, 16  ;;  %v810_v44 = vsel %vm9038_vm8, %v9107_v11, %v9132_v27  ;;  %v536_v45 = vrot.slane %v9091_v2, 4  ;;  %v9193_v62 = vld [vmem:[#allocation2 + $0x3c] sm:$0xf] }
  0x25   : > { %265 = vst.msk [vmem:[#allocation2 + $0x94] sm:$0xf] %vm226_vm0, %v12347_v0  ;;  %v493_v46 = vrot.slane %v9102_v9, 4  ;;  %v500_v47 = vor.u32 %v498_v25, %v9127_v24  ;;  %v518_v50 = vsel %vm9060_vm9, %v510_v6, %v517_v22  ;;  %v9176_v54 = vsel %vm9060_vm9, %v527_v17, %v534_v23  ;;  %v419_v7 = vld [vmem:[%s8989_s24 + $0x88] sm:$0xff]  ;;  %v416_v25 = vld [vmem:[%s8989_s24 + $0x70] sm:$0xff] }
  0x26   : > { %267 = vst.msk [vmem:[#allocation2 + $0x9c] sm:$0xf] %vm226_vm0, %v12347_v0  ;;  %v580_v56 = vshrl.u32 %v9138_v31, 16  ;;  %v519_v59 = vrot.slane %v9074_v58, 4  ;;  %v9191_v60 = vor.u32 %v541_v37, %v9147_v35  ;;  %v9195_v63 = vrot.slane %v572_v38, 7 }
  0x27   : > { %268 = vst.msk [vmem:[#allocation2 + $0xa0] sm:$0xf] %vm226_vm0, %v12347_v0  ;;  %v450_v2 = vpack.c.bf16 %v418_v57, %v418_v57  ;;  %v9201_v4 = vsel %vm9060_vm9, %v561_v40, %v568_v41  ;;  %v831_v58 = vsel %vm9038_vm8, %v9136_v29, %v9142_v33  ;;  %v803_v5 = vsel %vm9038_vm8, %v9145_v34, %v9165_v48 }
  0x28   : > { %270 = vst.msk [vmem:[#allocation2 + $0xa8] sm:$0xf] %vm226_vm0, %v12347_v0  ;;  %v9211_v6 = vrot.slane %v546_v42, 7  ;;  %v9218_v9 = vsel %vm9060_vm9, %v493_v46, %v500_v47  ;;  %v549_v11 = vshll.u32 %v9121_v20, 16  ;;  %v451_v12 = vpack.c.bf16 %v419_v7, %v419_v7  ;;  %v9261_v47 = vld [vmem:[#allocation2 + $0x6c] sm:$0xf] }
  0x29   : > { %271 = vst.msk [vmem:[#allocation2 + $0xac] sm:$0xf] %vm226_vm0, %v12347_v0  ;;  %v606_v13 = vshrl.u32 %v450_v2, 16  ;;  %v582_v15 = vrot.slane %v580_v56, 7  ;;  %v583_v17 = vshll.u32 %v9138_v31, 16  ;;  %v609_v19 = vshll.u32 %v450_v2, 16 }
  0x2a   : > { %273 = vst.msk [vmem:[#allocation2 + $0xb4] sm:$0xf] %vm226_vm0, %v12347_v0  ;;  %v824_v20 = vsel %vm9038_vm8, %v9191_v60, %v9193_v62  ;;  %v614_v22 = vshrl.u32 %v451_v12, 16  ;;  %v524_v23 = vshll.u32 %v9016_v32, 16  ;;  %v578_v27 = vrot.slane %v9195_v63, 4 }
  0x2b   : > { %274 = vst.msk [vmem:[#allocation2 + $0xb8] sm:$0xf] %vm226_vm0, %v12347_v0  ;;  %v448_v31 = vpack.c.bf16 %v416_v25, %v416_v25  ;;  %v551_v37 = vor.u32 %v549_v11, %v9211_v6  ;;  %v585_v42 = vor.u32 %v583_v17, %v582_v15  ;;  %v570_v56 = vrot.slane %v9118_v18, 4 }
  0x2c   : > { %276 = vst.msk [vmem:[#allocation2 + $0xc0] sm:$0xf] %vm226_vm0, %v12347_v0  ;;  %v9249_v38 = vrot.slane %v614_v22, 7  ;;  %vm3688_vm7 = vcmask 257248   ;;  %vm285_vm11 = vcmask 57344  }
  0x2d   : > { %277 = vst.msk [vmem:[#allocation2 + $0xc4] sm:$0xf] %vm226_vm0, %v12347_v0  ;;  %v589_v41 = vshrl.u32 %v448_v31, 16 }
  0x2e   : > { %279 = vst.msk [vmem:[#allocation2 + $0xcc] sm:$0xf] %vm226_vm0, %v12347_v0 }
  0x2f   : > { %280 = vst.msk [vmem:[#allocation2 + $0xd0] sm:$0xf] %vm226_vm0, %v12347_v0 }
  0x30   : > { %338 = vst [vmem:[#allocation4] sm:$0xf] %v12347_v0 }
  0x31   : > { %339 = vst [vmem:[#allocation4 + $0x4] sm:$0xf] %v12347_v0 }
  0x32   : > { %340 = vst [vmem:[#allocation4 + $0x8] sm:$0xf] %v12347_v0 }
  0x33   : > { %341 = vst [vmem:[#allocation4 + $0xc] sm:$0xf] %v12347_v0 }
  0x34   : > { %342 = vst [vmem:[#allocation4 + $0x10] sm:$0xf] %v12347_v0 }
  0x35   : > { %343 = vst [vmem:[#allocation4 + $0x14] sm:$0xf] %v12347_v0 }
  0x36   : > { %344 = vst [vmem:[#allocation4 + $0x18] sm:$0xf] %v12347_v0 }
  0x37   : > { %345 = vst [vmem:[#allocation4 + $0x1c] sm:$0xf] %v12347_v0 }
  0x38   : > { %346 = vst [vmem:[#allocation4 + $0x20] sm:$0xf] %v12347_v0 }
  0x39   : > { %347 = vst [vmem:[#allocation4 + $0x24] sm:$0xf] %v12347_v0 }
  0x3a   : > { %348 = vst [vmem:[#allocation4 + $0x28] sm:$0xf] %v12347_v0 }
  0x3b   : > { %349 = vst [vmem:[#allocation4 + $0x2c] sm:$0xf] %v12347_v0 }
  0x3c   : > { %350 = vst [vmem:[#allocation4 + $0x30] sm:$0xf] %v12347_v0 }
  0x3d   : > { %351 = vst [vmem:[#allocation4 + $0x34] sm:$0xf] %v12347_v0 }
  0x3e   : > { %352 = vst [vmem:[#allocation4 + $0x38] sm:$0xf] %v12347_v0 }
  0x3f   : > { %353 = vst [vmem:[#allocation4 + $0x3c] sm:$0xf] %v12347_v0 }
  0x40   : > { %354 = vst [vmem:[#allocation4 + $0x40] sm:$0xf] %v12347_v0 }
  0x41   : > { %355 = vst [vmem:[#allocation4 + $0x44] sm:$0xf] %v12347_v0 }
  0x42   : > { %356 = vst [vmem:[#allocation4 + $0x48] sm:$0xf] %v12347_v0 }
  0x43   : > { %357 = vst [vmem:[#allocation4 + $0x4c] sm:$0xf] %v12347_v0 }
  0x44   : > { %358 = vst [vmem:[#allocation4 + $0x50] sm:$0xf] %v12347_v0 }
  0x45   : > { %359 = vst [vmem:[#allocation4 + $0x54] sm:$0xf] %v12347_v0 }
  0x46   : > { %360 = vst [vmem:[#allocation4 + $0x58] sm:$0xf] %v12347_v0 }
  0x47   : > { %361 = vst [vmem:[#allocation4 + $0x5c] sm:$0xf] %v12347_v0 }
  0x48   : > { %362 = vst [vmem:[#allocation4 + $0x60] sm:$0xf] %v12347_v0 }
  0x49   : > { %363 = vst [vmem:[#allocation4 + $0x64] sm:$0xf] %v12347_v0 }
  0x4a   : > { %364 = vst [vmem:[#allocation4 + $0x68] sm:$0xf] %v12347_v0 }
  0x4b   : > { %365 = vst [vmem:[#allocation4 + $0x6c] sm:$0xf] %v12347_v0 }
  0x4c   : > { %366 = vst [vmem:[#allocation4 + $0x70] sm:$0xf] %v12347_v0 }
  0x4d   : > { %367 = vst [vmem:[#allocation4 + $0x74] sm:$0xf] %v12347_v0 }
  0x4e   : > { %368 = vst [vmem:[#allocation4 + $0x78] sm:$0xf] %v12347_v0 }
  0x4f   : > { %369 = vst [vmem:[#allocation4 + $0x7c] sm:$0xf] %v12347_v0 }
  0x50   : > { %370 = vst [vmem:[#allocation5] sm:$0xf] %v12347_v0 }
  0x51   : > { %371 = vst [vmem:[#allocation5 + $0x4] sm:$0xf] %v12347_v0 }
  0x52   : > { %372 = vst [vmem:[#allocation5 + $0x8] sm:$0xf] %v12347_v0 }
  0x53   : > { %373 = vst [vmem:[#allocation5 + $0xc] sm:$0xf] %v12347_v0 }
  0x54   : > { %374 = vst [vmem:[#allocation5 + $0x10] sm:$0xf] %v12347_v0 }
  0x55   : > { %375 = vst [vmem:[#allocation5 + $0x14] sm:$0xf] %v12347_v0 }
  0x56   : > { %376 = vst [vmem:[#allocation5 + $0x18] sm:$0xf] %v12347_v0 }
  0x57   : > { %377 = vst [vmem:[#allocation5 + $0x1c] sm:$0xf] %v12347_v0 }
  0x58   : > { %378 = vst [vmem:[#allocation5 + $0x20] sm:$0xf] %v12347_v0 }
  0x59   : > { %379 = vst [vmem:[#allocation5 + $0x24] sm:$0xf] %v12347_v0 }
  0x5a   : > { %380 = vst [vmem:[#allocation5 + $0x28] sm:$0xf] %v12347_v0 }
  0x5b   : > { %381 = vst [vmem:[#allocation5 + $0x2c] sm:$0xf] %v12347_v0 }
  0x5c   : > { %382 = vst [vmem:[#allocation5 + $0x30] sm:$0xf] %v12347_v0 }
  0x5d   : > { %383 = vst [vmem:[#allocation5 + $0x34] sm:$0xf] %v12347_v0 }
  0x5e   : > { %384 = vst [vmem:[#allocation5 + $0x38] sm:$0xf] %v12347_v0 }
  0x5f   : > { %385 = vst [vmem:[#allocation5 + $0x3c] sm:$0xf] %v12347_v0 }
  0x60   : > { %386 = vst [vmem:[#allocation5 + $0x40] sm:$0xf] %v12347_v0 }
  0x61   : > { %387 = vst [vmem:[#allocation5 + $0x44] sm:$0xf] %v12347_v0 }
  0x62   : > { %388 = vst [vmem:[#allocation5 + $0x48] sm:$0xf] %v12347_v0 }
  0x63   : > { %389 = vst [vmem:[#allocation5 + $0x4c] sm:$0xf] %v12347_v0 }
  0x64   : > { %390 = vst [vmem:[#allocation5 + $0x50] sm:$0xf] %v12347_v0 }
  0x65   : > { %391 = vst [vmem:[#allocation5 + $0x54] sm:$0xf] %v12347_v0 }
  0x66   : > { %392 = vst [vmem:[#allocation5 + $0x58] sm:$0xf] %v12347_v0 }
  0x67   : > { %393 = vst [vmem:[#allocation5 + $0x5c] sm:$0xf] %v12347_v0 }
  0x68   : > { %394 = vst [vmem:[#allocation5 + $0x60] sm:$0xf] %v12347_v0 }
  0x69   : > { %395 = vst [vmem:[#allocation5 + $0x64] sm:$0xf] %v12347_v0 }
  0x6a   : > { %396 = vst [vmem:[#allocation5 + $0x68] sm:$0xf] %v12347_v0 }
  0x6b   : > { %397 = vst [vmem:[#allocation5 + $0x6c] sm:$0xf] %v12347_v0 }
  0x6c   : > { %398 = vst [vmem:[#allocation5 + $0x70] sm:$0xf] %v12347_v0 }
  0x6d   : > { %399 = vst [vmem:[#allocation5 + $0x74] sm:$0xf] %v12347_v0 }
  0x6e   : > { %400 = vst [vmem:[#allocation5 + $0x78] sm:$0xf] %v12347_v0 }
  0x6f   : > { %401 = vst [vmem:[#allocation5 + $0x7c] sm:$0xf] %v12347_v0 }
  0x70   : > { %230 = vst.msk [vmem:[#allocation2 + $0x8] sm:$0x1] %vm229_vm4, %v12347_v0 }
  0x71   : > { %233 = vst.msk [vmem:[#allocation2 + $0x14] sm:$0x1] %vm229_vm4, %v12347_v0 }
  0x72   : > { %236 = vst.msk [vmem:[#allocation2 + $0x20] sm:$0x1] %vm229_vm4, %v12347_v0 }
  0x73   : > { %239 = vst.msk [vmem:[#allocation2 + $0x2c] sm:$0x1] %vm229_vm4, %v12347_v0 }
  0x74   : > { %242 = vst.msk [vmem:[#allocation2 + $0x38] sm:$0x1] %vm229_vm4, %v12347_v0 }
  0x75   : > { %245 = vst.msk [vmem:[#allocation2 + $0x44] sm:$0x1] %vm229_vm4, %v12347_v0 }
  0x76   : > { %248 = vst.msk [vmem:[#allocation2 + $0x50] sm:$0x1] %vm229_vm4, %v12347_v0 }
  0x77   : > { %v973_v21 = vld [vmem:[#allocation2 + $0x8] sm:$0x1]  ;;  %251 = vst.msk [vmem:[#allocation2 + $0x5c] sm:$0x1] %vm229_vm4, %v12347_v0 }
  0x78   : > { %v1042_v26 = vshll.u32 %v973_v21, 16  ;;  %254 = vst.msk [vmem:[#allocation2 + $0x68] sm:$0x1] %vm229_vm4, %v12347_v0  ;;  %v799_v53 = vld [vmem:[#allocation2 + $0x14] sm:$0x1]  ;;  %v9232_v21 = vrot.slane %v606_v13, 7 }
  0x79   : > { %257 = vst.msk [vmem:[#allocation2 + $0x74] sm:$0x1] %vm229_vm4, %v12347_v0  ;;  %v800_v14 = vsel %vm9185_vm10, %v485_v28, %v799_v53  ;;  %v502_v28 = vrot.slane %v9127_v24, 4  ;;  %v587_v24 = vrot.slane %v582_v15, 4  ;;  %v806_v40 = vld [vmem:[#allocation2 + $0x20] sm:$0x1]  ;;  %v9269_v53 = vpack.c.bf16 %v421_v39, %v421_v39 }
  0x7a   : > { %v1044_v30 = vrot.slane %v1042_v26, 5  ;;  %260 = vst.msk [vmem:[#allocation2 + $0x80] sm:$0x1] %vm229_vm4, %v12347_v0  ;;  %v813_v3 = vld [vmem:[#allocation2 + $0x2c] sm:$0x1]  ;;  %v544_v26 = vrot.slane %v9147_v35, 4  ;;  %v9259_v46 = vor.u32 %v609_v19, %v9232_v21 }
  0x7b   : > { %263 = vst.msk [vmem:[#allocation2 + $0x8c] sm:$0x1] %vm229_vm4, %v12347_v0  ;;  %v820_v8 = vld [vmem:[#allocation2 + $0x38] sm:$0x1]  ;;  %v814_v32 = vsel %vm9185_vm10, %v519_v59, %v813_v3  ;;  %v592_v59 = vshll.u32 %v448_v31, 16  ;;  %v612_v3 = vrot.slane %v9232_v21, 4  ;;  %v9301_v17 = vsel %vm9185_vm10, %v502_v28, %v806_v40 }
  0x7c   : > { %v1045_v49 = vsel %vm8874_vm3, %v9056_v51, %v1044_v30  ;;  %266 = vst.msk [vmem:[#allocation2 + $0x98] sm:$0x1] %vm229_vm4, %v12347_v0  ;;  %v617_v30 = vshll.u32 %v451_v12, 16  ;;  %v631_v12 = vshrl.u32 %v9269_v53, 16  ;;  %v9307_v21 = vld [vmem:[#allocation2 + $0x60] sm:$0xf] }
  0x7d   : > { %1408 = vrot.lane.b32.xlu0 %v1045_v49, %s8793_s20  ;;  %269 = vst.msk [vmem:[#allocation2 + $0xa4] sm:$0x1] %vm229_vm4, %v12347_v0  ;;  %v9264_v49 = vor.u32 %v524_v23, %v9080_v61  ;;  %v9280_v61 = vsel %vm9060_vm9, %v544_v26, %v551_v37  ;;  %v834_v2 = vld [vmem:[#allocation2 + $0x50] sm:$0x1] }
  0x7e   : > { %272 = vst.msk [vmem:[#allocation2 + $0xb0] sm:$0x1] %vm229_vm4, %v12347_v0  ;;  %v841_v35 = vld [vmem:[#allocation2 + $0x5c] sm:$0x1]  ;;  %v619_v7 = vor.u32 %v617_v30, %v9249_v38  ;;  %v9316_v26 = vsel %vm9185_vm10, %v570_v56, %v834_v2 }
  0x7f   : > { %275 = vst.msk [vmem:[#allocation2 + $0xbc] sm:$0x1] %vm229_vm4, %v12347_v0  ;;  %v9297_v15 = vsel %vm9185_vm10, %v587_v24, %v841_v35 }
  0x80   : > { %278 = vst.msk [vmem:[#allocation2 + $0xc8] sm:$0x1] %vm229_vm4, %v12347_v0  ;;  %v9326_v37 = vsel %vm9060_vm9, %v612_v3, %v619_v7 }
  0x81   : > { %281 = vst.msk [vmem:[#allocation2 + $0xd4] sm:$0x1] %vm229_vm4, %v12347_v0  ;;  %vm3127_vm4 = vcmask 224448  }
  0x82   : > { %795 = vst [vmem:[#allocation2 + $0xc] sm:$0xf] %v794_v55  ;;  %v821_v55 = vsel %vm9185_vm10, %v536_v45, %v820_v8  ;;  %v417_v45 = vld [vmem:[%s8989_s24 + $0x78] sm:$0xff] }
  0x83   : > { %796 = vst.msk [vmem:[#allocation2 + $0x10] sm:$0xf] %vm226_vm0, %v9089_v1  ;;  %v9255_v1 = vpack.c.bf16 %v420_v36, %v420_v36  ;;  %v9272_v57 = vpack.c.bf16 %v417_v45, %v417_v45 }
  0x84   : > { %811 = vst [vmem:[#allocation2 + $0x24] sm:$0xf] %v810_v44  ;;  %v9266_v44 = vld [vmem:[#allocation2 + $0x30] sm:$0xf] }
  0x85   : > { %812 = vst.msk [vmem:[#allocation2 + $0x28] sm:$0xf] %vm226_vm0, %v518_v50  ;;  %v9274_v50 = vrot.slane %v589_v41, 7  ;;  %v623_v8 = vshrl.u32 %v9255_v1, 16  ;;  %v597_v11 = vshrl.u32 %v9272_v57, 16 }
  0x86   : > { %801 = vst [vmem:[#allocation2 + $0x14] sm:$0x1] %v800_v14  ;;  %v9293_v14 = vsel %vm9060_vm9, %v578_v27, %v585_v42  ;;  %v852_v27 = vsel %vm9038_vm8, %v9259_v46, %v9261_v47 }
  0x87   : > { %819 = vst.msk [vmem:[#allocation2 + $0x34] sm:$0xf] %vm226_vm0, %v9176_v54  ;;  %v9286_v18 = vor.u32 %v592_v59, %v9274_v50  ;;  %v634_v54 = vshll.u32 %v9269_v53, 16 }
  0x88   : > { %822 = vst [vmem:[#allocation2 + $0x38] sm:$0x1] %v821_v55 }
  0x89   : > { %v974_v13 = vld [vmem:[#allocation2 + $0xc] sm:$0xf]  ;;  %815 = vst [vmem:[#allocation2 + $0x2c] sm:$0x1] %v814_v32 }
  0x8a   : > { %v975_v22 = vld [vmem:[#allocation2 + $0x10] sm:$0xf]  ;;  %v1047_v23 = vshrl.u32 %v974_v13, 16  ;;  %v1050_v25 = vshll.u32 %v974_v13, 16  ;;  %832 = vst [vmem:[#allocation2 + $0x48] sm:$0xf] %v831_v58 }
  0x8b   : > { %v1056_v28 = vshll.u32 %v975_v22, 16  ;;  %v1060_v31 = vshrl.u32 %v975_v22, 16  ;;  %v980_v32 = vld [vmem:[#allocation2 + $0x24] sm:$0xf]  ;;  %833 = vst.msk [vmem:[#allocation2 + $0x4c] sm:$0xf] %vm226_vm0, %v9201_v4 }
  0x8c   : > { %v1049_v33 = vrot.slane %v1047_v23, 4  ;;  %v1052_v58 = vrot.slane %v1050_v25, 5  ;;  %v981_v30 = vld [vmem:[#allocation2 + $0x28] sm:$0xf]  ;;  %v1095_v36 = vshrl.u32 %v980_v32, 16  ;;  %v1098_v39 = vshll.u32 %v980_v32, 16 }
  0x8d   : > { %v1058_v55 = vrot.slane %v1056_v28, 5  ;;  %v1062_v24 = vrot.slane %v1060_v31, 4  ;;  %v1104_v35 = vshll.u32 %v981_v30, 16  ;;  %v1108_v40 = vshrl.u32 %v981_v30, 16  ;;  %v976_v41 = vld [vmem:[#allocation2 + $0x14] sm:$0x1] }
  0x8e   : > { %v1053_v4 = vor.u32 %v1052_v58, %v1049_v33  ;;  %v1097_v42 = vrot.slane %v1095_v36, 4  ;;  %v1100_v45 = vrot.slane %v1098_v39, 5  ;;  %v1066_v56 = vshll.u32 %v976_v41, 16  ;;  %v984_v59 = vld [vmem:[#allocation2 + $0x34] sm:$0xf] }
  0x8f   : > { %v1106_v2 = vrot.slane %v1104_v35, 5  ;;  %v1063_v3 = vor.u32 %v1062_v24, %v1058_v55  ;;  %v985_v7 = vld [vmem:[#allocation2 + $0x38] sm:$0x1]  ;;  %v1128_v13 = vshll.u32 %v984_v59, 16  ;;  %v1132_v22 = vshrl.u32 %v984_v59, 16 }
  0x90   : > { %v1054_v23 = vrot.slane %v1053_v4, 4  ;;  %v1101_v25 = vor.u32 %v1100_v45, %v1097_v42  ;;  %v1068_v0 = vrot.slane %v1066_v56, 5  ;;  %v1138_v29 = vshll.u32 %v985_v7, 16  ;;  %v982_v32 = vld [vmem:[#allocation2 + $0x2c] sm:$0x1] }
  0x91   : > { %v1064_v28 = vrot.slane %v1063_v3, 4  ;;  %v9332_v31 = vrot.slane %v1128_v13, 5  ;;  %v1134_v30 = vrot.slane %v1132_v22, 4  ;;  %v1110_v19 = vrot.slane %v1108_v40, 4  ;;  %v989_v33 = vld [vmem:[#allocation2 + $0x48] sm:$0xf] }
  0x92   : > { %v1059_v58 = vsel %vm8874_vm3, %v1054_v23, %v1058_v55  ;;  %v1102_v36 = vrot.slane %v1101_v25, 4  ;;  %v1140_v39 = vrot.slane %v1138_v29, 5  ;;  %v1114_v24 = vshll.u32 %v982_v32, 16  ;;  %v990_v35 = vld [vmem:[#allocation2 + $0x4c] sm:$0xf] }
  0x93   : > { %1410 = vrot.lane.b32.xlu1 %v1059_v58, %s8793_s20  ;;  %v1069_v41 = vsel %vm8874_vm3, %v1064_v28, %v1068_v0  ;;  %v1135_v4 = vor.u32 %v1134_v30, %v9332_v31  ;;  %v1111_v42 = vor.u32 %v1110_v19, %v1106_v2  ;;  %v1167_v45 = vshrl.u32 %v989_v33, 16  ;;  %804 = vst [vmem:[#allocation2 + $0x18] sm:$0xf] %v803_v5  ;;  %v424_v0 = vld [vmem:[%s8989_s24 + $0xb0] sm:$0xff] }
  0x94   : > { %v1107_v29 = vsel %vm8874_vm3, %v1102_v36, %v1106_v2  ;;  %v9347_v55 = vrot.slane %v1114_v24, 5  ;;  %v1170_v40 = vshll.u32 %v989_v33, 16  ;;  %v1176_v56 = vshll.u32 %v990_v35, 16  ;;  %805 = vst.msk [vmem:[#allocation2 + $0x1c] sm:$0xf] %vm226_vm0, %v9218_v9 }
  0x95   : > { %1418 = vrot.lane.b32.xlu0 %v1107_v29, %s8793_s20  ;;  %v1136_v19 = vrot.slane %v1135_v4, 4  ;;  %v9353_v59 = vrot.slane %v1111_v42, 4  ;;  %v1169_v3 = vrot.slane %v1167_v45, 4  ;;  %v1180_v7 = vshrl.u32 %v990_v35, 16  ;;  %825 = vst [vmem:[#allocation2 + $0x3c] sm:$0xf] %v824_v20 }
  0x96   : > { %v1172_v34 = vrot.slane %v1170_v40, 5  ;;  %v9360_v48 = vrot.slane %v1176_v56, 5  ;;  %826 = vst.msk [vmem:[#allocation2 + $0x40] sm:$0xf] %vm226_vm0, %v9280_v61  ;;  %v595_v5 = vrot.slane %v9274_v50, 4  ;;  %v9367_v9 = vrot.slane %v597_v11, 7 }
  0x97   : > { %v1141_v2 = vsel %vm8874_vm3, %v1136_v19, %v1140_v39  ;;  %v1117_v60 = vsel %vm8874_vm3, %v9353_v59, %v9347_v55  ;;  %840 = vst.msk [vmem:[#allocation2 + $0x58] sm:$0xf] %vm226_vm0, %v9293_v14  ;;  %v1182_v62 = vrot.slane %v1180_v7, 4  ;;  %v600_v20 = vshll.u32 %v9272_v57, 16  ;;  %v827_v61 = vld [vmem:[#allocation2 + $0x44] sm:$0x1] }
  0x98   : > { %v1173_v50 = vor.u32 %v1172_v34, %v1169_v3  ;;  %843 = vst [vmem:[#allocation2 + $0x5c] sm:$0x1] %v9297_v15  ;;  %v9381_v11 = vrot.slane %v623_v8, 7  ;;  %v9385_v13 = vrot.slane %v631_v12, 7  ;;  %v553_v22 = vrot.slane %v9211_v6, 4 }
  0x99   : > { %808 = vst [vmem:[#allocation2 + $0x20] sm:$0x1] %v9301_v17  ;;  %v1183_v14 = vor.u32 %v1182_v62, %v9360_v48  ;;  %v602_v57 = vor.u32 %v600_v20, %v9367_v9  ;;  %v621_v23 = vrot.slane %v9249_v38, 4  ;;  %v9392_v25 = vpack.c.bf16 %v424_v0, %v424_v0  ;;  %v855_v0 = vld [vmem:[#allocation2 + $0x74] sm:$0x1] }
  0x9a   : > { %v9394_v15 = vrot.slane %v1173_v50, 4  ;;  %v977_v8 = vld [vmem:[#allocation2 + $0x18] sm:$0xf]  ;;  %836 = vst [vmem:[#allocation2 + $0x50] sm:$0x1] %v9316_v26  ;;  %v629_v12 = vrot.slane %v9381_v11, 4  ;;  %v636_v6 = vor.u32 %v634_v54, %v9385_v13  ;;  %v9403_v17 = vsel %vm9185_vm10, %v553_v22, %v827_v61 }
  0x9b   : > { %1412 = vrot.lane.b32.xlu1 %v1069_v41, %s8793_s20  ;;  %v978_v38 = vld [vmem:[#allocation2 + $0x1c] sm:$0xf]  ;;  %v1071_v32 = vshrl.u32 %v977_v8, 16  ;;  %v1074_v28 = vshll.u32 %v977_v8, 16  ;;  %v9406_v30 = vrot.slane %v1183_v14, 4  ;;  %v603_v26 = vsel %vm9060_vm9, %v595_v5, %v602_v57 }
  0x9c   : > { %v1179_v53 = vsel %vm8874_vm3, %v9394_v15, %v9360_v48  ;;  %v1080_v54 = vshll.u32 %v978_v38, 16  ;;  %v1084_v33 = vshrl.u32 %v978_v38, 16  ;;  %v986_v58 = vld [vmem:[#allocation2 + $0x3c] sm:$0xf]  ;;  %853 = vst [vmem:[#allocation2 + $0x6c] sm:$0xf] %v852_v27  ;;  %v637_v36 = vsel %vm9060_vm9, %v629_v12, %v636_v6 }
  0x9d   : > { %1424 = vrot.lane.b32.xlu0 %v1141_v2, %s8793_s20  ;;  %v1073_v39 = vrot.slane %v1071_v32, 4  ;;  %v1076_v24 = vrot.slane %v1074_v28, 5  ;;  %v987_v35 = vld [vmem:[#allocation2 + $0x40] sm:$0xf]  ;;  %v1143_v41 = vshrl.u32 %v986_v58, 16  ;;  %v1146_v4 = vshll.u32 %v986_v58, 16 }
  0x9e   : > { %v1082_v42 = vrot.slane %v1080_v54, 5  ;;  %v1086_v45 = vrot.slane %v1084_v33, 4  ;;  %v1152_v29 = vshll.u32 %v987_v35, 16  ;;  %v1156_v40 = vshrl.u32 %v987_v35, 16  ;;  %v993_v56 = vld [vmem:[#allocation2 + $0x58] sm:$0xf] }
  0x9f   : > { %v1077_v19 = vor.u32 %v1076_v24, %v1073_v39  ;;  %v1145_v3 = vrot.slane %v1143_v41, 4  ;;  %v1148_v46 = vrot.slane %v1146_v4, 5  ;;  %v994_v47 = vld [vmem:[#allocation2 + $0x5c] sm:$0x1]  ;;  %v1200_v27 = vshll.u32 %v993_v56, 16  ;;  %v422_v35 = vld [vmem:[%s8989_s24 + $0xa0] sm:$0xff] }
  0xa0   : > { %v9422_v7 = vrot.slane %v1152_v29, 5  ;;  %v1204_v34 = vshrl.u32 %v993_v56, 16  ;;  %v1210_v48 = vshll.u32 %v994_v47, 16  ;;  %v979_v5 = vld [vmem:[#allocation2 + $0x20] sm:$0x1]  ;;  %v1087_v2 = vor.u32 %v1086_v45, %v1082_v42  ;;  %v423_v4 = vld [vmem:[%s8989_s24 + $0xa8] sm:$0xff] }
  0xa1   : > { %v1078_v62 = vrot.slane %v1077_v19, 4  ;;  %v1149_v20 = vor.u32 %v1148_v46, %v1145_v3  ;;  %v9424_v61 = vrot.slane %v1200_v27, 5  ;;  %v1090_v50 = vshll.u32 %v979_v5, 16  ;;  %v991_v22 = vld [vmem:[#allocation2 + $0x50] sm:$0x1] }
  0xa2   : > { %v1206_v14 = vrot.slane %v1204_v34, 4  ;;  %v9426_v57 = vrot.slane %v1210_v48, 5  ;;  %v1088_v15 = vrot.slane %v1087_v2, 4  ;;  %v1186_v8 = vshll.u32 %v991_v22, 16  ;;  %854 = vst.msk [vmem:[#allocation2 + $0x70] sm:$0xf] %vm226_vm0, %v9326_v37 }
  0xa3   : > { %v862_v12 = vld [vmem:[#allocation2 + $0x80] sm:$0x1]  ;;  %1420 = vrot.lane.b32.xlu1 %v1117_v60, %s8793_s20  ;;  %v1083_v6 = vsel %vm8874_vm3, %v1078_v62, %v1082_v42  ;;  %v1150_v38 = vrot.slane %v1149_v20, 4  ;;  %v1092_v32 = vrot.slane %v1090_v50, 5  ;;  %v998_v28 = vld [vmem:[#allocation2 + $0x6c] sm:$0xf]  ;;  %v12357_v54 = vsel %vm9038_vm8, %v9264_v49, %v9266_v44 }
  0xa4   : > { %818 = vst [vmem:[#allocation2 + $0x30] sm:$0xf] %v12357_v54  ;;  %v856_v37 = vsel %vm9185_vm10, %v621_v23, %v855_v0  ;;  %1414 = vrot.lane.b32.xlu2 %v1083_v6, %s8793_s20  ;;  %v1207_v55 = vor.u32 %v1206_v14, %v9424_v61  ;;  %v9447_v59 = vrot.slane %v1186_v8, 5  ;;  %v1239_v60 = vshrl.u32 %v998_v28, 16  ;;  %v425_v49 = vld [vmem:[%s8989_s24 + $0xb8] sm:$0xff] }
  0xa5   : > { %v1242_v33 = vshll.u32 %v998_v28, 16  ;;  %v12358_v58 = vsel %vm9038_vm8, %v9286_v18, %v9307_v21  ;;  %1430 = vrot.lane.b32.xlu0 %v1179_v53, %s8793_s20  ;;  %v1155_v44 = vsel %vm8874_vm3, %v1150_v38, %v9422_v7  ;;  %v1093_v23 = vsel %vm8874_vm3, %v1088_v15, %v1092_v32  ;;  %847 = vst.msk [vmem:[#allocation2 + $0x64] sm:$0xf] %vm226_vm0, %v603_v26 }
  0xa6   : > { %846 = vst [vmem:[#allocation2 + $0x60] sm:$0xf] %v12358_v58  ;;  %v638_v39 = vrot.slane %v9385_v13, 4  ;;  %v1158_v24 = vrot.slane %v1156_v40, 4  ;;  %v1208_v41 = vrot.slane %v1207_v55, 4  ;;  %v1189_v18 = vsel %vm8874_vm3, %v9406_v30, %v9447_v59 }
  0xa7   : > { %v1241_v21 = vrot.slane %v1239_v60, 4  ;;  %v1244_v53 = vrot.slane %v1242_v33, 5  ;;  %861 = vst.msk [vmem:[#allocation2 + $0x7c] sm:$0xf] %vm226_vm0, %v637_v36  ;;  %v9474_v26 = vpack.c.bf16 %v425_v49, %v425_v49  ;;  %v657_v45 = vshrl.u32 %v9392_v25, 16 }
  0xa8   : > { %v863_v42 = vsel %vm9185_vm10, %v638_v39, %v862_v12  ;;  %829 = vst [vmem:[#allocation2 + $0x44] sm:$0x1] %v9403_v17  ;;  %v1159_v13 = vor.u32 %v1158_v24, %v9422_v7  ;;  %v1213_v29 = vsel %vm8874_vm3, %v1208_v41, %v9426_v57  ;;  %v660_v36 = vshll.u32 %v9392_v25, 16 }
  0xa9   : > { %v1245_v40 = vor.u32 %v1244_v53, %v1241_v21  ;;  %864 = vst [vmem:[#allocation2 + $0x80] sm:$0x1] %v863_v42  ;;  %v575_v56 = vshll.u32 %v9113_v16, 16  ;;  %v999_v0 = vld [vmem:[#allocation2 + $0x70] sm:$0xf]  ;;  %v9484_v17 = vrot.slane %v657_v45, 7  ;;  %v9486_v3 = vpack.c.bf16 %v422_v35, %v422_v35 }
  0xaa   : > { %v9482_v19 = vrot.slane %v1159_v13, 4  ;;  %857 = vst [vmem:[#allocation2 + $0x74] sm:$0x1] %v856_v37  ;;  %v9488_v46 = vpack.c.bf16 %v423_v4, %v423_v4  ;;  %v1248_v27 = vshll.u32 %v999_v0, 16  ;;  %v1252_v7 = vshrl.u32 %v999_v0, 16 }
  0xab   : > { %v1246_v47 = vrot.slane %v1245_v40, 4  ;;  %v983_v34 = vld [vmem:[#allocation2 + $0x30] sm:$0xf]  ;;  %v665_v48 = vshrl.u32 %v9474_v26, 16  ;;  %1426 = vrot.lane.b32.xlu1 %v1155_v44, %s8793_s20  ;;  %v662_v62 = vor.u32 %v660_v36, %v9484_v17  ;;  %v663_v20 = vrot.slane %v9484_v17, 4 }
  0xac   : > { %v1119_v25 = vshrl.u32 %v983_v34, 16  ;;  %v1122_v5 = vshll.u32 %v983_v34, 16  ;;  %1416 = vrot.lane.b32.xlu2 %v1093_v23, %s8793_s20  ;;  %v1250_v50 = vrot.slane %v1248_v27, 5  ;;  %v9495_v22 = vld [vmem:[#allocation2 + $0x64] sm:$0xf]  ;;  %v1254_v15 = vrot.slane %v1252_v7, 4 }
  0xad   : > { %v995_v2 = vld [vmem:[#allocation2 + $0x60] sm:$0xf]  ;;  %1436 = vrot.lane.b32.xlu0 %v1213_v29, %s8793_s20  ;;  %v1224_v6 = vshll.u32 %v9495_v22, 16  ;;  %v1228_v38 = vshrl.u32 %v9495_v22, 16  ;;  %v872_v45 = vld [vmem:[#allocation2 + $0x90] sm:$0xf] }
  0xae   : > { %v1215_v14 = vshrl.u32 %v995_v2, 16  ;;  %v1218_v57 = vshll.u32 %v995_v2, 16  ;;  %v1121_v8 = vrot.slane %v1119_v25, 4  ;;  %v1124_v12 = vrot.slane %v1122_v5, 5  ;;  %v1002_v32 = vld [vmem:[#allocation2 + $0x7c] sm:$0xf] }
  0xaf   : > { %v1251_v28 = vsel %vm8874_vm3, %v1246_v47, %v1250_v50  ;;  %v1272_v55 = vshll.u32 %v1002_v32, 16  ;;  %v988_v60 = vld [vmem:[#allocation2 + $0x44] sm:$0x1]  ;;  %v9502_v58 = vrot.slane %v1224_v6, 5  ;;  %v1276_v44 = vshrl.u32 %v1002_v32, 16 }
  0xb0   : > { %v1217_v54 = vrot.slane %v1215_v14, 4  ;;  %v1220_v37 = vrot.slane %v1218_v57, 5  ;;  %v1125_v33 = vor.u32 %v1124_v12, %v1121_v8  ;;  %v1003_v49 = vld [vmem:[#allocation2 + $0x80] sm:$0x1]  ;;  %v1162_v23 = vshll.u32 %v988_v60, 16 }
  0xb1   : > { %v9504_v24 = vrot.slane %v1272_v55, 5  ;;  %v1282_v35 = vshll.u32 %v1003_v49, 16  ;;  %v1000_v41 = vld [vmem:[#allocation2 + $0x74] sm:$0x1]  ;;  %v1255_v21 = vor.u32 %v1254_v15, %v1250_v50  ;;  %v1278_v4 = vrot.slane %v1276_v44, 4  ;;  %v426_v25 = vld [vmem:[%s8989_s24 + $0xc0] sm:$0xff] }
  0xb2   : > { %v1221_v39 = vor.u32 %v1220_v37, %v1217_v54  ;;  %v1126_v53 = vrot.slane %v1125_v33, 4  ;;  %v1164_v42 = vrot.slane %v1162_v23, 5  ;;  %v1258_v13 = vshll.u32 %v1000_v41, 16  ;;  %v865_v6 = vld [vmem:[#allocation2 + $0x84] sm:$0xf]  ;;  %v431_v33 = vld [vmem:[%s8989_s24 + $0xe8] sm:$0xff] }
  0xb3   : > { %v1284_v40 = vrot.slane %v1282_v35, 5  ;;  %v9506_v36 = vrot.slane %v1255_v21, 4  ;;  %v9508_v0 = vrot.slane %v665_v48, 7  ;;  %1432 = vrot.lane.b32.xlu1 %v1189_v18, %s8793_s20  ;;  %v1279_v27 = vor.u32 %v1278_v4, %v9504_v24  ;;  %v837_v48 = vld [vmem:[#allocation2 + $0x54] sm:$0xf] }
  0xb4   : > { %v1222_v29 = vrot.slane %v1221_v39, 4  ;;  %v1131_v47 = vsel %vm8874_vm3, %v1126_v53, %v9332_v31  ;;  %v1165_v7 = vsel %vm8874_vm3, %v9482_v19, %v1164_v42  ;;  %v9523_v34 = vrot.slane %v1258_v13, 5  ;;  %v427_v19 = vld [vmem:[%s8989_s24 + $0xc8] sm:$0xff]  ;;  %v876_v23 = vld [vmem:[#allocation2 + $0x98] sm:$0x1] }
  0xb5   : > { %1422 = vrot.lane.b32.xlu2 %v1131_v47, %s8793_s20  ;;  %v668_v59 = vshll.u32 %v9474_v26, 16  ;;  %v873_v31 = vsel %vm9038_vm8, %v662_v62, %v872_v45  ;;  %v577_v18 = vor.u32 %v575_v56, %v9195_v63  ;;  %1442 = vrot.lane.b32.xlu0 %v1251_v28, %s8793_s20  ;;  %v1280_v5 = vrot.slane %v1279_v27, 4  ;;  %v430_v28 = vld [vmem:[%s8989_s24 + $0xe0] sm:$0xff] }
  0xb6   : > { %v1227_v30 = vsel %vm8874_vm3, %v1222_v29, %v9502_v58  ;;  %v1261_v2 = vsel %vm8874_vm3, %v9506_v36, %v9523_v34  ;;  %874 = vst [vmem:[#allocation2 + $0x90] sm:$0xf] %v873_v31  ;;  %v640_v26 = vshrl.u32 %v9486_v3, 16  ;;  %v643_v50 = vshll.u32 %v9486_v3, 16  ;;  %v848_v3 = vld [vmem:[#allocation2 + $0x68] sm:$0x1] }
  0xb7   : > { %v670_v62 = vor.u32 %v668_v59, %v9508_v0  ;;  %v838_v16 = vsel %vm9038_vm8, %v577_v18, %v837_v48  ;;  %v648_v63 = vshrl.u32 %v9488_v46, 16  ;;  %v651_v56 = vshll.u32 %v9488_v46, 16 }
  0xb8   : > { %v1285_v22 = vsel %vm8874_vm3, %v1280_v5, %v1284_v40  ;;  %839 = vst [vmem:[#allocation2 + $0x54] sm:$0xf] %v838_v16  ;;  %v642_v14 = vrot.slane %v640_v26, 7  ;;  %v9551_v57 = vpack.c.bf16 %v426_v25, %v426_v25  ;;  %v459_v15 = vpack.c.bf16 %v427_v19, %v427_v19 }
  0xb9   : > { %v671_v8 = vsel %vm9060_vm9, %v663_v20, %v670_v62  ;;  %v9557_v12 = vrot.slane %v648_v63, 7  ;;  %v604_v46 = vrot.slane %v9367_v9, 4  ;;  %v1230_v32 = vrot.slane %v1228_v38, 4 }
  0xba   : > { %875 = vst.msk [vmem:[#allocation2 + $0x94] sm:$0xf] %vm226_vm0, %v671_v8  ;;  %v645_v54 = vor.u32 %v643_v50, %v642_v14  ;;  %v646_v37 = vrot.slane %v642_v14, 4  ;;  %v674_v55 = vshrl.u32 %v9551_v57, 16  ;;  %v682_v60 = vshrl.u32 %v459_v15, 16 }
  0xbb   : > { %v653_v17 = vor.u32 %v651_v56, %v9557_v12  ;;  %v685_v49 = vshll.u32 %v459_v15, 16  ;;  %v849_v20 = vsel %vm9185_vm10, %v604_v46, %v848_v3  ;;  %v1231_v44 = vor.u32 %v1230_v32, %v9502_v58  ;;  %1438 = vrot.lane.b32.xlu1 %v1227_v30, %s8793_s20  ;;  %v883_v58 = vld [vmem:[#allocation2 + $0xa4] sm:$0x1] }
  0xbc   : > { %v866_v9 = vsel %vm9038_vm8, %v645_v54, %v865_v6  ;;  %v9571_v38 = vrot.slane %v674_v55, 7  ;;  %v684_v39 = vrot.slane %v682_v60, 7  ;;  %850 = vst [vmem:[#allocation2 + $0x68] sm:$0x1] %v849_v20  ;;  %v672_v35 = vrot.slane %v9508_v0, 4  ;;  %v428_v60 = vld [vmem:[%s8989_s24 + $0xd0] sm:$0xff] }
  0xbd   : > { %1428 = vrot.lane.b32.xlu2 %v1165_v7, %s8793_s20  ;;  %v1007_v41 = vld [vmem:[#allocation2 + $0x90] sm:$0xf]  ;;  %v654_v21 = vsel %vm9060_vm9, %v646_v37, %v653_v17  ;;  %867 = vst [vmem:[#allocation2 + $0x84] sm:$0xf] %v866_v9  ;;  %v462_v53 = vpack.c.bf16 %v430_v28, %v430_v28  ;;  %v9577_v4 = vpack.c.bf16 %v431_v33, %v431_v33  ;;  %v9590_v14 = vrot.slane %v1231_v44, 4 }
  0xbe   : > { %1448 = vrot.lane.b32.xlu0 %v1285_v22, %s8793_s20  ;;  %v1311_v42 = vshrl.u32 %v1007_v41, 16  ;;  %v1314_v13 = vshll.u32 %v1007_v41, 16  ;;  %868 = vst.msk [vmem:[#allocation2 + $0x88] sm:$0xf] %vm226_vm0, %v654_v21  ;;  %v680_v45 = vrot.slane %v9571_v38, 4  ;;  %v687_v29 = vor.u32 %v685_v49, %v684_v39  ;;  %v429_v21 = vld [vmem:[%s8989_s24 + $0xd8] sm:$0xff] }
  0xbf   : > { %v992_v40 = vld [vmem:[#allocation2 + $0x54] sm:$0xf]  ;;  %v689_v0 = vrot.slane %v684_v39, 4  ;;  %v877_v47 = vsel %vm9185_vm10, %v672_v35, %v876_v23  ;;  %v708_v27 = vshrl.u32 %v462_v53, 16  ;;  %v711_v7 = vshll.u32 %v462_v53, 16 }
  0xc0   : > { %v1313_v48 = vrot.slane %v1311_v42, 4  ;;  %v1316_v30 = vrot.slane %v1314_v13, 5  ;;  %v1191_v59 = vshrl.u32 %v992_v40, 16  ;;  %v1194_v31 = vshll.u32 %v992_v40, 16  ;;  %878 = vst [vmem:[#allocation2 + $0x98] sm:$0x1] %v877_v47 }
  0xc1   : > { %v1008_v18 = vld [vmem:[#allocation2 + $0x94] sm:$0xf]  ;;  %v688_v25 = vsel %vm9060_vm9, %v680_v45, %v687_v29  ;;  %v884_v19 = vsel %vm9185_vm10, %v689_v0, %v883_v58  ;;  %v710_v5 = vrot.slane %v708_v27, 7  ;;  %v716_v26 = vshrl.u32 %v9577_v4, 16 }
  0xc2   : > { %v1317_v50 = vor.u32 %v1316_v30, %v1313_v48  ;;  %v1320_v62 = vshll.u32 %v1008_v18, 16  ;;  %v1324_v16 = vshrl.u32 %v1008_v18, 16  ;;  %v1193_v63 = vrot.slane %v1191_v59, 4  ;;  %882 = vst.msk [vmem:[#allocation2 + $0xa0] sm:$0xf] %vm226_vm0, %v688_v25 }
  0xc3   : > { %v1196_v56 = vrot.slane %v1194_v31, 5  ;;  %885 = vst [vmem:[#allocation2 + $0xa4] sm:$0x1] %v884_v19  ;;  %v997_v22 = vld [vmem:[#allocation2 + $0x68] sm:$0x1]  ;;  %1444 = vrot.lane.b32.xlu1 %v1261_v2, %s8793_s20  ;;  %v713_v55 = vor.u32 %v711_v7, %v710_v5  ;;  %v714_v36 = vrot.slane %v710_v5, 4  ;;  %v460_v58 = vpack.c.bf16 %v428_v60, %v428_v60 }
  0xc4   : > { %v1318_v15 = vrot.slane %v1317_v50, 4  ;;  %v1322_v3 = vrot.slane %v1320_v62, 5  ;;  %v1004_v8 = vld [vmem:[#allocation2 + $0x84] sm:$0xf]  ;;  %v1234_v6 = vshll.u32 %v997_v22, 16  ;;  %v1326_v46 = vrot.slane %v1324_v16, 4 }
  0xc5   : > { %v1197_v32 = vor.u32 %v1196_v56, %v1193_v63  ;;  %v9598_v28 = vld [vmem:[#allocation2 + $0x88] sm:$0xf]  ;;  %v1287_v54 = vshrl.u32 %v1004_v8, 16  ;;  %v1290_v37 = vshll.u32 %v1004_v8, 16  ;;  %v9604_v34 = vrot.slane %v716_v26, 7 }
  0xc6   : > { %v1323_v33 = vsel %vm8874_vm3, %v1318_v15, %v1322_v3  ;;  %v1296_v17 = vshll.u32 %v9598_v28, 16  ;;  %v893_v2 = vld [vmem:[#allocation2 + $0xb4] sm:$0xf]  ;;  %v1327_v9 = vor.u32 %v1326_v46, %v1322_v3  ;;  %v1236_v39 = vrot.slane %v1234_v6, 5  ;;  %v858_v19 = vld [vmem:[#allocation2 + $0x78] sm:$0xf] }
  0xc7   : > { %1454 = vrot.lane.b32.xlu0 %v1323_v33, %s8793_s20  ;;  %v1198_v49 = vrot.slane %v1197_v32, 4  ;;  %v1289_v20 = vrot.slane %v1287_v54, 4  ;;  %v1292_v44 = vrot.slane %v1290_v37, 5  ;;  %v1009_v23 = vld [vmem:[#allocation2 + $0x98] sm:$0x1]  ;;  %v719_v41 = vshll.u32 %v9577_v4, 16 }
  0xc8   : > { %v1330_v35 = vshll.u32 %v1009_v23, 16  ;;  %v9612_v13 = vrot.slane %v1296_v17, 5  ;;  %v894_v29 = vsel %vm9038_vm8, %v713_v55, %v893_v2  ;;  %v1328_v27 = vrot.slane %v1327_v9, 4  ;;  %v886_v8 = vld [vmem:[#allocation2 + $0xa8] sm:$0xf] }
  0xc9   : > { %v1203_v53 = vsel %vm8874_vm3, %v1198_v49, %v9424_v61  ;;  %v1293_v42 = vor.u32 %v1292_v44, %v1289_v20  ;;  %v1011_v45 = vld [vmem:[#allocation2 + $0xa0] sm:$0xf]  ;;  %v721_v4 = vor.u32 %v719_v41, %v9604_v34  ;;  %895 = vst [vmem:[#allocation2 + $0xb4] sm:$0xf] %v894_v29  ;;  %v626_v61 = vshll.u32 %v9255_v1, 16 }
  0xca   : > { %1434 = vrot.lane.b32.xlu2 %v1203_v53, %s8793_s20  ;;  %v1012_v40 = vld [vmem:[#allocation2 + $0xa4] sm:$0x1]  ;;  %v1344_v0 = vshll.u32 %v1011_v45, 16  ;;  %v1348_v47 = vshrl.u32 %v1011_v45, 16  ;;  %v461_v30 = vpack.c.bf16 %v429_v21, %v429_v21  ;;  %v1332_v18 = vrot.slane %v1330_v35, 5 }
  0xcb   : > { %v1294_v7 = vrot.slane %v1293_v42, 4  ;;  %v1354_v48 = vshll.u32 %v1012_v40, 16  ;;  %v722_v25 = vsel %vm9060_vm9, %v714_v36, %v721_v4  ;;  %v628_v50 = vor.u32 %v626_v61, %v9381_v11  ;;  %v869_v46 = vld [vmem:[#allocation2 + $0x8c] sm:$0x1]  ;;  %v897_v55 = vld [vmem:[#allocation2 + $0xbc] sm:$0x1] }
  0xcc   : > { %v9619_v59 = vrot.slane %v1344_v0, 5  ;;  %v1350_v31 = vrot.slane %v1348_v47, 4  ;;  %896 = vst.msk [vmem:[#allocation2 + $0xb8] sm:$0xf] %vm226_vm0, %v722_v25  ;;  %v691_v62 = vshrl.u32 %v460_v58, 16  ;;  %v694_v16 = vshll.u32 %v460_v58, 16 }
  0xcd   : > { %v1299_v5 = vsel %vm8874_vm3, %v1294_v7, %v9612_v13  ;;  %v1356_v26 = vrot.slane %v1354_v48, 5  ;;  %v699_v63 = vshrl.u32 %v461_v30, 16  ;;  %v702_v56 = vshll.u32 %v461_v30, 16  ;;  %v9652_v9 = vld [vmem:[#allocation2 + $0x4] sm:$0xf] }
  0xce   : > { %1450 = vrot.lane.b32.xlu1 %v1299_v5, %s8793_s20  ;;  %v1351_v1 = vor.u32 %v1350_v31, %v9619_v59  ;;  %v1237_v22 = vsel %vm8874_vm3, %v9590_v14, %v1236_v39  ;;  %v859_v15 = vsel %vm9038_vm8, %v628_v50, %v858_v19  ;;  %v693_v3 = vrot.slane %v691_v62, 7  ;;  %v879_v53 = vld [vmem:[#allocation2 + $0x9c] sm:$0xf]  ;;  %v1537_v47 = vld [vmem:[#allocation2 + $0x8] sm:$0x1] }
  0xcf   : > { %860 = vst [vmem:[#allocation2 + $0x78] sm:$0xf] %v859_v15  ;;  %v9635_v11 = vrot.slane %v699_v63, 7  ;;  %v655_v37 = vrot.slane %v9557_v12, 4  ;;  %v1333_v14 = vsel %vm8874_vm3, %v1328_v27, %v1332_v18  ;;  %v723_v36 = vrot.slane %v9604_v34, 4 }
  0xd0   : > { %v1352_v6 = vrot.slane %v1351_v1, 4  ;;  %v696_v32 = vor.u32 %v694_v16, %v693_v3  ;;  %v697_v54 = vrot.slane %v693_v3, 4  ;;  %v1016_v33 = vld [vmem:[#allocation2 + $0xb4] sm:$0xf]  ;;  %v1300_v39 = vshrl.u32 %v9598_v28, 16 }
  0xd1   : > { %v704_v17 = vor.u32 %v702_v56, %v9635_v11  ;;  %v1383_v2 = vshrl.u32 %v1016_v33, 16  ;;  %v1386_v49 = vshll.u32 %v1016_v33, 16  ;;  %v870_v20 = vsel %vm9185_vm10, %v655_v37, %v869_v46  ;;  %v890_v31 = vld [vmem:[#allocation2 + $0xb0] sm:$0x1] }
  0xd2   : > { %v1357_v60 = vsel %vm8874_vm3, %v1352_v6, %v1356_v26  ;;  %1440 = vrot.lane.b32.xlu2 %v1237_v22, %s8793_s20  ;;  %v887_v12 = vsel %vm9038_vm8, %v696_v32, %v886_v8  ;;  %v898_v34 = vsel %vm9185_vm10, %v723_v36, %v897_v55  ;;  %871 = vst [vmem:[#allocation2 + $0x8c] sm:$0x1] %v870_v20  ;;  %v677_v58 = vshll.u32 %v9551_v57, 16  ;;  %v1541_v55 = vld [vmem:[#allocation2 + $0x18] sm:$0xe] }
  0xd3   : > { %1460 = vrot.lane.b32.xlu0 %v1357_v60, %s8793_s20  ;;  %v1017_v44 = vld [vmem:[#allocation2 + $0xb8] sm:$0xf]  ;;  %v705_v23 = vsel %vm9060_vm9, %v697_v54, %v704_v17  ;;  %888 = vst [vmem:[#allocation2 + $0xa8] sm:$0xf] %v887_v12  ;;  %v1385_v35 = vrot.slane %v1383_v2, 4  ;;  %v1388_v41 = vrot.slane %v1386_v49, 5 }
  0xd4   : > { %v1392_v21 = vshll.u32 %v1017_v44, 16  ;;  %889 = vst.msk [vmem:[#allocation2 + $0xac] sm:$0xf] %vm226_vm0, %v705_v23  ;;  %v1636_v28 = vrot.slane %v9652_v9, 5  ;;  %v679_v27 = vor.u32 %v677_v58, %v9571_v38  ;;  %v1396_v7 = vshrl.u32 %v1017_v44, 16  ;;  %v1407_v58 = vpop.permute.xlu0 %1406 }
  0xd5   : > { %v1389_v42 = vor.u32 %v1388_v41, %v1385_v35  ;;  %899 = vst [vmem:[#allocation2 + $0xbc] sm:$0x1] %v898_v34  ;;  %v1302_v48 = vrot.slane %v1300_v39, 4  ;;  %v1639_v19 = vrot.slane %v1537_v47, 5  ;;  %v706_v22 = vrot.slane %v9635_v11, 4 }
  0xd6   : > { %1456 = vrot.lane.b32.xlu1 %v1333_v14, %s8793_s20  ;;  %v9660_v45 = vrot.slane %v1392_v21, 5  ;;  %v1001_v29 = vld [vmem:[#allocation2 + $0x78] sm:$0xf]  ;;  %v880_v57 = vsel %vm9038_vm8, %v679_v27, %v879_v53  ;;  %v1638_v62 = vrot.slane %v1636_v28, 4  ;;  %v1398_v56 = vrot.slane %v1396_v7, 4 }
  0xd7   : > { %v1263_v40 = vshrl.u32 %v1001_v29, 16  ;;  %v1266_v0 = vshll.u32 %v1001_v29, 16  ;;  %v1390_v4 = vrot.slane %v1389_v42, 4  ;;  %881 = vst [vmem:[#allocation2 + $0x9c] sm:$0xf] %v880_v57  ;;  %v1303_v63 = vor.u32 %v1302_v48, %v9612_v13 }
  0xd8   : > { %v891_v54 = vsel %vm9185_vm10, %v706_v22, %v890_v31  ;;  %v1640_v60 = vsel %vm9676_vm13, %v1638_v62, %v1639_v19  ;;  %v9690_v17 = vld [vmem:[#allocation2 + $0x1c] sm:$0xf]  ;;  %v907_v36 = vld [vmem:[#allocation2] sm:$0xf]  ;;  %v1399_v12 = vor.u32 %v1398_v56, %v9660_v45  ;;  %v8405_v34 = vrot.slane %v1541_v55, 9 }
  0xd9   : > { %v1265_v61 = vrot.slane %v1263_v40, 4  ;;  %v1268_v30 = vrot.slane %v1266_v0, 5  ;;  %v1395_v18 = vsel %vm8874_vm3, %v1390_v4, %v9660_v45  ;;  %v1006_v16 = vld [vmem:[#allocation2 + $0x8c] sm:$0x1]  ;;  %892 = vst [vmem:[#allocation2 + $0xb0] sm:$0x1] %v891_v54 }
  0xda   : > { %v1013_v25 = vld [vmem:[#allocation2 + $0xa8] sm:$0xf]  ;;  %v1306_v46 = vshll.u32 %v1006_v16, 16  ;;  %v1304_v14 = vrot.slane %v1303_v63, 4  ;;  %939 = vst.msk [vmem:[#allocation4] sm:$0xf] %vm226_vm0, %v907_v36 }
  0xdb   : > { %1466 = vrot.lane.b32.xlu0 %v1395_v18, %s8793_s20  ;;  %v1269_v38 = vor.u32 %v1268_v30, %v1265_v61  ;;  %v1014_v5 = vld [vmem:[#allocation2 + $0xac] sm:$0xf]  ;;  %v1359_v26 = vshrl.u32 %v1013_v25, 16  ;;  %v1362_v50 = vshll.u32 %v1013_v25, 16  ;;  %v1650_v39 = vrot.slane %v9690_v17, 5 }
  0xdc   : > { %v1368_v1 = vshll.u32 %v1014_v5, 16  ;;  %v1018_v32 = vld [vmem:[#allocation2 + $0xbc] sm:$0x1]  ;;  %v1308_v49 = vrot.slane %v1306_v46, 5  ;;  %v9700_v21 = vld [vmem:[#allocation2 + $0x28] sm:$0xf] }
  0xdd   : > { %v1270_v15 = vrot.slane %v1269_v38, 4  ;;  %v1361_v3 = vrot.slane %v1359_v26, 4  ;;  %v1364_v8 = vrot.slane %v1362_v50, 5  ;;  %v1402_v33 = vshll.u32 %v1018_v32, 16  ;;  %1503 = vst.msk [vmem:[#allocation4] sm:$0xf] %vm1502_vm14, %v1407_v58 }
  0xde   : > { %v9685_v11 = vrot.slane %v1368_v1, 5  ;;  %v1372_v53 = vshrl.u32 %v1014_v5, 16  ;;  %v1309_v42 = vsel %vm8874_vm3, %v1304_v14, %v1308_v49  ;;  %v1400_v45 = vrot.slane %v1399_v12, 4  ;;  %v1538_v0 = vld [vmem:[#allocation2 + $0xc] sm:$0xe] }
  0xdf   : > { %v1275_v13 = vsel %vm8874_vm3, %v1270_v15, %v9504_v24  ;;  %v1365_v37 = vor.u32 %v1364_v8, %v1361_v3  ;;  %v1010_v24 = vld [vmem:[#allocation2 + $0x9c] sm:$0xf]  ;;  %v1404_v29 = vrot.slane %v1402_v33, 5  ;;  %v1651_v47 = vsel %vm9676_vm13, %v8405_v34, %v1650_v39  ;;  %v908_v4 = vld [vmem:[#allocation2 + $0x4] sm:$0xf] }
  0xe0   : > { %1446 = vrot.lane.b32.xlu2 %v1275_v13, %s8793_s20  ;;  %v1335_v20 = vshrl.u32 %v1010_v24, 16  ;;  %v1338_v44 = vshll.u32 %v1010_v24, 16  ;;  %v1657_v27 = vrot.slane %v9700_v21, 5  ;;  %v911_v7 = vld [vmem:[#allocation2 + $0x18] sm:$0xf]  ;;  %v1374_v57 = vrot.slane %v1372_v53, 4 }
  0xe1   : > { %v1366_v2 = vrot.slane %v1365_v37, 4  ;;  %v1405_v48 = vsel %vm8874_vm3, %v1400_v45, %v1404_v29  ;;  %v1546_v30 = vld [vmem:[#allocation2 + $0x2c] sm:$0x1]  ;;  %940 = vst.msk [vmem:[#allocation4 + $0x4] sm:$0xf] %vm226_vm0, %v908_v4  ;;  %v8404_v25 = vrot.slane %v1538_v0, 9 }
  0xe2   : > { %v1337_v35 = vrot.slane %v1335_v20, 4  ;;  %v1340_v41 = vrot.slane %v1338_v44, 5  ;;  %v1539_v31 = vld [vmem:[#allocation2 + $0x10] sm:$0xf]  ;;  %943 = vst.msk [vmem:[#allocation4 + $0x10] sm:$0xf] %vm226_vm0, %v911_v7  ;;  %v1375_v50 = vor.u32 %v1374_v57, %v9685_v11 }
  0xe3   : > { %v1371_v23 = vsel %vm8874_vm3, %v1366_v2, %v9685_v11  ;;  %1748 = vrot.lane.b32.xlu0 %v1640_v60, %s8794_s25  ;;  %v1015_v18 = vld [vmem:[#allocation2 + $0xb0] sm:$0x1]  ;;  %v1659_v19 = vrot.slane %v1657_v27, 4  ;;  %v1660_v38 = vrot.slane %v1546_v30, 5  ;;  %v1643_v26 = vrot.slane %v1539_v31, 5 }
  0xe4   : > { %1462 = vrot.lane.b32.xlu1 %v1371_v23, %s8793_s20  ;;  %v1341_v40 = vor.u32 %v1340_v41, %v1337_v35  ;;  %v1378_v62 = vshll.u32 %v1015_v18, 16  ;;  %v1550_v1 = vld [vmem:[#allocation2 + $0x3c] sm:$0xe]  ;;  %v9721_v16 = vld [vmem:[#allocation2 + $0x40] sm:$0xf]  ;;  %v1376_v3 = vrot.slane %v1375_v50, 4 }
  0xe5   : > { %v1661_v56 = vsel %vm9676_vm13, %v1659_v19, %v1660_v38  ;;  %v909_v22 = vld [vmem:[#allocation2 + $0xc] sm:$0xf]  ;;  %v913_v15 = vld [vmem:[#allocation2 + $0x24] sm:$0xf]  ;;  %v912_v46 = vld [vmem:[#allocation2 + $0x1c] sm:$0xf] }
  0xe6   : > { %v1342_v61 = vrot.slane %v1341_v40, 4  ;;  %v1380_v8 = vrot.slane %v1378_v62, 5  ;;  %941 = vst.msk [vmem:[#allocation4 + $0x8] sm:$0xf] %vm226_vm0, %v909_v22  ;;  %v1543_v32 = vld [vmem:[#allocation2 + $0x20] sm:$0x1] }
  0xe7   : > { %945 = vst.msk [vmem:[#allocation4 + $0x18] sm:$0xf] %vm226_vm0, %v913_v15  ;;  %v8408_v54 = vrot.slane %v1550_v1, 9  ;;  %v1671_v13 = vrot.slane %v9721_v16, 5  ;;  %v9735_v37 = vld [vmem:[#allocation2 + $0x4c] sm:$0xf] }
  0xe8   : > { %1452 = vrot.lane.b32.xlu2 %v1309_v42, %s8793_s20  ;;  %v1347_v5 = vsel %vm8874_vm3, %v1342_v61, %v9619_v59  ;;  %v1644_v59 = vsel %vm9676_vm13, %v8404_v25, %v1643_v26  ;;  %944 = vst.msk [vmem:[#allocation4 + $0x14] sm:$0xf] %vm226_vm0, %v912_v46  ;;  %v1381_v11 = vsel %vm8874_vm3, %v1376_v3, %v1380_v8  ;;  %v1652_v55 = vrot.slane %v1650_v39, 4  ;;  %v1535_v14 = vld [vmem:[#allocation2] sm:$0xe] }
  0xe9   : > { %v1653_v60 = vrot.slane %v1543_v32, 5  ;;  %v1678_v33 = vrot.slane %v9735_v37, 5  ;;  %v1672_v17 = vsel %vm9676_vm13, %v8408_v54, %v1671_v13  ;;  %v910_v36 = vld [vmem:[#allocation2 + $0x10] sm:$0xf]  ;;  %v916_v2 = vld [vmem:[#allocation2 + $0x34] sm:$0xf] }
  0xea   : > { %v915_v49 = vld [vmem:[#allocation2 + $0x30] sm:$0xf]  ;;  %v8403_v24 = vrot.slane %v1535_v14, 9  ;;  %942 = vst.msk [vmem:[#allocation4 + $0xc] sm:$0xf] %vm226_vm0, %v910_v36  ;;  %v1645_v45 = vrot.slane %v1643_v26, 4 }
  0xeb   : > { %1754 = vrot.lane.b32.xlu0 %v1651_v47, %s8794_s25  ;;  %v1654_v12 = vsel %vm9676_vm13, %v1652_v55, %v1653_v60  ;;  %v1555_v20 = vld [vmem:[#allocation2 + $0x50] sm:$0x1]  ;;  %v1547_v44 = vld [vmem:[#allocation2 + $0x30] sm:$0xe]  ;;  %v9746_v23 = vld [vmem:[#allocation2 + $0x34] sm:$0xf] }
  0xec   : > { %1468 = vrot.lane.b32.xlu1 %v1405_v48, %s8793_s20  ;;  %948 = vst.msk [vmem:[#allocation4 + $0x24] sm:$0xf] %vm226_vm0, %v916_v2  ;;  %v1680_v34 = vrot.slane %v1678_v33, 4  ;;  %v1681_v39 = vrot.slane %v1555_v20, 5  ;;  %v1540_v35 = vld [vmem:[#allocation2 + $0x14] sm:$0x1]  ;;  %v1637_v41 = vsel %vm9676_vm13, %v8403_v24, %v1636_v28 }
  0xed   : > { %947 = vst.msk [vmem:[#allocation4 + $0x20] sm:$0xf] %vm226_vm0, %v915_v49  ;;  %v8407_v58 = vrot.slane %v1547_v44, 9  ;;  %v1664_v53 = vrot.slane %v9746_v23, 5  ;;  %v1646_v29 = vrot.slane %v1540_v35, 5  ;;  %v1673_v25 = vrot.slane %v1671_v13, 4 }
  0xee   : > { %v1682_v40 = vsel %vm9676_vm13, %v1680_v34, %v1681_v39  ;;  %v914_v0 = vld [vmem:[#allocation2 + $0x28] sm:$0xf]  ;;  %v918_v4 = vld [vmem:[#allocation2 + $0x40] sm:$0xf]  ;;  %v9765_v7 = vld [vmem:[#allocation2 + $0x64] sm:$0xf] }
  0xef   : > { %v1409_v63 = vpop.permute.xlu0 %1408  ;;  %v919_v47 = vld [vmem:[#allocation2 + $0x48] sm:$0xf]  ;;  %v1665_v9 = vsel %vm9676_vm13, %v8407_v58, %v1664_v53  ;;  %v1559_v28 = vld [vmem:[#allocation2 + $0x60] sm:$0xe]  ;;  %946 = vst.msk [vmem:[#allocation4 + $0x1c] sm:$0xf] %vm226_vm0, %v914_v0  ;;  %v1647_v18 = vsel %vm9676_vm13, %v1645_v45, %v1646_v29 }
  0xf0   : > { %1458 = vrot.lane.b32.xlu2 %v1347_v5, %s8793_s20  ;;  %1504 = vst.msk [vmem:[#allocation4 + $0x4] sm:$0xf] %vm1502_vm14, %v1409_v63  ;;  %v1552_v48 = vld [vmem:[#allocation2 + $0x44] sm:$0x1]  ;;  %v8411_v61 = vrot.slane %v1559_v28, 9  ;;  %v1692_v30 = vrot.slane %v9765_v7, 5 }
  0xf1   : > { %951 = vst.msk [vmem:[#allocation4 + $0x30] sm:$0xf] %vm226_vm0, %v919_v47  ;;  %v1544_v57 = vld [vmem:[#allocation2 + $0x24] sm:$0xe]  ;;  %v9773_v31 = vld [vmem:[#allocation2 + $0x70] sm:$0xf] }
  0xf2   : > { %950 = vst.msk [vmem:[#allocation4 + $0x2c] sm:$0xf] %vm226_vm0, %v918_v4  ;;  %v1674_v19 = vrot.slane %v1552_v48, 5  ;;  %v8406_v26 = vrot.slane %v1544_v57, 9  ;;  %v1699_v62 = vrot.slane %v9773_v31, 5  ;;  %v1693_v1 = vsel %vm9676_vm13, %v8411_v61, %v1692_v30 }
  0xf3   : > { %1760 = vrot.lane.b32.xlu0 %v1661_v56, %s8794_s25  ;;  %v917_v16 = vld [vmem:[#allocation2 + $0x3c] sm:$0xf]  ;;  %v922_v63 = vld [vmem:[#allocation2 + $0x58] sm:$0xf]  ;;  %v1564_v22 = vld [vmem:[#allocation2 + $0x74] sm:$0x1] }
  0xf4   : > { %1750 = vrot.lane.b32.xlu1 %v1644_v59, %s8794_s25  ;;  %v1675_v56 = vsel %vm9676_vm13, %v1673_v25, %v1674_v19  ;;  %949 = vst.msk [vmem:[#allocation4 + $0x28] sm:$0xf] %vm226_vm0, %v917_v16  ;;  %v921_v15 = vld [vmem:[#allocation2 + $0x54] sm:$0xf]  ;;  %v9787_v3 = vld [vmem:[#allocation2 + $0x58] sm:$0xf]  ;;  %v1658_v54 = vsel %vm9676_vm13, %v8406_v26, %v1657_v27 }
  0xf5   : > { %v1556_v59 = vld [vmem:[#allocation2 + $0x54] sm:$0xe]  ;;  %954 = vst.msk [vmem:[#allocation4 + $0x3c] sm:$0xf] %vm226_vm0, %v922_v63  ;;  %v1701_v8 = vrot.slane %v1699_v62, 4  ;;  %v1702_v46 = vrot.slane %v1564_v22, 5 }
  0xf6   : > { %953 = vst.msk [vmem:[#allocation4 + $0x38] sm:$0xf] %vm226_vm0, %v921_v15  ;;  %v1549_v32 = vld [vmem:[#allocation2 + $0x38] sm:$0x1]  ;;  %v8410_v13 = vrot.slane %v1556_v59, 9  ;;  %v1666_v14 = vrot.slane %v1664_v53, 4 }
  0xf7   : > { %v1568_v2 = vld [vmem:[#allocation2 + $0x84] sm:$0xe]  ;;  %v1703_v21 = vsel %vm9676_vm13, %v1701_v8, %v1702_v46  ;;  %v920_v27 = vld [vmem:[#allocation2 + $0x4c] sm:$0xf]  ;;  %v9808_v24 = vld [vmem:[#allocation2 + $0x88] sm:$0xf] }
  0xf8   : > { %1464 = vrot.lane.b32.xlu2 %v1381_v11, %s8793_s20  ;;  %v1685_v11 = vrot.slane %v9787_v3, 5  ;;  %v925_v49 = vld [vmem:[#allocation2 + $0x6c] sm:$0xf]  ;;  %952 = vst.msk [vmem:[#allocation4 + $0x34] sm:$0xf] %vm226_vm0, %v920_v27  ;;  %v8414_v23 = vrot.slane %v1568_v2, 9 }
  0xf9   : > { %v924_v20 = vld [vmem:[#allocation2 + $0x64] sm:$0xf]  ;;  %v1561_v44 = vld [vmem:[#allocation2 + $0x68] sm:$0x1]  ;;  %957 = vst.msk [vmem:[#allocation4 + $0x48] sm:$0xf] %vm226_vm0, %v925_v49 }
  0xfa   : > { %956 = vst.msk [vmem:[#allocation4 + $0x44] sm:$0xf] %vm226_vm0, %v924_v20  ;;  %v1713_v34 = vrot.slane %v9808_v24, 5  ;;  %v1553_v39 = vld [vmem:[#allocation2 + $0x48] sm:$0xe]  ;;  %v1694_v58 = vrot.slane %v1692_v30, 4 }
  0xfb   : > { %1766 = vrot.lane.b32.xlu0 %v1672_v17, %s8794_s25  ;;  %v1667_v17 = vrot.slane %v1549_v32, 5  ;;  %v9816_v35 = vld [vmem:[#allocation2 + $0x94] sm:$0xf]  ;;  %v1695_v53 = vrot.slane %v1561_v44, 5  ;;  %v8409_v29 = vrot.slane %v1553_v39, 9 }
  0xfc   : > { %1756 = vrot.lane.b32.xlu1 %v1654_v12, %s8794_s25  ;;  %v1686_v12 = vsel %vm9676_vm13, %v8410_v13, %v1685_v11  ;;  %v1720_v0 = vrot.slane %v9816_v35, 5  ;;  %v1714_v47 = vsel %vm9676_vm13, %v8414_v23, %v1713_v34  ;;  %v923_v4 = vld [vmem:[#allocation2 + $0x60] sm:$0xf]  ;;  %v1573_v7 = vld [vmem:[#allocation2 + $0x98] sm:$0x1] }
  0xfd   : > { %v1696_v28 = vsel %vm9676_vm13, %v1694_v58, %v1695_v53  ;;  %955 = vst.msk [vmem:[#allocation4 + $0x40] sm:$0xf] %vm226_vm0, %v923_v4  ;;  %v927_v48 = vld [vmem:[#allocation2 + $0x78] sm:$0xf]  ;;  %v9830_v30 = vld [vmem:[#allocation2 + $0x7c] sm:$0xf]  ;;  %v1679_v19 = vsel %vm9676_vm13, %v8409_v29, %v1678_v33 }
  0xfe   : > { %v1415_v42 = vpop.permute.xlu2 %1414  ;;  %v1565_v61 = vld [vmem:[#allocation2 + $0x78] sm:$0xe]  ;;  %959 = vst.msk [vmem:[#allocation4 + $0x50] sm:$0xf] %vm226_vm0, %v927_v48  ;;  %v1722_v57 = vrot.slane %v1720_v0, 4 }
  0xff   : > { %1507 = vst.msk [vmem:[#allocation4 + $0x10] sm:$0xf] %vm1502_vm14, %v1415_v42  ;;  %v1558_v25 = vld [vmem:[#allocation2 + $0x5c] sm:$0x1]  ;;  %v1577_v63 = vld [vmem:[#allocation2 + $0xa8] sm:$0xe] }
 0x100   : > { %1746 = vrot.lane.b32.xlu2 %v1637_v41, %s8794_s25  ;;  %v1668_v41 = vsel %vm9676_vm13, %v1666_v14, %v1667_v17  ;;  %v926_v37 = vld [vmem:[#allocation2 + $0x70] sm:$0xf]  ;;  %v9852_v15 = vld [vmem:[#allocation2 + $0xac] sm:$0xf]  ;;  %v930_v59 = vld [vmem:[#allocation2 + $0x88] sm:$0xf] }
 0x101   : > { %v931_v22 = vld [vmem:[#allocation2 + $0x90] sm:$0xf]  ;;  %958 = vst.msk [vmem:[#allocation4 + $0x4c] sm:$0xf] %vm226_vm0, %v926_v37  ;;  %v1570_v3 = vld [vmem:[#allocation2 + $0x8c] sm:$0x1] }
 0x102   : > { %963 = vst.msk [vmem:[#allocation4 + $0x60] sm:$0xf] %vm226_vm0, %v931_v22  ;;  %v1562_v46 = vld [vmem:[#allocation2 + $0x6c] sm:$0xe]  ;;  %v8417_v32 = vrot.slane %v1577_v63, 9 }
 0x103   : > { %1772 = vrot.lane.b32.xlu0 %v1682_v40, %s8794_s25  ;;  %962 = vst.msk [vmem:[#allocation4 + $0x5c] sm:$0xf] %vm226_vm0, %v930_v59  ;;  %v9861_v13 = vld [vmem:[#allocation2 + $0xb8] sm:$0xf]  ;;  %v8412_v17 = vrot.slane %v1562_v46, 9 }
 0x104   : > { %1762 = vrot.lane.b32.xlu1 %v1665_v9, %s8794_s25  ;;  %v928_v9 = vld [vmem:[#allocation2 + $0x7c] sm:$0xf]  ;;  %v1741_v2 = vrot.slane %v9861_v13, 5  ;;  %v929_v27 = vld [vmem:[#allocation2 + $0x84] sm:$0xf] }
 0x105   : > { %v1411_v38 = vpop.permute.xlu1 %1410  ;;  %960 = vst.msk [vmem:[#allocation4 + $0x54] sm:$0xf] %vm226_vm0, %v928_v9  ;;  %v934_v49 = vld [vmem:[#allocation2 + $0xa0] sm:$0xf]  ;;  %v1582_v24 = vld [vmem:[#allocation2 + $0xbc] sm:$0x1]  ;;  %v1700_v58 = vsel %vm9676_vm13, %v8412_v17, %v1699_v62 }
 0x106   : > { %1505 = vst.msk [vmem:[#allocation4 + $0x8] sm:$0xf] %vm1502_vm14, %v1411_v38  ;;  %v1417_v5 = vpop.permute.xlu2 %1416  ;;  %v8413_v38 = vrot.slane %v1565_v61, 9  ;;  %v933_v20 = vld [vmem:[#allocation2 + $0x9c] sm:$0xf]  ;;  %v1743_v39 = vrot.slane %v1741_v2, 4 }
 0x107   : > { %v1419_v50 = vpop.permute.xlu0 %1418  ;;  %1508 = vst.msk [vmem:[#allocation4 + $0x14] sm:$0xf] %vm1502_vm14, %v1417_v5  ;;  %v1706_v5 = vrot.slane %v9830_v30, 5  ;;  %v1574_v44 = vld [vmem:[#allocation2 + $0x9c] sm:$0xe] }
 0x108   : > { %1752 = vrot.lane.b32.xlu2 %v1647_v18, %s8794_s25  ;;  %1509 = vst.msk [vmem:[#allocation4 + $0x18] sm:$0xf] %vm1502_vm14, %v1419_v50  ;;  %v1723_v18 = vrot.slane %v1573_v7, 5  ;;  %v1687_v50 = vrot.slane %v1685_v11, 4  ;;  %v1575_v23 = vld [vmem:[#allocation2 + $0xa0] sm:$0xf] }
 0x109   : > { %v1707_v33 = vsel %vm9676_vm13, %v8413_v38, %v1706_v5  ;;  %961 = vst.msk [vmem:[#allocation4 + $0x58] sm:$0xf] %vm226_vm0, %v929_v27  ;;  %v8416_v53 = vrot.slane %v1574_v44, 9  ;;  %v1567_v29 = vld [vmem:[#allocation2 + $0x80] sm:$0x1]  ;;  %v1708_v62 = vrot.slane %v1706_v5, 4 }
 0x10a   : > { %966 = vst.msk [vmem:[#allocation4 + $0x6c] sm:$0xf] %vm226_vm0, %v934_v49  ;;  %v932_v4 = vld [vmem:[#allocation2 + $0x94] sm:$0xf]  ;;  %v936_v7 = vld [vmem:[#allocation2 + $0xac] sm:$0xf] }
 0x10b   : > { %1778 = vrot.lane.b32.xlu0 %v1693_v1, %s8794_s25  ;;  %v1688_v1 = vrot.slane %v1558_v25, 5  ;;  %965 = vst.msk [vmem:[#allocation4 + $0x68] sm:$0xf] %vm226_vm0, %v933_v20  ;;  %v937_v9 = vld [vmem:[#allocation2 + $0xb4] sm:$0xf] }
 0x10c   : > { %1768 = vrot.lane.b32.xlu1 %v1675_v56, %s8794_s25  ;;  %v1724_v56 = vsel %vm9676_vm13, %v1722_v57, %v1723_v18  ;;  %964 = vst.msk [vmem:[#allocation4 + $0x64] sm:$0xf] %vm226_vm0, %v932_v4  ;;  %v1579_v48 = vld [vmem:[#allocation2 + $0xb0] sm:$0x1]  ;;  %v1571_v25 = vld [vmem:[#allocation2 + $0x90] sm:$0xe] }
 0x10d   : > { %v1413_v55 = vpop.permute.xlu1 %1412  ;;  %v1689_v11 = vsel %vm9676_vm13, %v1687_v50, %v1688_v1  ;;  %969 = vst.msk [vmem:[#allocation4 + $0x78] sm:$0xf] %vm226_vm0, %v937_v9  ;;  %v1737_v18 = vrot.slane %v1579_v48, 5  ;;  %v935_v5 = vld [vmem:[#allocation2 + $0xa8] sm:$0xf]  ;;  %v8415_v50 = vrot.slane %v1571_v25, 9 }
 0x10e   : > { %1506 = vst.msk [vmem:[#allocation4 + $0xc] sm:$0xf] %vm1502_vm14, %v1413_v55  ;;  %v1715_v55 = vrot.slane %v1713_v34, 4  ;;  %v1576_v63 = vld [vmem:[#allocation2 + $0xa4] sm:$0x1] }
 0x10f   : > { %v1423_v60 = vpop.permute.xlu2 %1422  ;;  %v1425_v36 = vpop.permute.xlu0 %1424  ;;  %968 = vst.msk [vmem:[#allocation4 + $0x74] sm:$0xf] %vm226_vm0, %v936_v7  ;;  %v1880_v37 = vld [vmem:[#allocation2 + $0x28] sm:$0xf]  ;;  %v938_v22 = vld [vmem:[#allocation2 + $0xb8] sm:$0xf] }
 0x110   : > { %1511 = vst.msk [vmem:[#allocation4 + $0x20] sm:$0xf] %vm1502_vm14, %v1423_v60  ;;  %1758 = vrot.lane.b32.xlu2 %v1658_v54, %s8794_s25  ;;  %v1734_v54 = vrot.slane %v9852_v15, 5  ;;  %v1716_v60 = vrot.slane %v1570_v3, 5  ;;  %v1730_v59 = vrot.slane %v1576_v63, 5 }
 0x111   : > { %1512 = vst.msk [vmem:[#allocation4 + $0x24] sm:$0xf] %vm1502_vm14, %v1425_v36  ;;  %v1886_v17 = vld [vmem:[#allocation2 + $0x4c] sm:$0xf]  ;;  %v1876_v27 = vld [vmem:[#allocation2 + $0x10] sm:$0xf] }
 0x112   : > { %v1736_v57 = vrot.slane %v1734_v54, 4  ;;  %967 = vst.msk [vmem:[#allocation4 + $0x70] sm:$0xf] %vm226_vm0, %v935_v5  ;;  %v1879_v20 = vld [vmem:[#allocation2 + $0x24] sm:$0xf] }
 0x113   : > { %1784 = vrot.lane.b32.xlu0 %v1703_v21, %s8794_s25  ;;  %v1735_v21 = vsel %vm9676_vm13, %v8417_v32, %v1734_v54  ;;  %970 = vst.msk [vmem:[#allocation4 + $0x7c] sm:$0xf] %vm226_vm0, %v938_v22  ;;  %v1883_v32 = vld [vmem:[#allocation2 + $0x3c] sm:$0xf]  ;;  %v1890_v4 = vld [vmem:[#allocation2 + $0x64] sm:$0xf] }
 0x114   : > { %1774 = vrot.lane.b32.xlu1 %v1686_v12, %s8794_s25  ;;  %v1717_v12 = vsel %vm9676_vm13, %v1715_v55, %v1716_v60  ;;  %v1878_v54 = vld [vmem:[#allocation2 + $0x1c] sm:$0xf]  ;;  %v1885_v7 = vld [vmem:[#allocation2 + $0x48] sm:$0xf]  ;;  %v1893_v25 = vld [vmem:[#allocation2 + $0x78] sm:$0xf] }
 0x115   : > { %v1421_v42 = vpop.permute.xlu1 %1420 }
 0x116   : > { %1510 = vst.msk [vmem:[#allocation4 + $0x1c] sm:$0xf] %vm1502_vm14, %v1421_v42  ;;  %v1727_v42 = vrot.slane %v1575_v23, 5 }
 0x117   : > { %v1429_v45 = vpop.permute.xlu2 %1428  ;;  %v1431_v40 = vpop.permute.xlu0 %1430 }
 0x118   : > { %1514 = vst.msk [vmem:[#allocation4 + $0x2c] sm:$0xf] %vm1502_vm14, %v1429_v45  ;;  %1764 = vrot.lane.b32.xlu2 %v1668_v41, %s8794_s25  ;;  %v1744_v41 = vrot.slane %v1582_v24, 5  ;;  %v1728_v31 = vsel %vm9676_vm13, %v8416_v53, %v1727_v42  ;;  %v1729_v15 = vrot.slane %v1727_v42, 4  ;;  %v432_v42 = vld [vmem:[%s8989_s24 + $0xf0] sm:$0xff] }
 0x119   : > { %1515 = vst.msk [vmem:[#allocation4 + $0x30] sm:$0xf] %vm1502_vm14, %v1431_v40 }
 0x11b   : > { %1790 = vrot.lane.b32.xlu0 %v1714_v47, %s8794_s25  ;;  %v1745_v47 = vsel %vm9676_vm13, %v1743_v39, %v1744_v41  ;;  %v1887_v39 = vld [vmem:[#allocation2 + $0x54] sm:$0xf] }
 0x11c   : > { %1780 = vrot.lane.b32.xlu1 %v1696_v28, %s8794_s25  ;;  %v1709_v28 = vrot.slane %v1567_v29, 5  ;;  %v464_v29 = vpack.c.bf16 %v432_v42, %v432_v42 }
 0x11d   : > { %v1427_v26 = vpop.permute.xlu1 %1426 }
 0x11e   : > { %1513 = vst.msk [vmem:[#allocation4 + $0x28] sm:$0xf] %vm1502_vm14, %v1427_v26  ;;  %v1710_v61 = vsel %vm9676_vm13, %v1708_v62, %v1709_v28  ;;  %v1738_v26 = vsel %vm9676_vm13, %v1736_v57, %v1737_v18  ;;  %v728_v62 = vshll.u32 %v464_v29, 16 }
 0x11f   : > { %v1437_v16 = vpop.permute.xlu0 %1436 }
 0x120   : > { %1770 = vrot.lane.b32.xlu2 %v1679_v19, %s8794_s25  ;;  %1518 = vst.msk [vmem:[#allocation4 + $0x3c] sm:$0xf] %vm1502_vm14, %v1437_v16  ;;  %v1877_v19 = vld [vmem:[#allocation2 + $0x18] sm:$0xf]  ;;  %v1721_v16 = vsel %vm9676_vm13, %v8415_v50, %v1720_v0  ;;  %v1731_v0 = vsel %vm9676_vm13, %v1729_v15, %v1730_v59 }
 0x121   : > { %v433_v50 = vld [vmem:[%s8989_s24 + $0xf8] sm:$0xff] }
 0x123   : > { %1796 = vrot.lane.b32.xlu0 %v1724_v56, %s8794_s25 }
 0x124   : > { %v1435_v8 = vpop.permute.xlu2 %1434  ;;  %1786 = vrot.lane.b32.xlu1 %v1707_v33, %s8794_s25  ;;  %v1875_v33 = vld [vmem:[#allocation2 + $0xc] sm:$0xf] }
 0x125   : > { %1517 = vst.msk [vmem:[#allocation4 + $0x38] sm:$0xf] %vm1502_vm14, %v1435_v8  ;;  %v1433_v14 = vpop.permute.xlu1 %1432  ;;  %v1580_v8 = vld [vmem:[#allocation2 + $0xb4] sm:$0xe] }
 0x126   : > { %1516 = vst.msk [vmem:[#allocation4 + $0x34] sm:$0xf] %vm1502_vm14, %v1433_v14 }
 0x127   : > { %v1443_v36 = vpop.permute.xlu0 %1442 }
 0x128   : > { %1776 = vrot.lane.b32.xlu2 %v1689_v11, %s8794_s25  ;;  %1521 = vst.msk [vmem:[#allocation4 + $0x48] sm:$0xf] %vm1502_vm14, %v1443_v36  ;;  %v8418_v11 = vrot.slane %v1580_v8, 9  ;;  %v1881_v36 = vld [vmem:[#allocation2 + $0x30] sm:$0xf] }
 0x129   : > { %v1891_v8 = vld [vmem:[#allocation2 + $0x6c] sm:$0xf] }
 0x12a   : > { %v1742_v60 = vsel %vm9676_vm13, %v8418_v11, %v1741_v2  ;;  %v1889_v2 = vld [vmem:[#allocation2 + $0x60] sm:$0xf] }
 0x12b   : > { %1802 = vrot.lane.b32.xlu0 %v1735_v21, %s8794_s25 }
 0x12c   : > { %v1441_v34 = vpop.permute.xlu2 %1440  ;;  %1792 = vrot.lane.b32.xlu1 %v1717_v12, %s8794_s25  ;;  %v1884_v12 = vld [vmem:[#allocation2 + $0x40] sm:$0xf] }
 0x12d   : > { %1520 = vst.msk [vmem:[#allocation4 + $0x44] sm:$0xf] %vm1502_vm14, %v1441_v34  ;;  %v1439_v45 = vpop.permute.xlu1 %1438  ;;  %v1892_v34 = vld [vmem:[#allocation2 + $0x70] sm:$0xf] }
 0x12e   : > { %1519 = vst.msk [vmem:[#allocation4 + $0x40] sm:$0xf] %vm1502_vm14, %v1439_v45 }
 0x130   : > { %v1449_v40 = vpop.permute.xlu0 %1448  ;;  %1782 = vrot.lane.b32.xlu2 %v1700_v58, %s8794_s25  ;;  %v1882_v58 = vld [vmem:[#allocation2 + $0x34] sm:$0xf] }
 0x131   : > { %1524 = vst.msk [vmem:[#allocation4 + $0x54] sm:$0xf] %vm1502_vm14, %v1449_v40  ;;  %v1895_v40 = vld [vmem:[#allocation2 + $0x84] sm:$0xf] }
 0x133   : > { %1808 = vrot.lane.b32.xlu0 %v1745_v47, %s8794_s25  ;;  %v725_v47 = vshrl.u32 %v464_v29, 16 }
 0x134   : > { %1798 = vrot.lane.b32.xlu1 %v1728_v31, %s8794_s25 }
 0x135   : > { %v1445_v30 = vpop.permute.xlu1 %1444  ;;  %v727_v31 = vrot.slane %v725_v47, 7 }
 0x136   : > { %1522 = vst.msk [vmem:[#allocation4 + $0x4c] sm:$0xf] %vm1502_vm14, %v1445_v30  ;;  %v1898_v30 = vld [vmem:[#allocation2 + $0x94] sm:$0xf] }
 0x137   : > { %v730_v28 = vor.u32 %v728_v62, %v727_v31  ;;  %v1897_v62 = vld [vmem:[#allocation2 + $0x90] sm:$0xf] }
 0x138   : > { %1788 = vrot.lane.b32.xlu2 %v1710_v61, %s8794_s25  ;;  %v900_v61 = vld [vmem:[#allocation2 + $0xc0] sm:$0xf] }
 0x139   : > { %v1455_v38 = vpop.permute.xlu0 %1454  ;;  %v901_v18 = vsel %vm9038_vm8, %v730_v28, %v900_v61  ;;  %vm4025_vm8 = vcmask 290048  }
 0x13a   : > { %1527 = vst.msk [vmem:[#allocation4 + $0x60] sm:$0xf] %vm1502_vm14, %v1455_v38  ;;  %v1447_v1 = vpop.permute.xlu2 %1446  ;;  %v1888_v38 = vld [vmem:[#allocation2 + $0x58] sm:$0xf] }
 0x13b   : > { %1523 = vst.msk [vmem:[#allocation4 + $0x50] sm:$0xf] %vm1502_vm14, %v1447_v1  ;;  %1943 = vrot.lane.b32.xlu0 %v1877_v19, %s8795_s26  ;;  %v465_v1 = vpack.c.bf16 %v433_v50, %v433_v50 }
 0x13c   : > { %1804 = vrot.lane.b32.xlu1 %v1738_v26, %s8794_s25  ;;  %902 = vst [vmem:[#allocation2 + $0xc0] sm:$0xf] %v901_v18  ;;  %v2068_v26 = vld [vmem:[#allocation2 + $0xc] sm:$0xf]  ;;  %v2081_v18 = vld [vmem:[#allocation2 + $0x40] sm:$0xf] }
 0x13d   : > { %v2117_v63 = vshrl.u32 %v2068_v26, 16  ;;  %v733_v22 = vshrl.u32 %v465_v1, 16  ;;  %v736_v59 = vshll.u32 %v465_v1, 16  ;;  %v2226_v50 = vshrl.u32 %v2081_v18, 16 }
 0x13f   : > { %v9970_v15 = vrot.slane %v733_v22, 7 }
 0x140   : > { %v1451_v56 = vpop.permute.xlu1 %1450  ;;  %1794 = vrot.lane.b32.xlu2 %v1721_v16, %s8794_s25  ;;  %v1901_v16 = vld [vmem:[#allocation2 + $0xa8] sm:$0xf] }
 0x141   : > { %1525 = vst.msk [vmem:[#allocation4 + $0x58] sm:$0xf] %vm1502_vm14, %v1451_v56  ;;  %v2120_v56 = vshll.u32 %v2068_v26, 16  ;;  %v738_v11 = vor.u32 %v736_v59, %v9970_v15 }
 0x142   : > { %v1453_v3 = vpop.permute.xlu2 %1452 }
 0x143   : > { %1526 = vst.msk [vmem:[#allocation4 + $0x5c] sm:$0xf] %vm1502_vm14, %v1453_v3  ;;  %1949 = vrot.lane.b32.xlu0 %v1880_v37, %s8795_s26  ;;  %v1896_v37 = vld [vmem:[#allocation2 + $0x88] sm:$0xf]  ;;  %v2119_v3 = vrot.slane %v2117_v63, 4 }
 0x144   : > { %1939 = vrot.lane.b32.xlu1 %v1875_v33, %s8795_s26  ;;  %v1905_v1 = vld [vmem:[#allocation2 + $0xc0] sm:$0xf] }
 0x145   : > { %v1461_v35 = vpop.permute.xlu0 %1460 }
 0x146   : > { %1530 = vst.msk [vmem:[#allocation4 + $0x6c] sm:$0xf] %vm1502_vm14, %v1461_v35  ;;  %v2122_v35 = vrot.slane %v2120_v56, 5 }
 0x148   : > { %v1457_v46 = vpop.permute.xlu1 %1456  ;;  %1800 = vrot.lane.b32.xlu2 %v1731_v0, %s8794_s25  ;;  %v2072_v0 = vld [vmem:[#allocation2 + $0x1c] sm:$0xf] }
 0x149   : > { %1528 = vst.msk [vmem:[#allocation4 + $0x64] sm:$0xf] %vm1502_vm14, %v1457_v46 }
 0x14a   : > { %v1459_v55 = vpop.permute.xlu2 %1458 }
 0x14b   : > { %1529 = vst.msk [vmem:[#allocation4 + $0x68] sm:$0xf] %vm1502_vm14, %v1459_v55  ;;  %1955 = vrot.lane.b32.xlu0 %v1883_v32, %s8795_s26  ;;  %v2069_v32 = vld [vmem:[#allocation2 + $0x10] sm:$0xf] }
 0x14c   : > { %1945 = vrot.lane.b32.xlu1 %v1878_v54, %s8795_s26  ;;  %v731_v54 = vrot.slane %v727_v31, 4  ;;  %v2130_v47 = vshrl.u32 %v2069_v32, 16 }
 0x14d   : > { %v1467_v14 = vpop.permute.xlu0 %1466 }
 0x14e   : > { %1533 = vst.msk [vmem:[#allocation4 + $0x78] sm:$0xf] %vm1502_vm14, %v1467_v14  ;;  %v2154_v14 = vshrl.u32 %v2072_v0, 16  ;;  %v2132_v61 = vrot.slane %v2130_v47, 4  ;;  %v2083_v47 = vld [vmem:[#allocation2 + $0x48] sm:$0xf] }
 0x150   : > { %1806 = vrot.lane.b32.xlu2 %v1742_v60, %s8794_s25  ;;  %v2150_v60 = vshll.u32 %v2072_v0, 16  ;;  %v2228_v0 = vrot.slane %v2226_v50, 4 }
 0x152   : > { %v1465_v21 = vpop.permute.xlu2 %1464 }
 0x153   : > { %1532 = vst.msk [vmem:[#allocation4 + $0x74] sm:$0xf] %vm1502_vm14, %v1465_v21  ;;  %1961 = vrot.lane.b32.xlu0 %v1886_v17, %s8795_s26  ;;  %v739_v17 = vsel %vm9060_vm9, %v731_v54, %v738_v11  ;;  %v2123_v21 = vor.u32 %v2122_v35, %v2119_v3 }
 0x154   : > { %1951 = vrot.lane.b32.xlu1 %v1881_v36, %s8795_s26  ;;  %v1904_v36 = vld [vmem:[#allocation2 + $0xb8] sm:$0xf]  ;;  %903 = vst.msk [vmem:[#allocation2 + $0xc4] sm:$0xf] %vm226_vm0, %v739_v17  ;;  %v10010_v17 = vld [vmem:[#allocation2 + $0x28] sm:$0xf] }
 0x155   : > { %v1749_v13 = vpop.permute.xlu0 %1748  ;;  %vm2035_vm0 = vcmask 126048  }
 0x156   : > { %v1463_v49 = vpop.permute.xlu1 %1462  ;;  %1844 = vst.msk [vmem:[#allocation4 + $0x4] sm:$0xf] %vm1842_vm15, %v1749_v13  ;;  %v1899_v13 = vld [vmem:[#allocation2 + $0x9c] sm:$0xf] }
 0x157   : > { %1531 = vst.msk [vmem:[#allocation4 + $0x70] sm:$0xf] %vm1502_vm14, %v1463_v49 }
 0x158   : > { %1941 = vrot.lane.b32.xlu2 %v1876_v27, %s8795_s26  ;;  %v2126_v27 = vshll.u32 %v2069_v32, 16 }
 0x15a   : > { %v1747_v24 = vpop.permute.xlu2 %1746 }
 0x15b   : > { %1843 = vst.msk [vmem:[#allocation4] sm:$0xf] %vm1842_vm15, %v1747_v24  ;;  %1967 = vrot.lane.b32.xlu0 %v1889_v2, %s8795_s26  ;;  %v9982_v2 = vrot.slane %v2150_v60, 5  ;;  %v2124_v24 = vrot.slane %v2123_v21, 4  ;;  %v2082_v60 = vld [vmem:[#allocation2 + $0x44] sm:$0x1] }
 0x15c   : > { %1957 = vrot.lane.b32.xlu1 %v1884_v12, %s8795_s26  ;;  %v2156_v12 = vrot.slane %v2154_v14, 4 }
 0x15d   : > { %v1755_v44 = vpop.permute.xlu0 %1754 }
 0x15e   : > { %v1469_v23 = vpop.permute.xlu1 %1468  ;;  %1847 = vst.msk [vmem:[#allocation4 + $0x10] sm:$0xf] %vm1842_vm15, %v1755_v44  ;;  %v2073_v44 = vld [vmem:[#allocation2 + $0x20] sm:$0x1] }
 0x15f   : > { %1534 = vst.msk [vmem:[#allocation4 + $0x7c] sm:$0xf] %vm1502_vm14, %v1469_v23  ;;  %v1894_v23 = vld [vmem:[#allocation2 + $0x7c] sm:$0xf]  ;;  %vm5773_vm14 = vcmask 191616  }
 0x160   : > { %1947 = vrot.lane.b32.xlu2 %v1879_v20, %s8795_s26  ;;  %v2128_v20 = vrot.slane %v2126_v27, 5 }
 0x162   : > { %v1753_v41 = vpop.permute.xlu2 %1752  ;;  %v2129_v42 = vsel %vm8874_vm3, %v2124_v24, %v2128_v20 }
 0x163   : > { %1846 = vst.msk [vmem:[#allocation4 + $0xc] sm:$0xf] %vm1842_vm15, %v1753_v41  ;;  %1973 = vrot.lane.b32.xlu0 %v1892_v34, %s8795_s26 }
 0x164   : > { %1963 = vrot.lane.b32.xlu1 %v1887_v39, %s8795_s26  ;;  %v2077_v39 = vld [vmem:[#allocation2 + $0x30] sm:$0xf] }
 0x165   : > { %v1761_v53 = vpop.permute.xlu0 %1760  ;;  %v2192_v29 = vshll.u32 %v2077_v39, 16 }
 0x166   : > { %v1751_v45 = vpop.permute.xlu1 %1750  ;;  %1850 = vst.msk [vmem:[#allocation4 + $0x1c] sm:$0xf] %vm1842_vm15, %v1761_v53  ;;  %v2160_v53 = vshll.u32 %v2073_v44, 16 }
 0x167   : > { %1845 = vst.msk [vmem:[#allocation4 + $0x8] sm:$0xf] %vm1842_vm15, %v1751_v45  ;;  %v2189_v45 = vshrl.u32 %v2077_v39, 16 }
 0x168   : > { %1953 = vrot.lane.b32.xlu2 %v1882_v58, %s8795_s26  ;;  %v2157_v58 = vor.u32 %v2156_v12, %v9982_v2  ;;  %v2162_v31 = vrot.slane %v2160_v53, 5  ;;  %v2232_v12 = vshll.u32 %v2082_v60, 16  ;;  %v2095_v60 = vld [vmem:[#allocation2 + $0x78] sm:$0xf] }
 0x169   : > { %v2191_v28 = vrot.slane %v2189_v45, 4 }
 0x16a   : > { %v1759_v9 = vpop.permute.xlu2 %1758 }
 0x16b   : > { %1849 = vst.msk [vmem:[#allocation4 + $0x18] sm:$0xf] %vm1842_vm15, %v1759_v9  ;;  %1979 = vrot.lane.b32.xlu0 %v1895_v40, %s8795_s26  ;;  %v1902_v40 = vld [vmem:[#allocation2 + $0xac] sm:$0xf]  ;;  %v2158_v9 = vrot.slane %v2157_v58, 4 }
 0x16c   : > { %1969 = vrot.lane.b32.xlu1 %v1890_v4, %s8795_s26  ;;  %v1903_v58 = vld [vmem:[#allocation2 + $0xb4] sm:$0xf] }
 0x16d   : > { %v1767_v48 = vpop.permute.xlu0 %1766 }
 0x16e   : > { %v1757_v57 = vpop.permute.xlu1 %1756  ;;  %1853 = vst.msk [vmem:[#allocation4 + $0x28] sm:$0xf] %vm1842_vm15, %v1767_v48 }
 0x16f   : > { %1848 = vst.msk [vmem:[#allocation4 + $0x14] sm:$0xf] %vm1842_vm15, %v1757_v57  ;;  %v9994_v57 = vld [vmem:[#allocation2 + $0x34] sm:$0xf] }
 0x170   : > { %1959 = vrot.lane.b32.xlu2 %v1885_v7, %s8795_s26  ;;  %v2194_v7 = vrot.slane %v2192_v29, 5  ;;  %v2198_v26 = vshll.u32 %v9994_v57, 16  ;;  %v2234_v29 = vrot.slane %v2232_v12, 5 }
 0x172   : > { %v1765_v19 = vpop.permute.xlu2 %1764  ;;  %v10005_v3 = vrot.slane %v2198_v26, 5 }
 0x173   : > { %1852 = vst.msk [vmem:[#allocation4 + $0x24] sm:$0xf] %vm1842_vm15, %v1765_v19  ;;  %1985 = vrot.lane.b32.xlu0 %v1898_v30, %s8795_s26  ;;  %v2074_v19 = vld [vmem:[#allocation2 + $0x24] sm:$0xf] }
 0x174   : > { %1975 = vrot.lane.b32.xlu1 %v1893_v25, %s8795_s26  ;;  %v2070_v25 = vld [vmem:[#allocation2 + $0x14] sm:$0x1]  ;;  %v2165_v56 = vshrl.u32 %v2074_v19, 16 }
 0x175   : > { %v1773_v5 = vpop.permute.xlu0 %1772  ;;  %v2136_v63 = vshll.u32 %v2070_v25, 16  ;;  %v2237_v25 = vshrl.u32 %v2083_v47, 16 }
 0x176   : > { %v1763_v43 = vpop.permute.xlu1 %1762  ;;  %1856 = vst.msk [vmem:[#allocation4 + $0x34] sm:$0xf] %vm1842_vm15, %v1773_v5  ;;  %v2195_v5 = vor.u32 %v2194_v7, %v2191_v28  ;;  %v2167_v11 = vrot.slane %v2165_v56, 4  ;;  %v2090_v28 = vld [vmem:[#allocation2 + $0x64] sm:$0xf] }
 0x177   : > { %1851 = vst.msk [vmem:[#allocation4 + $0x20] sm:$0xf] %vm1842_vm15, %v1763_v43  ;;  %v2222_v43 = vshll.u32 %v2081_v18, 16  ;;  %v2138_v54 = vrot.slane %v2136_v63, 5  ;;  %v2298_v26 = vshrl.u32 %v2090_v28, 16  ;;  %v2178_v63 = vshrl.u32 %v10010_v17, 16 }
 0x178   : > { %1965 = vrot.lane.b32.xlu2 %v1888_v38, %s8795_s26  ;;  %v2163_v38 = vsel %vm8874_vm3, %v2158_v9, %v2162_v31  ;;  %v2196_v59 = vrot.slane %v2195_v5, 4  ;;  %v2294_v5 = vshll.u32 %v2090_v28, 16  ;;  %v2099_v28 = vld [vmem:[#allocation2 + $0x88] sm:$0xf] }
 0x179   : > { %v10007_v35 = vrot.slane %v2222_v43, 5 }
 0x17a   : > { %v1771_v33 = vpop.permute.xlu2 %1770 }
 0x17b   : > { %1855 = vst.msk [vmem:[#allocation4 + $0x30] sm:$0xf] %vm1842_vm15, %v1771_v33  ;;  %1991 = vrot.lane.b32.xlu0 %v1901_v16, %s8795_s26  ;;  %v2133_v16 = vor.u32 %v2132_v61, %v2128_v20  ;;  %v1900_v33 = vld [vmem:[#allocation2 + $0xa0] sm:$0xf]  ;;  %v2202_v20 = vshrl.u32 %v9994_v57, 16 }
 0x17c   : > { %1981 = vrot.lane.b32.xlu1 %v1896_v37, %s8795_s26  ;;  %v2168_v37 = vshll.u32 %v2074_v19, 16  ;;  %v2240_v19 = vshll.u32 %v2083_v47, 16  ;;  %v2092_v47 = vld [vmem:[#allocation2 + $0x6c] sm:$0xf] }
 0x17d   : > { %v1779_v46 = vpop.permute.xlu0 %1778  ;;  %v2134_v32 = vrot.slane %v2133_v16, 4 }
 0x17e   : > { %v1769_v55 = vpop.permute.xlu1 %1768  ;;  %1859 = vst.msk [vmem:[#allocation4 + $0x40] sm:$0xf] %vm1842_vm15, %v1779_v46 }
 0x17f   : > { %1854 = vst.msk [vmem:[#allocation4 + $0x2c] sm:$0xf] %vm1842_vm15, %v1769_v55  ;;  %v2170_v55 = vrot.slane %v2168_v37, 5  ;;  %v2139_v24 = vsel %vm8874_vm3, %v2134_v32, %v2138_v54 }
 0x180   : > { %1971 = vrot.lane.b32.xlu2 %v1891_v8, %s8795_s26  ;;  %v2086_v8 = vld [vmem:[#allocation2 + $0x54] sm:$0xf] }
 0x181   : > { %v2261_v21 = vshrl.u32 %v2086_v8, 16  ;;  %v2264_v27 = vshll.u32 %v2086_v8, 16  ;;  %v2171_v44 = vor.u32 %v2170_v55, %v2167_v11  ;;  %v10045_v8 = vld [vmem:[#allocation2 + $0x4c] sm:$0xf]  ;;  %v2091_v55 = vld [vmem:[#allocation2 + $0x68] sm:$0x1] }
 0x182   : > { %v1777_v49 = vpop.permute.xlu2 %1776 }
 0x183   : > { %1858 = vst.msk [vmem:[#allocation4 + $0x3c] sm:$0xf] %vm1842_vm15, %v1777_v49  ;;  %1997 = vrot.lane.b32.xlu0 %v1904_v36, %s8795_s26  ;;  %v2071_v36 = vld [vmem:[#allocation2 + $0x18] sm:$0xf]  ;;  %v2229_v49 = vor.u32 %v2228_v0, %v10007_v35  ;;  %v2263_v53 = vrot.slane %v2261_v21, 4  ;;  %v2172_v9 = vrot.slane %v2171_v44, 4 }
 0x184   : > { %1987 = vrot.lane.b32.xlu1 %v1899_v13, %s8795_s26  ;;  %v2201_v13 = vsel %vm8874_vm3, %v2196_v59, %v10005_v3  ;;  %v2141_v39 = vshrl.u32 %v2071_v36, 16  ;;  %v2242_v59 = vrot.slane %v2240_v19, 5  ;;  %v1906_v0 = vld [vmem:[#allocation2 + $0xc4] sm:$0xf]  ;;  %v2336_v44 = vshll.u32 %v2095_v60, 16 }
 0x185   : > { %v1785_v34 = vpop.permute.xlu0 %1784  ;;  %v2230_v45 = vrot.slane %v2229_v49, 4  ;;  %v2180_v49 = vrot.slane %v2178_v63, 4 }
 0x186   : > { %v1775_v41 = vpop.permute.xlu1 %1774  ;;  %1862 = vst.msk [vmem:[#allocation4 + $0x4c] sm:$0xf] %vm1842_vm15, %v1785_v34  ;;  %v2143_v61 = vrot.slane %v2141_v39, 4 }
 0x187   : > { %1857 = vst.msk [vmem:[#allocation4 + $0x38] sm:$0xf] %vm1842_vm15, %v1775_v41  ;;  %v2144_v41 = vshll.u32 %v2071_v36, 16 }
 0x188   : > { %1977 = vrot.lane.b32.xlu2 %v1894_v23, %s8795_s26  ;;  %v2174_v23 = vshll.u32 %v10010_v17, 16 }
 0x189   : > { %v2146_v57 = vrot.slane %v2144_v41, 5 }
 0x18a   : > { %v1783_v4 = vpop.permute.xlu2 %1782  ;;  %v10027_v31 = vrot.slane %v2174_v23, 5 }
 0x18b   : > { %1861 = vst.msk [vmem:[#allocation4 + $0x48] sm:$0xf] %vm1842_vm15, %v1783_v4  ;;  %2500 = vrot.lane.b32.xlu0 %v2129_v42, %s8796_s27  ;;  %v2266_v42 = vrot.slane %v2264_v27, 5  ;;  %v2147_v56 = vor.u32 %v2146_v57, %v2143_v61  ;;  %v2246_v27 = vshll.u32 %v10045_v8, 16  ;;  %v10069_v57 = vld [vmem:[#allocation2 + $0x7c] sm:$0xf] }
 0x18c   : > { %1993 = vrot.lane.b32.xlu1 %v1902_v40, %s8795_s26  ;;  %v10025_v40 = vld [vmem:[#allocation2 + $0x58] sm:$0xf]  ;;  %v2177_v43 = vsel %vm8874_vm3, %v2172_v9, %v10027_v31 }
 0x18d   : > { %v1791_v48 = vpop.permute.xlu0 %1790  ;;  %v2267_v18 = vor.u32 %v2266_v42, %v2263_v53  ;;  %v2148_v17 = vrot.slane %v2147_v56, 4 }
 0x18e   : > { %v1781_v30 = vpop.permute.xlu1 %1780  ;;  %1865 = vst.msk [vmem:[#allocation4 + $0x58] sm:$0xf] %vm1842_vm15, %v1791_v48  ;;  %v2079_v48 = vld [vmem:[#allocation2 + $0x38] sm:$0x1] }
 0x18f   : > { %1860 = vst.msk [vmem:[#allocation4 + $0x44] sm:$0xf] %vm1842_vm15, %v1781_v30  ;;  %v2270_v30 = vshll.u32 %v10025_v40, 16  ;;  %v2268_v37 = vrot.slane %v2267_v18, 4  ;;  %v2153_v53 = vsel %vm8874_vm3, %v2148_v17, %v9982_v2 }
 0x190   : > { %1983 = vrot.lane.b32.xlu2 %v1897_v62, %s8795_s26  ;;  %v2204_v62 = vrot.slane %v2202_v20, 4  ;;  %v2333_v20 = vshrl.u32 %v2095_v60, 16 }
 0x192   : > { %v1789_v22 = vpop.permute.xlu2 %1788  ;;  %v2205_v50 = vor.u32 %v2204_v62, %v10005_v3  ;;  %v10047_v3 = vrot.slane %v2294_v5, 5  ;;  %v2335_v9 = vrot.slane %v2333_v20, 4  ;;  %v2338_v62 = vrot.slane %v2336_v44, 5  ;;  %v2085_v44 = vld [vmem:[#allocation2 + $0x50] sm:$0x1] }
 0x193   : > { %1864 = vst.msk [vmem:[#allocation4 + $0x54] sm:$0xf] %vm1842_vm15, %v1789_v22  ;;  %2506 = vrot.lane.b32.xlu0 %v2163_v38, %s8796_s27  ;;  %v2235_v38 = vsel %vm8874_vm3, %v2230_v45, %v2234_v29  ;;  %v10042_v22 = vrot.slane %v2270_v30, 5  ;;  %v10065_v45 = vrot.slane %v2246_v27, 5  ;;  %v2181_v29 = vor.u32 %v2180_v49, %v10027_v31  ;;  %v2088_v30 = vld [vmem:[#allocation2 + $0x5c] sm:$0x1] }
 0x194   : > { %1999 = vrot.lane.b32.xlu1 %v1905_v1, %s8795_s26  ;;  %v2208_v1 = vshll.u32 %v2079_v48, 16  ;;  %v2206_v54 = vrot.slane %v2205_v50, 4  ;;  %v2309_v31 = vshrl.u32 %v2092_v47, 16  ;;  %v2366_v5 = vshll.u32 %v2099_v28, 16 }
 0x195   : > { %v1797_v46 = vpop.permute.xlu0 %1796  ;;  %v2273_v36 = vsel %vm8874_vm3, %v2268_v37, %v10042_v22  ;;  %v2182_v19 = vrot.slane %v2181_v29, 4  ;;  %v2280_v56 = vshll.u32 %v2088_v30, 16  ;;  %v2346_v29 = vshrl.u32 %v10069_v57, 16  ;;  %v2101_v30 = vld [vmem:[#allocation2 + $0x90] sm:$0xf] }
 0x196   : > { %v1787_v14 = vpop.permute.xlu1 %1786  ;;  %1868 = vst.msk [vmem:[#allocation4 + $0x64] sm:$0xf] %vm1842_vm15, %v1797_v46  ;;  %v2300_v46 = vrot.slane %v2298_v26, 4  ;;  %v2210_v11 = vrot.slane %v2208_v1, 5  ;;  %v2370_v26 = vshrl.u32 %v2099_v28, 16  ;;  %v2339_v1 = vor.u32 %v2338_v62, %v2335_v9 }
 0x197   : > { %1863 = vst.msk [vmem:[#allocation4 + $0x50] sm:$0xf] %vm1842_vm15, %v1787_v14  ;;  %v2256_v28 = vshll.u32 %v2085_v44, 16 }
 0x198   : > { %1989 = vrot.lane.b32.xlu2 %v1900_v33, %s8795_s26  ;;  %v2239_v33 = vrot.slane %v2237_v25, 4  ;;  %v2301_v12 = vor.u32 %v2300_v46, %v10047_v3  ;;  %v2211_v23 = vsel %vm8874_vm3, %v2206_v54, %v2210_v11  ;;  %v2312_v25 = vshll.u32 %v2092_v47, 16  ;;  %v10084_v54 = vld [vmem:[#allocation2 + $0x70] sm:$0xf]  ;;  %v2089_v47 = vld [vmem:[#allocation2 + $0x60] sm:$0xf] }
 0x199   : > { %v2311_v46 = vrot.slane %v2309_v31, 4  ;;  %v10086_v11 = vrot.slane %v2366_v5, 5  ;;  %v740_v31 = vrot.slane %v9970_v15, 4  ;;  %v2108_v5 = vld [vmem:[#allocation2 + $0xac] sm:$0xf] }
 0x19a   : > { %v1795_v34 = vpop.permute.xlu2 %1794  ;;  %v2243_v21 = vor.u32 %v2242_v59, %v2239_v33 }
 0x19b   : > { %1867 = vst.msk [vmem:[#allocation4 + $0x60] sm:$0xf] %vm1842_vm15, %v1795_v34  ;;  %2512 = vrot.lane.b32.xlu0 %v2201_v13, %s8796_s27  ;;  %v2076_v13 = vld [vmem:[#allocation2 + $0x2c] sm:$0x1]  ;;  %v2274_v34 = vshrl.u32 %v10025_v40, 16  ;;  %v2302_v40 = vrot.slane %v2301_v12, 4 }
 0x19c   : > { %2502 = vrot.lane.b32.xlu1 %v2139_v24, %s8796_s27  ;;  %v2304_v24 = vshll.u32 %v2091_v55, 16  ;;  %v2184_v41 = vshll.u32 %v2076_v13, 16  ;;  %v2244_v42 = vrot.slane %v2243_v21, 4  ;;  %v2372_v55 = vrot.slane %v2370_v26, 4  ;;  %v2100_v13 = vld [vmem:[#allocation2 + $0x8c] sm:$0x1] }
 0x19d   : > { %v1803_v4 = vpop.permute.xlu0 %1802  ;;  %v2276_v48 = vrot.slane %v2274_v34, 4  ;;  %v2282_v21 = vrot.slane %v2280_v56, 5  ;;  %v2384_v56 = vshll.u32 %v2101_v30, 16 }
 0x19e   : > { %v1793_v7 = vpop.permute.xlu1 %1792  ;;  %1871 = vst.msk [vmem:[#allocation4 + $0x70] sm:$0xf] %vm1842_vm15, %v1803_v4  ;;  %v2306_v4 = vrot.slane %v2304_v24, 5  ;;  %v2318_v24 = vshll.u32 %v10084_v54, 16 }
 0x19f   : > { %1866 = vst.msk [vmem:[#allocation4 + $0x5c] sm:$0xf] %vm1842_vm15, %v1793_v7  ;;  %v2277_v63 = vor.u32 %v2276_v48, %v10042_v22  ;;  %v2340_v22 = vrot.slane %v2339_v1, 4  ;;  %v2258_v1 = vrot.slane %v2256_v28, 5 }
 0x1a0   : > { %1995 = vrot.lane.b32.xlu2 %v1903_v58, %s8795_s26  ;;  %v2080_v58 = vld [vmem:[#allocation2 + $0x3c] sm:$0xf]  ;;  %v2307_v50 = vsel %vm8874_vm3, %v2302_v40, %v2306_v4  ;;  %v10104_v9 = vrot.slane %v2318_v24, 5 }
 0x1a1   : > { %v2213_v61 = vshrl.u32 %v2080_v58, 16  ;;  %v2216_v2 = vshll.u32 %v2080_v58, 16  ;;  %v2376_v58 = vshll.u32 %v2100_v13, 16  ;;  %v2386_v13 = vrot.slane %v2384_v56, 5 }
 0x1a2   : > { %v1801_v16 = vpop.permute.xlu2 %1800 }
 0x1a3   : > { %1870 = vst.msk [vmem:[#allocation4 + $0x6c] sm:$0xf] %vm1842_vm15, %v1801_v16  ;;  %2518 = vrot.lane.b32.xlu0 %v2235_v38, %s8796_s27  ;;  %v2186_v38 = vrot.slane %v2184_v41, 5  ;;  %v2342_v16 = vshll.u32 %v10069_v57, 16  ;;  %v2215_v37 = vrot.slane %v2213_v61, 4  ;;  %v2218_v33 = vrot.slane %v2216_v2, 5 }
 0x1a4   : > { %2508 = vrot.lane.b32.xlu1 %v2177_v43, %s8796_s27  ;;  %v2249_v43 = vsel %vm8874_vm3, %v2244_v42, %v10065_v45  ;;  %v2378_v2 = vrot.slane %v2376_v58, 5  ;;  %v10110_v57 = vld [vmem:[#allocation2 + $0xa0] sm:$0xf] }
 0x1a5   : > { %v1809_v32 = vpop.permute.xlu0 %1808  ;;  %v10089_v60 = vrot.slane %v2342_v16, 5  ;;  %v2219_v27 = vor.u32 %v2218_v33, %v2215_v37  ;;  %v2097_v16 = vld [vmem:[#allocation2 + $0x80] sm:$0x1] }
 0x1a6   : > { %v1799_v14 = vpop.permute.xlu1 %1798  ;;  %1874 = vst.msk [vmem:[#allocation4 + $0x7c] sm:$0xf] %vm1842_vm15, %v1809_v32  ;;  %v2314_v32 = vrot.slane %v2312_v25, 5 }
 0x1a7   : > { %1869 = vst.msk [vmem:[#allocation4 + $0x68] sm:$0xf] %vm1842_vm15, %v1799_v14  ;;  %v2104_v14 = vld [vmem:[#allocation2 + $0x9c] sm:$0xf]  ;;  %v2345_v41 = vsel %vm8874_vm3, %v2340_v22, %v10089_v60  ;;  %v2220_v42 = vrot.slane %v2219_v27, 4 }
 0x1a8   : > { %2001 = vrot.lane.b32.xlu2 %v1906_v0, %s8795_s26  ;;  %v2250_v0 = vshrl.u32 %v10045_v8, 16  ;;  %v2187_v8 = vsel %vm8874_vm3, %v2182_v19, %v2186_v38  ;;  %v2315_v12 = vor.u32 %v2314_v32, %v2311_v46  ;;  %v2405_v34 = vshrl.u32 %v2104_v14, 16  ;;  %v904_v46 = vld [vmem:[#allocation2 + $0xc8] sm:$0x1] }
 0x1a9   : > { %v2348_v19 = vrot.slane %v2346_v29, 4  ;;  %v2288_v38 = vshll.u32 %v2089_v47, 16  ;;  %v2094_v29 = vld [vmem:[#allocation2 + $0x74] sm:$0x1] }
 0x1aa   : > { %v1807_v39 = vpop.permute.xlu2 %1806  ;;  %v2252_v20 = vrot.slane %v2250_v0, 4  ;;  %v2316_v4 = vrot.slane %v2315_v12, 4  ;;  %v2407_v48 = vrot.slane %v2405_v34, 4  ;;  %v2442_v0 = vshrl.u32 %v2108_v5, 16  ;;  %v2113_v34 = vld [vmem:[#allocation2 + $0xc0] sm:$0xf] }
 0x1ab   : > { %1873 = vst.msk [vmem:[#allocation4 + $0x78] sm:$0xf] %vm1842_vm15, %v1807_v39  ;;  %2524 = vrot.lane.b32.xlu0 %v2273_v36, %s8796_s27  ;;  %v2278_v36 = vrot.slane %v2277_v63, 4  ;;  %v2408_v39 = vshll.u32 %v2104_v14, 16  ;;  %v2414_v63 = vshll.u32 %v10110_v57, 16  ;;  %v2349_v32 = vor.u32 %v2348_v19, %v10089_v60 }
 0x1ac   : > { %2514 = vrot.lane.b32.xlu1 %v2211_v23, %s8796_s27  ;;  %v2373_v23 = vor.u32 %v2372_v55, %v10086_v11  ;;  %v2253_v62 = vor.u32 %v2252_v20, %v10065_v45  ;;  %v2225_v45 = vsel %vm8874_vm3, %v2220_v42, %v10007_v35  ;;  %v2381_v35 = vshrl.u32 %v2101_v30, 16  ;;  %v10134_v60 = vld [vmem:[#allocation2 + $0x94] sm:$0xf] }
 0x1ad   : > { %v1944_v7 = vpop.permute.xlu0 %1943  ;;  %v2410_v61 = vrot.slane %v2408_v39, 5  ;;  %v2352_v55 = vshll.u32 %v2097_v16, 16  ;;  %v2290_v22 = vrot.slane %v2288_v38, 5  ;;  %v905_v14 = vsel %vm9185_vm10, %v740_v31, %v904_v46 }
 0x1ae   : > { %v1805_v18 = vpop.permute.xlu1 %1804  ;;  %2038 = vst.msk [vmem:[#allocation4 + $0x8] sm:$0xf] %vm2035_vm0, %v1944_v7  ;;  %v2374_v7 = vrot.slane %v2373_v23, 4  ;;  %v2383_v27 = vrot.slane %v2381_v35, 4  ;;  %v2444_v51 = vrot.slane %v2442_v0, 4  ;;  %v2350_v24 = vrot.slane %v2349_v32, 4 }
 0x1af   : > { %1872 = vst.msk [vmem:[#allocation4 + $0x74] sm:$0xf] %vm1842_vm15, %v1805_v18  ;;  %v2285_v18 = vshrl.u32 %v2089_v47, 16  ;;  %v2411_v15 = vor.u32 %v2410_v61, %v2407_v48  ;;  %v2354_v20 = vrot.slane %v2352_v55, 5  ;;  %v2109_v23 = vld [vmem:[#allocation2 + $0xb0] sm:$0x1] }
 0x1b0   : > { %2504 = vrot.lane.b32.xlu2 %v2153_v53, %s8796_s27  ;;  %v2283_v53 = vsel %vm8874_vm3, %v2278_v36, %v2282_v21  ;;  %v2379_v37 = vsel %vm8874_vm3, %v2374_v7, %v2378_v2  ;;  %v10131_v21 = vrot.slane %v2414_v63, 5  ;;  %906 = vst [vmem:[#allocation2 + $0xc8] sm:$0x1] %v905_v14  ;;  %v2390_v42 = vshll.u32 %v10134_v60, 16  ;;  %v2110_v63 = vld [vmem:[#allocation2 + $0xb4] sm:$0xf] }
 0x1b1   : > { %v2287_v33 = vrot.slane %v2285_v18, 4  ;;  %v2412_v36 = vrot.slane %v2411_v15, 4  ;;  %v2480_v28 = vshll.u32 %v2113_v34, 16  ;;  %v2355_v7 = vsel %vm8874_vm3, %v2350_v24, %v2354_v20  ;;  %v2106_v15 = vld [vmem:[#allocation2 + $0xa4] sm:$0x1] }
 0x1b2   : > { %v1942_v59 = vpop.permute.xlu2 %1941  ;;  %v2418_v61 = vshrl.u32 %v10110_v57, 16  ;;  %v2328_v30 = vshll.u32 %v2094_v29, 16  ;;  %v2424_v55 = vshll.u32 %v2106_v15, 16  ;;  %v2456_v14 = vshll.u32 %v2110_v63, 16 }
 0x1b3   : > { %2037 = vst.msk [vmem:[#allocation4 + $0x4] sm:$0xf] %vm2035_vm0, %v1942_v59  ;;  %2530 = vrot.lane.b32.xlu0 %v2307_v50, %s8796_s27  ;;  %v2254_v50 = vrot.slane %v2253_v62, 4  ;;  %v2438_v59 = vshll.u32 %v2108_v5, 16  ;;  %v2291_v44 = vor.u32 %v2290_v22, %v2287_v33  ;;  %v2417_v58 = vsel %vm8874_vm3, %v2412_v36, %v10131_v21 }
 0x1b4   : > { %2520 = vrot.lane.b32.xlu1 %v2249_v43, %s8796_s27  ;;  %v2321_v43 = vsel %vm8874_vm3, %v2316_v4, %v10104_v9  ;;  %v2098_v4 = vld [vmem:[#allocation2 + $0x84] sm:$0xf]  ;;  %v2477_v62 = vshrl.u32 %v2113_v34, 16  ;;  %v2330_v56 = vrot.slane %v2328_v30, 5  ;;  %v2453_v22 = vshrl.u32 %v2110_v63, 16 }
 0x1b5   : > { %v1950_v17 = vpop.permute.xlu0 %1949  ;;  %v2292_v48 = vrot.slane %v2291_v44, 4  ;;  %v2360_v19 = vshll.u32 %v2098_v4, 16  ;;  %v2458_v20 = vrot.slane %v2456_v14, 5  ;;  %v10180_v44 = vld [vmem:[#allocation2 + $0x10] sm:$0xf]  ;;  %vm282_vm10 = vcmask 60416  }
 0x1b6   : > { %v1940_v49 = vpop.permute.xlu1 %1939  ;;  %2041 = vst.msk [vmem:[#allocation4 + $0x14] sm:$0xf] %vm2035_vm0, %v1950_v17  ;;  %v2322_v17 = vshrl.u32 %v10084_v54, 16  ;;  %v2259_v54 = vsel %vm8874_vm3, %v2254_v50, %v2258_v1  ;;  %v2420_v50 = vrot.slane %v2418_v61, 4  ;;  %v10160_v1 = vld [vmem:[#allocation2 + $0xc4] sm:$0xf]  ;;  %vm11029_vm12 = vmand %vm282_vm10, %vm791_vm5 }
 0x1b7   : > { %2036 = vst.msk [vmem:[#allocation4] sm:$0xf] %vm2035_vm0, %v1940_v49  ;;  %v10136_v49 = vrot.slane %v2438_v59, 5  ;;  %v2362_v33 = vrot.slane %v2360_v19, 5  ;;  %v2486_v46 = vshll.u32 %v10160_v1, 16  ;;  %v2455_v24 = vrot.slane %v2453_v22, 4  ;;  %vm11054_vm5 = vmand %vm285_vm11, %vm466_vm6 }
 0x1b8   : > { %2510 = vrot.lane.b32.xlu2 %v2187_v8, %s8796_s27  ;;  %v2421_v32 = vor.u32 %v2420_v50, %v10131_v21  ;;  %v2635_v63 = vld [vmem:[#allocation2 + $0x24] sm:$0xe]  ;;  %v10221_v22 = vld [vmem:[#allocation2 + $0x34] sm:$0xf]  ;;  %vm5436_vm6 = vcmask 126016   ;;  %vm6527_vm15 = vcmask 322816  }
 0x1b9   : > { %v2445_v47 = vor.u32 %v2444_v51, %v10136_v49  ;;  %v10178_v51 = vrot.slane %v2486_v46, 5  ;;  %v2459_v29 = vor.u32 %v2458_v20, %v2455_v24  ;;  %v2112_v24 = vld [vmem:[#allocation2 + $0xbc] sm:$0x1] }
 0x1ba   : > { %v1948_v40 = vpop.permute.xlu2 %1947 }
 0x1bb   : > { %2040 = vst.msk [vmem:[#allocation4 + $0x10] sm:$0xf] %vm2035_vm0, %v1948_v40  ;;  %2536 = vrot.lane.b32.xlu0 %v2345_v41, %s8796_s27  ;;  %v2324_v41 = vrot.slane %v2322_v17, 4  ;;  %v2448_v40 = vshll.u32 %v2109_v23, 16  ;;  %v2446_v38 = vrot.slane %v2445_v47, 4  ;;  %v2394_v17 = vshrl.u32 %v10134_v60, 16 }
 0x1bc   : > { %2526 = vrot.lane.b32.xlu1 %v2283_v53, %s8796_s27  ;;  %v2387_v53 = vor.u32 %v2386_v13, %v2383_v27  ;;  %v10183_v60 = vld [vmem:[#allocation2 + $0xb8] sm:$0xf] }
 0x1bd   : > { %v1956_v25 = vpop.permute.xlu0 %1955  ;;  %v2325_v18 = vor.u32 %v2324_v41, %v10104_v9  ;;  %v2450_v5 = vrot.slane %v2448_v40, 5  ;;  %v2297_v9 = vsel %vm8874_vm3, %v2292_v48, %v10047_v3  ;;  %v2462_v47 = vshll.u32 %v10183_v60, 16  ;;  %v2631_v40 = vld [vmem:[#allocation2 + $0x14] sm:$0x1] }
 0x1be   : > { %v1946_v26 = vpop.permute.xlu1 %1945  ;;  %2044 = vst.msk [vmem:[#allocation4 + $0x20] sm:$0xf] %vm2035_vm0, %v1956_v25  ;;  %v2388_v31 = vrot.slane %v2387_v53, 4  ;;  %v2357_v25 = vshrl.u32 %v2098_v4, 16  ;;  %v2107_v4 = vld [vmem:[#allocation2 + $0xa8] sm:$0xf] }
 0x1bf   : > { %2039 = vst.msk [vmem:[#allocation4 + $0xc] sm:$0xf] %vm2035_vm0, %v1946_v26  ;;  %v2479_v26 = vrot.slane %v2477_v62, 4  ;;  %v2326_v35 = vrot.slane %v2325_v18, 4  ;;  %v2451_v59 = vsel %vm8874_vm3, %v2446_v38, %v2450_v5  ;;  %v2429_v18 = vshrl.u32 %v2107_v4, 16 }
 0x1c0   : > { %2516 = vrot.lane.b32.xlu2 %v2225_v45, %s8796_s27  ;;  %v10154_v45 = vrot.slane %v2390_v42, 5  ;;  %v2490_v42 = vshrl.u32 %v10160_v1, 16  ;;  %v2432_v30 = vshll.u32 %v2107_v4, 16  ;;  %v10204_v19 = vrot.slane %v2462_v47, 5 }
 0x1c1   : > { %v2331_v27 = vsel %vm8874_vm3, %v2326_v35, %v2330_v56  ;;  %v2636_v35 = vld [vmem:[#allocation2 + $0x28] sm:$0xf] }
 0x1c2   : > { %v1954_v8 = vpop.permute.xlu2 %1953  ;;  %v2393_v3 = vsel %vm8874_vm3, %v2388_v31, %v10154_v45  ;;  %v2492_v5 = vrot.slane %v2490_v42, 4  ;;  %v2472_v42 = vshll.u32 %v2112_v24, 16  ;;  %v2638_v24 = vld [vmem:[#allocation2 + $0x30] sm:$0xe] }
 0x1c3   : > { %2043 = vst.msk [vmem:[#allocation4 + $0x1c] sm:$0xf] %vm2035_vm0, %v1954_v8  ;;  %2542 = vrot.lane.b32.xlu0 %v2379_v37, %s8796_s27  ;;  %v2359_v37 = vrot.slane %v2357_v25, 4  ;;  %v2460_v25 = vrot.slane %v2459_v29, 4 }
 0x1c4   : > { %2532 = vrot.lane.b32.xlu1 %v2321_v43, %s8796_s27  ;;  %v2482_v43 = vrot.slane %v2480_v28, 5  ;;  %v2103_v28 = vld [vmem:[#allocation2 + $0x98] sm:$0x1]  ;;  %v2474_v4 = vrot.slane %v2472_v42, 5  ;;  %v10299_v42 = vld [vmem:[#allocation2 + $0x64] sm:$0xf] }
 0x1c5   : > { %v1962_v12 = vpop.permute.xlu0 %1961  ;;  %v2363_v36 = vor.u32 %v2362_v33, %v2359_v37  ;;  %v2400_v38 = vshll.u32 %v2103_v28, 16  ;;  %v2465_v50 = vsel %vm8874_vm3, %v2460_v25, %v10204_v19  ;;  %v8421_v33 = vrot.slane %v2635_v63, 9  ;;  %v2645_v28 = vld [vmem:[#allocation2 + $0x4c] sm:$0xf] }
 0x1c6   : > { %v1952_v39 = vpop.permute.xlu1 %1951  ;;  %2047 = vst.msk [vmem:[#allocation4 + $0x2c] sm:$0xf] %vm2035_vm0, %v1962_v12  ;;  %v2483_v0 = vor.u32 %v2482_v43, %v2479_v26  ;;  %v2426_v12 = vrot.slane %v2424_v55, 5 }
 0x1c7   : > { %2042 = vst.msk [vmem:[#allocation4 + $0x18] sm:$0xf] %vm2035_vm0, %v1952_v39  ;;  %v2364_v34 = vrot.slane %v2363_v36, 4  ;;  %v2396_v39 = vrot.slane %v2394_v17, 4  ;;  %v2402_v1 = vrot.slane %v2400_v38, 5  ;;  %v2748_v36 = vrot.slane %v10221_v22, 5 }
 0x1c8   : > { %2522 = vrot.lane.b32.xlu2 %v2259_v54, %s8796_s27  ;;  %v2484_v13 = vrot.slane %v2483_v0, 4  ;;  %v2422_v54 = vrot.slane %v2421_v32, 4 }
 0x1c9   : > { %v2397_v48 = vor.u32 %v2396_v39, %v10154_v45 }
 0x1ca   : > { %v1960_v2 = vpop.permute.xlu2 %1959  ;;  %v2489_v41 = vsel %vm8874_vm3, %v2484_v13, %v10178_v51  ;;  %v2427_v53 = vsel %vm8874_vm3, %v2422_v54, %v2426_v12  ;;  %v2632_v54 = vld [vmem:[#allocation2 + $0x18] sm:$0xe]  ;;  %v10231_v12 = vld [vmem:[#allocation2 + $0x1c] sm:$0xf] }
 0x1cb   : > { %2046 = vst.msk [vmem:[#allocation4 + $0x28] sm:$0xf] %vm2035_vm0, %v1960_v2  ;;  %2548 = vrot.lane.b32.xlu0 %v2417_v58, %s8796_s27  ;;  %v2727_v58 = vrot.slane %v10180_v44, 5  ;;  %v2730_v2 = vrot.slane %v2631_v40, 5  ;;  %v2398_v45 = vrot.slane %v2397_v48, 4  ;;  %v8420_v39 = vrot.slane %v2632_v54, 9 }
 0x1cc   : > { %2538 = vrot.lane.b32.xlu1 %v2355_v7, %s8796_s27  ;;  %v2369_v7 = vsel %vm8874_vm3, %v2364_v34, %v10086_v11  ;;  %v2115_v11 = vld [vmem:[#allocation2 + $0xc8] sm:$0x1]  ;;  %v2637_v48 = vld [vmem:[#allocation2 + $0x2c] sm:$0x1]  ;;  %v10289_v54 = vld [vmem:[#allocation2 + $0x7c] sm:$0xf] }
 0x1cd   : > { %v1968_v57 = vpop.permute.xlu0 %1967  ;;  %v2729_v61 = vrot.slane %v2727_v58, 4  ;;  %v2496_v15 = vshll.u32 %v2115_v11, 16  ;;  %v2403_v0 = vsel %vm8874_vm3, %v2398_v45, %v2402_v1  ;;  %v2744_v25 = vrot.slane %v2637_v48, 5  ;;  %v10265_v1 = vld [vmem:[#allocation2 + $0x40] sm:$0xf] }
 0x1ce   : > { %v1958_v16 = vpop.permute.xlu1 %1957  ;;  %2050 = vst.msk [vmem:[#allocation4 + $0x38] sm:$0xf] %vm2035_vm0, %v1968_v57  ;;  %v2434_v57 = vrot.slane %v2432_v30, 5 }
 0x1cf   : > { %2045 = vst.msk [vmem:[#allocation4 + $0x24] sm:$0xf] %vm2035_vm0, %v1958_v16  ;;  %v2731_v43 = vsel %vm9676_vm13, %v2729_v61, %v2730_v2  ;;  %v2493_v16 = vor.u32 %v2492_v5, %v10178_v51  ;;  %v2498_v55 = vrot.slane %v2496_v15, 5  ;;  %v2640_v51 = vld [vmem:[#allocation2 + $0x38] sm:$0x1]  ;;  %v2762_v2 = vrot.slane %v2645_v28, 5 }
 0x1d0   : > { %2528 = vrot.lane.b32.xlu2 %v2297_v9, %s8796_s27  ;;  %v2431_v9 = vrot.slane %v2429_v18, 4  ;;  %v2629_v5 = vld [vmem:[#allocation2 + $0xc] sm:$0xe] }
 0x1d1   : > { %v2494_v32 = vrot.slane %v2493_v16, 4 }
 0x1d2   : > { %v1966_v8 = vpop.permute.xlu2 %1965  ;;  %v2435_v37 = vor.u32 %v2434_v57, %v2431_v9  ;;  %v2649_v9 = vld [vmem:[#allocation2 + $0x5c] sm:$0x1] }
 0x1d3   : > { %2049 = vst.msk [vmem:[#allocation4 + $0x34] sm:$0xf] %vm2035_vm0, %v1966_v8  ;;  %2554 = vrot.lane.b32.xlu0 %v2451_v59, %s8796_s27  ;;  %v2466_v59 = vshrl.u32 %v10183_v60, 16  ;;  %v2751_v60 = vrot.slane %v2640_v51, 5  ;;  %v2772_v15 = vrot.slane %v2649_v9, 5  ;;  %v2764_v51 = vrot.slane %v2762_v2, 4 }
 0x1d4   : > { %2544 = vrot.lane.b32.xlu1 %v2393_v3, %s8796_s27  ;;  %v2741_v3 = vrot.slane %v2636_v35, 5  ;;  %v2436_v8 = vrot.slane %v2435_v37, 4  ;;  %v2755_v37 = vrot.slane %v10265_v1, 5  ;;  %v10323_v9 = vld [vmem:[#allocation2 + $0xa0] sm:$0xf] }
 0x1d5   : > { %v1974_v21 = vpop.permute.xlu0 %1973  ;;  %v2468_v13 = vrot.slane %v2466_v59, 4 }
 0x1d6   : > { %v1964_v23 = vpop.permute.xlu1 %1963  ;;  %2053 = vst.msk [vmem:[#allocation4 + $0x44] sm:$0xf] %vm2035_vm0, %v1974_v21  ;;  %v2742_v17 = vsel %vm9676_vm13, %v8421_v33, %v2741_v3  ;;  %v2441_v20 = vsel %vm8874_vm3, %v2436_v8, %v10136_v49 }
 0x1d7   : > { %2048 = vst.msk [vmem:[#allocation4 + $0x30] sm:$0xf] %vm2035_vm0, %v1964_v23  ;;  %v2750_v23 = vrot.slane %v2748_v36, 4 }
 0x1d8   : > { %2534 = vrot.lane.b32.xlu2 %v2331_v27, %s8796_s27  ;;  %v2499_v27 = vsel %vm8874_vm3, %v2494_v32, %v2498_v55  ;;  %v2654_v32 = vld [vmem:[#allocation2 + $0x70] sm:$0xf] }
 0x1d9   : > { %v2752_v49 = vsel %vm9676_vm13, %v2750_v23, %v2751_v60  ;;  %v2790_v23 = vrot.slane %v10289_v54, 5 }
 0x1da   : > { %v1972_v62 = vpop.permute.xlu2 %1971 }
 0x1db   : > { %2052 = vst.msk [vmem:[#allocation4 + $0x40] sm:$0xf] %vm2035_vm0, %v1972_v62  ;;  %2560 = vrot.lane.b32.xlu0 %v2489_v41, %s8796_s27  ;;  %v2734_v41 = vrot.slane %v10231_v12, 5  ;;  %v2644_v62 = vld [vmem:[#allocation2 + $0x48] sm:$0xe] }
 0x1dc   : > { %2550 = vrot.lane.b32.xlu1 %v2427_v53, %s8796_s27  ;;  %v2469_v53 = vor.u32 %v2468_v13, %v10204_v19  ;;  %v8424_v61 = vrot.slane %v2644_v62, 9  ;;  %v10255_v19 = vld [vmem:[#allocation2 + $0x58] sm:$0xf]  ;;  %v2776_v62 = vrot.slane %v10299_v42, 5 }
 0x1dd   : > { %v1980_v31 = vpop.permute.xlu0 %1979  ;;  %v2735_v47 = vsel %vm9676_vm13, %v8420_v39, %v2734_v41  ;;  %v2769_v11 = vrot.slane %v10255_v19, 5  ;;  %v2658_v39 = vld [vmem:[#allocation2 + $0x80] sm:$0x1] }
 0x1de   : > { %v1970_v26 = vpop.permute.xlu1 %1969  ;;  %2056 = vst.msk [vmem:[#allocation4 + $0x50] sm:$0xf] %vm2035_vm0, %v1980_v31  ;;  %v2470_v40 = vrot.slane %v2469_v53, 4  ;;  %v2743_v31 = vrot.slane %v2741_v3, 4  ;;  %v2634_v3 = vld [vmem:[#allocation2 + $0x20] sm:$0x1] }
 0x1df   : > { %2051 = vst.msk [vmem:[#allocation4 + $0x3c] sm:$0xf] %vm2035_vm0, %v1970_v26  ;;  %v2763_v26 = vsel %vm9676_vm13, %v8424_v61, %v2762_v2  ;;  %v2771_v16 = vrot.slane %v2769_v11, 4  ;;  %v2650_v53 = vld [vmem:[#allocation2 + $0x60] sm:$0xe]  ;;  %v2757_v61 = vrot.slane %v2755_v37, 4 }
 0x1e0   : > { %2540 = vrot.lane.b32.xlu2 %v2369_v7, %s8796_s27  ;;  %v2475_v18 = vsel %vm8874_vm3, %v2470_v40, %v2474_v4  ;;  %v2745_v45 = vsel %vm9676_vm13, %v2743_v31, %v2744_v25  ;;  %v8426_v4 = vrot.slane %v2650_v53, 9  ;;  %v2662_v2 = vld [vmem:[#allocation2 + $0x90] sm:$0xe]  ;;  %v2655_v31 = vld [vmem:[#allocation2 + $0x74] sm:$0x1] }
 0x1e1   : > { %v2773_v59 = vsel %vm9676_vm13, %v2771_v16, %v2772_v15  ;;  %v8430_v25 = vrot.slane %v2662_v2, 9  ;;  %v2811_v16 = vrot.slane %v10323_v9, 5  ;;  %v2656_v53 = vld [vmem:[#allocation2 + $0x78] sm:$0xe] }
 0x1e2   : > { %v1978_v56 = vpop.permute.xlu2 %1977  ;;  %v2777_v22 = vsel %vm9676_vm13, %v8426_v4, %v2776_v62 }
 0x1e3   : > { %2055 = vst.msk [vmem:[#allocation4 + $0x4c] sm:$0xf] %vm2035_vm0, %v1978_v56  ;;  %2839 = vrot.lane.b32.xlu0 %v2731_v43, %s8797_s28  ;;  %v8419_v43 = vrot.slane %v2629_v5, 9 }
 0x1e4   : > { %2556 = vrot.lane.b32.xlu1 %v2465_v50, %s8796_s27  ;;  %v2641_v50 = vld [vmem:[#allocation2 + $0x3c] sm:$0xe] }
 0x1e5   : > { %v1986_v46 = vpop.permute.xlu0 %1985  ;;  %v2728_v63 = vsel %vm9676_vm13, %v8419_v43, %v2727_v58  ;;  %v8423_v56 = vrot.slane %v2641_v50, 9  ;;  %v2737_v58 = vrot.slane %v2634_v3, 5  ;;  %v2786_v43 = vrot.slane %v2655_v31, 5  ;;  %v2647_v50 = vld [vmem:[#allocation2 + $0x54] sm:$0xe] }
 0x1e6   : > { %v1976_v14 = vpop.permute.xlu1 %1975  ;;  %2059 = vst.msk [vmem:[#allocation4 + $0x5c] sm:$0xf] %vm2035_vm0, %v1986_v46  ;;  %v2653_v46 = vld [vmem:[#allocation2 + $0x6c] sm:$0xe]  ;;  %v2813_v3 = vrot.slane %v2811_v16, 4 }
 0x1e7   : > { %2054 = vst.msk [vmem:[#allocation4 + $0x48] sm:$0xf] %vm2035_vm0, %v1976_v14  ;;  %v2756_v44 = vsel %vm9676_vm13, %v8423_v56, %v2755_v37  ;;  %v2646_v14 = vld [vmem:[#allocation2 + $0x50] sm:$0x1]  ;;  %v8427_v8 = vrot.slane %v2653_v46, 9 }
 0x1e8   : > { %2546 = vrot.lane.b32.xlu2 %v2403_v0, %s8796_s27  ;;  %v2736_v0 = vrot.slane %v2734_v41, 4  ;;  %v2659_v37 = vld [vmem:[#allocation2 + $0x84] sm:$0xe] }
 0x1ea   : > { %v1984_v21 = vpop.permute.xlu2 %1983 }
 0x1eb   : > { %2058 = vst.msk [vmem:[#allocation4 + $0x58] sm:$0xf] %vm2035_vm0, %v1984_v21  ;;  %2845 = vrot.lane.b32.xlu0 %v2742_v17, %s8797_s28  ;;  %v2783_v17 = vrot.slane %v2654_v32, 5  ;;  %v2765_v21 = vrot.slane %v2646_v14, 5 }
 0x1ec   : > { %2562 = vrot.lane.b32.xlu1 %v2499_v27, %s8796_s27  ;;  %v2738_v27 = vsel %vm9676_vm13, %v2736_v0, %v2737_v58  ;;  %v8429_v58 = vrot.slane %v2659_v37, 9 }
 0x1ed   : > { %v1992_v34 = vpop.permute.xlu0 %1991  ;;  %v2766_v60 = vsel %vm9676_vm13, %v2764_v51, %v2765_v21  ;;  %v2664_v51 = vld [vmem:[#allocation2 + $0x98] sm:$0x1] }
 0x1ee   : > { %v1982_v29 = vpop.permute.xlu1 %1981  ;;  %2062 = vst.msk [vmem:[#allocation4 + $0x68] sm:$0xf] %vm2035_vm0, %v1992_v34  ;;  %v8422_v34 = vrot.slane %v2638_v24, 9 }
 0x1ef   : > { %2057 = vst.msk [vmem:[#allocation4 + $0x54] sm:$0xf] %vm2035_vm0, %v1982_v29  ;;  %v2792_v29 = vrot.slane %v2790_v23, 4 }
 0x1f0   : > { %2552 = vrot.lane.b32.xlu2 %v2441_v20, %s8796_s27  ;;  %v2784_v20 = vsel %vm9676_vm13, %v8427_v8, %v2783_v17  ;;  %v2778_v8 = vrot.slane %v2776_v62, 4  ;;  %v2668_v62 = vld [vmem:[#allocation2 + $0xa8] sm:$0xe] }
 0x1f2   : > { %v1990_v7 = vpop.permute.xlu2 %1989 }
 0x1f3   : > { %2061 = vst.msk [vmem:[#allocation4 + $0x64] sm:$0xf] %vm2035_vm0, %v1990_v7  ;;  %2851 = vrot.lane.b32.xlu0 %v2752_v49, %s8797_s28  ;;  %v2793_v49 = vrot.slane %v2658_v39, 5  ;;  %v2643_v7 = vld [vmem:[#allocation2 + $0x44] sm:$0x1] }
 0x1f4   : > { %2841 = vrot.lane.b32.xlu1 %v2735_v47, %s8797_s28  ;;  %v2749_v47 = vsel %vm9676_vm13, %v8422_v34, %v2748_v36  ;;  %v2758_v36 = vrot.slane %v2643_v7, 5  ;;  %v2807_v34 = vrot.slane %v2664_v51, 5  ;;  %v10357_v39 = vld [vmem:[#allocation2 + $0xc4] sm:$0xf] }
 0x1f5   : > { %v1998_v30 = vpop.permute.xlu0 %1997  ;;  %v2794_v48 = vsel %vm9676_vm13, %v2792_v29, %v2793_v49  ;;  %v2832_v29 = vrot.slane %v10357_v39, 5  ;;  %v2981_v39 = vld [vmem:[#allocation2 + $0x6c] sm:$0xf] }
 0x1f6   : > { %v1988_v38 = vpop.permute.xlu1 %1987  ;;  %2065 = vst.msk [vmem:[#allocation4 + $0x74] sm:$0xf] %vm2035_vm0, %v1998_v30  ;;  %v2759_v5 = vsel %vm9676_vm13, %v2757_v61, %v2758_v36  ;;  %v8432_v36 = vrot.slane %v2668_v62, 9  ;;  %v2974_v62 = vld [vmem:[#allocation2 + $0x40] sm:$0xf] }
 0x1f7   : > { %2060 = vst.msk [vmem:[#allocation4 + $0x60] sm:$0xf] %vm2035_vm0, %v1988_v38  ;;  %v2834_v7 = vrot.slane %v2832_v29, 4 }
 0x1f8   : > { %2558 = vrot.lane.b32.xlu2 %v2475_v18, %s8796_s27  ;;  %v2663_v18 = vld [vmem:[#allocation2 + $0x94] sm:$0xf] }
 0x1f9   : > { %v2804_v38 = vrot.slane %v2663_v18, 5 }
 0x1fa   : > { %v1996_v57 = vpop.permute.xlu2 %1995 }
 0x1fb   : > { %2064 = vst.msk [vmem:[#allocation4 + $0x70] sm:$0xf] %vm2035_vm0, %v1996_v57  ;;  %2857 = vrot.lane.b32.xlu0 %v2763_v26, %s8797_s28  ;;  %v2805_v1 = vsel %vm9676_vm13, %v8430_v25, %v2804_v38 }
 0x1fc   : > { %2847 = vrot.lane.b32.xlu1 %v2745_v45, %s8797_s28  ;;  %v2785_v45 = vrot.slane %v2783_v17, 4  ;;  %v2671_v17 = vld [vmem:[#allocation2 + $0xb4] sm:$0xe] }
 0x1fd   : > { %v2501_v35 = vpop.permute.xlu0 %2500  ;;  %v8433_v21 = vrot.slane %v2671_v17, 9 }
 0x1fe   : > { %v1994_v33 = vpop.permute.xlu1 %1993  ;;  %2597 = vst.msk [vmem:[#allocation4] sm:$0xf] %vm2596_vm1, %v2501_v35  ;;  %v2787_v15 = vsel %vm9676_vm13, %v2785_v45, %v2786_v43  ;;  %v2667_v35 = vld [vmem:[#allocation2 + $0xa4] sm:$0x1] }
 0x1ff   : > { %2063 = vst.msk [vmem:[#allocation4 + $0x6c] sm:$0xf] %vm2035_vm0, %v1994_v33  ;;  %v10333_v33 = vld [vmem:[#allocation2 + $0x88] sm:$0xf] }
 0x200   : > { %2837 = vrot.lane.b32.xlu2 %v2728_v63, %s8797_s28  ;;  %v8425_v63 = vrot.slane %v2647_v50, 9  ;;  %v2797_v46 = vrot.slane %v10333_v33, 5 }
 0x202   : > { %v2002_v55 = vpop.permute.xlu2 %2001  ;;  %v2798_v19 = vsel %vm9676_vm13, %v8429_v58, %v2797_v46  ;;  %v2799_v25 = vrot.slane %v2797_v46, 4 }
 0x203   : > { %2067 = vst.msk [vmem:[#allocation4 + $0x7c] sm:$0xf] %vm2035_vm0, %v2002_v55  ;;  %2863 = vrot.lane.b32.xlu0 %v2773_v59, %s8797_s28  ;;  %v2814_v59 = vrot.slane %v2667_v35, 5  ;;  %v2652_v55 = vld [vmem:[#allocation2 + $0x68] sm:$0x1] }
 0x204   : > { %2853 = vrot.lane.b32.xlu1 %v2756_v44, %s8797_s28  ;;  %v2770_v44 = vsel %vm9676_vm13, %v8425_v63, %v2769_v11  ;;  %v2779_v11 = vrot.slane %v2652_v55, 5 }
 0x205   : > { %v2507_v13 = vpop.permute.xlu0 %2506  ;;  %v2815_v14 = vsel %vm9676_vm13, %v2813_v3, %v2814_v59  ;;  %v2670_v59 = vld [vmem:[#allocation2 + $0xb0] sm:$0x1] }
 0x206   : > { %v2000_v12 = vpop.permute.xlu1 %1999  ;;  %2600 = vst.msk [vmem:[#allocation4 + $0xc] sm:$0xf] %vm2596_vm1, %v2507_v13  ;;  %v2780_v24 = vsel %vm9676_vm13, %v2778_v8, %v2779_v11  ;;  %v2821_v46 = vrot.slane %v2670_v59, 5  ;;  %v2970_v8 = vld [vmem:[#allocation2 + $0x28] sm:$0xf] }
 0x207   : > { %2066 = vst.msk [vmem:[#allocation4 + $0x78] sm:$0xf] %vm2035_vm0, %v2000_v12  ;;  %vm6864_vm0 = vcmask 388416  }
 0x208   : > { %2843 = vrot.lane.b32.xlu2 %v2738_v27, %s8797_s28  ;;  %v2672_v27 = vld [vmem:[#allocation2 + $0xb8] sm:$0xf] }
 0x209   : > { %v2825_v12 = vrot.slane %v2672_v27, 5 }
 0x20a   : > { %v2505_v41 = vpop.permute.xlu2 %2504 }
 0x20b   : > { %2599 = vst.msk [vmem:[#allocation4 + $0x8] sm:$0xf] %vm2596_vm1, %v2505_v41  ;;  %2869 = vrot.lane.b32.xlu0 %v2784_v20, %s8797_s28  ;;  %v2826_v42 = vsel %vm9676_vm13, %v8433_v21, %v2825_v12  ;;  %v2827_v43 = vrot.slane %v2825_v12, 4  ;;  %v2978_v21 = vld [vmem:[#allocation2 + $0x58] sm:$0xf] }
 0x20c   : > { %2859 = vrot.lane.b32.xlu1 %v2766_v60, %s8797_s28  ;;  %v2806_v60 = vrot.slane %v2804_v38, 4  ;;  %v2973_v12 = vld [vmem:[#allocation2 + $0x3c] sm:$0xf] }
 0x20d   : > { %v2513_v40 = vpop.permute.xlu0 %2512 }
 0x20e   : > { %v2503_v28 = vpop.permute.xlu1 %2502  ;;  %2603 = vst.msk [vmem:[#allocation4 + $0x18] sm:$0xf] %vm2596_vm1, %v2513_v40  ;;  %v2808_v49 = vsel %vm9676_vm13, %v2806_v60, %v2807_v34  ;;  %v2676_v40 = vld [vmem:[#allocation2 + $0xc8] sm:$0x1] }
 0x20f   : > { %2598 = vst.msk [vmem:[#allocation4 + $0x4] sm:$0xf] %vm2596_vm1, %v2503_v28  ;;  %v2669_v28 = vld [vmem:[#allocation2 + $0xac] sm:$0xf] }
 0x210   : > { %2849 = vrot.lane.b32.xlu2 %v2749_v47, %s8797_s28  ;;  %v8428_v47 = vrot.slane %v2656_v53, 9  ;;  %v2818_v2 = vrot.slane %v2669_v28, 5 }
 0x212   : > { %v2511_v30 = vpop.permute.xlu2 %2510  ;;  %v2819_v54 = vsel %vm9676_vm13, %v8432_v36, %v2818_v2  ;;  %v2820_v58 = vrot.slane %v2818_v2, 4  ;;  %v2977_v36 = vld [vmem:[#allocation2 + $0x54] sm:$0xf] }
 0x213   : > { %2602 = vst.msk [vmem:[#allocation4 + $0x14] sm:$0xf] %vm2596_vm1, %v2511_v30  ;;  %2875 = vrot.lane.b32.xlu0 %v2794_v48, %s8797_s28  ;;  %v2835_v48 = vrot.slane %v2676_v40, 5  ;;  %v2661_v30 = vld [vmem:[#allocation2 + $0x8c] sm:$0x1] }
 0x214   : > { %2865 = vrot.lane.b32.xlu1 %v2777_v22, %s8797_s28  ;;  %v2791_v22 = vsel %vm9676_vm13, %v8428_v47, %v2790_v23  ;;  %v2800_v38 = vrot.slane %v2661_v30, 5  ;;  %v2822_v9 = vsel %vm9676_vm13, %v2820_v58, %v2821_v46  ;;  %v2984_v47 = vld [vmem:[#allocation2 + $0x7c] sm:$0xf]  ;;  %v2979_v40 = vld [vmem:[#allocation2 + $0x60] sm:$0xf] }
 0x215   : > { %v2519_v26 = vpop.permute.xlu0 %2518  ;;  %v2836_v31 = vsel %vm9676_vm13, %v2834_v7, %v2835_v48  ;;  %v2987_v48 = vld [vmem:[#allocation2 + $0x90] sm:$0xf]  ;;  %v2990_v30 = vld [vmem:[#allocation2 + $0xa0] sm:$0xf]  ;;  %v2991_v46 = vld [vmem:[#allocation2 + $0xa8] sm:$0xf] }
 0x216   : > { %v2509_v57 = vpop.permute.xlu1 %2508  ;;  %2606 = vst.msk [vmem:[#allocation4 + $0x24] sm:$0xf] %vm2596_vm1, %v2519_v26  ;;  %v2801_v26 = vsel %vm9676_vm13, %v2799_v25, %v2800_v38  ;;  %v2980_v25 = vld [vmem:[#allocation2 + $0x64] sm:$0xf] }
 0x217   : > { %2601 = vst.msk [vmem:[#allocation4 + $0x10] sm:$0xf] %vm2596_vm1, %v2509_v57 }
 0x218   : > { %2855 = vrot.lane.b32.xlu2 %v2759_v5, %s8797_s28  ;;  %v2673_v5 = vld [vmem:[#allocation2 + $0xbc] sm:$0x1] }
 0x219   : > { %v2828_v57 = vrot.slane %v2673_v5, 5 }
 0x21a   : > { %v2517_v56 = vpop.permute.xlu2 %2516 }
 0x21b   : > { %2605 = vst.msk [vmem:[#allocation4 + $0x20] sm:$0xf] %vm2596_vm1, %v2517_v56  ;;  %2881 = vrot.lane.b32.xlu0 %v2805_v1, %s8797_s28  ;;  %v2665_v1 = vld [vmem:[#allocation2 + $0x9c] sm:$0xe]  ;;  %v2829_v63 = vsel %vm9676_vm13, %v2827_v43, %v2828_v57  ;;  %v2988_v57 = vld [vmem:[#allocation2 + $0x94] sm:$0xf] }
 0x21c   : > { %2871 = vrot.lane.b32.xlu1 %v2787_v15, %s8797_s28  ;;  %v2969_v15 = vld [vmem:[#allocation2 + $0x24] sm:$0xf]  ;;  %v8431_v35 = vrot.slane %v2665_v1, 9 }
 0x21d   : > { %v2525_v0 = vpop.permute.xlu0 %2524 }
 0x21e   : > { %v2515_v32 = vpop.permute.xlu1 %2514  ;;  %2609 = vst.msk [vmem:[#allocation4 + $0x30] sm:$0xf] %vm2596_vm1, %v2525_v0  ;;  %v2812_v37 = vsel %vm9676_vm13, %v8431_v35, %v2811_v16  ;;  %v2967_v0 = vld [vmem:[#allocation2 + $0x18] sm:$0xf] }
 0x21f   : > { %2604 = vst.msk [vmem:[#allocation4 + $0x1c] sm:$0xf] %vm2596_vm1, %v2515_v32  ;;  %v2983_v35 = vld [vmem:[#allocation2 + $0x78] sm:$0xf] }
 0x220   : > { %2861 = vrot.lane.b32.xlu2 %v2770_v44, %s8797_s28  ;;  %v2972_v44 = vld [vmem:[#allocation2 + $0x34] sm:$0xf] }
 0x222   : > { %v2523_v13 = vpop.permute.xlu2 %2522 }
 0x223   : > { %2608 = vst.msk [vmem:[#allocation4 + $0x2c] sm:$0xf] %vm2596_vm1, %v2523_v13  ;;  %2887 = vrot.lane.b32.xlu0 %v2815_v14, %s8797_s28  ;;  %v2674_v14 = vld [vmem:[#allocation2 + $0xc0] sm:$0xe] }
 0x224   : > { %2877 = vrot.lane.b32.xlu1 %v2798_v19, %s8797_s28  ;;  %v2975_v19 = vld [vmem:[#allocation2 + $0x48] sm:$0xf]  ;;  %v8434_v11 = vrot.slane %v2674_v14, 9 }
 0x225   : > { %v2531_v20 = vpop.permute.xlu0 %2530 }
 0x226   : > { %v2521_v41 = vpop.permute.xlu1 %2520  ;;  %2612 = vst.msk [vmem:[#allocation4 + $0x3c] sm:$0xf] %vm2596_vm1, %v2531_v20  ;;  %v2833_v27 = vsel %vm9676_vm13, %v8434_v11, %v2832_v29  ;;  %v2968_v20 = vld [vmem:[#allocation2 + $0x1c] sm:$0xf] }
 0x227   : > { %2607 = vst.msk [vmem:[#allocation4 + $0x28] sm:$0xf] %vm2596_vm1, %v2521_v41  ;;  %v2976_v41 = vld [vmem:[#allocation2 + $0x4c] sm:$0xf] }
 0x228   : > { %2867 = vrot.lane.b32.xlu2 %v2780_v24, %s8797_s28 }
 0x22a   : > { %v2529_v4 = vpop.permute.xlu2 %2528 }
 0x22b   : > { %2611 = vst.msk [vmem:[#allocation4 + $0x38] sm:$0xf] %vm2596_vm1, %v2529_v4  ;;  %2893 = vrot.lane.b32.xlu0 %v2826_v42, %s8797_s28  ;;  %v2971_v42 = vld [vmem:[#allocation2 + $0x30] sm:$0xf] }
 0x22c   : > { %2883 = vrot.lane.b32.xlu1 %v2808_v49, %s8797_s28 }
 0x22d   : > { %v2537_v61 = vpop.permute.xlu0 %2536 }
 0x22e   : > { %v2527_v18 = vpop.permute.xlu1 %2526  ;;  %2615 = vst.msk [vmem:[#allocation4 + $0x48] sm:$0xf] %vm2596_vm1, %v2537_v61 }
 0x22f   : > { %2610 = vst.msk [vmem:[#allocation4 + $0x34] sm:$0xf] %vm2596_vm1, %v2527_v18 }
 0x230   : > { %2873 = vrot.lane.b32.xlu2 %v2791_v22, %s8797_s28  ;;  %v2982_v22 = vld [vmem:[#allocation2 + $0x70] sm:$0xf] }
 0x232   : > { %v2535_v23 = vpop.permute.xlu2 %2534 }
 0x233   : > { %2614 = vst.msk [vmem:[#allocation4 + $0x44] sm:$0xf] %vm2596_vm1, %v2535_v23  ;;  %2899 = vrot.lane.b32.xlu0 %v2836_v31, %s8797_s28  ;;  %v2985_v31 = vld [vmem:[#allocation2 + $0x84] sm:$0xf]  ;;  %v3160_v23 = vld [vmem:[#allocation2 + $0x18] sm:$0xf] }
 0x234   : > { %2889 = vrot.lane.b32.xlu1 %v2819_v54, %s8797_s28  ;;  %v3212_v43 = vshll.u32 %v3160_v23, 16 }
 0x235   : > { %v2543_v45 = vpop.permute.xlu0 %2542 }
 0x236   : > { %v2533_v50 = vpop.permute.xlu1 %2532  ;;  %2618 = vst.msk [vmem:[#allocation4 + $0x54] sm:$0xf] %vm2596_vm1, %v2543_v45  ;;  %v3209_v45 = vshrl.u32 %v3160_v23, 16 }
 0x237   : > { %2613 = vst.msk [vmem:[#allocation4 + $0x40] sm:$0xf] %vm2596_vm1, %v2533_v50 }
 0x238   : > { %2879 = vrot.lane.b32.xlu2 %v2801_v26, %s8797_s28  ;;  %v2993_v26 = vld [vmem:[#allocation2 + $0xb4] sm:$0xf]  ;;  %v3211_v1 = vrot.slane %v3209_v45, 4 }
 0x23a   : > { %v2541_v56 = vpop.permute.xlu2 %2540 }
 0x23b   : > { %2617 = vst.msk [vmem:[#allocation4 + $0x50] sm:$0xf] %vm2596_vm1, %v2541_v56  ;;  %3035 = vrot.lane.b32.xlu0 %v2969_v15, %s8798_s29  ;;  %v3214_v15 = vrot.slane %v3212_v43, 5 }
 0x23c   : > { %2895 = vrot.lane.b32.xlu1 %v2829_v63, %s8797_s28  ;;  %v3164_v63 = vld [vmem:[#allocation2 + $0x28] sm:$0xf] }
 0x23d   : > { %v2549_v33 = vpop.permute.xlu0 %2548  ;;  %v3246_v59 = vshrl.u32 %v3164_v63, 16 }
 0x23e   : > { %v2539_v3 = vpop.permute.xlu1 %2538  ;;  %2621 = vst.msk [vmem:[#allocation4 + $0x60] sm:$0xf] %vm2596_vm1, %v2549_v33 }
 0x23f   : > { %2616 = vst.msk [vmem:[#allocation4 + $0x4c] sm:$0xf] %vm2596_vm1, %v2539_v3  ;;  %v3242_v3 = vshll.u32 %v3164_v63, 16 }
 0x240   : > { %2885 = vrot.lane.b32.xlu2 %v2812_v37, %s8797_s28  ;;  %v3161_v37 = vld [vmem:[#allocation2 + $0x1c] sm:$0xf] }
 0x241   : > { %v3218_v58 = vshll.u32 %v3161_v37, 16 }
 0x242   : > { %v2547_v32 = vpop.permute.xlu2 %2546 }
 0x243   : > { %2620 = vst.msk [vmem:[#allocation4 + $0x5c] sm:$0xf] %vm2596_vm1, %v2547_v32  ;;  %3041 = vrot.lane.b32.xlu0 %v2972_v44, %s8798_s29  ;;  %v2996_v44 = vld [vmem:[#allocation2 + $0xc4] sm:$0xf]  ;;  %v3220_v14 = vrot.slane %v3218_v58, 5 }
 0x244   : > { %3031 = vrot.lane.b32.xlu1 %v2967_v0, %s8798_s29  ;;  %v3215_v0 = vor.u32 %v3214_v15, %v3211_v1  ;;  %v3174_v1 = vld [vmem:[#allocation2 + $0x50] sm:$0x1]  ;;  %v2992_v15 = vld [vmem:[#allocation2 + $0xac] sm:$0xf] }
 0x245   : > { %v2555_v16 = vpop.permute.xlu0 %2554 }
 0x246   : > { %v2545_v55 = vpop.permute.xlu1 %2544  ;;  %2624 = vst.msk [vmem:[#allocation4 + $0x6c] sm:$0xf] %vm2596_vm1, %v2555_v16  ;;  %v3248_v16 = vrot.slane %v3246_v59, 4 }
 0x247   : > { %2619 = vst.msk [vmem:[#allocation4 + $0x58] sm:$0xf] %vm2596_vm1, %v2545_v55  ;;  %v3216_v55 = vrot.slane %v3215_v0, 4  ;;  %v3324_v0 = vshll.u32 %v3174_v1, 16 }
 0x248   : > { %2891 = vrot.lane.b32.xlu2 %v2822_v9, %s8797_s28  ;;  %v10459_v9 = vrot.slane %v3242_v3, 5 }
 0x24a   : > { %v2553_v17 = vpop.permute.xlu2 %2552 }
 0x24b   : > { %2623 = vst.msk [vmem:[#allocation4 + $0x68] sm:$0xf] %vm2596_vm1, %v2553_v17  ;;  %3047 = vrot.lane.b32.xlu0 %v2975_v19, %s8798_s29  ;;  %v3165_v19 = vld [vmem:[#allocation2 + $0x2c] sm:$0x1]  ;;  %v3169_v17 = vld [vmem:[#allocation2 + $0x3c] sm:$0xf] }
 0x24c   : > { %3037 = vrot.lane.b32.xlu1 %v2970_v8, %s8798_s29  ;;  %v2986_v8 = vld [vmem:[#allocation2 + $0x88] sm:$0xf] }
 0x24d   : > { %v2561_v13 = vpop.permute.xlu0 %2560 }
 0x24e   : > { %v2551_v51 = vpop.permute.xlu1 %2550  ;;  %2627 = vst.msk [vmem:[#allocation4 + $0x78] sm:$0xf] %vm2596_vm1, %v2561_v13  ;;  %v3249_v13 = vor.u32 %v3248_v16, %v10459_v9 }
 0x24f   : > { %2622 = vst.msk [vmem:[#allocation4 + $0x64] sm:$0xf] %vm2596_vm1, %v2551_v51  ;;  %v3252_v51 = vshll.u32 %v3165_v19, 16  ;;  %v3163_v19 = vld [vmem:[#allocation2 + $0x24] sm:$0xf] }
 0x250   : > { %2897 = vrot.lane.b32.xlu2 %v2833_v27, %s8797_s28 }
 0x252   : > { %v2559_v24 = vpop.permute.xlu2 %2558 }
 0x253   : > { %2626 = vst.msk [vmem:[#allocation4 + $0x74] sm:$0xf] %vm2596_vm1, %v2559_v24  ;;  %3053 = vrot.lane.b32.xlu0 %v2978_v21, %s8798_s29  ;;  %v3221_v21 = vsel %vm8874_vm3, %v3216_v55, %v3220_v14  ;;  %v3284_v24 = vshll.u32 %v3169_v17, 16 }
 0x254   : > { %3043 = vrot.lane.b32.xlu1 %v2973_v12, %s8798_s29  ;;  %v3281_v12 = vshrl.u32 %v3169_v17, 16 }
 0x255   : > { %v2840_v60 = vpop.permute.xlu0 %2839 }
 0x256   : > { %v2557_v34 = vpop.permute.xlu1 %2556  ;;  %2935 = vst.msk [vmem:[#allocation4 + $0x4] sm:$0xf] %vm2933_vm2, %v2840_v60  ;;  %v3222_v60 = vshrl.u32 %v3161_v37, 16  ;;  %v3178_v37 = vld [vmem:[#allocation2 + $0x60] sm:$0xf] }
 0x257   : > { %2625 = vst.msk [vmem:[#allocation4 + $0x70] sm:$0xf] %vm2596_vm1, %v2557_v34 }
 0x258   : > { %3033 = vrot.lane.b32.xlu2 %v2968_v20, %s8798_s29  ;;  %v2994_v20 = vld [vmem:[#allocation2 + $0xb8] sm:$0xf] }
 0x25a   : > { %v2838_v53 = vpop.permute.xlu2 %2837 }
 0x25b   : > { %2934 = vst.msk [vmem:[#allocation4] sm:$0xf] %vm2933_vm2, %v2838_v53  ;;  %3059 = vrot.lane.b32.xlu0 %v2981_v39, %s8798_s29  ;;  %v3250_v39 = vrot.slane %v3249_v13, 4  ;;  %v3283_v53 = vrot.slane %v3281_v12, 4  ;;  %v3326_v13 = vrot.slane %v3324_v0, 5 }
 0x25c   : > { %3049 = vrot.lane.b32.xlu1 %v2976_v41, %s8798_s29  ;;  %v3254_v41 = vrot.slane %v3252_v51, 5  ;;  %v3175_v12 = vld [vmem:[#allocation2 + $0x54] sm:$0xf] }
 0x25d   : > { %v2846_v29 = vpop.permute.xlu0 %2845 }
 0x25e   : > { %v2563_v49 = vpop.permute.xlu1 %2562  ;;  %2938 = vst.msk [vmem:[#allocation4 + $0x10] sm:$0xf] %vm2933_vm2, %v2846_v29  ;;  %v3166_v29 = vld [vmem:[#allocation2 + $0x30] sm:$0xf] }
 0x25f   : > { %2628 = vst.msk [vmem:[#allocation4 + $0x7c] sm:$0xf] %vm2596_vm1, %v2563_v49  ;;  %v3173_v49 = vld [vmem:[#allocation2 + $0x4c] sm:$0xf]  ;;  %vm7058_vm1 = vcmask 454016  }
 0x260   : > { %3039 = vrot.lane.b32.xlu2 %v2971_v42, %s8798_s29  ;;  %v3286_v42 = vrot.slane %v3284_v24, 5  ;;  %v3182_v24 = vld [vmem:[#allocation2 + $0x70] sm:$0xf] }
 0x262   : > { %v2844_v4 = vpop.permute.xlu2 %2843 }
 0x263   : > { %2937 = vst.msk [vmem:[#allocation4 + $0xc] sm:$0xf] %vm2933_vm2, %v2844_v4  ;;  %3065 = vrot.lane.b32.xlu0 %v2984_v47, %s8798_s29  ;;  %v2989_v47 = vld [vmem:[#allocation2 + $0x9c] sm:$0xf]  ;;  %v3224_v4 = vrot.slane %v3222_v60, 4 }
 0x264   : > { %3055 = vrot.lane.b32.xlu1 %v2979_v40, %s8798_s29 }
 0x265   : > { %v2852_v28 = vpop.permute.xlu0 %2851 }
 0x266   : > { %v2842_v7 = vpop.permute.xlu1 %2841  ;;  %2941 = vst.msk [vmem:[#allocation4 + $0x1c] sm:$0xf] %vm2933_vm2, %v2852_v28 }
 0x267   : > { %2936 = vst.msk [vmem:[#allocation4 + $0x8] sm:$0xf] %vm2933_vm2, %v2842_v7  ;;  %v3162_v7 = vld [vmem:[#allocation2 + $0x20] sm:$0x1] }
 0x268   : > { %3045 = vrot.lane.b32.xlu2 %v2974_v62, %s8798_s29  ;;  %v3170_v62 = vld [vmem:[#allocation2 + $0x40] sm:$0xf] }
 0x269   : > { %v3294_v55 = vshrl.u32 %v3170_v62, 16 }
 0x26a   : > { %v2850_v61 = vpop.permute.xlu2 %2849 }
 0x26b   : > { %2940 = vst.msk [vmem:[#allocation4 + $0x18] sm:$0xf] %vm2933_vm2, %v2850_v61  ;;  %3071 = vrot.lane.b32.xlu0 %v2987_v48, %s8798_s29  ;;  %v3257_v48 = vshrl.u32 %v3166_v29, 16  ;;  %v3314_v61 = vshll.u32 %v3173_v49, 16  ;;  %v3296_v60 = vrot.slane %v3294_v55, 4 }
 0x26c   : > { %3061 = vrot.lane.b32.xlu1 %v2982_v22, %s8798_s29  ;;  %v3260_v22 = vshll.u32 %v3166_v29, 16  ;;  %v3329_v29 = vshrl.u32 %v3175_v12, 16 }
 0x26d   : > { %v2858_v2 = vpop.permute.xlu0 %2857  ;;  %v3259_v23 = vrot.slane %v3257_v48, 4 }
 0x26e   : > { %v2848_v18 = vpop.permute.xlu1 %2847  ;;  %2944 = vst.msk [vmem:[#allocation4 + $0x28] sm:$0xf] %vm2933_vm2, %v2858_v2  ;;  %v3255_v2 = vsel %vm8874_vm3, %v3250_v39, %v3254_v41  ;;  %v3236_v39 = vshll.u32 %v3163_v19, 16  ;;  %v10500_v41 = vld [vmem:[#allocation2 + $0x64] sm:$0xf] }
 0x26f   : > { %2939 = vst.msk [vmem:[#allocation4 + $0x14] sm:$0xf] %vm2933_vm2, %v2848_v18  ;;  %v3287_v18 = vor.u32 %v3286_v42, %v3283_v53  ;;  %v3171_v42 = vld [vmem:[#allocation2 + $0x44] sm:$0x1]  ;;  %v3366_v55 = vshrl.u32 %v10500_v41, 16 }
 0x270   : > { %3051 = vrot.lane.b32.xlu2 %v2977_v36, %s8798_s29  ;;  %v3318_v36 = vshrl.u32 %v3173_v49, 16  ;;  %v3332_v49 = vshll.u32 %v3175_v12, 16 }
 0x271   : > { %v3288_v43 = vrot.slane %v3287_v18, 4 }
 0x272   : > { %v2856_v54 = vpop.permute.xlu2 %2855  ;;  %v3320_v45 = vrot.slane %v3318_v36, 4  ;;  %v3238_v36 = vrot.slane %v3236_v39, 5  ;;  %v3368_v39 = vrot.slane %v3366_v55, 4 }
 0x273   : > { %2943 = vst.msk [vmem:[#allocation4 + $0x24] sm:$0xf] %vm2933_vm2, %v2856_v54  ;;  %3077 = vrot.lane.b32.xlu0 %v2990_v30, %s8798_s29  ;;  %v3290_v30 = vshll.u32 %v3170_v62, 16  ;;  %v3225_v54 = vor.u32 %v3224_v4, %v3220_v14 }
 0x274   : > { %3067 = vrot.lane.b32.xlu1 %v2985_v31, %s8798_s29  ;;  %v2997_v31 = vld [vmem:[#allocation2 + $0xcc] sm:$0xf] }
 0x275   : > { %v2864_v38 = vpop.permute.xlu0 %2863 }
 0x276   : > { %v2854_v5 = vpop.permute.xlu1 %2853  ;;  %2947 = vst.msk [vmem:[#allocation4 + $0x34] sm:$0xf] %vm2933_vm2, %v2864_v38 }
 0x277   : > { %2942 = vst.msk [vmem:[#allocation4 + $0x20] sm:$0xf] %vm2933_vm2, %v2854_v5  ;;  %v3262_v5 = vrot.slane %v3260_v22, 5  ;;  %v3300_v22 = vshll.u32 %v3171_v42, 16  ;;  %v3191_v42 = vld [vmem:[#allocation2 + $0x94] sm:$0xf] }
 0x278   : > { %3057 = vrot.lane.b32.xlu2 %v2980_v25, %s8798_s29  ;;  %v3228_v25 = vshll.u32 %v3162_v7, 16  ;;  %v3362_v7 = vshll.u32 %v10500_v41, 16 }
 0x279   : > { %v3263_v3 = vor.u32 %v3262_v5, %v3259_v23  ;;  %v10520_v5 = vld [vmem:[#allocation2 + $0x58] sm:$0xf]  ;;  %v3302_v1 = vrot.slane %v3300_v22, 5  ;;  %v3458_v22 = vshll.u32 %v3191_v42, 16 }
 0x27a   : > { %v2862_v50 = vpop.permute.xlu2 %2861  ;;  %v10518_v23 = vrot.slane %v3362_v7, 5 }
 0x27b   : > { %2946 = vst.msk [vmem:[#allocation4 + $0x30] sm:$0xf] %vm2933_vm2, %v2862_v50  ;;  %3083 = vrot.lane.b32.xlu0 %v2993_v26, %s8798_s29  ;;  %v10478_v26 = vrot.slane %v3314_v61, 5  ;;  %v10483_v50 = vld [vmem:[#allocation2 + $0x34] sm:$0xf] }
 0x27c   : > { %3073 = vrot.lane.b32.xlu1 %v2988_v57, %s8798_s29  ;;  %v10481_v57 = vrot.slane %v3290_v30, 5  ;;  %v3266_v59 = vshll.u32 %v10483_v50, 16  ;;  %v3270_v18 = vshrl.u32 %v10483_v50, 16  ;;  %v3331_v30 = vrot.slane %v3329_v29, 4 }
 0x27d   : > { %v2870_v56 = vpop.permute.xlu0 %2869 }
 0x27e   : > { %v2860_v33 = vpop.permute.xlu1 %2859  ;;  %2950 = vst.msk [vmem:[#allocation4 + $0x40] sm:$0xf] %vm2933_vm2, %v2870_v56  ;;  %v3230_v56 = vrot.slane %v3228_v25, 5  ;;  %v3293_v58 = vsel %vm8874_vm3, %v3288_v43, %v10481_v57  ;;  %v10497_v17 = vrot.slane %v3266_v59, 5  ;;  %v3297_v48 = vor.u32 %v3296_v60, %v10481_v57  ;;  %v2998_v43 = vld [vmem:[#allocation2 + $0xd0] sm:$0xf] }
 0x27f   : > { %2945 = vst.msk [vmem:[#allocation4 + $0x2c] sm:$0xf] %vm2933_vm2, %v2860_v33  ;;  %v3184_v60 = vld [vmem:[#allocation2 + $0x78] sm:$0xf] }
 0x280   : > { %3063 = vrot.lane.b32.xlu2 %v2983_v35, %s8798_s29  ;;  %v3226_v35 = vrot.slane %v3225_v54, 4  ;;  %v3298_v50 = vrot.slane %v3297_v48, 4 }
 0x282   : > { %v2868_v32 = vpop.permute.xlu2 %2867  ;;  %v3231_v16 = vsel %vm8874_vm3, %v3226_v35, %v3230_v56  ;;  %v3272_v56 = vrot.slane %v3270_v18, 4 }
 0x283   : > { %2949 = vst.msk [vmem:[#allocation4 + $0x3c] sm:$0xf] %vm2933_vm2, %v2868_v32  ;;  %3089 = vrot.lane.b32.xlu0 %v2996_v44, %s8798_s29  ;;  %v3321_v44 = vor.u32 %v3320_v45, %v10478_v26  ;;  %v3356_v32 = vshll.u32 %v3178_v37, 16  ;;  %v3183_v45 = vld [vmem:[#allocation2 + $0x74] sm:$0x1] }
 0x284   : > { %3079 = vrot.lane.b32.xlu1 %v2991_v46, %s8798_s29  ;;  %v3353_v46 = vshrl.u32 %v3178_v37, 16 }
 0x285   : > { %v2876_v11 = vpop.permute.xlu0 %2875 }
 0x286   : > { %v2866_v27 = vpop.permute.xlu1 %2865  ;;  %2953 = vst.msk [vmem:[#allocation4 + $0x4c] sm:$0xf] %vm2933_vm2, %v2876_v11  ;;  %v3264_v11 = vrot.slane %v3263_v3, 4  ;;  %v3355_v51 = vrot.slane %v3353_v46, 4  ;;  %v3168_v3 = vld [vmem:[#allocation2 + $0x38] sm:$0x1] }
 0x287   : > { %2948 = vst.msk [vmem:[#allocation4 + $0x38] sm:$0xf] %vm2933_vm2, %v2866_v27  ;;  %v3322_v27 = vrot.slane %v3321_v44, 4  ;;  %v3396_v44 = vshll.u32 %v3183_v45, 16 }
 0x288   : > { %3069 = vrot.lane.b32.xlu2 %v2986_v8, %s8798_s29  ;;  %v2995_v8 = vld [vmem:[#allocation2 + $0xc0] sm:$0xf]  ;;  %v3269_v4 = vsel %vm8874_vm3, %v3264_v11, %v10497_v17  ;;  %v3276_v11 = vshll.u32 %v3168_v3, 16 }
 0x289   : > { %v3327_v62 = vsel %vm8874_vm3, %v3322_v27, %v3326_v13 }
 0x28a   : > { %v2874_v34 = vpop.permute.xlu2 %2873 }
 0x28b   : > { %2952 = vst.msk [vmem:[#allocation4 + $0x48] sm:$0xf] %vm2933_vm2, %v2874_v34  ;;  %3592 = vrot.lane.b32.xlu0 %v3221_v21, %s8799_s30  ;;  %v3358_v21 = vrot.slane %v3356_v32, 5  ;;  %v3233_v34 = vshrl.u32 %v3163_v19, 16  ;;  %v3303_v32 = vsel %vm8874_vm3, %v3298_v50, %v3302_v1 }
 0x28c   : > { %3085 = vrot.lane.b32.xlu1 %v2994_v20, %s8798_s29 }
 0x28d   : > { %v2882_v40 = vpop.permute.xlu0 %2881  ;;  %v3235_v61 = vrot.slane %v3233_v34, 4 }
 0x28e   : > { %v2872_v28 = vpop.permute.xlu1 %2871  ;;  %2956 = vst.msk [vmem:[#allocation4 + $0x58] sm:$0xf] %vm2933_vm2, %v2882_v40  ;;  %v3390_v40 = vshrl.u32 %v3182_v24, 16 }
 0x28f   : > { %2951 = vst.msk [vmem:[#allocation4 + $0x44] sm:$0xf] %vm2933_vm2, %v2872_v28  ;;  %v3359_v28 = vor.u32 %v3358_v21, %v3355_v51  ;;  %v3398_v21 = vrot.slane %v3396_v44, 5 }
 0x290   : > { %3075 = vrot.lane.b32.xlu2 %v2989_v47, %s8798_s29  ;;  %v3386_v47 = vshll.u32 %v3182_v24, 16  ;;  %v3392_v25 = vrot.slane %v3390_v40, 4  ;;  %v3180_v40 = vld [vmem:[#allocation2 + $0x68] sm:$0x1] }
 0x292   : > { %v2880_v38 = vpop.permute.xlu2 %2879  ;;  %v10515_v54 = vrot.slane %v3386_v47, 5  ;;  %v3278_v47 = vrot.slane %v3276_v11, 5 }
 0x293   : > { %2955 = vst.msk [vmem:[#allocation4 + $0x54] sm:$0xf] %vm2933_vm2, %v2880_v38  ;;  %3598 = vrot.lane.b32.xlu0 %v3255_v2, %s8799_s30  ;;  %v3360_v38 = vrot.slane %v3359_v28, 4  ;;  %v3404_v28 = vshll.u32 %v3184_v60, 16 }
 0x294   : > { %3091 = vrot.lane.b32.xlu1 %v2997_v31, %s8798_s29  ;;  %v3334_v31 = vrot.slane %v3332_v49, 5  ;;  %v3393_v59 = vor.u32 %v3392_v25, %v10515_v54  ;;  %v3342_v25 = vshrl.u32 %v10520_v5, 16 }
 0x295   : > { %v2888_v63 = vpop.permute.xlu0 %2887  ;;  %v3365_v0 = vsel %vm8874_vm3, %v3360_v38, %v10518_v23  ;;  %v10557_v38 = vld [vmem:[#allocation2 + $0x7c] sm:$0xf] }
 0x296   : > { %v2878_v33 = vpop.permute.xlu1 %2877  ;;  %2959 = vst.msk [vmem:[#allocation4 + $0x64] sm:$0xf] %vm2933_vm2, %v2888_v63  ;;  %v3187_v63 = vld [vmem:[#allocation2 + $0x84] sm:$0xf]  ;;  %v3335_v37 = vor.u32 %v3334_v31, %v3331_v30  ;;  %v3394_v51 = vrot.slane %v3393_v59, 4  ;;  %v3410_v59 = vshll.u32 %v10557_v38, 16 }
 0x297   : > { %2954 = vst.msk [vmem:[#allocation4 + $0x50] sm:$0xf] %vm2933_vm2, %v2878_v33  ;;  %v3338_v33 = vshll.u32 %v10520_v5, 16  ;;  %v3428_v46 = vshll.u32 %v3187_v63, 16  ;;  %v3344_v44 = vrot.slane %v3342_v25, 4 }
 0x298   : > { %3081 = vrot.lane.b32.xlu2 %v2992_v15, %s8798_s29  ;;  %v3239_v15 = vor.u32 %v3238_v36, %v3235_v61  ;;  %v3336_v27 = vrot.slane %v3335_v37, 4  ;;  %v3462_v61 = vshrl.u32 %v3191_v42, 16  ;;  %v3369_v36 = vor.u32 %v3368_v39, %v10518_v23 }
 0x299   : > { %v10536_v13 = vrot.slane %v3338_v33, 5  ;;  %v10562_v23 = vrot.slane %v3458_v22, 5  ;;  %v3192_v33 = vld [vmem:[#allocation2 + $0x98] sm:$0x1] }
 0x29a   : > { %v2886_v14 = vpop.permute.xlu2 %2885  ;;  %v3464_v1 = vrot.slane %v3462_v61, 4 }
 0x29b   : > { %2958 = vst.msk [vmem:[#allocation4 + $0x60] sm:$0xf] %vm2933_vm2, %v2886_v14  ;;  %3604 = vrot.lane.b32.xlu0 %v3293_v58, %s8799_s30  ;;  %v3425_v58 = vshrl.u32 %v3187_v63, 16  ;;  %v3172_v14 = vld [vmem:[#allocation2 + $0x48] sm:$0xf] }
 0x29c   : > { %3594 = vrot.lane.b32.xlu1 %v3231_v16, %s8799_s30  ;;  %v3240_v16 = vrot.slane %v3239_v15, 4  ;;  %v3305_v12 = vshrl.u32 %v3172_v14, 16  ;;  %v3308_v41 = vshll.u32 %v3172_v14, 16  ;;  %v3196_v15 = vld [vmem:[#allocation2 + $0xa8] sm:$0xf]  ;;  %v3465_v55 = vor.u32 %v3464_v1, %v10562_v23 }
 0x29d   : > { %v2894_v20 = vpop.permute.xlu0 %2893  ;;  %v3427_v24 = vrot.slane %v3425_v58, 4  ;;  %v3177_v58 = vld [vmem:[#allocation2 + $0x5c] sm:$0x1]  ;;  %v3468_v14 = vshll.u32 %v3192_v33, 16 }
 0x29e   : > { %v2884_v53 = vpop.permute.xlu1 %2883  ;;  %2962 = vst.msk [vmem:[#allocation4 + $0x70] sm:$0xf] %vm2933_vm2, %v2894_v20  ;;  %v3430_v20 = vrot.slane %v3428_v46, 5  ;;  %v3307_v18 = vrot.slane %v3305_v12, 4  ;;  %v3310_v30 = vrot.slane %v3308_v41, 5  ;;  %v3497_v46 = vshrl.u32 %v3196_v15, 16 }
 0x29f   : > { %2957 = vst.msk [vmem:[#allocation4 + $0x5c] sm:$0xf] %vm2933_vm2, %v2884_v53  ;;  %v10542_v53 = vld [vmem:[#allocation2 + $0x88] sm:$0xf]  ;;  %v3181_v12 = vld [vmem:[#allocation2 + $0x6c] sm:$0xf] }
 0x2a0   : > { %3087 = vrot.lane.b32.xlu2 %v2995_v8, %s8798_s29  ;;  %v3273_v8 = vor.u32 %v3272_v56, %v10497_v17  ;;  %v3245_v17 = vsel %vm8874_vm3, %v3240_v16, %v10459_v9  ;;  %v3399_v9 = vsel %vm8874_vm3, %v3394_v51, %v3398_v21  ;;  %v3431_v7 = vor.u32 %v3430_v20, %v3427_v24  ;;  %v10583_v41 = vld [vmem:[#allocation2 + $0xac] sm:$0xf] }
 0x2a1   : > { %v3434_v48 = vshll.u32 %v10542_v53, 16  ;;  %v3311_v37 = vor.u32 %v3310_v30, %v3307_v18  ;;  %v3438_v11 = vshrl.u32 %v10542_v53, 16  ;;  %v3345_v51 = vor.u32 %v3344_v44, %v10536_v13  ;;  %v3193_v53 = vld [vmem:[#allocation2 + $0x9c] sm:$0xf] }
 0x2a2   : > { %v2892_v2 = vpop.permute.xlu2 %2891  ;;  %v3274_v49 = vrot.slane %v3273_v8, 4  ;;  %v3348_v21 = vshll.u32 %v3177_v58, 16  ;;  %v10580_v20 = vrot.slane %v3410_v59, 5  ;;  %v3470_v39 = vrot.slane %v3468_v14, 5  ;;  %v3201_v44 = vld [vmem:[#allocation2 + $0xbc] sm:$0x1] }
 0x2a3   : > { %2961 = vst.msk [vmem:[#allocation4 + $0x6c] sm:$0xf] %vm2933_vm2, %v2892_v2  ;;  %3610 = vrot.lane.b32.xlu0 %v3327_v62, %s8799_s30  ;;  %v3401_v62 = vshrl.u32 %v3184_v60, 16  ;;  %v3372_v2 = vshll.u32 %v3180_v40, 16  ;;  %v10560_v50 = vrot.slane %v3434_v48, 5  ;;  %v3312_v8 = vrot.slane %v3311_v37, 4 }
 0x2a4   : > { %3600 = vrot.lane.b32.xlu1 %v3269_v4, %s8799_s30  ;;  %v3341_v4 = vsel %vm8874_vm3, %v3336_v27, %v10536_v13  ;;  %v3279_v5 = vsel %vm8874_vm3, %v3274_v49, %v3278_v47  ;;  %v3499_v60 = vrot.slane %v3497_v46, 4  ;;  %v3377_v49 = vshrl.u32 %v3181_v12, 16  ;;  %v3200_v40 = vld [vmem:[#allocation2 + $0xb8] sm:$0xf]  ;;  %v3186_v14 = vld [vmem:[#allocation2 + $0x80] sm:$0x1] }
 0x2a5   : > { %v2900_v57 = vpop.permute.xlu0 %2899  ;;  %v3403_v45 = vrot.slane %v3401_v62, 4  ;;  %v3374_v56 = vrot.slane %v3372_v2, 5  ;;  %v3317_v13 = vsel %vm8874_vm3, %v3312_v8, %v10478_v26  ;;  %v3380_v47 = vshll.u32 %v3181_v12, 16 }
 0x2a6   : > { %v2890_v35 = vpop.permute.xlu1 %2889  ;;  %2965 = vst.msk [vmem:[#allocation4 + $0x7c] sm:$0xf] %vm2933_vm2, %v2900_v57  ;;  %v3432_v57 = vrot.slane %v3431_v7, 4  ;;  %v3350_v62 = vrot.slane %v3348_v21, 5  ;;  %v3506_v48 = vshll.u32 %v10583_v41, 16  ;;  %v3473_v22 = vshrl.u32 %v3193_v53, 16 }
 0x2a7   : > { %2960 = vst.msk [vmem:[#allocation4 + $0x68] sm:$0xf] %vm2933_vm2, %v2890_v35  ;;  %v3370_v35 = vrot.slane %v3369_v36, 4  ;;  %v3476_v61 = vshll.u32 %v3193_v53, 16  ;;  %v3530_v2 = vshll.u32 %v3200_v40, 16  ;;  %v3534_v18 = vshrl.u32 %v3200_v40, 16 }
 0x2a8   : > { %3093 = vrot.lane.b32.xlu2 %v2998_v43, %s8798_s29  ;;  %v3406_v43 = vrot.slane %v3404_v28, 5  ;;  %v3437_v16 = vsel %vm8874_vm3, %v3432_v57, %v10560_v50  ;;  %v3189_v28 = vld [vmem:[#allocation2 + $0x8c] sm:$0x1]  ;;  %v3379_v25 = vrot.slane %v3377_v49, 4  ;;  %v3414_v57 = vshrl.u32 %v10557_v38, 16 }
 0x2a9   : > { %v3540_v8 = vshll.u32 %v3201_v44, 16 }
 0x2aa   : > { %v2898_v19 = vpop.permute.xlu2 %2897  ;;  %v3416_v46 = vrot.slane %v3414_v57, 4 }
 0x2ab   : > { %2964 = vst.msk [vmem:[#allocation4 + $0x78] sm:$0xf] %vm2933_vm2, %v2898_v19  ;;  %3616 = vrot.lane.b32.xlu0 %v3365_v0, %s8799_s30  ;;  %v3407_v0 = vor.u32 %v3406_v43, %v3403_v45  ;;  %v3375_v19 = vsel %vm8874_vm3, %v3370_v35, %v3374_v56  ;;  %v3382_v45 = vrot.slane %v3380_v47, 5  ;;  %v10604_v35 = vld [vmem:[#allocation2 + $0xa0] sm:$0xf]  ;;  %v3536_v56 = vrot.slane %v3534_v18, 4 }
 0x2ac   : > { %3606 = vrot.lane.b32.xlu1 %v3303_v32, %s8799_s30  ;;  %v3500_v32 = vshll.u32 %v3196_v15, 16  ;;  %v10601_v15 = vrot.slane %v3506_v48, 5  ;;  %v3542_v49 = vrot.slane %v3540_v8, 5  ;;  %v3486_v57 = vshrl.u32 %v10604_v35, 16  ;;  %v3723_v8 = vld [vmem:[#allocation2 + $0x20] sm:$0x1] }
 0x2ad   : > { %v3036_v34 = vpop.permute.xlu0 %3035  ;;  %v3408_v24 = vrot.slane %v3407_v0, 4  ;;  %v3383_v59 = vor.u32 %v3382_v45, %v3379_v25  ;;  %v3205_v0 = vld [vmem:[#allocation2 + $0xcc] sm:$0xf] }
 0x2ae   : > { %v2896_v29 = vpop.permute.xlu1 %2895  ;;  %3130 = vst.msk [vmem:[#allocation4 + $0x8] sm:$0xf] %vm3127_vm4, %v3036_v34  ;;  %v3466_v34 = vrot.slane %v3465_v55, 4  ;;  %v3482_v55 = vshll.u32 %v10604_v35, 16  ;;  %v10653_v35 = vld [vmem:[#allocation2 + $0xc4] sm:$0xf] }
 0x2af   : > { %2963 = vst.msk [vmem:[#allocation4 + $0x74] sm:$0xf] %vm2933_vm2, %v2896_v29  ;;  %v3440_v29 = vrot.slane %v3438_v11, 4  ;;  %v3413_v26 = vsel %vm8874_vm3, %v3408_v24, %v10580_v20  ;;  %v3190_v11 = vld [vmem:[#allocation2 + $0x90] sm:$0xf]  ;;  %v3384_v12 = vrot.slane %v3383_v59, 4 }
 0x2b0   : > { %3596 = vrot.lane.b32.xlu2 %v3245_v17, %s8799_s30  ;;  %v3502_v17 = vrot.slane %v3500_v32, 5  ;;  %v3471_v36 = vsel %vm8874_vm3, %v3466_v34, %v3470_v39  ;;  %v3510_v24 = vshrl.u32 %v10583_v41, 16  ;;  %v3420_v34 = vshll.u32 %v3186_v14, 16  ;;  %v10650_v59 = vld [vmem:[#allocation2 + $0x1c] sm:$0xf] }
 0x2b1   : > { %v3441_v30 = vor.u32 %v3440_v29, %v10560_v50  ;;  %v10606_v50 = vrot.slane %v3530_v2, 5  ;;  %v10624_v53 = vrot.slane %v3482_v55, 5  ;;  %vm7619_vm2 = vcmask 519616  }
 0x2b2   : > { %v3034_v31 = vpop.permute.xlu2 %3033  ;;  %v3503_v7 = vor.u32 %v3502_v17, %v3499_v60  ;;  %v3417_v17 = vor.u32 %v3416_v46, %v10580_v20  ;;  %v3389_v20 = vsel %vm8874_vm3, %v3384_v12, %v10515_v54 }
 0x2b3   : > { %3129 = vst.msk [vmem:[#allocation4 + $0x4] sm:$0xf] %vm3127_vm4, %v3034_v31  ;;  %3622 = vrot.lane.b32.xlu0 %v3399_v9, %s8799_s30  ;;  %v3346_v9 = vrot.slane %v3345_v51, 4  ;;  %v3444_v31 = vshll.u32 %v3189_v28, 16  ;;  %v3442_v33 = vrot.slane %v3441_v30, 4  ;;  %v3572_v51 = vshll.u32 %v3205_v0, 16 }
 0x2b4   : > { %3612 = vrot.lane.b32.xlu1 %v3341_v4, %s8799_s30  ;;  %v3504_v1 = vrot.slane %v3503_v7, 4  ;;  %v3198_v28 = vld [vmem:[#allocation2 + $0xb0] sm:$0x1]  ;;  %v3202_v7 = vld [vmem:[#allocation2 + $0xc0] sm:$0xf]  ;;  %v3418_v48 = vrot.slane %v3417_v17, 4 }
 0x2b5   : > { %v3042_v63 = vpop.permute.xlu0 %3041  ;;  %v3351_v37 = vsel %vm8874_vm3, %v3346_v9, %v3350_v62  ;;  %v3574_v40 = vrot.slane %v3572_v51, 5  ;;  %v10630_v9 = vld [vmem:[#allocation2 + $0xd0] sm:$0xf]  ;;  %v3545_v25 = vshrl.u32 %v3202_v7, 16  ;;  %v3548_v45 = vshll.u32 %v3202_v7, 16 }
 0x2b6   : > { %v3032_v3 = vpop.permute.xlu1 %3031  ;;  %3133 = vst.msk [vmem:[#allocation4 + $0x14] sm:$0xf] %vm3127_vm4, %v3042_v63  ;;  %v3478_v63 = vrot.slane %v3476_v61, 5  ;;  %v3509_v32 = vsel %vm8874_vm3, %v3504_v1, %v10601_v15  ;;  %v3578_v18 = vshll.u32 %v10630_v9, 16  ;;  %v3582_v55 = vshrl.u32 %v10630_v9, 16 }
 0x2b7   : > { %3128 = vst.msk [vmem:[#allocation4] sm:$0xf] %vm3127_vm4, %v3032_v3  ;;  %v3446_v3 = vrot.slane %v3444_v31, 5  ;;  %v3516_v31 = vshll.u32 %v3198_v28, 16  ;;  %v3195_v51 = vld [vmem:[#allocation2 + $0xa4] sm:$0x1] }
 0x2b8   : > { %3602 = vrot.lane.b32.xlu2 %v3279_v5, %s8799_s30  ;;  %v3475_v5 = vrot.slane %v3473_v22, 4  ;;  %v3422_v22 = vrot.slane %v3420_v34, 5  ;;  %v3727_v7 = vld [vmem:[#allocation2 + $0x30] sm:$0xe] }
 0x2b9   : > { %v3447_v21 = vsel %vm8874_vm3, %v3442_v33, %v3446_v3  ;;  %v3547_v33 = vrot.slane %v3545_v25, 4  ;;  %v3550_v3 = vrot.slane %v3548_v45, 5 }
 0x2ba   : > { %v3040_v27 = vpop.permute.xlu2 %3039 }
 0x2bb   : > { %3132 = vst.msk [vmem:[#allocation4 + $0x10] sm:$0xf] %vm3127_vm4, %v3040_v27  ;;  %3628 = vrot.lane.b32.xlu0 %v3437_v16, %s8799_s30  ;;  %v3479_v16 = vor.u32 %v3478_v63, %v3475_v5  ;;  %v3569_v27 = vshrl.u32 %v3205_v0, 16  ;;  %v3423_v5 = vsel %vm8874_vm3, %v3418_v48, %v3422_v22  ;;  %v3551_v14 = vor.u32 %v3550_v3, %v3547_v33  ;;  %v3728_v22 = vld [vmem:[#allocation2 + $0x34] sm:$0xf] }
 0x2bc   : > { %3618 = vrot.lane.b32.xlu1 %v3375_v19, %s8799_s30  ;;  %v3537_v19 = vor.u32 %v3536_v56, %v10606_v50  ;;  %v10648_v56 = vrot.slane %v3578_v18, 5  ;;  %v3833_v45 = vrot.slane %v3728_v22, 5  ;;  %v3204_v33 = vld [vmem:[#allocation2 + $0xc8] sm:$0x1] }
 0x2bd   : > { %v3048_v42 = vpop.permute.xlu0 %3047  ;;  %v3480_v39 = vrot.slane %v3479_v16, 4  ;;  %v3571_v47 = vrot.slane %v3569_v27, 4 }
 0x2be   : > { %v3038_v4 = vpop.permute.xlu1 %3037  ;;  %3136 = vst.msk [vmem:[#allocation4 + $0x20] sm:$0xf] %vm3127_vm4, %v3048_v42  ;;  %v3452_v42 = vshll.u32 %v3190_v11, 16  ;;  %v3538_v29 = vrot.slane %v3537_v19, 4  ;;  %v3554_v19 = vshll.u32 %v10653_v35, 16 }
 0x2bf   : > { %3131 = vst.msk [vmem:[#allocation4 + $0xc] sm:$0xf] %vm3127_vm4, %v3038_v4  ;;  %v3512_v4 = vrot.slane %v3510_v24, 4  ;;  %v3485_v54 = vsel %vm8874_vm3, %v3480_v39, %v10624_v53  ;;  %v3575_v2 = vor.u32 %v3574_v40, %v3571_v47 }
 0x2c0   : > { %3608 = vrot.lane.b32.xlu2 %v3317_v13, %s8799_s30  ;;  %v3449_v13 = vshrl.u32 %v3190_v11, 16  ;;  %v3199_v11 = vld [vmem:[#allocation2 + $0xb4] sm:$0xf] }
 0x2c1   : > { %v3513_v30 = vor.u32 %v3512_v4, %v10601_v15  ;;  %v3576_v63 = vrot.slane %v3575_v2, 4  ;;  %v3521_v17 = vshrl.u32 %v3199_v11, 16  ;;  %v3524_v34 = vshll.u32 %v3199_v11, 16 }
 0x2c2   : > { %v3046_v43 = vpop.permute.xlu2 %3045  ;;  %v3451_v61 = vrot.slane %v3449_v13, 4  ;;  %v3552_v13 = vrot.slane %v3551_v14, 4 }
 0x2c3   : > { %3135 = vst.msk [vmem:[#allocation4 + $0x1c] sm:$0xf] %vm3127_vm4, %v3046_v43  ;;  %3634 = vrot.lane.b32.xlu0 %v3471_v36, %s8799_s30  ;;  %v3543_v36 = vsel %vm8874_vm3, %v3538_v29, %v3542_v49  ;;  %v3581_v46 = vsel %vm8874_vm3, %v3576_v63, %v10648_v56  ;;  %v3492_v29 = vshll.u32 %v3195_v51, 16  ;;  %v3584_v49 = vrot.slane %v3582_v55, 4 }
 0x2c4   : > { %3624 = vrot.lane.b32.xlu1 %v3413_v26, %s8799_s30  ;;  %v3454_v26 = vrot.slane %v3452_v42, 5  ;;  %v10674_v42 = vrot.slane %v3554_v19, 5  ;;  %v3564_v55 = vshll.u32 %v3204_v33, 16 }
 0x2c5   : > { %v3054_v38 = vpop.permute.xlu0 %3053  ;;  %v3494_v9 = vrot.slane %v3492_v29, 5  ;;  %v3721_v29 = vld [vmem:[#allocation2 + $0x18] sm:$0xe] }
 0x2c6   : > { %v3044_v58 = vpop.permute.xlu1 %3043  ;;  %3139 = vst.msk [vmem:[#allocation4 + $0x2c] sm:$0xf] %vm3127_vm4, %v3054_v38  ;;  %v3455_v1 = vor.u32 %v3454_v26, %v3451_v61  ;;  %v3518_v38 = vrot.slane %v3516_v31, 5  ;;  %v3557_v4 = vsel %vm8874_vm3, %v3552_v13, %v10674_v42  ;;  %v8437_v26 = vrot.slane %v3727_v7, 9  ;;  %v10691_v31 = vld [vmem:[#allocation2 + $0x40] sm:$0xf] }
 0x2c7   : > { %3134 = vst.msk [vmem:[#allocation4 + $0x18] sm:$0xf] %vm3127_vm4, %v3044_v58  ;;  %v3488_v58 = vrot.slane %v3486_v57, 4  ;;  %v3566_v11 = vrot.slane %v3564_v55, 5  ;;  %v10725_v13 = vld [vmem:[#allocation2 + $0x64] sm:$0xf] }
 0x2c8   : > { %3614 = vrot.lane.b32.xlu2 %v3351_v37, %s8799_s30  ;;  %v3514_v37 = vrot.slane %v3513_v30, 4  ;;  %v3456_v0 = vrot.slane %v3455_v1, 4  ;;  %v3834_v57 = vsel %vm9676_vm13, %v8437_v26, %v3833_v45  ;;  %v3840_v1 = vrot.slane %v10691_v31, 5  ;;  %v3750_v55 = vld [vmem:[#allocation2 + $0x8c] sm:$0x1] }
 0x2c9   : > { %v3489_v12 = vor.u32 %v3488_v58, %v10624_v53 }
 0x2ca   : > { %v3052_v60 = vpop.permute.xlu2 %3051  ;;  %v3519_v16 = vsel %vm8874_vm3, %v3514_v37, %v3518_v38  ;;  %v3724_v37 = vld [vmem:[#allocation2 + $0x24] sm:$0xe]  ;;  %v10701_v38 = vld [vmem:[#allocation2 + $0x28] sm:$0xf] }
 0x2cb   : > { %3138 = vst.msk [vmem:[#allocation4 + $0x28] sm:$0xf] %vm3127_vm4, %v3052_v60  ;;  %3640 = vrot.lane.b32.xlu0 %v3509_v32, %s8799_s30  ;;  %v3819_v32 = vrot.slane %v10650_v59, 5  ;;  %v3822_v60 = vrot.slane %v3723_v8, 5  ;;  %v3490_v53 = vrot.slane %v3489_v12, 4  ;;  %v8436_v58 = vrot.slane %v3724_v37, 9 }
 0x2cc   : > { %3630 = vrot.lane.b32.xlu1 %v3447_v21, %s8799_s30  ;;  %v3461_v21 = vsel %vm8874_vm3, %v3456_v0, %v10562_v23  ;;  %v3207_v23 = vld [vmem:[#allocation2 + $0xd4] sm:$0x1]  ;;  %v3737_v12 = vld [vmem:[#allocation2 + $0x58] sm:$0xf]  ;;  %v3730_v37 = vld [vmem:[#allocation2 + $0x3c] sm:$0xe] }
 0x2cd   : > { %v3060_v41 = vpop.permute.xlu0 %3059  ;;  %v3821_v24 = vrot.slane %v3819_v32, 4  ;;  %v3588_v28 = vshll.u32 %v3207_v23, 16  ;;  %v3861_v23 = vrot.slane %v10725_v13, 5  ;;  %v8718_v13 = vld [vmem:[%s12342_s1 + $0x38] sm:$0xff] }
 0x2ce   : > { %v3050_v62 = vpop.permute.xlu1 %3049  ;;  %3142 = vst.msk [vmem:[#allocation4 + $0x38] sm:$0xf] %vm3127_vm4, %v3060_v41  ;;  %v3526_v41 = vrot.slane %v3524_v34, 5  ;;  %v3835_v34 = vrot.slane %v3833_v45, 4  ;;  %v3746_v45 = vld [vmem:[#allocation2 + $0x7c] sm:$0xf]  ;;  %4254 = vmatpush.bf16.msra.mxu0 %v8718_v13  ;;  %8743 = vmatpush.bf16.msra.mxu2 %v8718_v13 }
 0x2cf   : > { %3137 = vst.msk [vmem:[#allocation4 + $0x24] sm:$0xf] %vm3127_vm4, %v3050_v62  ;;  %v3823_v40 = vsel %vm9676_vm13, %v3821_v24, %v3822_v60  ;;  %v3585_v62 = vor.u32 %v3584_v49, %v10648_v56  ;;  %v3590_v30 = vrot.slane %v3588_v28, 5  ;;  %v3732_v56 = vld [vmem:[#allocation2 + $0x44] sm:$0x1]  ;;  %v3854_v49 = vrot.slane %v3737_v12, 5 }
 0x2d0   : > { %3620 = vrot.lane.b32.xlu2 %v3389_v20, %s8799_s30  ;;  %v3523_v20 = vrot.slane %v3521_v17, 4 }
 0x2d1   : > { %v3586_v18 = vrot.slane %v3585_v62, 4  ;;  %v3863_v62 = vrot.slane %v3861_v23, 4 }
 0x2d2   : > { %v3058_v43 = vpop.permute.xlu2 %3057  ;;  %v3527_v61 = vor.u32 %v3526_v41, %v3523_v20  ;;  %v3741_v20 = vld [vmem:[#allocation2 + $0x68] sm:$0x1] }
 0x2d3   : > { %3141 = vst.msk [vmem:[#allocation4 + $0x34] sm:$0xf] %vm3127_vm4, %v3058_v43  ;;  %3646 = vrot.lane.b32.xlu0 %v3543_v36, %s8799_s30  ;;  %v3495_v36 = vsel %vm8874_vm3, %v3490_v53, %v3494_v9  ;;  %v10735_v9 = vld [vmem:[#allocation2 + $0x4c] sm:$0xf]  ;;  %v3864_v28 = vrot.slane %v3741_v20, 5 }
 0x2d4   : > { %3636 = vrot.lane.b32.xlu1 %v3485_v54, %s8799_s30  ;;  %v3558_v54 = vshrl.u32 %v10653_v35, 16  ;;  %v3528_v43 = vrot.slane %v3527_v61, 4  ;;  %v3843_v35 = vrot.slane %v3732_v56, 5  ;;  %v3847_v61 = vrot.slane %v10735_v9, 5 }
 0x2d5   : > { %v3066_v15 = vpop.permute.xlu0 %3065 }
 0x2d6   : > { %v3056_v44 = vpop.permute.xlu1 %3055  ;;  %3145 = vst.msk [vmem:[#allocation4 + $0x44] sm:$0xf] %vm3127_vm4, %v3066_v15  ;;  %v3560_v63 = vrot.slane %v3558_v54, 4  ;;  %v3533_v3 = vsel %vm8874_vm3, %v3528_v43, %v10606_v50  ;;  %v3726_v54 = vld [vmem:[#allocation2 + $0x2c] sm:$0x1] }
 0x2d7   : > { %3140 = vst.msk [vmem:[#allocation4 + $0x30] sm:$0xf] %vm3127_vm4, %v3056_v44  ;;  %v3842_v44 = vrot.slane %v3840_v1, 4 }
 0x2d8   : > { %3626 = vrot.lane.b32.xlu2 %v3423_v5, %s8799_s30  ;;  %v3591_v5 = vsel %vm8874_vm3, %v3586_v18, %v3590_v30  ;;  %v3745_v18 = vld [vmem:[#allocation2 + $0x78] sm:$0xe] }
 0x2d9   : > { %v3844_v50 = vsel %vm9676_vm13, %v3842_v44, %v3843_v35  ;;  %v8443_v43 = vrot.slane %v3745_v18, 9  ;;  %v8438_v44 = vrot.slane %v3730_v37, 9  ;;  %v10766_v35 = vld [vmem:[#allocation2 + $0x88] sm:$0xf]  ;;  %v8717_v18 = vld [vmem:[%s12342_s1 + $0x30] sm:$0xff] }
 0x2da   : > { %v3064_v27 = vpop.permute.xlu2 %3063  ;;  %4255 = vmatpush.bf16.msra.mxu0 %v8717_v18  ;;  %8744 = vmatpush.bf16.msra.mxu2 %v8717_v18 }
 0x2db   : > { %3144 = vst.msk [vmem:[#allocation4 + $0x40] sm:$0xf] %vm3127_vm4, %v3064_v27  ;;  %3652 = vrot.lane.b32.xlu0 %v3581_v46, %s8799_s30  ;;  %v3826_v46 = vrot.slane %v10701_v38, 5  ;;  %v3736_v27 = vld [vmem:[#allocation2 + $0x54] sm:$0xe]  ;;  %v3875_v38 = vrot.slane %v3746_v45, 5 }
 0x2dc   : > { %3642 = vrot.lane.b32.xlu1 %v3519_v16, %s8799_s30  ;;  %v3561_v16 = vor.u32 %v3560_v63, %v10674_v42  ;;  %v8440_v24 = vrot.slane %v3736_v27, 9  ;;  %v3856_v63 = vrot.slane %v3854_v49, 4  ;;  %v3885_v27 = vrot.slane %v3750_v55, 5 }
 0x2dd   : > { %v3072_v39 = vpop.permute.xlu0 %3071  ;;  %v3827_v19 = vsel %vm9676_vm13, %v8436_v58, %v3826_v46  ;;  %v3876_v33 = vsel %vm9676_vm13, %v8443_v43, %v3875_v38  ;;  %v3742_v58 = vld [vmem:[#allocation2 + $0x6c] sm:$0xe] }
 0x2de   : > { %v3062_v47 = vpop.permute.xlu1 %3061  ;;  %3148 = vst.msk [vmem:[#allocation4 + $0x50] sm:$0xf] %vm3127_vm4, %v3072_v39  ;;  %v3562_v8 = vrot.slane %v3561_v16, 4  ;;  %v3882_v16 = vrot.slane %v10766_v35, 5  ;;  %v8715_v35 = vld [vmem:[%s12342_s1 + $0x20] sm:$0xff] }
 0x2df   : > { %3143 = vst.msk [vmem:[#allocation4 + $0x3c] sm:$0xf] %vm3127_vm4, %v3062_v47  ;;  %v3855_v47 = vsel %vm9676_vm13, %v8440_v24, %v3854_v49  ;;  %v3849_v24 = vrot.slane %v3847_v61, 4 }
 0x2e0   : > { %3632 = vrot.lane.b32.xlu2 %v3461_v21, %s8799_s30  ;;  %v3729_v21 = vld [vmem:[#allocation2 + $0x38] sm:$0x1]  ;;  %v3567_v60 = vsel %vm8874_vm3, %v3562_v8, %v3566_v11  ;;  %v8442_v8 = vrot.slane %v3742_v58, 9 }
 0x2e1   : > { %v3836_v39 = vrot.slane %v3729_v21, 5  ;;  %v3735_v21 = vld [vmem:[#allocation2 + $0x50] sm:$0x1] }
 0x2e2   : > { %v3070_v48 = vpop.permute.xlu2 %3069 }
 0x2e3   : > { %3147 = vst.msk [vmem:[#allocation4 + $0x4c] sm:$0xf] %vm3127_vm4, %v3070_v48  ;;  %3931 = vrot.lane.b32.xlu0 %v3823_v40, %s8800_s6  ;;  %v3837_v53 = vsel %vm9676_vm13, %v3835_v34, %v3836_v39  ;;  %v8435_v40 = vrot.slane %v3721_v29, 9 }
 0x2e4   : > { %3648 = vrot.lane.b32.xlu1 %v3557_v4, %s8799_s30  ;;  %v3733_v4 = vld [vmem:[#allocation2 + $0x48] sm:$0xe] }
 0x2e5   : > { %v3078_v2 = vpop.permute.xlu0 %3077  ;;  %v3820_v7 = vsel %vm9676_vm13, %v8435_v40, %v3819_v32  ;;  %v8439_v22 = vrot.slane %v3733_v4, 9  ;;  %v3829_v32 = vrot.slane %v3726_v54, 5  ;;  %v3752_v4 = vld [vmem:[#allocation2 + $0x94] sm:$0xf] }
 0x2e6   : > { %v3068_v25 = vpop.permute.xlu1 %3067  ;;  %3151 = vst.msk [vmem:[#allocation4 + $0x5c] sm:$0xf] %vm3127_vm4, %v3078_v2  ;;  %v3828_v2 = vrot.slane %v3826_v46, 4  ;;  %v3743_v46 = vld [vmem:[#allocation2 + $0x70] sm:$0xf] }
 0x2e7   : > { %3146 = vst.msk [vmem:[#allocation4 + $0x48] sm:$0xf] %vm3127_vm4, %v3068_v25  ;;  %v3848_v59 = vsel %vm9676_vm13, %v8439_v22, %v3847_v61  ;;  %v3738_v25 = vld [vmem:[#allocation2 + $0x5c] sm:$0x1]  ;;  %v3868_v11 = vrot.slane %v3743_v46, 5 }
 0x2e8   : > { %3638 = vrot.lane.b32.xlu2 %v3495_v36, %s8799_s30  ;;  %v3865_v36 = vsel %vm9676_vm13, %v3863_v62, %v3864_v28  ;;  %v3857_v56 = vrot.slane %v3738_v25, 5  ;;  %v3744_v22 = vld [vmem:[#allocation2 + $0x74] sm:$0x1]  ;;  %v3755_v25 = vld [vmem:[#allocation2 + $0xa0] sm:$0xf]  ;;  %v8714_v46 = vld [vmem:[%s12342_s1 + $0x18] sm:$0xff] }
 0x2e9   : > { %v3869_v31 = vsel %vm9676_vm13, %v8442_v8, %v3868_v11  ;;  %v3870_v61 = vrot.slane %v3868_v11, 4  ;;  %v3896_v43 = vrot.slane %v3755_v25, 5  ;;  %v8713_v11 = vld [vmem:[%s12342_s1 + $0x10] sm:$0xff] }
 0x2ea   : > { %v3076_v15 = vpop.permute.xlu2 %3075 }
 0x2eb   : > { %3150 = vst.msk [vmem:[#allocation4 + $0x58] sm:$0xf] %vm3127_vm4, %v3076_v15  ;;  %3937 = vrot.lane.b32.xlu0 %v3834_v57, %s8800_s6 }
 0x2ec   : > { %3654 = vrot.lane.b32.xlu1 %v3591_v5, %s8799_s30  ;;  %v3830_v5 = vsel %vm9676_vm13, %v3828_v2, %v3829_v32  ;;  %v3748_v32 = vld [vmem:[#allocation2 + $0x84] sm:$0xe] }
 0x2ed   : > { %v3084_v0 = vpop.permute.xlu0 %3083 }
 0x2ee   : > { %v3074_v14 = vpop.permute.xlu1 %3073  ;;  %3154 = vst.msk [vmem:[#allocation4 + $0x68] sm:$0xf] %vm3127_vm4, %v3084_v0 }
 0x2ef   : > { %3149 = vst.msk [vmem:[#allocation4 + $0x54] sm:$0xf] %vm3127_vm4, %v3074_v14  ;;  %v3884_v14 = vrot.slane %v3882_v16, 4 }
 0x2f0   : > { %3644 = vrot.lane.b32.xlu2 %v3533_v3, %s8799_s30  ;;  %v3858_v3 = vsel %vm9676_vm13, %v3856_v63, %v3857_v56  ;;  %v3756_v56 = vld [vmem:[#allocation2 + $0xa4] sm:$0x1] }
 0x2f1   : > { %v3886_v12 = vsel %vm9676_vm13, %v3884_v14, %v3885_v27  ;;  %v3758_v27 = vld [vmem:[#allocation2 + $0xac] sm:$0xf] }
 0x2f2   : > { %v3082_v51 = vpop.permute.xlu2 %3081 }
 0x2f3   : > { %3153 = vst.msk [vmem:[#allocation4 + $0x64] sm:$0xf] %vm3127_vm4, %v3082_v51  ;;  %3943 = vrot.lane.b32.xlu0 %v3844_v50, %s8800_s6 }
 0x2f4   : > { %3933 = vrot.lane.b32.xlu1 %v3827_v19, %s8800_s6  ;;  %v3841_v19 = vsel %vm9676_vm13, %v8438_v44, %v3840_v1 }
 0x2f5   : > { %v3090_v17 = vpop.permute.xlu0 %3089 }
 0x2f6   : > { %v3080_v42 = vpop.permute.xlu1 %3079  ;;  %3157 = vst.msk [vmem:[#allocation4 + $0x74] sm:$0xf] %vm3127_vm4, %v3090_v17  ;;  %v3747_v17 = vld [vmem:[#allocation2 + $0x80] sm:$0x1] }
 0x2f7   : > { %3152 = vst.msk [vmem:[#allocation4 + $0x60] sm:$0xf] %vm3127_vm4, %v3080_v42  ;;  %v3877_v42 = vrot.slane %v3875_v38, 4  ;;  %v3878_v29 = vrot.slane %v3747_v17, 5 }
 0x2f8   : > { %3650 = vrot.lane.b32.xlu2 %v3567_v60, %s8799_s30  ;;  %v3850_v60 = vrot.slane %v3735_v21, 5  ;;  %v3903_v21 = vrot.slane %v3758_v27, 5 }
 0x2fa   : > { %v3088_v41 = vpop.permute.xlu2 %3087  ;;  %v3851_v39 = vsel %vm9676_vm13, %v3849_v24, %v3850_v60  ;;  %v3905_v24 = vrot.slane %v3903_v21, 4 }
 0x2fb   : > { %3156 = vst.msk [vmem:[#allocation4 + $0x70] sm:$0xf] %vm3127_vm4, %v3088_v41  ;;  %3949 = vrot.lane.b32.xlu0 %v3855_v47, %s8800_s6  ;;  %v3739_v47 = vld [vmem:[#allocation2 + $0x60] sm:$0xe]  ;;  %v3751_v41 = vld [vmem:[#allocation2 + $0x90] sm:$0xe] }
 0x2fc   : > { %3939 = vrot.lane.b32.xlu1 %v3837_v53, %s8800_s6  ;;  %v3879_v53 = vsel %vm9676_vm13, %v3877_v42, %v3878_v29  ;;  %v8441_v40 = vrot.slane %v3739_v47, 9  ;;  %v8445_v28 = vrot.slane %v3751_v41, 9  ;;  %v3760_v47 = vld [vmem:[#allocation2 + $0xb4] sm:$0xe] }
 0x2fd   : > { %v3593_v48 = vpop.permute.xlu0 %3592 }
 0x2fe   : > { %v3086_v26 = vpop.permute.xlu1 %3085  ;;  %3689 = vst.msk [vmem:[#allocation4] sm:$0xf] %vm3688_vm7, %v3593_v48  ;;  %v3862_v62 = vsel %vm9676_vm13, %v8441_v40, %v3861_v23  ;;  %v8448_v40 = vrot.slane %v3760_v47, 9 }
 0x2ff   : > { %3155 = vst.msk [vmem:[#allocation4 + $0x6c] sm:$0xf] %vm3127_vm4, %v3086_v26  ;;  %v3871_v26 = vrot.slane %v3744_v22, 5 }
 0x300   : > { %3929 = vrot.lane.b32.xlu2 %v3820_v7, %s8800_s6  ;;  %v3889_v7 = vrot.slane %v3752_v4, 5 }
 0x302   : > { %v3094_v30 = vpop.permute.xlu2 %3093  ;;  %v3890_v54 = vsel %vm9676_vm13, %v8445_v28, %v3889_v7  ;;  %v3891_v55 = vrot.slane %v3889_v7, 4  ;;  %v3757_v7 = vld [vmem:[#allocation2 + $0xa8] sm:$0xe] }
 0x303   : > { %3159 = vst.msk [vmem:[#allocation4 + $0x7c] sm:$0xf] %vm3127_vm4, %v3094_v30  ;;  %3955 = vrot.lane.b32.xlu0 %v3865_v36, %s8800_s6  ;;  %v8444_v30 = vrot.slane %v3748_v32, 9 }
 0x304   : > { %3945 = vrot.lane.b32.xlu1 %v3848_v59, %s8800_s6  ;;  %v3872_v59 = vsel %vm9676_vm13, %v3870_v61, %v3871_v26 }
 0x305   : > { %v3599_v57 = vpop.permute.xlu0 %3598  ;;  %v3883_v38 = vsel %vm9676_vm13, %v8444_v30, %v3882_v16  ;;  %v3753_v16 = vld [vmem:[#allocation2 + $0x98] sm:$0x1] }
 0x306   : > { %v3092_v15 = vpop.permute.xlu1 %3091  ;;  %3692 = vst.msk [vmem:[#allocation4 + $0xc] sm:$0xf] %vm3688_vm7, %v3599_v57  ;;  %v8716_v57 = vld [vmem:[%s12342_s1 + $0x28] sm:$0xff]  ;;  %v3892_v14 = vrot.slane %v3753_v16, 5 }
 0x307   : > { %3158 = vst.msk [vmem:[#allocation4 + $0x78] sm:$0xf] %vm3127_vm4, %v3092_v15  ;;  %v3898_v15 = vrot.slane %v3896_v43, 4  ;;  %4256 = vmatpush.bf16.msra.mxu0 %v8716_v57  ;;  %8745 = vmatpush.bf16.msra.mxu2 %v8716_v57  ;;  %vm7956_vm4 = vcmask 585216  }
 0x308   : > { %3935 = vrot.lane.b32.xlu2 %v3830_v5, %s8800_s6  ;;  %v3754_v5 = vld [vmem:[#allocation2 + $0x9c] sm:$0xe]  ;;  %v3893_v8 = vsel %vm9676_vm13, %v3891_v55, %v3892_v14 }
 0x309   : > { %v8446_v63 = vrot.slane %v3754_v5, 9 }
 0x30a   : > { %v3597_v0 = vpop.permute.xlu2 %3596 }
 0x30b   : > { %3691 = vst.msk [vmem:[#allocation4 + $0x8] sm:$0xf] %vm3688_vm7, %v3597_v0  ;;  %3961 = vrot.lane.b32.xlu0 %v3876_v33, %s8800_s6  ;;  %v3899_v33 = vrot.slane %v3756_v56, 5  ;;  %v3897_v44 = vsel %vm9676_vm13, %v8446_v63, %v3896_v43  ;;  %4257 = vmatpush.bf16.msra.mxu0 %v8715_v35  ;;  %v3762_v63 = vld [vmem:[#allocation2 + $0xbc] sm:$0x1] }
 0x30c   : > { %3951 = vrot.lane.b32.xlu1 %v3858_v3, %s8800_s6  ;;  %8746 = vmatpush.bf16.msra.mxu2 %v8715_v35 }
 0x30d   : > { %v3605_v50 = vpop.permute.xlu0 %3604  ;;  %v3900_v0 = vsel %vm9676_vm13, %v3898_v15, %v3899_v33  ;;  %v3913_v15 = vrot.slane %v3762_v63, 5 }
 0x30e   : > { %v3595_v51 = vpop.permute.xlu1 %3594  ;;  %3695 = vst.msk [vmem:[#allocation4 + $0x18] sm:$0xf] %vm3688_vm7, %v3605_v50 }
 0x30f   : > { %3690 = vst.msk [vmem:[#allocation4 + $0x4] sm:$0xf] %vm3688_vm7, %v3595_v51  ;;  %4258 = vmatpush.bf16.msra.mxu0 %v8714_v46 }
 0x310   : > { %3941 = vrot.lane.b32.xlu2 %v3841_v19, %s8800_s6  ;;  %8747 = vmatpush.bf16.msra.mxu2 %v8714_v46 }
 0x312   : > { %v3603_v1 = vpop.permute.xlu2 %3602 }
 0x313   : > { %3694 = vst.msk [vmem:[#allocation4 + $0x14] sm:$0xf] %vm3688_vm7, %v3603_v1  ;;  %3967 = vrot.lane.b32.xlu0 %v3886_v12, %s8800_s6  ;;  %4259 = vmatpush.bf16.msra.mxu0 %v8713_v11  ;;  %v8712_v12 = vld [vmem:[%s12342_s1 + $0x8] sm:$0xff] }
 0x314   : > { %3957 = vrot.lane.b32.xlu1 %v3869_v31, %s8800_s6  ;;  %8748 = vmatpush.bf16.msra.mxu2 %v8713_v11  ;;  %v3759_v31 = vld [vmem:[#allocation2 + $0xb0] sm:$0x1] }
 0x315   : > { %v3611_v34 = vpop.permute.xlu0 %3610  ;;  %v3906_v60 = vrot.slane %v3759_v31, 5 }
 0x316   : > { %v3601_v49 = vpop.permute.xlu1 %3600  ;;  %3698 = vst.msk [vmem:[#allocation4 + $0x24] sm:$0xf] %vm3688_vm7, %v3611_v34 }
 0x317   : > { %3693 = vst.msk [vmem:[#allocation4 + $0x10] sm:$0xf] %vm3688_vm7, %v3601_v49  ;;  %4260 = vmatpush.bf16.msra.mxu0 %v8712_v12  ;;  %v3907_v34 = vsel %vm9676_vm13, %v3905_v24, %v3906_v60 }
 0x318   : > { %3947 = vrot.lane.b32.xlu2 %v3851_v39, %s8800_s6  ;;  %8749 = vmatpush.bf16.msra.mxu2 %v8712_v12  ;;  %v8711_v39 = vld [vmem:[%s12342_s1] sm:$0xff] }
 0x31a   : > { %v3609_v20 = vpop.permute.xlu2 %3608 }
 0x31b   : > { %3697 = vst.msk [vmem:[#allocation4 + $0x20] sm:$0xf] %vm3688_vm7, %v3609_v20  ;;  %3973 = vrot.lane.b32.xlu0 %v3897_v44, %s8800_s6  ;;  %4261 = vmatpush.bf16.msra.mxu0 %v8711_v39 }
 0x31c   : > { %3963 = vrot.lane.b32.xlu1 %v3879_v53, %s8800_s6  ;;  %8750 = vmatpush.bf16.msra.mxu2 %v8711_v39  ;;  %v3761_v53 = vld [vmem:[#allocation2 + $0xb8] sm:$0xf] }
 0x31d   : > { %v3617_v9 = vpop.permute.xlu0 %3616  ;;  %v3910_v20 = vrot.slane %v3761_v53, 5  ;;  %v12361_v53 = vmov 0  }
 0x31e   : > { %v3607_v48 = vpop.permute.xlu1 %3606  ;;  %3701 = vst.msk [vmem:[#allocation4 + $0x30] sm:$0xf] %vm3688_vm7, %v3617_v9 }
 0x31f   : > { %3696 = vst.msk [vmem:[#allocation4 + $0x1c] sm:$0xf] %vm3688_vm7, %v3607_v48  ;;  %v3911_v4 = vsel %vm9676_vm13, %v8448_v40, %v3910_v20  ;;  %v8447_v48 = vrot.slane %v3757_v7, 9  ;;  %v3912_v56 = vrot.slane %v3910_v20, 4 }
 0x320   : > { %3953 = vrot.lane.b32.xlu2 %v3862_v62, %s8800_s6  ;;  %287 = vst.msk [vmem:[#allocation3 + $0xc] sm:$0xf] %vm282_vm10, %v12361_v53 }
 0x321   : > { %v3904_v26 = vsel %vm9676_vm13, %v8447_v48, %v3903_v21  ;;  %v3914_v33 = vsel %vm9676_vm13, %v3912_v56, %v3913_v15  ;;  %283 = vst.msk [vmem:[#allocation3] sm:$0xf] %vm282_vm10, %v12361_v53 }
 0x322   : > { %v3615_v36 = vpop.permute.xlu2 %3614  ;;  %284 = vst.msk [vmem:[#allocation3 + $0x4] sm:$0xf] %vm282_vm10, %v12361_v53 }
 0x323   : > { %3700 = vst.msk [vmem:[#allocation4 + $0x2c] sm:$0xf] %vm3688_vm7, %v3615_v36  ;;  %3979 = vrot.lane.b32.xlu0 %v3907_v34, %s8800_s6  ;;  %v3764_v36 = vld [vmem:[#allocation2 + $0xc4] sm:$0xf] }
 0x324   : > { %3969 = vrot.lane.b32.xlu1 %v3890_v54, %s8800_s6  ;;  %v3763_v54 = vld [vmem:[#allocation2 + $0xc0] sm:$0xe]  ;;  %288 = vst.msk [vmem:[#allocation3 + $0x10] sm:$0xf] %vm282_vm10, %v12361_v53 }
 0x325   : > { %v3623_v23 = vpop.permute.xlu0 %3622  ;;  %v8449_v13 = vrot.slane %v3763_v54, 9  ;;  %290 = vst.msk [vmem:[#allocation3 + $0x18] sm:$0xf] %vm282_vm10, %v12361_v53 }
 0x326   : > { %v3613_v2 = vpop.permute.xlu1 %3612  ;;  %3704 = vst.msk [vmem:[#allocation4 + $0x3c] sm:$0xf] %vm3688_vm7, %v3623_v23  ;;  %v3917_v23 = vrot.slane %v3764_v36, 5 }
 0x327   : > { %3699 = vst.msk [vmem:[#allocation4 + $0x28] sm:$0xf] %vm3688_vm7, %v3613_v2 }
 0x328   : > { %3959 = vrot.lane.b32.xlu2 %v3872_v59, %s8800_s6  ;;  %v3765_v59 = vld [vmem:[#allocation2 + $0xc8] sm:$0x1]  ;;  %v3918_v18 = vsel %vm9676_vm13, %v8449_v13, %v3917_v23  ;;  %v3919_v30 = vrot.slane %v3917_v23, 4  ;;  %291 = vst.msk [vmem:[#allocation3 + $0x1c] sm:$0xf] %vm282_vm10, %v12361_v53 }
 0x329   : > { %v3920_v2 = vrot.slane %v3765_v59, 5  ;;  %293 = vst.msk [vmem:[#allocation3 + $0x24] sm:$0xf] %vm282_vm10, %v12361_v53  ;;  %v4908_v7 = vld [vmem:[#allocation3] sm:$0xf] }
 0x32a   : > { %v3621_v45 = vpop.permute.xlu2 %3620  ;;  %294 = vst.msk [vmem:[#allocation3 + $0x28] sm:$0xf] %vm282_vm10, %v12361_v53  ;;  %v4909_v59 = vld [vmem:[#allocation3 + $0x4] sm:$0xf] }
 0x32b   : > { %3703 = vst.msk [vmem:[#allocation4 + $0x38] sm:$0xf] %vm3688_vm7, %v3621_v45  ;;  %3985 = vrot.lane.b32.xlu0 %v3918_v18, %s8800_s6  ;;  %v3921_v25 = vsel %vm9676_vm13, %v3919_v30, %v3920_v2  ;;  %v4966_v18 = vshll.u32 %v4909_v59, 16  ;;  %v10991_v30 = vld [vmem:[%s12343_s2] ss:$0 sm:$0xff] }
 0x32c   : > { %3975 = vrot.lane.b32.xlu1 %v3900_v0, %s8800_s6  ;;  %296 = vst.msk [vmem:[#allocation3 + $0x30] sm:$0xf] %vm282_vm10, %v12361_v53 }
 0x32d   : > { %v3629_v37 = vpop.permute.xlu0 %3628  ;;  %297 = vst.msk [vmem:[#allocation3 + $0x34] sm:$0xf] %vm282_vm10, %v12361_v53 }
 0x32e   : > { %v3619_v3 = vpop.permute.xlu1 %3618  ;;  %3707 = vst.msk [vmem:[#allocation4 + $0x48] sm:$0xf] %vm3688_vm7, %v3629_v37 }
 0x32f   : > { %3702 = vst.msk [vmem:[#allocation4 + $0x34] sm:$0xf] %vm3688_vm7, %v3619_v3 }
 0x330   : > { %3965 = vrot.lane.b32.xlu2 %v3883_v38, %s8800_s6  ;;  %299 = vst.msk [vmem:[#allocation3 + $0x3c] sm:$0xf] %vm282_vm10, %v12361_v53 }
 0x331   : > { %300 = vst.msk [vmem:[#allocation3 + $0x40] sm:$0xf] %vm282_vm10, %v12361_v53 }
 0x332   : > { %v3627_v58 = vpop.permute.xlu2 %3626  ;;  %302 = vst.msk [vmem:[#allocation3 + $0x48] sm:$0xf] %vm282_vm10, %v12361_v53 }
 0x333   : > { %3706 = vst.msk [vmem:[#allocation4 + $0x44] sm:$0xf] %vm3688_vm7, %v3627_v58 }
 0x334   : > { %3981 = vrot.lane.b32.xlu1 %v3911_v4, %s8800_s6  ;;  %303 = vst.msk [vmem:[#allocation3 + $0x4c] sm:$0xf] %vm282_vm10, %v12361_v53 }
 0x335   : > { %v3635_v50 = vpop.permute.xlu0 %3634  ;;  %305 = vst.msk [vmem:[#allocation3 + $0x54] sm:$0xf] %vm282_vm10, %v12361_v53 }
 0x336   : > { %v3625_v19 = vpop.permute.xlu1 %3624  ;;  %3710 = vst.msk [vmem:[#allocation4 + $0x54] sm:$0xf] %vm3688_vm7, %v3635_v50 }
 0x337   : > { %3705 = vst.msk [vmem:[#allocation4 + $0x40] sm:$0xf] %vm3688_vm7, %v3625_v19 }
 0x338   : > { %3971 = vrot.lane.b32.xlu2 %v3893_v8, %s8800_s6  ;;  %306 = vst.msk [vmem:[#allocation3 + $0x58] sm:$0xf] %vm282_vm10, %v12361_v53 }
 0x339   : > { %308 = vst.msk [vmem:[#allocation3 + $0x60] sm:$0xf] %vm282_vm10, %v12361_v53 }
 0x33a   : > { %v3633_v51 = vpop.permute.xlu2 %3632  ;;  %309 = vst.msk [vmem:[#allocation3 + $0x64] sm:$0xf] %vm282_vm10, %v12361_v53 }
 0x33b   : > { %3709 = vst.msk [vmem:[#allocation4 + $0x50] sm:$0xf] %vm3688_vm7, %v3633_v51 }
 0x33c   : > { %3987 = vrot.lane.b32.xlu1 %v3921_v25, %s8800_s6  ;;  %311 = vst.msk [vmem:[#allocation3 + $0x6c] sm:$0xf] %vm282_vm10, %v12361_v53 }
 0x33d   : > { %v3641_v1 = vpop.permute.xlu0 %3640  ;;  %312 = vst.msk [vmem:[#allocation3 + $0x70] sm:$0xf] %vm282_vm10, %v12361_v53 }
 0x33e   : > { %v3631_v17 = vpop.permute.xlu1 %3630  ;;  %3713 = vst.msk [vmem:[#allocation4 + $0x60] sm:$0xf] %vm3688_vm7, %v3641_v1 }
 0x33f   : > { %3708 = vst.msk [vmem:[#allocation4 + $0x4c] sm:$0xf] %vm3688_vm7, %v3631_v17 }
 0x340   : > { %3977 = vrot.lane.b32.xlu2 %v3904_v26, %s8800_s6  ;;  %314 = vst.msk [vmem:[#allocation3 + $0x78] sm:$0xf] %vm282_vm10, %v12361_v53  ;;  %v3768_v26 = vld [vmem:[#allocation2 + $0xd4] sm:$0x1] }
 0x341   : > { %315 = vst.msk [vmem:[#allocation3 + $0x7c] sm:$0xf] %vm282_vm10, %v12361_v53  ;;  %v3927_v36 = vrot.slane %v3768_v26, 5 }
 0x342   : > { %v3639_v42 = vpop.permute.xlu2 %3638  ;;  %317 = vst.msk [vmem:[#allocation3 + $0x84] sm:$0xf] %vm282_vm10, %v12361_v53 }
 0x343   : > { %3712 = vst.msk [vmem:[#allocation4 + $0x5c] sm:$0xf] %vm3688_vm7, %v3639_v42 }
 0x344   : > { %318 = vst.msk [vmem:[#allocation3 + $0x88] sm:$0xf] %vm282_vm10, %v12361_v53 }
 0x345   : > { %v3647_v29 = vpop.permute.xlu0 %3646  ;;  %320 = vst.msk [vmem:[#allocation3 + $0x90] sm:$0xf] %vm282_vm10, %v12361_v53 }
 0x346   : > { %v3637_v49 = vpop.permute.xlu1 %3636  ;;  %3716 = vst.msk [vmem:[#allocation4 + $0x6c] sm:$0xf] %vm3688_vm7, %v3647_v29 }
 0x347   : > { %3711 = vst.msk [vmem:[#allocation4 + $0x58] sm:$0xf] %vm3688_vm7, %v3637_v49 }
 0x348   : > { %3983 = vrot.lane.b32.xlu2 %v3914_v33, %s8800_s6  ;;  %321 = vst.msk [vmem:[#allocation3 + $0x94] sm:$0xf] %vm282_vm10, %v12361_v53 }
 0x349   : > { %323 = vst.msk [vmem:[#allocation3 + $0x9c] sm:$0xf] %vm282_vm10, %v12361_v53 }
 0x34a   : > { %v3645_v41 = vpop.permute.xlu2 %3644  ;;  %324 = vst.msk [vmem:[#allocation3 + $0xa0] sm:$0xf] %vm282_vm10, %v12361_v53 }
 0x34b   : > { %3715 = vst.msk [vmem:[#allocation4 + $0x68] sm:$0xf] %vm3688_vm7, %v3645_v41 }
 0x34c   : > { %326 = vst.msk [vmem:[#allocation3 + $0xa8] sm:$0xf] %vm282_vm10, %v12361_v53 }
 0x34d   : > { %v3653_v9 = vpop.permute.xlu0 %3652  ;;  %327 = vst.msk [vmem:[#allocation3 + $0xac] sm:$0xf] %vm282_vm10, %v12361_v53 }
 0x34e   : > { %v3643_v62 = vpop.permute.xlu1 %3642  ;;  %3719 = vst.msk [vmem:[#allocation4 + $0x78] sm:$0xf] %vm3688_vm7, %v3653_v9 }
 0x34f   : > { %3714 = vst.msk [vmem:[#allocation4 + $0x64] sm:$0xf] %vm3688_vm7, %v3643_v62 }
 0x350   : > { %329 = vst.msk [vmem:[#allocation3 + $0xb4] sm:$0xf] %vm282_vm10, %v12361_v53 }
 0x351   : > { %330 = vst.msk [vmem:[#allocation3 + $0xb8] sm:$0xf] %vm282_vm10, %v12361_v53 }
 0x352   : > { %v3651_v28 = vpop.permute.xlu2 %3650  ;;  %332 = vst.msk [vmem:[#allocation3 + $0xc0] sm:$0xf] %vm282_vm10, %v12361_v53 }
 0x353   : > { %3718 = vst.msk [vmem:[#allocation4 + $0x74] sm:$0xf] %vm3688_vm7, %v3651_v28  ;;  %v3767_v28 = vld [vmem:[#allocation2 + $0xd0] sm:$0xf] }
 0x354   : > { %v3924_v48 = vrot.slane %v3767_v28, 5  ;;  %333 = vst.msk [vmem:[#allocation3 + $0xc4] sm:$0xf] %vm282_vm10, %v12361_v53 }
 0x355   : > { %v3932_v22 = vpop.permute.xlu0 %3931  ;;  %335 = vst.msk [vmem:[#allocation3 + $0xcc] sm:$0xf] %vm282_vm10, %v12361_v53 }
 0x356   : > { %v3649_v61 = vpop.permute.xlu1 %3648  ;;  %4027 = vst.msk [vmem:[#allocation4 + $0x4] sm:$0xf] %vm4025_vm8, %v3932_v22  ;;  %v4957_v22 = vshrl.u32 %v4908_v7, 16  ;;  %v3926_v54 = vrot.slane %v3924_v48, 4 }
 0x357   : > { %3717 = vst.msk [vmem:[#allocation4 + $0x70] sm:$0xf] %vm3688_vm7, %v3649_v61  ;;  %v4960_v61 = vshll.u32 %v4908_v7, 16 }
 0x358   : > { %v4959_v13 = vrot.slane %v4957_v22, 4  ;;  %v3928_v2 = vsel %vm9676_vm13, %v3926_v54, %v3927_v36  ;;  %336 = vst.msk [vmem:[#allocation3 + $0xd0] sm:$0xf] %vm282_vm10, %v12361_v53 }
 0x359   : > { %v4962_v23 = vrot.slane %v4960_v61, 5  ;;  %3991 = vrot.lane.b32.xlu0 %v3928_v2, %s8800_s6  ;;  %289 = vst.msk [vmem:[#allocation3 + $0x14] sm:$0x1] %vm285_vm11, %v12361_v53 }
 0x35a   : > { %v3930_v32 = vpop.permute.xlu2 %3929  ;;  %286 = vst.msk [vmem:[#allocation3 + $0x8] sm:$0x1] %vm285_vm11, %v12361_v53 }
 0x35b   : > { %4026 = vst.msk [vmem:[#allocation4] sm:$0xf] %vm4025_vm8, %v3930_v32  ;;  %v4963_v32 = vor.u32 %v4962_v23, %v4959_v13 }
 0x35c   : > { %292 = vst.msk [vmem:[#allocation3 + $0x20] sm:$0x1] %vm285_vm11, %v12361_v53 }
 0x35d   : > { %v3938_v45 = vpop.permute.xlu0 %3937  ;;  %v4964_v25 = vrot.slane %v4963_v32, 4  ;;  %295 = vst.msk [vmem:[#allocation3 + $0x2c] sm:$0x1] %vm285_vm11, %v12361_v53  ;;  %v4739_v32 = vld [vmem:[#allocation3 + $0x18] sm:$0xf] }
 0x35e   : > { %v3655_v43 = vpop.permute.xlu1 %3654  ;;  %4030 = vst.msk [vmem:[#allocation4 + $0x10] sm:$0xf] %vm4025_vm8, %v3938_v45  ;;  %v4968_v45 = vrot.slane %v4966_v18, 5 }
 0x35f   : > { %3720 = vst.msk [vmem:[#allocation4 + $0x7c] sm:$0xf] %vm3688_vm7, %v3655_v43 }
 0x360   : > { %v4969_v43 = vsel %vm8874_vm3, %v4964_v25, %v4968_v45  ;;  %298 = vst.msk [vmem:[#allocation3 + $0x38] sm:$0x1] %vm285_vm11, %v12361_v53 }
 0x361   : > { %5340 = vrot.lane.b32.xlu1 %v4969_v43, %s8794_s25  ;;  %301 = vst.msk [vmem:[#allocation3 + $0x44] sm:$0x1] %vm285_vm11, %v12361_v53 }
 0x362   : > { %v8695_v57 = vld [vmem:[#allocation4] sm:$0xff]  ;;  %v3936_v5 = vpop.permute.xlu2 %3935  ;;  %304 = vst.msk [vmem:[#allocation3 + $0x50] sm:$0x1] %vm285_vm11, %v12361_v53 }
 0x363   : > { %4029 = vst.msk [vmem:[#allocation4 + $0xc] sm:$0xf] %vm4025_vm8, %v3936_v5  ;;  %4262 = vmatmul.bf16.vlgmr.msra.gmra.mxu0 %v8695_v57  ;;  %v3766_v5 = vld [vmem:[#allocation2 + $0xcc] sm:$0xe] }
 0x364   : > { %v8450_v56 = vrot.slane %v3766_v5, 9  ;;  %307 = vst.msk [vmem:[#allocation3 + $0x5c] sm:$0x1] %vm285_vm11, %v12361_v53 }
 0x365   : > { %v3944_v37 = vpop.permute.xlu0 %3943  ;;  %310 = vst.msk [vmem:[#allocation3 + $0x68] sm:$0x1] %vm285_vm11, %v12361_v53 }
 0x366   : > { %v3934_v38 = vpop.permute.xlu1 %3933  ;;  %4033 = vst.msk [vmem:[#allocation4 + $0x1c] sm:$0xf] %vm4025_vm8, %v3944_v37  ;;  %v3925_v33 = vsel %vm9676_vm13, %v8450_v56, %v3924_v48 }
 0x367   : > { %4028 = vst.msk [vmem:[#allocation4 + $0x8] sm:$0xf] %vm4025_vm8, %v3934_v38  ;;  %v4970_v38 = vshrl.u32 %v4909_v59, 16  ;;  %3989 = vrot.lane.b32.xlu2 %v3925_v33, %s8800_s6 }
 0x368   : > { %313 = vst.msk [vmem:[#allocation3 + $0x74] sm:$0x1] %vm285_vm11, %v12361_v53 }
 0x369   : > { %316 = vst.msk [vmem:[#allocation3 + $0x80] sm:$0x1] %vm285_vm11, %v12361_v53 }
 0x36a   : > { %v3942_v3 = vpop.permute.xlu2 %3941  ;;  %319 = vst.msk [vmem:[#allocation3 + $0x8c] sm:$0x1] %vm285_vm11, %v12361_v53 }
 0x36b   : > { %4032 = vst.msk [vmem:[#allocation4 + $0x18] sm:$0xf] %vm4025_vm8, %v3942_v3 }
 0x36c   : > { %322 = vst.msk [vmem:[#allocation3 + $0x98] sm:$0x1] %vm285_vm11, %v12361_v53 }
 0x36d   : > { %v3950_v44 = vpop.permute.xlu0 %3949  ;;  %325 = vst.msk [vmem:[#allocation3 + $0xa4] sm:$0x1] %vm285_vm11, %v12361_v53 }
 0x36e   : > { %v3940_v0 = vpop.permute.xlu1 %3939  ;;  %4036 = vst.msk [vmem:[#allocation4 + $0x28] sm:$0xf] %vm4025_vm8, %v3950_v44  ;;  %v8696_v35 = vld [vmem:[#allocation4 + $0x8] sm:$0xff]  ;;  %v4972_v44 = vrot.slane %v4970_v38, 4 }
 0x36f   : > { %4031 = vst.msk [vmem:[#allocation4 + $0x14] sm:$0xf] %vm4025_vm8, %v3940_v0  ;;  %v4910_v0 = vld [vmem:[#allocation3 + $0x8] sm:$0x1] }
 0x370   : > { %328 = vst.msk [vmem:[#allocation3 + $0xb0] sm:$0x1] %vm285_vm11, %v12361_v53 }
 0x371   : > { %331 = vst.msk [vmem:[#allocation3 + $0xbc] sm:$0x1] %vm285_vm11, %v12361_v53 }
 0x372   : > { %v3948_v58 = vpop.permute.xlu2 %3947  ;;  %v8698_v12 = vld [vmem:[#allocation4 + $0x18] sm:$0xff]  ;;  %334 = vst.msk [vmem:[#allocation3 + $0xc8] sm:$0x1] %vm285_vm11, %v12361_v53 }
 0x373   : > { %4035 = vst.msk [vmem:[#allocation4 + $0x24] sm:$0xf] %vm4025_vm8, %v3948_v58  ;;  %4267 = vmatmul.bf16.gmra.mxu0 %v8696_v35 }
 0x374   : > { %337 = vst.msk [vmem:[#allocation3 + $0xd4] sm:$0x1] %vm285_vm11, %v12361_v53 }
 0x375   : > { %v3956_v46 = vpop.permute.xlu0 %3955 }
 0x376   : > { %v3946_v16 = vpop.permute.xlu1 %3945  ;;  %4039 = vst.msk [vmem:[#allocation4 + $0x34] sm:$0xf] %vm4025_vm8, %v3956_v46  ;;  %v8697_v19 = vld [vmem:[#allocation4 + $0x10] sm:$0xff]  ;;  %v4973_v46 = vor.u32 %v4972_v44, %v4968_v45 }
 0x377   : > { %4034 = vst.msk [vmem:[#allocation4 + $0x20] sm:$0xf] %vm4025_vm8, %v3946_v16 }
 0x37a   : > { %v3954_v55 = vpop.permute.xlu2 %3953 }
 0x37b   : > { %4038 = vst.msk [vmem:[#allocation4 + $0x30] sm:$0xf] %vm4025_vm8, %v3954_v55  ;;  %v4976_v55 = vshll.u32 %v4910_v0, 16 }
 0x37d   : > { %v3962_v14 = vpop.permute.xlu0 %3961 }
 0x37e   : > { %v3952_v50 = vpop.permute.xlu1 %3951  ;;  %4042 = vst.msk [vmem:[#allocation4 + $0x40] sm:$0xf] %vm4025_vm8, %v3962_v14  ;;  %v8699_v17 = vld [vmem:[#allocation4 + $0x20] sm:$0xff] }
 0x37f   : > { %4037 = vst.msk [vmem:[#allocation4 + $0x2c] sm:$0xf] %vm4025_vm8, %v3952_v50 }
 0x382   : > { %v3960_v8 = vpop.permute.xlu2 %3959  ;;  %v8701_v41 = vld [vmem:[#allocation4 + $0x30] sm:$0xff] }
 0x383   : > { %4041 = vst.msk [vmem:[#allocation4 + $0x3c] sm:$0xf] %vm4025_vm8, %v3960_v8  ;;  %4272 = vmatmul.bf16.gmra.mxu0 %v8697_v19  ;;  %v4974_v19 = vrot.slane %v4973_v46, 4  ;;  %v4841_v8 = vld [vmem:[#allocation3 + $0xc8] sm:$0x1] }
 0x385   : > { %v3968_v11 = vpop.permute.xlu0 %3967 }
 0x386   : > { %v3958_v27 = vpop.permute.xlu1 %3957  ;;  %4045 = vst.msk [vmem:[#allocation4 + $0x4c] sm:$0xf] %vm4025_vm8, %v3968_v11  ;;  %v8700_v49 = vld [vmem:[#allocation4 + $0x28] sm:$0xff]  ;;  %v4730_v11 = vld [vmem:[#allocation3 + $0xc] sm:$0xf] }
 0x387   : > { %4040 = vst.msk [vmem:[#allocation4 + $0x38] sm:$0xf] %vm4025_vm8, %v3958_v27  ;;  %v4978_v27 = vrot.slane %v4976_v55, 5  ;;  %v4743_v55 = vld [vmem:[#allocation3 + $0x20] sm:$0x1] }
 0x38a   : > { %v3966_v51 = vpop.permute.xlu2 %3965 }
 0x38b   : > { %4044 = vst.msk [vmem:[#allocation4 + $0x48] sm:$0xf] %vm4025_vm8, %v3966_v51 }
 0x38d   : > { %v3974_v1 = vpop.permute.xlu0 %3973 }
 0x38e   : > { %v3964_v21 = vpop.permute.xlu1 %3963  ;;  %4048 = vst.msk [vmem:[#allocation4 + $0x58] sm:$0xf] %vm4025_vm8, %v3974_v1  ;;  %v8702_v9 = vld [vmem:[#allocation4 + $0x38] sm:$0xff] }
 0x38f   : > { %4043 = vst.msk [vmem:[#allocation4 + $0x44] sm:$0xf] %vm4025_vm8, %v3964_v21 }
 0x392   : > { %v3972_v31 = vpop.permute.xlu2 %3971  ;;  %v8704_v39 = vld [vmem:[#allocation4 + $0x48] sm:$0xff] }
 0x393   : > { %4047 = vst.msk [vmem:[#allocation4 + $0x54] sm:$0xf] %vm4025_vm8, %v3972_v31  ;;  %4277 = vmatmul.bf16.gmra.mxu0 %v8698_v12  ;;  %v4979_v12 = vsel %vm8874_vm3, %v4974_v19, %v4978_v27 }
 0x394   : > { %5342 = vrot.lane.b32.xlu2 %v4979_v12, %s8794_s25 }
 0x395   : > { %v3980_v29 = vpop.permute.xlu0 %3979 }
 0x396   : > { %v8703_v24 = vld [vmem:[#allocation4 + $0x40] sm:$0xff]  ;;  %v3970_v60 = vpop.permute.xlu1 %3969  ;;  %4051 = vst.msk [vmem:[#allocation4 + $0x64] sm:$0xf] %vm4025_vm8, %v3980_v29 }
 0x397   : > { %4046 = vst.msk [vmem:[#allocation4 + $0x50] sm:$0xf] %vm4025_vm8, %v3970_v60  ;;  %4302 = vmatmul.bf16.vlgmr.msra.gmra.mxu2 %v8703_v24 }
 0x39a   : > { %v3978_v42 = vpop.permute.xlu2 %3977 }
 0x39b   : > { %4050 = vst.msk [vmem:[#allocation4 + $0x60] sm:$0xf] %vm4025_vm8, %v3978_v42 }
 0x39d   : > { %v3986_v60 = vpop.permute.xlu0 %3985 }
 0x39e   : > { %v3976_v34 = vpop.permute.xlu1 %3975  ;;  %v8705_v47 = vld [vmem:[#allocation4 + $0x50] sm:$0xff]  ;;  %4054 = vst.msk [vmem:[#allocation4 + $0x70] sm:$0xf] %vm4025_vm8, %v3986_v60 }
 0x39f   : > { %4049 = vst.msk [vmem:[#allocation4 + $0x5c] sm:$0xf] %vm4025_vm8, %v3976_v34 }
 0x3a2   : > { %v3984_v20 = vpop.permute.xlu2 %3983  ;;  %v8707_v62 = vld [vmem:[#allocation4 + $0x60] sm:$0xff] }
 0x3a3   : > { %4282 = vmatmul.bf16.gmra.mxu0 %v8699_v17  ;;  %4053 = vst.msk [vmem:[#allocation4 + $0x6c] sm:$0xf] %vm4025_vm8, %v3984_v20 }
 0x3a6   : > { %v3982_v40 = vpop.permute.xlu1 %3981  ;;  %v8706_v4 = vld [vmem:[#allocation4 + $0x58] sm:$0xff] }
 0x3a7   : > { %4307 = vmatmul.bf16.gmra.mxu2 %v8704_v39  ;;  %4052 = vst.msk [vmem:[#allocation4 + $0x68] sm:$0xf] %vm4025_vm8, %v3982_v40  ;;  %v4736_v40 = vld [vmem:[#allocation3 + $0x14] sm:$0x1] }
 0x3ae   : > { %v8708_v37 = vld [vmem:[#allocation4 + $0x68] sm:$0xff]  ;;  %v3988_v34 = vpop.permute.xlu1 %3987 }
 0x3af   : > { %4055 = vst.msk [vmem:[#allocation4 + $0x74] sm:$0xf] %vm4025_vm8, %v3988_v34 }
 0x3b3   : > { %4287 = vmatmul.bf16.gmra.mxu0 %v8700_v49 }
 0x3b6   : > { %v8709_v2 = vld [vmem:[#allocation4 + $0x70] sm:$0xff] }
 0x3b7   : > { %4312 = vmatmul.bf16.gmra.mxu2 %v8705_v47 }
 0x3c3   : > { %4292 = vmatmul.bf16.gmra.mxu0 %v8701_v41 }
 0x3c7   : > { %4317 = vmatmul.bf16.gmra.mxu2 %v8706_v4 }
 0x3d3   : > { %4297 = vmatmul.bf16.gmra.mxu0 %v8702_v9 }
 0x3d7   : > { %4322 = vmatmul.bf16.gmra.mxu2 %v8707_v62 }
 0x3e0   : > { %v4263_v57 = vpop.f32.mrf.mxu0 }
 0x3e1   : > { %v4264_v63 = vadd.f32 %v10991_v30, %v4263_v57 }
 0x3e3   : > { %v4343_v15 = vmax.f32 %v4264_v63, 0.0 }
 0x3e5   : > { %v4375_v3 = vpack.c.bf16 %v4343_v15, %v4343_v15 }
 0x3e7   : > { %v4408_v35 = vshrl.u32 %v4375_v3, 16  ;;  %v4411_v58 = vshll.u32 %v4375_v3, 16  ;;  %4327 = vmatmul.bf16.gmra.mxu2 %v8708_v37 }
 0x3e8   : > { %v4265_v16 = vpop.f32.mrf.mxu0 }
 0x3e9   : > { %v4410_v14 = vrot.slane %v4408_v35, 7  ;;  %v4266_v50 = vadd.f32 %v10991_v30, %v4265_v16 }
 0x3eb   : > { %v4413_v51 = vor.u32 %v4411_v58, %v4410_v14  ;;  %v4344_v21 = vmax.f32 %v4266_v50, 0.0  ;;  %v4414_v42 = vrot.slane %v4410_v14, 4 }
 0x3ed   : > { %v4731_v31 = vsel %vm11029_vm12, %v4413_v51, %v4730_v11  ;;  %v4376_v24 = vpack.c.bf16 %v4344_v21, %v4344_v21 }
 0x3ee   : > { %4732 = vst [vmem:[#allocation3 + $0xc] sm:$0xf] %v4731_v31 }
 0x3ef   : > { %v4416_v1 = vshrl.u32 %v4376_v24, 16  ;;  %v4419_v17 = vshll.u32 %v4376_v24, 16 }
 0x3f0   : > { %v4268_v39 = vpop.f32.mrf.mxu0 }
 0x3f1   : > { %v4418_v29 = vrot.slane %v4416_v1, 7  ;;  %v4269_v49 = vadd.f32 %v10991_v30, %v4268_v39 }
 0x3f3   : > { %v4421_v20 = vor.u32 %v4419_v17, %v4418_v29  ;;  %v4423_v41 = vrot.slane %v4418_v29, 4  ;;  %v4345_v4 = vmax.f32 %v4269_v49, 0.0 }
 0x3f5   : > { %v4422_v53 = vsel %vm9060_vm9, %v4414_v42, %v4421_v20  ;;  %v4737_v9 = vsel %vm11054_vm5, %v4423_v41, %v4736_v40  ;;  %v4377_v62 = vpack.c.bf16 %v4345_v4, %v4345_v4  ;;  %v4911_v28 = vld [vmem:[#allocation3 + $0xc] sm:$0xf] }
 0x3f6   : > { %v4846_v7 = vld [vmem:[#allocation3 + $0xc] sm:$0xf]  ;;  %4733 = vst.msk [vmem:[#allocation3 + $0x10] sm:$0xf] %vm282_vm10, %v4422_v53  ;;  %v4981_v48 = vshrl.u32 %v4911_v28, 16  ;;  %v4984_v22 = vshll.u32 %v4911_v28, 16 }
 0x3f7   : > { %4738 = vst [vmem:[#allocation3 + $0x14] sm:$0x1] %v4737_v9  ;;  %v4425_v61 = vshrl.u32 %v4377_v62, 16  ;;  %v4428_v23 = vshll.u32 %v4377_v62, 16  ;;  %4332 = vmatmul.bf16.gmra.mxu2 %v8709_v2  ;;  %v4746_v9 = vld [vmem:[#allocation3 + $0x24] sm:$0xf] }
 0x3f8   : > { %v4270_v26 = vpop.f32.mrf.mxu0  ;;  %v4983_v54 = vrot.slane %v4981_v48, 4  ;;  %v4986_v36 = vrot.slane %v4984_v22, 5  ;;  %4878 = vst.msk [vmem:[#allocation5 + $0x8] sm:$0xf] %vm282_vm10, %v4846_v7 }
 0x3f9   : > { %v4427_v13 = vrot.slane %v4425_v61, 7  ;;  %v4271_v59 = vadd.f32 %v10991_v30, %v4270_v26 }
 0x3fa   : > { %v4987_v18 = vor.u32 %v4986_v36, %v4983_v54 }
 0x3fb   : > { %v4430_v25 = vor.u32 %v4428_v23, %v4427_v13  ;;  %v4346_v45 = vmax.f32 %v4271_v59, 0.0  ;;  %v4431_v19 = vrot.slane %v4427_v13, 4 }
 0x3fc   : > { %v4988_v63 = vrot.slane %v4987_v18, 4 }
 0x3fd   : > { %v4740_v43 = vsel %vm11029_vm12, %v4430_v25, %v4739_v32  ;;  %v4378_v57 = vpack.c.bf16 %v4346_v45, %v4346_v45  ;;  %v4912_v5 = vld [vmem:[#allocation3 + $0x10] sm:$0xf] }
 0x3fe   : > { %v4847_v56 = vld [vmem:[#allocation3 + $0x10] sm:$0xf]  ;;  %4741 = vst [vmem:[#allocation3 + $0x18] sm:$0xf] %v4740_v43  ;;  %v4990_v15 = vshll.u32 %v4912_v5, 16  ;;  %v4994_v37 = vshrl.u32 %v4912_v5, 16 }
 0x3ff   : > { %v4913_v38 = vld [vmem:[#allocation3 + $0x14] sm:$0x1]  ;;  %v4433_v33 = vshrl.u32 %v4378_v57, 16  ;;  %4879 = vst.msk [vmem:[#allocation5 + $0xc] sm:$0xf] %vm282_vm10, %v4847_v56  ;;  %v4436_v46 = vshll.u32 %v4378_v57, 16 }
 0x400   : > { %v4273_v3 = vpop.f32.mrf.mxu0  ;;  %v4992_v44 = vrot.slane %v4990_v15, 5  ;;  %v4996_v0 = vrot.slane %v4994_v37, 4  ;;  %v5000_v35 = vshll.u32 %v4913_v38, 16  ;;  %v4750_v57 = vld [vmem:[#allocation3 + $0x2c] sm:$0x1] }
 0x401   : > { %v4435_v58 = vrot.slane %v4433_v33, 7  ;;  %v4274_v16 = vadd.f32 %v10991_v30, %v4273_v3 }
 0x402   : > { %v4993_v14 = vsel %vm8874_vm3, %v4988_v63, %v4992_v44  ;;  %v4997_v50 = vor.u32 %v4996_v0, %v4992_v44  ;;  %v5002_v12 = vrot.slane %v5000_v35, 5 }
 0x403   : > { %v4438_v11 = vor.u32 %v4436_v46, %v4435_v58  ;;  %v4440_v27 = vrot.slane %v4435_v58, 4  ;;  %v4347_v51 = vmax.f32 %v4274_v16, 0.0  ;;  %5344 = vrot.lane.b32.xlu0 %v4993_v14, %s8794_s25 }
 0x404   : > { %v4998_v21 = vrot.slane %v4997_v50, 4 }
 0x405   : > { %v4439_v31 = vsel %vm9060_vm9, %v4431_v19, %v4438_v11  ;;  %v4744_v24 = vsel %vm11054_vm5, %v4440_v27, %v4743_v55  ;;  %v4379_v60 = vpack.c.bf16 %v4347_v51, %v4347_v51  ;;  %v4914_v1 = vld [vmem:[#allocation3 + $0x18] sm:$0xf] }
 0x406   : > { %v4848_v17 = vld [vmem:[#allocation3 + $0x18] sm:$0xf]  ;;  %4742 = vst.msk [vmem:[#allocation3 + $0x1c] sm:$0xf] %vm282_vm10, %v4439_v31  ;;  %v5003_v34 = vsel %vm8874_vm3, %v4998_v21, %v5002_v12  ;;  %v5005_v39 = vshrl.u32 %v4914_v1, 16  ;;  %v5008_v42 = vshll.u32 %v4914_v1, 16 }
 0x407   : > { %4745 = vst [vmem:[#allocation3 + $0x20] sm:$0x1] %v4744_v24  ;;  %v4442_v29 = vshrl.u32 %v4379_v60, 16  ;;  %5346 = vrot.lane.b32.xlu1 %v5003_v34, %s8794_s25  ;;  %v4445_v4 = vshll.u32 %v4379_v60, 16  ;;  %v4753_v31 = vld [vmem:[#allocation3 + $0x30] sm:$0xf] }
 0x408   : > { %v4275_v49 = vpop.f32.mrf.mxu0  ;;  %v5007_v40 = vrot.slane %v5005_v39, 4  ;;  %v5010_v20 = vrot.slane %v5008_v42, 5  ;;  %4880 = vst.msk [vmem:[#allocation5 + $0x10] sm:$0xf] %vm282_vm10, %v4848_v17 }
 0x409   : > { %v4444_v41 = vrot.slane %v4442_v29, 7  ;;  %v4276_v53 = vadd.f32 %v10991_v30, %v4275_v49 }
 0x40a   : > { %v5011_v7 = vor.u32 %v5010_v20, %v5007_v40 }
 0x40b   : > { %v4447_v62 = vor.u32 %v4445_v4, %v4444_v41  ;;  %v4348_v28 = vmax.f32 %v4276_v53, 0.0  ;;  %v4448_v56 = vrot.slane %v4444_v41, 4 }
 0x40c   : > { %v5012_v59 = vrot.slane %v5011_v7, 4 }
 0x40d   : > { %v4747_v48 = vsel %vm11029_vm12, %v4447_v62, %v4746_v9  ;;  %v4380_v22 = vpack.c.bf16 %v4348_v28, %v4348_v28  ;;  %v4915_v61 = vld [vmem:[#allocation3 + $0x1c] sm:$0xf] }
 0x40e   : > { %4748 = vst [vmem:[#allocation3 + $0x24] sm:$0xf] %v4747_v48  ;;  %v5014_v26 = vshll.u32 %v4915_v61, 16  ;;  %v5018_v54 = vshrl.u32 %v4915_v61, 16  ;;  %v4916_v36 = vld [vmem:[#allocation3 + $0x20] sm:$0x1] }
 0x40f   : > { %v4450_v13 = vshrl.u32 %v4380_v22, 16  ;;  %v5024_v18 = vshll.u32 %v4916_v36, 16  ;;  %v4453_v45 = vshll.u32 %v4380_v22, 16  ;;  %v4849_v33 = vld [vmem:[#allocation3 + $0x1c] sm:$0xf] }
 0x410   : > { %v4278_v23 = vpop.f32.mrf.mxu0  ;;  %v5016_v2 = vrot.slane %v5014_v26, 5  ;;  %v5020_v32 = vrot.slane %v5018_v54, 4  ;;  %4881 = vst.msk [vmem:[#allocation5 + $0x14] sm:$0xf] %vm282_vm10, %v4849_v33 }
 0x411   : > { %v4452_v25 = vrot.slane %v4450_v13, 7  ;;  %v4279_v43 = vadd.f32 %v10991_v30, %v4278_v23  ;;  %v5026_v44 = vrot.slane %v5024_v18, 5  ;;  %v4757_v23 = vld [vmem:[#allocation3 + $0x38] sm:$0x1] }
 0x412   : > { %v5017_v5 = vsel %vm8874_vm3, %v5012_v59, %v5016_v2  ;;  %v5021_v63 = vor.u32 %v5020_v32, %v5016_v2 }
 0x413   : > { %v4455_v15 = vor.u32 %v4453_v45, %v4452_v25  ;;  %v4457_v37 = vrot.slane %v4452_v25, 4  ;;  %v4349_v38 = vmax.f32 %v4279_v43, 0.0  ;;  %5348 = vrot.lane.b32.xlu2 %v5017_v5, %s8794_s25 }
 0x414   : > { %v5022_v3 = vrot.slane %v5021_v63, 4  ;;  %v4788_v63 = vld [vmem:[#allocation3 + $0x6c] sm:$0xf] }
 0x415   : > { %v4456_v0 = vsel %vm9060_vm9, %v4448_v56, %v4455_v15  ;;  %v4751_v35 = vsel %vm11054_vm5, %v4457_v37, %v4750_v57  ;;  %v4381_v58 = vpack.c.bf16 %v4349_v38, %v4349_v38  ;;  %v4917_v46 = vld [vmem:[#allocation3 + $0x24] sm:$0xf] }
 0x416   : > { %4749 = vst.msk [vmem:[#allocation3 + $0x28] sm:$0xf] %vm282_vm10, %v4456_v0  ;;  %v5027_v16 = vsel %vm8874_vm3, %v5022_v3, %v5026_v44  ;;  %v5029_v55 = vshrl.u32 %v4917_v46, 16  ;;  %v5032_v14 = vshll.u32 %v4917_v46, 16  ;;  %v4850_v34 = vld [vmem:[#allocation3 + $0x24] sm:$0xf] }
 0x417   : > { %4752 = vst [vmem:[#allocation3 + $0x2c] sm:$0x1] %v4751_v35  ;;  %v4459_v50 = vshrl.u32 %v4381_v58, 16  ;;  %5350 = vrot.lane.b32.xlu0 %v5027_v16, %s8794_s25  ;;  %v4462_v21 = vshll.u32 %v4381_v58, 16 }
 0x418   : > { %v4280_v19 = vpop.f32.mrf.mxu0  ;;  %v5031_v11 = vrot.slane %v5029_v55, 4  ;;  %v5034_v27 = vrot.slane %v5032_v14, 5  ;;  %4882 = vst.msk [vmem:[#allocation5 + $0x18] sm:$0xf] %vm282_vm10, %v4850_v34 }
 0x419   : > { %v4461_v51 = vrot.slane %v4459_v50, 7  ;;  %v4281_v12 = vadd.f32 %v10991_v30, %v4280_v19 }
 0x41a   : > { %v4303_v24 = vpop.f32.mrf.mxu2  ;;  %v5035_v39 = vor.u32 %v5034_v27, %v5031_v11 }
 0x41b   : > { %v4464_v60 = vor.u32 %v4462_v21, %v4461_v51  ;;  %v4350_v1 = vmax.f32 %v4281_v12, 0.0  ;;  %v4304_v17 = vadd.f32 %v10991_v30, %v4303_v24  ;;  %v4465_v13 = vrot.slane %v4461_v51, 4 }
 0x41c   : > { %v5036_v28 = vrot.slane %v5035_v39, 4 }
 0x41d   : > { %v4754_v42 = vsel %vm11029_vm12, %v4464_v60, %v4753_v31  ;;  %v4382_v29 = vpack.c.bf16 %v4350_v1, %v4350_v1  ;;  %v4359_v49 = vmax.f32 %v4304_v17, 0.0  ;;  %v4918_v40 = vld [vmem:[#allocation3 + $0x28] sm:$0xf]  ;;  %v4760_v60 = vld [vmem:[#allocation3 + $0x3c] sm:$0xf] }
 0x41e   : > { %4755 = vst [vmem:[#allocation3 + $0x30] sm:$0xf] %v4754_v42  ;;  %v5038_v20 = vshll.u32 %v4918_v40, 16  ;;  %v5042_v41 = vshrl.u32 %v4918_v40, 16  ;;  %v4919_v4 = vld [vmem:[#allocation3 + $0x2c] sm:$0x1] }
 0x41f   : > { %v4467_v53 = vshrl.u32 %v4382_v29, 16  ;;  %v4391_v9 = vpack.c.bf16 %v4359_v49, %v4359_v49  ;;  %v5048_v22 = vshll.u32 %v4919_v4, 16  ;;  %v4470_v26 = vshll.u32 %v4382_v29, 16  ;;  %v4851_v5 = vld [vmem:[#allocation3 + $0x28] sm:$0xf] }
 0x420   : > { %v4283_v62 = vpop.f32.mrf.mxu0  ;;  %v5040_v7 = vrot.slane %v5038_v20, 5  ;;  %v5044_v48 = vrot.slane %v5042_v41, 4  ;;  %4883 = vst.msk [vmem:[#allocation5 + $0x1c] sm:$0xf] %vm282_vm10, %v4851_v5  ;;  %v4792_v20 = vld [vmem:[#allocation3 + $0x74] sm:$0x1] }
 0x421   : > { %v4469_v61 = vrot.slane %v4467_v53, 7  ;;  %v4544_v54 = vshrl.u32 %v4391_v9, 16  ;;  %v4284_v36 = vadd.f32 %v10991_v30, %v4283_v62  ;;  %v4547_v59 = vshll.u32 %v4391_v9, 16 }
 0x422   : > { %v5041_v2 = vsel %vm8874_vm3, %v5036_v28, %v5040_v7  ;;  %v4305_v32 = vpop.f32.mrf.mxu2  ;;  %v5045_v18 = vor.u32 %v5044_v48, %v5040_v7  ;;  %v5050_v37 = vrot.slane %v5048_v22, 5 }
 0x423   : > { %v4472_v25 = vor.u32 %v4470_v26, %v4469_v61  ;;  %v4474_v45 = vrot.slane %v4469_v61, 4  ;;  %v4546_v43 = vrot.slane %v4544_v54, 7  ;;  %v4351_v57 = vmax.f32 %v4284_v36, 0.0  ;;  %5352 = vrot.lane.b32.xlu1 %v5041_v2, %s8794_s25 }
 0x424   : > { %v4306_v56 = vadd.f32 %v10991_v30, %v4305_v32  ;;  %v5046_v15 = vrot.slane %v5045_v18, 4 }
 0x425   : > { %v4473_v38 = vsel %vm9060_vm9, %v4465_v13, %v4472_v25  ;;  %v4758_v33 = vsel %vm11054_vm5, %v4474_v45, %v4757_v23  ;;  %v4549_v3 = vor.u32 %v4547_v59, %v4546_v43  ;;  %v4920_v44 = vld [vmem:[#allocation3 + $0x30] sm:$0xf]  ;;  %v4383_v0 = vpack.c.bf16 %v4351_v57, %v4351_v57  ;;  %v4764_v59 = vld [vmem:[#allocation3 + $0x44] sm:$0x1] }
 0x426   : > { %4756 = vst.msk [vmem:[#allocation3 + $0x34] sm:$0xf] %vm282_vm10, %v4473_v38  ;;  %v4360_v35 = vmax.f32 %v4306_v56, 0.0  ;;  %v5051_v58 = vsel %vm8874_vm3, %v5046_v15, %v5050_v37  ;;  %v5053_v46 = vshrl.u32 %v4920_v44, 16  ;;  %v5056_v55 = vshll.u32 %v4920_v44, 16 }
 0x427   : > { %4759 = vst [vmem:[#allocation3 + $0x38] sm:$0x1] %v4758_v33  ;;  %v4789_v16 = vsel %vm11029_vm12, %v4549_v3, %v4788_v63  ;;  %5354 = vrot.lane.b32.xlu2 %v5051_v58, %s8794_s25  ;;  %v4476_v14 = vshrl.u32 %v4383_v0, 16  ;;  %v4479_v12 = vshll.u32 %v4383_v0, 16  ;;  %v4852_v39 = vld [vmem:[#allocation3 + $0x30] sm:$0xf] }
 0x428   : > { %4790 = vst [vmem:[#allocation3 + $0x6c] sm:$0xf] %v4789_v16  ;;  %v4392_v50 = vpack.c.bf16 %v4360_v35, %v4360_v35  ;;  %v4285_v19 = vpop.f32.mrf.mxu0  ;;  %v5055_v11 = vrot.slane %v5053_v46, 4  ;;  %v5058_v51 = vrot.slane %v5056_v55, 5  ;;  %v4550_v40 = vrot.slane %v4546_v43, 4 }
 0x429   : > { %v4286_v27 = vadd.f32 %v10991_v30, %v4285_v19  ;;  %v4478_v21 = vrot.slane %v4476_v14, 7  ;;  %4884 = vst.msk [vmem:[#allocation5 + $0x20] sm:$0xf] %vm282_vm10, %v4852_v39  ;;  %v4795_v0 = vld [vmem:[#allocation3 + $0x78] sm:$0xf] }
 0x42a   : > { %v4552_v31 = vshrl.u32 %v4392_v50, 16  ;;  %v4308_v24 = vpop.f32.mrf.mxu2  ;;  %v5059_v34 = vor.u32 %v5058_v51, %v5055_v11  ;;  %v4555_v49 = vshll.u32 %v4392_v50, 16 }
 0x42b   : > { %v4352_v1 = vmax.f32 %v4286_v27, 0.0  ;;  %v4309_v17 = vadd.f32 %v10991_v30, %v4308_v24  ;;  %v4481_v42 = vor.u32 %v4479_v12, %v4478_v21  ;;  %v4482_v57 = vrot.slane %v4478_v21, 4 }
 0x42c   : > { %v4554_v29 = vrot.slane %v4552_v31, 7  ;;  %v5060_v26 = vrot.slane %v5059_v34, 4 }
 0x42d   : > { %v4384_v41 = vpack.c.bf16 %v4352_v1, %v4352_v1  ;;  %v4361_v4 = vmax.f32 %v4309_v17, 0.0  ;;  %v4921_v53 = vld [vmem:[#allocation3 + $0x34] sm:$0xf]  ;;  %v4761_v9 = vsel %vm11029_vm12, %v4481_v42, %v4760_v60 }
 0x42e   : > { %v4557_v62 = vor.u32 %v4555_v49, %v4554_v29  ;;  %v4559_v28 = vrot.slane %v4554_v29, 4  ;;  %v5062_v7 = vshll.u32 %v4921_v53, 16  ;;  %v4922_v48 = vld [vmem:[#allocation3 + $0x38] sm:$0x1]  ;;  %4762 = vst [vmem:[#allocation3 + $0x3c] sm:$0xf] %v4761_v9 }
 0x42f   : > { %v4484_v22 = vshrl.u32 %v4384_v41, 16  ;;  %v4393_v61 = vpack.c.bf16 %v4361_v4, %v4361_v4  ;;  %v5066_v54 = vshrl.u32 %v4921_v53, 16  ;;  %v4487_v23 = vshll.u32 %v4384_v41, 16  ;;  %v4853_v44 = vld [vmem:[#allocation3 + $0x34] sm:$0xf] }
 0x430   : > { %v4558_v36 = vsel %vm9060_vm9, %v4550_v40, %v4557_v62  ;;  %v4793_v13 = vsel %vm11054_vm5, %v4559_v28, %v4792_v20  ;;  %v4288_v2 = vpop.f32.mrf.mxu0  ;;  %v5064_v32 = vrot.slane %v5062_v7, 5  ;;  %v5072_v43 = vshll.u32 %v4922_v48, 16  ;;  %4885 = vst.msk [vmem:[#allocation5 + $0x24] sm:$0xf] %vm282_vm10, %v4853_v44  ;;  %v4767_v20 = vld [vmem:[#allocation3 + $0x48] sm:$0xf] }
 0x431   : > { %4791 = vst.msk [vmem:[#allocation3 + $0x70] sm:$0xf] %vm282_vm10, %v4558_v36  ;;  %v4486_v18 = vrot.slane %v4484_v22, 7  ;;  %v4561_v25 = vshrl.u32 %v4393_v61, 16  ;;  %v4289_v45 = vadd.f32 %v10991_v30, %v4288_v2  ;;  %v4564_v5 = vshll.u32 %v4393_v61, 16 }
 0x432   : > { %4794 = vst [vmem:[#allocation3 + $0x74] sm:$0x1] %v4793_v13  ;;  %v5065_v63 = vsel %vm8874_vm3, %v5060_v26, %v5064_v32  ;;  %v4310_v56 = vpop.f32.mrf.mxu2  ;;  %v5068_v15 = vrot.slane %v5066_v54, 4  ;;  %v5074_v14 = vrot.slane %v5072_v43, 5  ;;  %v4799_v22 = vld [vmem:[#allocation3 + $0x80] sm:$0x1]  ;;  %v3990_v43 = vpop.permute.xlu2 %3989 }
 0x433   : > { %v4489_v37 = vor.u32 %v4487_v23, %v4486_v18  ;;  %v4491_v38 = vrot.slane %v4486_v18, 4  ;;  %v4563_v33 = vrot.slane %v4561_v25, 7  ;;  %v4353_v3 = vmax.f32 %v4289_v45, 0.0  ;;  %5356 = vrot.lane.b32.xlu0 %v5065_v63, %s8794_s25  ;;  %4056 = vst.msk [vmem:[#allocation4 + $0x78] sm:$0xf] %vm4025_vm8, %v3990_v43 }
 0x434   : > { %v4311_v35 = vadd.f32 %v10991_v30, %v4310_v56  ;;  %v5069_v58 = vor.u32 %v5068_v15, %v5064_v32  ;;  %v4771_v56 = vld [vmem:[#allocation3 + $0x50] sm:$0x1] }
 0x435   : > { %v4490_v46 = vsel %vm9060_vm9, %v4482_v57, %v4489_v37  ;;  %v4765_v16 = vsel %vm11054_vm5, %v4491_v38, %v4764_v59  ;;  %v4566_v55 = vor.u32 %v4564_v5, %v4563_v33  ;;  %v4385_v50 = vpack.c.bf16 %v4353_v3, %v4353_v3  ;;  %v4923_v27 = vld [vmem:[#allocation3 + $0x3c] sm:$0xf] }
 0x436   : > { %4763 = vst.msk [vmem:[#allocation3 + $0x40] sm:$0xf] %vm282_vm10, %v4490_v46  ;;  %v4362_v19 = vmax.f32 %v4311_v35, 0.0  ;;  %v5070_v11 = vrot.slane %v5069_v58, 4  ;;  %v5077_v21 = vshrl.u32 %v4923_v27, 16  ;;  %v5080_v12 = vshll.u32 %v4923_v27, 16 }
 0x437   : > { %4766 = vst [vmem:[#allocation3 + $0x44] sm:$0x1] %v4765_v16  ;;  %v4796_v51 = vsel %vm11029_vm12, %v4566_v55, %v4795_v0  ;;  %v4493_v31 = vshrl.u32 %v4385_v50, 16  ;;  %v4496_v29 = vshll.u32 %v4385_v50, 16  ;;  %v4854_v9 = vld [vmem:[#allocation3 + $0x3c] sm:$0xf] }
 0x438   : > { %4797 = vst [vmem:[#allocation3 + $0x78] sm:$0xf] %v4796_v51  ;;  %v4394_v24 = vpack.c.bf16 %v4362_v19, %v4362_v19  ;;  %v5075_v60 = vsel %vm8874_vm3, %v5070_v11, %v5074_v14  ;;  %v4290_v1 = vpop.f32.mrf.mxu0  ;;  %v5079_v34 = vrot.slane %v5077_v21, 4  ;;  %v5082_v39 = vrot.slane %v5080_v12, 5  ;;  %v4802_v11 = vld [vmem:[#allocation3 + $0x84] sm:$0xf] }
 0x439   : > { %5358 = vrot.lane.b32.xlu1 %v5075_v60, %s8794_s25  ;;  %v4291_v17 = vadd.f32 %v10991_v30, %v4290_v1  ;;  %v4495_v42 = vrot.slane %v4493_v31, 7  ;;  %4886 = vst.msk [vmem:[#allocation5 + $0x28] sm:$0xf] %vm282_vm10, %v4854_v9  ;;  %v4567_v48 = vrot.slane %v4563_v33, 4  ;;  %v11168_v60 = vld [vmem:[#allocation3 + $0x6c] sm:$0xf] }
 0x43a   : > { %v4569_v49 = vshrl.u32 %v4394_v24, 16  ;;  %v4313_v40 = vpop.f32.mrf.mxu2  ;;  %v5083_v53 = vor.u32 %v5082_v39, %v5079_v34  ;;  %v4572_v7 = vshll.u32 %v4394_v24, 16 }
 0x43b   : > { %v4354_v41 = vmax.f32 %v4291_v17, 0.0  ;;  %v4314_v4 = vadd.f32 %v10991_v30, %v4313_v40  ;;  %v4498_v62 = vor.u32 %v4496_v29, %v4495_v42  ;;  %v4499_v0 = vrot.slane %v4495_v42, 4 }
 0x43c   : > { %v4571_v28 = vrot.slane %v4569_v49, 7  ;;  %v5084_v25 = vrot.slane %v5083_v53, 4 }
 0x43d   : > { %v4386_v61 = vpack.c.bf16 %v4354_v41, %v4354_v41  ;;  %v4363_v26 = vmax.f32 %v4314_v4, 0.0  ;;  %v4924_v54 = vld [vmem:[#allocation3 + $0x40] sm:$0xf]  ;;  %v4768_v36 = vsel %vm11029_vm12, %v4498_v62, %v4767_v20 }
 0x43e   : > { %v4574_v13 = vor.u32 %v4572_v7, %v4571_v28  ;;  %v4576_v23 = vrot.slane %v4571_v28, 4  ;;  %v5086_v59 = vshll.u32 %v4924_v54, 16  ;;  %v4925_v2 = vld [vmem:[#allocation3 + $0x44] sm:$0x1]  ;;  %4769 = vst [vmem:[#allocation3 + $0x48] sm:$0xf] %v4768_v36 }
 0x43f   : > { %v4501_v32 = vshrl.u32 %v4386_v61, 16  ;;  %v4395_v18 = vpack.c.bf16 %v4363_v26, %v4363_v26  ;;  %v5090_v45 = vshrl.u32 %v4924_v54, 16  ;;  %v4504_v63 = vshll.u32 %v4386_v61, 16  ;;  %v4845_v28 = vld [vmem:[#allocation3 + $0x4] sm:$0xf]  ;;  %v5343_v54 = vpop.permute.xlu2 %5342 }
 0x440   : > { %v4575_v57 = vsel %vm9060_vm9, %v4567_v48, %v4574_v13  ;;  %v4800_v5 = vsel %vm11054_vm5, %v4576_v23, %v4799_v22  ;;  %v4293_v15 = vpop.f32.mrf.mxu0  ;;  %v5088_v37 = vrot.slane %v5086_v59, 5  ;;  %v5096_v44 = vshll.u32 %v4925_v2, 16  ;;  %4877 = vst.msk [vmem:[#allocation5 + $0x4] sm:$0xf] %vm282_vm10, %v4845_v28  ;;  %v4774_v36 = vld [vmem:[#allocation3 + $0x54] sm:$0xf] }
 0x441   : > { %4798 = vst.msk [vmem:[#allocation3 + $0x7c] sm:$0xf] %vm282_vm10, %v4575_v57  ;;  %v4503_v38 = vrot.slane %v4501_v32, 7  ;;  %v4578_v33 = vshrl.u32 %v4395_v18, 16  ;;  %v4294_v3 = vadd.f32 %v10991_v30, %v4293_v15  ;;  %v4581_v35 = vshll.u32 %v4395_v18, 16 }
 0x442   : > { %4801 = vst [vmem:[#allocation3 + $0x80] sm:$0x1] %v4800_v5  ;;  %v5089_v58 = vsel %vm8874_vm3, %v5084_v25, %v5088_v37  ;;  %v4315_v46 = vpop.f32.mrf.mxu2  ;;  %v5092_v16 = vrot.slane %v5090_v45, 4  ;;  %v5098_v24 = vrot.slane %v5096_v44, 5  ;;  %v5173_v7 = vshrl.u32 %v11168_v60, 16 }
 0x443   : > { %v4506_v55 = vor.u32 %v4504_v63, %v4503_v38  ;;  %v4508_v14 = vrot.slane %v4503_v38, 4  ;;  %v11159_v50 = vrot.slane %v4578_v33, 7  ;;  %v4355_v19 = vmax.f32 %v4294_v3, 0.0  ;;  %5360 = vrot.lane.b32.xlu2 %v5089_v58, %s8794_s25  ;;  %5438 = vst.msk [vmem:[#allocation5 + $0x4] sm:$0xf] %vm5436_vm6, %v5343_v54 }
 0x444   : > { %v4316_v27 = vadd.f32 %v10991_v30, %v4315_v46  ;;  %v5093_v51 = vor.u32 %v5092_v16, %v5088_v37  ;;  %v4806_v25 = vld [vmem:[#allocation3 + $0x8c] sm:$0x1]  ;;  %v5176_v45 = vshll.u32 %v11168_v60, 16  ;;  %v3992_v46 = vpop.permute.xlu0 %3991 }
 0x445   : > { %v4507_v21 = vsel %vm9060_vm9, %v4499_v0, %v4506_v55  ;;  %v4772_v12 = vsel %vm11054_vm5, %v4508_v14, %v4771_v56  ;;  %v4583_v31 = vor.u32 %v4581_v35, %v11159_v50  ;;  %v4387_v1 = vpack.c.bf16 %v4355_v19, %v4355_v19  ;;  %v4926_v39 = vld [vmem:[#allocation3 + $0x48] sm:$0xf]  ;;  %4057 = vst.msk [vmem:[#allocation4 + $0x7c] sm:$0xf] %vm4025_vm8, %v3992_v46 }
 0x446   : > { %4770 = vst.msk [vmem:[#allocation3 + $0x4c] sm:$0xf] %vm282_vm10, %v4507_v21  ;;  %v4364_v17 = vmax.f32 %v4316_v27, 0.0  ;;  %v5094_v34 = vrot.slane %v5093_v51, 4  ;;  %v5101_v29 = vshrl.u32 %v4926_v39, 16  ;;  %v5104_v49 = vshll.u32 %v4926_v39, 16 }
 0x447   : > { %4773 = vst [vmem:[#allocation3 + $0x50] sm:$0x1] %v4772_v12  ;;  %v4803_v42 = vsel %vm11029_vm12, %v4583_v31, %v4802_v11  ;;  %v4510_v40 = vshrl.u32 %v4387_v1, 16  ;;  %v4513_v22 = vshll.u32 %v4387_v1, 16  ;;  %v4584_v43 = vrot.slane %v11159_v50, 4 }
 0x448   : > { %4804 = vst [vmem:[#allocation3 + $0x84] sm:$0xf] %v4803_v42  ;;  %v4396_v20 = vpack.c.bf16 %v4364_v17, %v4364_v17  ;;  %v5099_v41 = vsel %vm8874_vm3, %v5094_v34, %v5098_v24  ;;  %v4295_v4 = vpop.f32.mrf.mxu0  ;;  %v5103_v9 = vrot.slane %v5101_v29, 4  ;;  %v5106_v62 = vrot.slane %v5104_v49, 5  ;;  %v4778_v50 = vld [vmem:[#allocation3 + $0x5c] sm:$0x1] }
 0x449   : > { %5362 = vrot.lane.b32.xlu0 %v5099_v41, %s8794_s25  ;;  %v4296_v53 = vadd.f32 %v10991_v30, %v4295_v4  ;;  %v11178_v48 = vrot.slane %v4510_v40, 7  ;;  %v11186_v56 = vrot.slane %v5173_v7, 4  ;;  %v11195_v27 = vld [vmem:[#allocation3 + $0x70] sm:$0xf] }
 0x44a   : > { %v4586_v61 = vshrl.u32 %v4396_v20, 16  ;;  %v4318_v26 = vpop.f32.mrf.mxu2  ;;  %v5107_v59 = vor.u32 %v5106_v62, %v5103_v9  ;;  %v4589_v18 = vshll.u32 %v4396_v20, 16  ;;  %v4809_v20 = vld [vmem:[#allocation3 + $0x90] sm:$0xf]  ;;  %v5182_v9 = vshll.u32 %v11195_v27, 16 }
 0x44b   : > { %v4356_v13 = vmax.f32 %v4296_v53, 0.0  ;;  %v4319_v23 = vadd.f32 %v10991_v30, %v4318_v26  ;;  %v4515_v2 = vor.u32 %v4513_v22, %v11178_v48  ;;  %v4516_v24 = vrot.slane %v11178_v48, 4 }
 0x44c   : > { %v4588_v32 = vrot.slane %v4586_v61, 7  ;;  %v5108_v35 = vrot.slane %v5107_v59, 4  ;;  %v11206_v53 = vrot.slane %v5176_v45, 5 }
 0x44d   : > { %v4388_v57 = vpack.c.bf16 %v4356_v13, %v4356_v13  ;;  %v4365_v5 = vmax.f32 %v4319_v23, 0.0  ;;  %v4927_v63 = vld [vmem:[#allocation3 + $0x4c] sm:$0xf]  ;;  %v4775_v15 = vsel %vm11029_vm12, %v4515_v2, %v4774_v36 }
 0x44e   : > { %v4591_v37 = vor.u32 %v4589_v18, %v4588_v32  ;;  %v4593_v38 = vrot.slane %v4588_v32, 4  ;;  %v5110_v33 = vshll.u32 %v4927_v63, 16  ;;  %v4928_v3 = vld [vmem:[#allocation3 + $0x50] sm:$0x1]  ;;  %4776 = vst [vmem:[#allocation3 + $0x54] sm:$0xf] %v4775_v15 }
 0x44f   : > { %v4518_v44 = vshrl.u32 %v4388_v57, 16  ;;  %v4397_v0 = vpack.c.bf16 %v4365_v5, %v4365_v5  ;;  %v5114_v58 = vshrl.u32 %v4927_v63, 16  ;;  %v4521_v14 = vshll.u32 %v4388_v57, 16  ;;  %v4857_v40 = vld [vmem:[#allocation3 + $0x4c] sm:$0xf]  ;;  %v5341_v63 = vpop.permute.xlu1 %5340 }
 0x450   : > { %v4592_v16 = vsel %vm9060_vm9, %v4584_v43, %v4591_v37  ;;  %v4807_v55 = vsel %vm11054_vm5, %v4593_v38, %v4806_v25  ;;  %v4298_v19 = vpop.f32.mrf.mxu0  ;;  %v5112_v11 = vrot.slane %v5110_v33, 5  ;;  %v5120_v31 = vshll.u32 %v4928_v3, 16  ;;  %4889 = vst.msk [vmem:[#allocation5 + $0x34] sm:$0xf] %vm282_vm10, %v4857_v40  ;;  %v4844_v25 = vld [vmem:[#allocation3] sm:$0xf] }
 0x451   : > { %4805 = vst.msk [vmem:[#allocation3 + $0x88] sm:$0xf] %vm282_vm10, %v4592_v16  ;;  %v4520_v51 = vrot.slane %v4518_v44, 7  ;;  %v4595_v21 = vshrl.u32 %v4397_v0, 16  ;;  %v4299_v12 = vadd.f32 %v10991_v30, %v4298_v19  ;;  %v4598_v60 = vshll.u32 %v4397_v0, 16 }
 0x452   : > { %4808 = vst [vmem:[#allocation3 + $0x8c] sm:$0x1] %v4807_v55  ;;  %v5113_v1 = vsel %vm8874_vm3, %v5108_v35, %v5112_v11  ;;  %v4320_v17 = vpop.f32.mrf.mxu2  ;;  %v5116_v34 = vrot.slane %v5114_v58, 4  ;;  %v5122_v48 = vrot.slane %v5120_v31, 5  ;;  %v5179_v5 = vor.u32 %v11206_v53, %v11186_v56  ;;  %v4939_v15 = vld [vmem:[#allocation3 + $0x7c] sm:$0xf] }
 0x453   : > { %v4523_v39 = vor.u32 %v4521_v14, %v4520_v51  ;;  %v4525_v42 = vrot.slane %v4520_v51, 4  ;;  %v11202_v29 = vrot.slane %v4595_v21, 7  ;;  %v4357_v49 = vmax.f32 %v4299_v12, 0.0  ;;  %5364 = vrot.lane.b32.xlu1 %v5113_v1, %s8794_s25  ;;  %4876 = vst.msk [vmem:[#allocation5] sm:$0xf] %vm282_vm10, %v4844_v25 }
 0x454   : > { %v4321_v41 = vadd.f32 %v10991_v30, %v4320_v17  ;;  %v5117_v4 = vor.u32 %v5116_v34, %v5112_v11  ;;  %v11225_v44 = vrot.slane %v5182_v9, 5  ;;  %5437 = vst.msk [vmem:[#allocation5] sm:$0xf] %vm5436_vm6, %v5341_v63  ;;  %v4781_v0 = vld [vmem:[#allocation3 + $0x60] sm:$0xf]  ;;  %v5186_v16 = vshrl.u32 %v11195_v27, 16 }
 0x455   : > { %v4524_v62 = vsel %vm9060_vm9, %v4516_v24, %v4523_v39  ;;  %v4779_v28 = vsel %vm11054_vm5, %v4525_v42, %v4778_v50  ;;  %v4600_v7 = vor.u32 %v4598_v60, %v11202_v29  ;;  %v4389_v22 = vpack.c.bf16 %v4357_v49, %v4357_v49  ;;  %v4929_v54 = vld [vmem:[#allocation3 + $0x54] sm:$0xf]  ;;  %v4813_v50 = vld [vmem:[#allocation3 + $0x98] sm:$0x1]  ;;  %v4940_v63 = vld [vmem:[#allocation3 + $0x80] sm:$0x1] }
 0x456   : > { %4777 = vst.msk [vmem:[#allocation3 + $0x58] sm:$0xf] %vm282_vm10, %v4524_v62  ;;  %v4366_v61 = vmax.f32 %v4321_v41, 0.0  ;;  %v5118_v26 = vrot.slane %v5117_v4, 4  ;;  %v5125_v13 = vshrl.u32 %v4929_v54, 16  ;;  %v5128_v23 = vshll.u32 %v4929_v54, 16 }
 0x457   : > { %4780 = vst [vmem:[#allocation3 + $0x5c] sm:$0x1] %v4779_v28  ;;  %v4810_v36 = vsel %vm11029_vm12, %v4600_v7, %v4809_v20  ;;  %v4527_v59 = vshrl.u32 %v4389_v22, 16  ;;  %v4530_v38 = vshll.u32 %v4389_v22, 16  ;;  %v5206_v19 = vshll.u32 %v4939_v15, 16 }
 0x458   : > { %4811 = vst [vmem:[#allocation3 + $0x90] sm:$0xf] %v4810_v36  ;;  %v4398_v2 = vpack.c.bf16 %v4366_v61, %v4366_v61  ;;  %v5123_v32 = vsel %vm8874_vm3, %v5118_v26, %v5122_v48  ;;  %v4300_v18 = vpop.f32.mrf.mxu0  ;;  %v5127_v43 = vrot.slane %v5125_v13, 4  ;;  %v5130_v57 = vrot.slane %v5128_v23, 5  ;;  %v4785_v28 = vld [vmem:[#allocation3 + $0x68] sm:$0x1] }
 0x459   : > { %5366 = vrot.lane.b32.xlu2 %v5123_v32, %s8794_s25  ;;  %v4301_v45 = vadd.f32 %v10991_v30, %v4300_v18  ;;  %v4529_v37 = vrot.slane %v4527_v59, 7  ;;  %v4601_v11 = vrot.slane %v11202_v29, 4  ;;  %v5210_v31 = vshrl.u32 %v4939_v15, 16  ;;  %v11246_v36 = vld [vmem:[%s12343_s2] ss:$0 sm:$0xff] }
 0x45a   : > { %v4603_v33 = vshrl.u32 %v4398_v2, 16  ;;  %v4323_v3 = vpop.f32.mrf.mxu2  ;;  %v5131_v46 = vor.u32 %v5130_v57, %v5127_v43  ;;  %v4606_v14 = vshll.u32 %v4398_v2, 16  ;;  %v4816_v23 = vld [vmem:[#allocation3 + $0x9c] sm:$0xf]  ;;  %v11249_v2 = vrot.slane %v5179_v5, 4 }
 0x45b   : > { %v4358_v35 = vmax.f32 %v4301_v45, 0.0  ;;  %v4324_v58 = vadd.f32 %v10991_v30, %v4323_v3  ;;  %v4532_v56 = vor.u32 %v4530_v38, %v4529_v37  ;;  %v4533_v62 = vrot.slane %v4529_v37, 4  ;;  %v11258_v15 = vld [vmem:[#allocation3 + $0x74] sm:$0x1] }
 0x45c   : > { %v4605_v55 = vrot.slane %v4603_v33, 7  ;;  %v5132_v39 = vrot.slane %v5131_v46, 4  ;;  %v11251_v32 = vrot.slane %v5206_v19, 5  ;;  %v5212_v18 = vrot.slane %v5210_v31, 4  ;;  %v4820_v31 = vld [vmem:[#allocation3 + $0xa4] sm:$0x1] }
 0x45d   : > { %v4390_v51 = vpack.c.bf16 %v4358_v35, %v4358_v35  ;;  %v4367_v21 = vmax.f32 %v4324_v58, 0.0  ;;  %v4930_v12 = vld [vmem:[#allocation3 + $0x58] sm:$0xf]  ;;  %v4782_v24 = vsel %vm11029_vm12, %v4532_v56, %v4781_v0  ;;  %v5188_v35 = vrot.slane %v5186_v16, 4 }
 0x45e   : > { %v4608_v60 = vor.u32 %v4606_v14, %v4605_v55  ;;  %v4610_v1 = vrot.slane %v4605_v55, 4  ;;  %v5134_v30 = vshll.u32 %v4930_v12, 16  ;;  %v4931_v17 = vld [vmem:[#allocation3 + $0x5c] sm:$0x1]  ;;  %4783 = vst [vmem:[#allocation3 + $0x60] sm:$0xf] %v4782_v24  ;;  %v5213_v56 = vor.u32 %v5212_v18, %v11251_v32 }
 0x45f   : > { %v4535_v27 = vshrl.u32 %v4390_v51, 16  ;;  %v4399_v34 = vpack.c.bf16 %v4367_v21, %v4367_v21  ;;  %v5138_v42 = vshrl.u32 %v4930_v12, 16  ;;  %v4538_v40 = vshll.u32 %v4390_v51, 16  ;;  %v4938_v14 = vld [vmem:[#allocation3 + $0x78] sm:$0xf] }
 0x460   : > { %v4609_v49 = vsel %vm9060_vm9, %v4601_v11, %v4608_v60  ;;  %v4814_v29 = vsel %vm11054_vm5, %v4610_v1, %v4813_v50  ;;  %v5136_v20 = vrot.slane %v5134_v30, 5  ;;  %v5144_v9 = vshll.u32 %v4931_v17, 16  ;;  %v4944_v12 = vld [vmem:[#allocation3 + $0x90] sm:$0xf] }
 0x461   : > { %4812 = vst.msk [vmem:[#allocation3 + $0x94] sm:$0xf] %vm282_vm10, %v4609_v49  ;;  %v4537_v41 = vrot.slane %v4535_v27, 7  ;;  %v4612_v4 = vshrl.u32 %v4399_v34, 16  ;;  %v5140_v53 = vrot.slane %v5138_v42, 4  ;;  %v4615_v7 = vshll.u32 %v4399_v34, 16 }
 0x462   : > { %4815 = vst [vmem:[#allocation3 + $0x98] sm:$0x1] %v4814_v29  ;;  %v5137_v48 = vsel %vm8874_vm3, %v5132_v39, %v5136_v20  ;;  %v4325_v22 = vpop.f32.mrf.mxu2  ;;  %v5146_v57 = vrot.slane %v5144_v9, 5  ;;  %v5216_v55 = vshll.u32 %v4940_v63, 16  ;;  %v5185_v16 = vsel %vm8874_vm3, %v11249_v2, %v11225_v44  ;;  %v4941_v42 = vld [vmem:[#allocation3 + $0x84] sm:$0xf] }
 0x463   : > { %v4540_v61 = vor.u32 %v4538_v40, %v4537_v41  ;;  %v4542_v26 = vrot.slane %v4537_v41, 4  ;;  %v11240_v54 = vrot.slane %v4612_v4, 7  ;;  %5368 = vrot.lane.b32.xlu0 %v5137_v48, %s8794_s25  ;;  %v4326_v13 = vadd.f32 %v11246_v36, %v4325_v22 }
 0x464   : > { %v5141_v59 = vor.u32 %v5140_v53, %v5136_v20  ;;  %v5192_v21 = vshll.u32 %v11258_v15, 16  ;;  %v5189_v1 = vor.u32 %v5188_v35, %v11225_v44  ;;  %v5197_v30 = vshrl.u32 %v4938_v14, 16 }
 0x465   : > { %v4541_v25 = vsel %vm9060_vm9, %v4533_v62, %v4540_v61  ;;  %v4786_v45 = vsel %vm11054_vm5, %v4542_v26, %v4785_v28  ;;  %v4617_v43 = vor.u32 %v4615_v7, %v11240_v54  ;;  %v4368_v37 = vmax.f32 %v4326_v13, 0.0  ;;  %v4932_v38 = vld [vmem:[#allocation3 + $0x60] sm:$0xf] }
 0x466   : > { %4784 = vst.msk [vmem:[#allocation3 + $0x64] sm:$0xf] %vm282_vm10, %v4541_v25  ;;  %v5142_v5 = vrot.slane %v5141_v59, 4  ;;  %v5149_v3 = vshrl.u32 %v4932_v38, 16  ;;  %v5152_v0 = vshll.u32 %v4932_v38, 16  ;;  %v11274_v34 = vrot.slane %v5213_v56, 4 }
 0x467   : > { %4787 = vst [vmem:[#allocation3 + $0x68] sm:$0x1] %v4786_v45  ;;  %v4817_v33 = vsel %vm11029_vm12, %v4617_v43, %v4816_v23  ;;  %v4400_v58 = vpack.c.bf16 %v4368_v37, %v4368_v37  ;;  %v11276_v39 = vrot.slane %v5216_v55, 5  ;;  %v4618_v49 = vrot.slane %v11240_v54, 4 }
 0x468   : > { %4818 = vst [vmem:[#allocation3 + $0x9c] sm:$0xf] %v4817_v33  ;;  %v5147_v46 = vsel %vm8874_vm3, %v5142_v5, %v5146_v57  ;;  %v5151_v50 = vrot.slane %v5149_v3, 4  ;;  %v5154_v19 = vrot.slane %v5152_v0, 5  ;;  %v5245_v41 = vshrl.u32 %v4944_v12, 16 }
 0x469   : > { %5370 = vrot.lane.b32.xlu1 %v5147_v46, %s8794_s25  ;;  %v4620_v11 = vshrl.u32 %v4400_v58, 16  ;;  %v4623_v27 = vshll.u32 %v4400_v58, 16  ;;  %v5200_v4 = vshll.u32 %v4938_v14, 16  ;;  %v5248_v22 = vshll.u32 %v4944_v12, 16  ;;  %v4942_v3 = vld [vmem:[#allocation3 + $0x88] sm:$0xf] }
 0x46a   : > { %v4328_v51 = vpop.f32.mrf.mxu2  ;;  %v5155_v60 = vor.u32 %v5154_v19, %v5151_v50  ;;  %v5199_v61 = vrot.slane %v5197_v30, 4  ;;  %v5221_v25 = vshrl.u32 %v4941_v42, 16  ;;  %v5190_v63 = vrot.slane %v5189_v1, 4  ;;  %v4823_v0 = vld [vmem:[#allocation3 + $0xa8] sm:$0xf] }
 0x46b   : > { %v4329_v24 = vadd.f32 %v11246_v36, %v4328_v51  ;;  %v4622_v17 = vrot.slane %v4620_v11, 7  ;;  %v5202_v18 = vrot.slane %v5200_v4, 5  ;;  %v5224_v15 = vshll.u32 %v4941_v42, 16  ;;  %v4945_v19 = vld [vmem:[#allocation3 + $0x94] sm:$0xf] }
 0x46c   : > { %v5156_v7 = vrot.slane %v5155_v60, 4  ;;  %v5194_v33 = vrot.slane %v5192_v21, 5  ;;  %v5247_v46 = vrot.slane %v5245_v41, 4  ;;  %v5250_v56 = vrot.slane %v5248_v22, 5  ;;  %v4862_v4 = vld [vmem:[#allocation3 + $0x6c] sm:$0xf] }
 0x46d   : > { %v4369_v29 = vmax.f32 %v4329_v24, 0.0  ;;  %v5349_v40 = vpop.permute.xlu2 %5348  ;;  %v4933_v20 = vld [vmem:[#allocation3 + $0x64] sm:$0xf]  ;;  %v4625_v53 = vor.u32 %v4623_v27, %v4622_v17  ;;  %v4627_v9 = vrot.slane %v4622_v17, 4  ;;  %v5203_v11 = vor.u32 %v5202_v18, %v5199_v61  ;;  %4894 = vst.msk [vmem:[#allocation5 + $0x48] sm:$0xf] %vm282_vm10, %v4862_v4 }
 0x46e   : > { %5441 = vst.msk [vmem:[#allocation5 + $0x10] sm:$0xf] %vm5436_vm6, %v5349_v40  ;;  %v5158_v44 = vshll.u32 %v4933_v20, 16  ;;  %v5162_v62 = vshrl.u32 %v4933_v20, 16  ;;  %v4934_v48 = vld [vmem:[#allocation3 + $0x68] sm:$0x1]  ;;  %v5219_v1 = vsel %vm8874_vm3, %v11274_v34, %v11276_v39  ;;  %v5195_v30 = vsel %vm8874_vm3, %v5190_v63, %v5194_v33 }
 0x46f   : > { %v4401_v28 = vpack.c.bf16 %v4369_v29, %v4369_v29  ;;  %v4626_v26 = vsel %vm9060_vm9, %v4618_v49, %v4625_v53  ;;  %v4821_v54 = vsel %vm11054_vm5, %v4627_v9, %v4820_v31  ;;  %v5168_v2 = vshll.u32 %v4934_v48, 16  ;;  %v4827_v53 = vld [vmem:[#allocation3 + $0xb0] sm:$0x1]  ;;  %v4947_v22 = vld [vmem:[#allocation3 + $0x9c] sm:$0xf] }
 0x470   : > { %v5160_v13 = vrot.slane %v5158_v44, 5  ;;  %v5164_v23 = vrot.slane %v5162_v62, 4  ;;  %4819 = vst.msk [vmem:[#allocation3 + $0xa0] sm:$0xf] %vm282_vm10, %v4626_v26  ;;  %v5223_v51 = vrot.slane %v5221_v25, 4  ;;  %v5226_v12 = vrot.slane %v5224_v15, 5 }
 0x471   : > { %v4629_v59 = vshrl.u32 %v4401_v28, 16  ;;  %5376 = vrot.lane.b32.xlu1 %v5185_v16, %s8794_s25  ;;  %4822 = vst [vmem:[#allocation3 + $0xa4] sm:$0x1] %v4821_v54  ;;  %v4632_v5 = vshll.u32 %v4401_v28, 16  ;;  %v5170_v58 = vrot.slane %v5168_v2, 5  ;;  %v5230_v21 = vshll.u32 %v4942_v3, 16 }
 0x472   : > { %v5161_v45 = vsel %vm8874_vm3, %v5156_v7, %v5160_v13  ;;  %v4330_v43 = vpop.f32.mrf.mxu2  ;;  %v5165_v57 = vor.u32 %v5164_v23, %v5160_v13  ;;  %v5234_v31 = vshrl.u32 %v4942_v3, 16  ;;  %v5251_v17 = vor.u32 %v5250_v56, %v5247_v46  ;;  %v4943_v13 = vld [vmem:[#allocation3 + $0x8c] sm:$0x1]  ;;  %v4946_v33 = vld [vmem:[#allocation3 + $0x98] sm:$0x1] }
 0x473   : > { %v11288_v37 = vrot.slane %v4629_v59, 7  ;;  %5372 = vrot.lane.b32.xlu2 %v5161_v45, %s8794_s25  ;;  %v4331_v38 = vadd.f32 %v11246_v36, %v4330_v43  ;;  %v5254_v27 = vshll.u32 %v4945_v19, 16  ;;  %v5258_v40 = vshrl.u32 %v4945_v19, 16 }
 0x474   : > { %v5166_v35 = vrot.slane %v5165_v57, 4  ;;  %v5204_v9 = vrot.slane %v5203_v11, 4  ;;  %v5227_v44 = vor.u32 %v5226_v12, %v5223_v51  ;;  %v5232_v34 = vrot.slane %v5230_v21, 5 }
 0x475   : > { %v4634_v55 = vor.u32 %v4632_v5, %v11288_v37  ;;  %v5345_v14 = vpop.permute.xlu0 %5344  ;;  %v4370_v50 = vmax.f32 %v4331_v38, 0.0  ;;  %v5236_v39 = vrot.slane %v5234_v31, 4  ;;  %v5252_v61 = vrot.slane %v5251_v17, 4  ;;  %v4855_v31 = vld [vmem:[#allocation3 + $0x40] sm:$0xf] }
 0x476   : > { %5439 = vst.msk [vmem:[#allocation5 + $0x8] sm:$0xf] %vm5436_vm6, %v5345_v14  ;;  %v5171_v16 = vsel %vm8874_vm3, %v5166_v35, %v5170_v58  ;;  %v5256_v26 = vrot.slane %v5254_v27, 5  ;;  %v5209_v54 = vsel %vm8874_vm3, %v5204_v9, %v11251_v32  ;;  %v4635_v23 = vrot.slane %v11288_v37, 4  ;;  %v4863_v27 = vld [vmem:[#allocation3 + $0x70] sm:$0xf] }
 0x477   : > { %v4824_v24 = vsel %vm11029_vm12, %v4634_v55, %v4823_v0  ;;  %v4402_v60 = vpack.c.bf16 %v4370_v50, %v4370_v50  ;;  %5374 = vrot.lane.b32.xlu0 %v5171_v16, %s8794_s25  ;;  %v4948_v42 = vld [vmem:[#allocation3 + $0xa0] sm:$0xf]  ;;  %v5260_v25 = vrot.slane %v5258_v40, 4  ;;  %v5228_v43 = vrot.slane %v5227_v44, 4  ;;  %v8710_v50 = vld [vmem:[#allocation4 + $0x78] sm:$0xff] }
 0x478   : > { %4825 = vst [vmem:[#allocation3 + $0xa8] sm:$0xf] %v4824_v24  ;;  %v5278_v20 = vshll.u32 %v4948_v42, 16  ;;  %v5282_v41 = vshrl.u32 %v4948_v42, 16  ;;  %v4949_v18 = vld [vmem:[#allocation3 + $0xa4] sm:$0x1]  ;;  %v5237_v57 = vor.u32 %v5236_v39, %v5232_v34  ;;  %v5257_v3 = vsel %vm8874_vm3, %v5252_v61, %v5256_v26  ;;  %4337 = vmatmul.bf16.gmra.mxu2 %v8710_v50 }
 0x479   : > { %v4637_v49 = vshrl.u32 %v4402_v60, 16  ;;  %5382 = vrot.lane.b32.xlu1 %v5219_v1, %s8794_s25  ;;  %v5347_v29 = vpop.permute.xlu1 %5346  ;;  %v4640_v28 = vshll.u32 %v4402_v60, 16  ;;  %v5269_v63 = vshrl.u32 %v4947_v22, 16  ;;  %v5272_v15 = vshll.u32 %v4947_v22, 16  ;;  %4887 = vst.msk [vmem:[#allocation5 + $0x2c] sm:$0xf] %vm282_vm10, %v4855_v31 }
 0x47a   : > { %5440 = vst.msk [vmem:[#allocation5 + $0xc] sm:$0xf] %vm5436_vm6, %v5347_v29  ;;  %v11308_v7 = vrot.slane %v5278_v20, 5  ;;  %v5284_v48 = vrot.slane %v5282_v41, 4  ;;  %v4333_v45 = vpop.f32.mrf.mxu2  ;;  %v5288_v0 = vshll.u32 %v4949_v18, 16  ;;  %v5240_v35 = vshll.u32 %v4943_v13, 16 }
 0x47b   : > { %v4639_v62 = vrot.slane %v4637_v49, 7  ;;  %5378 = vrot.lane.b32.xlu2 %v5195_v30, %s8794_s25  ;;  %v4334_v38 = vadd.f32 %v11246_v36, %v4333_v45  ;;  %v5233_v56 = vsel %vm8874_vm3, %v5228_v43, %v5232_v34  ;;  %v5261_v55 = vor.u32 %v5260_v25, %v5256_v26  ;;  %4895 = vst.msk [vmem:[#allocation5 + $0x4c] sm:$0xf] %vm282_vm10, %v4863_v27  ;;  %v4830_v34 = vld [vmem:[#allocation3 + $0xb4] sm:$0xf] }
 0x47c   : > { %v5285_v37 = vor.u32 %v5284_v48, %v11308_v7  ;;  %v5238_v19 = vrot.slane %v5237_v57, 4  ;;  %v5264_v11 = vshll.u32 %v4946_v33, 16  ;;  %v5271_v51 = vrot.slane %v5269_v63, 4  ;;  %v4864_v18 = vld [vmem:[#allocation3 + $0x78] sm:$0xf] }
 0x47d   : > { %v4642_v59 = vor.u32 %v4640_v28, %v4639_v62  ;;  %v4644_v2 = vrot.slane %v4639_v62, 4  ;;  %v4371_v58 = vmax.f32 %v4334_v38, 0.0  ;;  %v5274_v16 = vrot.slane %v5272_v15, 5  ;;  %4896 = vst.msk [vmem:[#allocation5 + $0x50] sm:$0xf] %vm282_vm10, %v4864_v18 }
 0x47e   : > { %v5286_v21 = vrot.slane %v5285_v37, 4  ;;  %v5242_v24 = vrot.slane %v5240_v35, 5  ;;  %v5290_v17 = vrot.slane %v5288_v0, 5  ;;  %v5262_v29 = vrot.slane %v5261_v55, 4  ;;  %v4834_v38 = vld [vmem:[#allocation3 + $0xbc] sm:$0x1] }
 0x47f   : > { %v4643_v5 = vsel %vm9060_vm9, %v4635_v23, %v4642_v59  ;;  %v4828_v32 = vsel %vm11054_vm5, %v4644_v2, %v4827_v53  ;;  %5380 = vrot.lane.b32.xlu0 %v5209_v54, %s8794_s25  ;;  %v4950_v14 = vld [vmem:[#allocation3 + $0xa8] sm:$0xf]  ;;  %v4403_v12 = vpack.c.bf16 %v4371_v58, %v4371_v58  ;;  %v5266_v40 = vrot.slane %v5264_v11, 5  ;;  %v5473_v27 = vld [vmem:[#allocation3 + $0x10] sm:$0xf] }
 0x480   : > { %4826 = vst.msk [vmem:[#allocation3 + $0xac] sm:$0xf] %vm282_vm10, %v4643_v5  ;;  %v5293_v60 = vshrl.u32 %v4950_v14, 16  ;;  %v5296_v1 = vshll.u32 %v4950_v14, 16  ;;  %v5243_v49 = vsel %vm8874_vm3, %v5238_v19, %v5242_v24  ;;  %v5275_v20 = vor.u32 %v5274_v16, %v5271_v51  ;;  %v4856_v2 = vld [vmem:[#allocation3 + $0x48] sm:$0xf] }
 0x481   : > { %4829 = vst [vmem:[#allocation3 + $0xb0] sm:$0x1] %v4828_v32  ;;  %5388 = vrot.lane.b32.xlu1 %v5257_v3, %s8794_s25  ;;  %v5355_v46 = vpop.permute.xlu2 %5354  ;;  %v4646_v30 = vshrl.u32 %v4403_v12, 16  ;;  %v4649_v4 = vshll.u32 %v4403_v12, 16  ;;  %v5291_v9 = vsel %vm8874_vm3, %v5286_v21, %v5290_v17  ;;  %v4865_v3 = vld [vmem:[#allocation3 + $0x7c] sm:$0xf] }
 0x482   : > { %5444 = vst.msk [vmem:[#allocation5 + $0x1c] sm:$0xf] %vm5436_vm6, %v5355_v46  ;;  %v4335_v42 = vpop.f32.mrf.mxu2  ;;  %v5295_v39 = vrot.slane %v5293_v60, 4  ;;  %v5298_v62 = vrot.slane %v5296_v1, 5  ;;  %v5276_v25 = vrot.slane %v5275_v20, 4 }
 0x483   : > { %5384 = vrot.lane.b32.xlu2 %v5233_v56, %s8794_s25  ;;  %v4648_v41 = vrot.slane %v4646_v30, 7  ;;  %v4336_v53 = vadd.f32 %v11246_v36, %v4335_v42  ;;  %v5267_v36 = vsel %vm8874_vm3, %v5262_v29, %v5266_v40  ;;  %4888 = vst.msk [vmem:[#allocation5 + $0x30] sm:$0xf] %vm282_vm10, %v4856_v2  ;;  %v5469_v16 = vld [vmem:[#allocation3] sm:$0xe] }
 0x484   : > { %v5299_v45 = vor.u32 %v5298_v62, %v5295_v39  ;;  %v5281_v63 = vsel %vm8874_vm3, %v5276_v25, %v11308_v7  ;;  %4897 = vst.msk [vmem:[#allocation5 + $0x54] sm:$0xf] %vm282_vm10, %v4865_v3  ;;  %v5470_v12 = vld [vmem:[#allocation3 + $0x4] sm:$0xf]  ;;  %v8547_v1 = vrot.slane %v5469_v16, 9 }
 0x485   : > { %v4651_v22 = vor.u32 %v4649_v4, %v4648_v41  ;;  %v4372_v61 = vmax.f32 %v4336_v53, 0.0  ;;  %v4652_v0 = vrot.slane %v4648_v41, 4  ;;  %v4866_v60 = vld [vmem:[#allocation3 + $0x84] sm:$0xf]  ;;  %v5567_v30 = vrot.slane %v5470_v12, 5 }
 0x486   : > { %v5300_v37 = vrot.slane %v5299_v45, 4  ;;  %4898 = vst.msk [vmem:[#allocation5 + $0x58] sm:$0xf] %vm282_vm10, %v4866_v60  ;;  %v4858_v42 = vld [vmem:[#allocation3 + $0x54] sm:$0xf] }
 0x487   : > { %5386 = vrot.lane.b32.xlu0 %v5243_v49, %s8794_s25  ;;  %v4951_v44 = vld [vmem:[#allocation3 + $0xac] sm:$0xf]  ;;  %v4831_v23 = vsel %vm11029_vm12, %v4651_v22, %v4830_v34  ;;  %v4404_v59 = vpack.c.bf16 %v4372_v61, %v4372_v61  ;;  %4890 = vst.msk [vmem:[#allocation5 + $0x38] sm:$0xf] %vm282_vm10, %v4858_v42  ;;  %v5568_v29 = vsel %vm9676_vm13, %v8547_v1, %v5567_v30  ;;  %v5474_v53 = vld [vmem:[#allocation3 + $0x14] sm:$0x1] }
 0x488   : > { %v5302_v28 = vshll.u32 %v4951_v44, 16  ;;  %v5306_v48 = vshrl.u32 %v4951_v44, 16  ;;  %4832 = vst [vmem:[#allocation3 + $0xb4] sm:$0xf] %v4831_v23  ;;  %v4952_v57 = vld [vmem:[#allocation3 + $0xb0] sm:$0x1] }
 0x489   : > { %5394 = vrot.lane.b32.xlu1 %v5291_v9, %s8794_s25  ;;  %v5351_v26 = vpop.permute.xlu0 %5350  ;;  %v4654_v43 = vshrl.u32 %v4404_v59, 16  ;;  %v4657_v32 = vshll.u32 %v4404_v59, 16  ;;  %v5312_v33 = vshll.u32 %v4952_v57, 16  ;;  %v5574_v9 = vrot.slane %v5473_v27, 5  ;;  %v4867_v61 = vld [vmem:[#allocation3 + $0x88] sm:$0xf] }
 0x48a   : > { %5442 = vst.msk [vmem:[#allocation5 + $0x14] sm:$0xf] %vm5436_vm6, %v5351_v26  ;;  %v5304_v54 = vrot.slane %v5302_v28, 5  ;;  %v5308_v13 = vrot.slane %v5306_v48, 4  ;;  %v5471_v28 = vld [vmem:[#allocation3 + $0x8] sm:$0x1] }
 0x48b   : > { %5390 = vrot.lane.b32.xlu2 %v5267_v36, %s8794_s25  ;;  %v4656_v5 = vrot.slane %v4654_v43, 7  ;;  %v5314_v50 = vrot.slane %v5312_v33, 5  ;;  %v5576_v26 = vrot.slane %v5574_v9, 4  ;;  %v5577_v36 = vrot.slane %v5474_v53, 5  ;;  %4899 = vst.msk [vmem:[#allocation5 + $0x5c] sm:$0xf] %vm282_vm10, %v4867_v61 }
 0x48c   : > { %v5309_v15 = vor.u32 %v5308_v13, %v5304_v54  ;;  %v5305_v46 = vsel %vm8874_vm3, %v5300_v37, %v5304_v54  ;;  %v5569_v23 = vrot.slane %v5567_v30, 4  ;;  %v5570_v59 = vrot.slane %v5471_v28, 5  ;;  %v4859_v2 = vld [vmem:[#allocation3 + $0x58] sm:$0xf]  ;;  %v5472_v45 = vld [vmem:[#allocation3 + $0xc] sm:$0xe] }
 0x48d   : > { %v4659_v35 = vor.u32 %v4657_v32, %v4656_v5  ;;  %v4661_v58 = vrot.slane %v4656_v5, 4  ;;  %4891 = vst.msk [vmem:[#allocation5 + $0x3c] sm:$0xf] %vm282_vm10, %v4859_v2  ;;  %v5578_v43 = vsel %vm9676_vm13, %v5576_v26, %v5577_v36  ;;  %v8548_v5 = vrot.slane %v5472_v45, 9  ;;  %v5478_v32 = vld [vmem:[#allocation3 + $0x24] sm:$0xe] }
 0x48e   : > { %v5310_v7 = vrot.slane %v5309_v15, 4  ;;  %v5571_v57 = vsel %vm9676_vm13, %v5569_v23, %v5570_v59  ;;  %v4868_v15 = vld [vmem:[#allocation3 + $0x90] sm:$0xf]  ;;  %v4860_v33 = vld [vmem:[#allocation3 + $0x60] sm:$0xf] }
 0x48f   : > { %5392 = vrot.lane.b32.xlu0 %v5281_v63, %s8794_s25  ;;  %v4660_v56 = vsel %vm9060_vm9, %v4652_v0, %v4659_v35  ;;  %v4835_v55 = vsel %vm11054_vm5, %v4661_v58, %v4834_v38  ;;  %v4953_v14 = vld [vmem:[#allocation3 + $0xb4] sm:$0xf]  ;;  %v5479_v63 = vld [vmem:[#allocation3 + $0x28] sm:$0xf]  ;;  %4900 = vst.msk [vmem:[#allocation5 + $0x60] sm:$0xf] %vm282_vm10, %v4868_v15  ;;  %v5575_v58 = vsel %vm9676_vm13, %v8548_v5, %v5574_v9 }
 0x490   : > { %4833 = vst.msk [vmem:[#allocation3 + $0xb8] sm:$0xf] %vm282_vm10, %v4660_v56  ;;  %v5317_v19 = vshrl.u32 %v4953_v14, 16  ;;  %v5320_v11 = vshll.u32 %v4953_v14, 16  ;;  %v5315_v21 = vsel %vm8874_vm3, %v5310_v7, %v5314_v50  ;;  %v5476_v38 = vld [vmem:[#allocation3 + $0x1c] sm:$0xf] }
 0x491   : > { %4836 = vst [vmem:[#allocation3 + $0xbc] sm:$0x1] %v4835_v55  ;;  %v5588_v37 = vrot.slane %v5479_v63, 5  ;;  %v5475_v0 = vld [vmem:[#allocation3 + $0x18] sm:$0xe]  ;;  %v5581_v7 = vrot.slane %v5476_v38, 5 }
 0x492   : > { %v5319_v31 = vrot.slane %v5317_v19, 4  ;;  %v5322_v24 = vrot.slane %v5320_v11, 5  ;;  %v5482_v35 = vld [vmem:[#allocation3 + $0x34] sm:$0xf]  ;;  %4892 = vst.msk [vmem:[#allocation5 + $0x40] sm:$0xf] %vm282_vm10, %v4860_v33 }
 0x493   : > { %5396 = vrot.lane.b32.xlu2 %v5305_v46, %s8794_s25  ;;  %v8550_v46 = vrot.slane %v5478_v32, 9  ;;  %v8549_v55 = vrot.slane %v5475_v0, 9  ;;  %v5595_v14 = vrot.slane %v5482_v35, 5  ;;  %v5477_v50 = vld [vmem:[#allocation3 + $0x20] sm:$0x1] }
 0x494   : > { %v5323_v17 = vor.u32 %v5322_v24, %v5319_v31  ;;  %v4869_v19 = vld [vmem:[#allocation3 + $0x94] sm:$0xf]  ;;  %v5483_v16 = vld [vmem:[#allocation3 + $0x38] sm:$0x1]  ;;  %v5584_v12 = vrot.slane %v5477_v50, 5 }
 0x495   : > { %v5353_v51 = vpop.permute.xlu1 %5352  ;;  %v5589_v56 = vsel %vm9676_vm13, %v8550_v46, %v5588_v37  ;;  %v5582_v11 = vsel %vm9676_vm13, %v8549_v55, %v5581_v7  ;;  %4901 = vst.msk [vmem:[#allocation5 + $0x64] sm:$0xf] %vm282_vm10, %v4869_v19  ;;  %v4861_v31 = vld [vmem:[#allocation3 + $0x64] sm:$0xf]  ;;  %v5480_v60 = vld [vmem:[#allocation3 + $0x2c] sm:$0x1] }
 0x496   : > { %5443 = vst.msk [vmem:[#allocation5 + $0x18] sm:$0xf] %vm5436_vm6, %v5353_v51  ;;  %v5324_v44 = vrot.slane %v5323_v17, 4  ;;  %v5583_v51 = vrot.slane %v5581_v7, 4  ;;  %v5598_v30 = vrot.slane %v5483_v16, 5  ;;  %v5590_v17 = vrot.slane %v5588_v37, 4 }
 0x497   : > { %5398 = vrot.lane.b32.xlu0 %v5315_v21, %s8794_s25  ;;  %v4954_v49 = vld [vmem:[#allocation3 + $0xb8] sm:$0xf]  ;;  %v5597_v21 = vrot.slane %v5595_v14, 4  ;;  %4893 = vst.msk [vmem:[#allocation5 + $0x44] sm:$0xf] %vm282_vm10, %v4861_v31  ;;  %v5591_v42 = vrot.slane %v5480_v60, 5 }
 0x498   : > { %v5326_v40 = vshll.u32 %v4954_v49, 16  ;;  %v5330_v20 = vshrl.u32 %v4954_v49, 16  ;;  %v4955_v41 = vld [vmem:[#allocation3 + $0xbc] sm:$0x1]  ;;  %v5585_v1 = vsel %vm9676_vm13, %v5583_v51, %v5584_v12  ;;  %v5481_v49 = vld [vmem:[#allocation3 + $0x30] sm:$0xe] }
 0x499   : > { %v5336_v62 = vshll.u32 %v4955_v41, 16  ;;  %v5599_v27 = vsel %vm9676_vm13, %v5597_v21, %v5598_v30  ;;  %v5487_v41 = vld [vmem:[#allocation3 + $0x48] sm:$0xe]  ;;  %v8551_v53 = vrot.slane %v5481_v49, 9  ;;  %v5486_v36 = vld [vmem:[#allocation3 + $0x44] sm:$0x1] }
 0x49a   : > { %v5328_v34 = vrot.slane %v5326_v40, 5  ;;  %v5332_v39 = vrot.slane %v5330_v20, 4  ;;  %v4870_v40 = vld [vmem:[#allocation3 + $0x9c] sm:$0xf]  ;;  %v5592_v20 = vsel %vm9676_vm13, %v5590_v17, %v5591_v42  ;;  %v8553_v28 = vrot.slane %v5487_v41, 9 }
 0x49b   : > { %v5338_v13 = vrot.slane %v5336_v62, 5  ;;  %4902 = vst.msk [vmem:[#allocation5 + $0x68] sm:$0xf] %vm282_vm10, %v4870_v40  ;;  %v5596_v62 = vsel %vm9676_vm13, %v8551_v53, %v5595_v14  ;;  %v5492_v59 = vld [vmem:[#allocation3 + $0x5c] sm:$0x1]  ;;  %v5605_v2 = vrot.slane %v5486_v36, 5 }
 0x49c   : > { %v5329_v48 = vsel %vm8874_vm3, %v5324_v44, %v5328_v34  ;;  %v5333_v22 = vor.u32 %v5332_v39, %v5328_v34  ;;  %v5484_v34 = vld [vmem:[#allocation3 + $0x3c] sm:$0xe]  ;;  %v5491_v39 = vld [vmem:[#allocation3 + $0x58] sm:$0xf]  ;;  %v5490_v32 = vld [vmem:[#allocation3 + $0x54] sm:$0xe] }
 0x49d   : > { %v5361_v4 = vpop.permute.xlu2 %5360  ;;  %5400 = vrot.lane.b32.xlu1 %v5329_v48, %s8794_s25  ;;  %v8552_v61 = vrot.slane %v5484_v34, 9  ;;  %v5616_v26 = vrot.slane %v5491_v39, 5  ;;  %v5497_v38 = vld [vmem:[#allocation3 + $0x70] sm:$0xf]  ;;  %v4872_v37 = vld [vmem:[#allocation3 + $0xa8] sm:$0xf] }
 0x49e   : > { %5447 = vst.msk [vmem:[#allocation5 + $0x28] sm:$0xf] %vm5436_vm6, %v5361_v4  ;;  %v5334_v54 = vrot.slane %v5333_v22, 4  ;;  %v5485_v4 = vld [vmem:[#allocation3 + $0x40] sm:$0xf]  ;;  %v8554_v35 = vrot.slane %v5490_v32, 9 }
 0x49f   : > { %5677 = vrot.lane.b32.xlu0 %v5568_v29, %s8796_s27  ;;  %v5488_v29 = vld [vmem:[#allocation3 + $0x4c] sm:$0xf]  ;;  %v5602_v48 = vrot.slane %v5485_v4, 5  ;;  %4904 = vst.msk [vmem:[#allocation5 + $0x70] sm:$0xf] %vm282_vm10, %v4872_v37 }
 0x4a0   : > { %v5339_v18 = vsel %vm8874_vm3, %v5334_v54, %v5338_v13  ;;  %v5609_v9 = vrot.slane %v5488_v29, 5  ;;  %v4871_v54 = vld [vmem:[#allocation3 + $0xa0] sm:$0xf]  ;;  %v5494_v0 = vld [vmem:[#allocation3 + $0x64] sm:$0xf] }
 0x4a1   : > { %5402 = vrot.lane.b32.xlu2 %v5339_v18, %s8794_s25  ;;  %v5603_v13 = vsel %vm9676_vm13, %v8552_v61, %v5602_v48  ;;  %v5604_v23 = vrot.slane %v5602_v48, 4  ;;  %4903 = vst.msk [vmem:[#allocation5 + $0x6c] sm:$0xf] %vm282_vm10, %v4871_v54  ;;  %v5618_v18 = vrot.slane %v5616_v26, 4  ;;  %v5493_v46 = vld [vmem:[#allocation3 + $0x60] sm:$0xe] }
 0x4a2   : > { %v5610_v22 = vsel %vm9676_vm13, %v8553_v28, %v5609_v9  ;;  %v5500_v7 = vld [vmem:[#allocation3 + $0x7c] sm:$0xf]  ;;  %v5623_v14 = vrot.slane %v5494_v0, 5  ;;  %v5495_v16 = vld [vmem:[#allocation3 + $0x68] sm:$0x1] }
 0x4a3   : > { %v5606_v45 = vsel %vm9676_vm13, %v5604_v23, %v5605_v2  ;;  %v5637_v51 = vrot.slane %v5500_v7, 5  ;;  %v4873_v31 = vld [vmem:[#allocation3 + $0xac] sm:$0xf]  ;;  %v5626_v60 = vrot.slane %v5495_v16, 5  ;;  %v5498_v30 = vld [vmem:[#allocation3 + $0x74] sm:$0x1] }
 0x4a4   : > { %v5625_v21 = vrot.slane %v5623_v14, 4  ;;  %4905 = vst.msk [vmem:[#allocation5 + $0x74] sm:$0xf] %vm282_vm10, %v4873_v31  ;;  %v5499_v41 = vld [vmem:[#allocation3 + $0x78] sm:$0xe] }
 0x4a5   : > { %v5357_v25 = vpop.permute.xlu0 %5356  ;;  %5679 = vrot.lane.b32.xlu1 %v5571_v57, %s8796_s27  ;;  %v5611_v57 = vrot.slane %v5609_v9, 4  ;;  %v5506_v4 = vld [vmem:[#allocation3 + $0x94] sm:$0xf]  ;;  %v5503_v34 = vld [vmem:[#allocation3 + $0x88] sm:$0xf]  ;;  %v8557_v39 = vrot.slane %v5499_v41, 9 }
 0x4a6   : > { %5445 = vst.msk [vmem:[#allocation5 + $0x20] sm:$0xf] %vm5436_vm6, %v5357_v25  ;;  %v5489_v25 = vld [vmem:[#allocation3 + $0x50] sm:$0x1]  ;;  %v5627_v17 = vsel %vm9676_vm13, %v5625_v21, %v5626_v60  ;;  %v4874_v9 = vld [vmem:[#allocation3 + $0xb4] sm:$0xf] }
 0x4a7   : > { %5683 = vrot.lane.b32.xlu0 %v5578_v43, %s8796_s27  ;;  %v5619_v43 = vrot.slane %v5492_v59, 5  ;;  %v5612_v5 = vrot.slane %v5489_v25, 5  ;;  %4906 = vst.msk [vmem:[#allocation5 + $0x78] sm:$0xf] %vm282_vm10, %v4874_v9  ;;  %v5502_v48 = vld [vmem:[#allocation3 + $0x84] sm:$0xe]  ;;  %v5638_v61 = vsel %vm9676_vm13, %v8557_v39, %v5637_v51 }
 0x4a8   : > { %v5644_v36 = vrot.slane %v5503_v34, 5  ;;  %v8558_v59 = vrot.slane %v5502_v48, 9  ;;  %v5513_v60 = vld [vmem:[#allocation3 + $0xb0] sm:$0x1]  ;;  %v5810_v34 = vld [vmem:[#allocation3 + $0x24] sm:$0xf] }
 0x4a9   : > { %5681 = vrot.lane.b32.xlu2 %v5575_v58, %s8796_s27  ;;  %v5620_v15 = vsel %vm9676_vm13, %v5618_v18, %v5619_v43  ;;  %v5613_v33 = vsel %vm9676_vm13, %v5611_v57, %v5612_v5  ;;  %v5630_v58 = vrot.slane %v5497_v38, 5  ;;  %v5504_v18 = vld [vmem:[#allocation3 + $0x8c] sm:$0x1]  ;;  %v5510_v43 = vld [vmem:[#allocation3 + $0xa4] sm:$0x1] }
 0x4aa   : > { %v5645_v25 = vsel %vm9676_vm13, %v8558_v59, %v5644_v36  ;;  %v5647_v57 = vrot.slane %v5504_v18, 5  ;;  %v5507_v5 = vld [vmem:[#allocation3 + $0x98] sm:$0x1]  ;;  %v5661_v38 = vrot.slane %v5510_v43, 5  ;;  %v5809_v48 = vld [vmem:[#allocation3 + $0x1c] sm:$0xf] }
 0x4ab   : > { %v5359_v3 = vpop.permute.xlu1 %5358  ;;  %v5632_v42 = vrot.slane %v5630_v58, 4  ;;  %v5654_v0 = vrot.slane %v5507_v5, 5  ;;  %v5812_v18 = vld [vmem:[#allocation3 + $0x30] sm:$0xf]  ;;  %v5816_v43 = vld [vmem:[#allocation3 + $0x48] sm:$0xf] }
 0x4ac   : > { %5446 = vst.msk [vmem:[#allocation5 + $0x24] sm:$0xf] %vm5436_vm6, %v5359_v3  ;;  %v5496_v3 = vld [vmem:[#allocation3 + $0x6c] sm:$0xe] }
 0x4ad   : > { %5685 = vrot.lane.b32.xlu1 %v5582_v11, %s8796_s27  ;;  %v8556_v55 = vrot.slane %v5496_v3, 9  ;;  %v8555_v11 = vrot.slane %v5493_v46, 9 }
 0x4af   : > { %5689 = vrot.lane.b32.xlu0 %v5589_v56, %s8796_s27  ;;  %v5617_v56 = vsel %vm9676_vm13, %v8554_v35, %v5616_v26  ;;  %v5631_v19 = vsel %vm9676_vm13, %v8556_v55, %v5630_v58  ;;  %v5624_v12 = vsel %vm9676_vm13, %v8555_v11, %v5623_v14  ;;  %v5508_v35 = vld [vmem:[#allocation3 + $0x9c] sm:$0xe]  ;;  %v5515_v58 = vld [vmem:[#allocation3 + $0xb8] sm:$0xf]  ;;  %v5512_v55 = vld [vmem:[#allocation3 + $0xac] sm:$0xf] }
 0x4b0   : > { %v8560_v14 = vrot.slane %v5508_v35, 9  ;;  %v5511_v11 = vld [vmem:[#allocation3 + $0xa8] sm:$0xe] }
 0x4b1   : > { %5687 = vrot.lane.b32.xlu2 %v5585_v1, %s8796_s27  ;;  %v5639_v1 = vrot.slane %v5637_v51, 4 }
 0x4b3   : > { %v5367_v24 = vpop.permute.xlu2 %5366 }
 0x4b4   : > { %5450 = vst.msk [vmem:[#allocation5 + $0x34] sm:$0xf] %vm5436_vm6, %v5367_v24  ;;  %v5501_v24 = vld [vmem:[#allocation3 + $0x80] sm:$0x1] }
 0x4b5   : > { %5691 = vrot.lane.b32.xlu1 %v5592_v20, %s8796_s27  ;;  %v5633_v20 = vrot.slane %v5498_v30, 5 }
 0x4b7   : > { %5695 = vrot.lane.b32.xlu0 %v5599_v27, %s8796_s27  ;;  %v5640_v27 = vrot.slane %v5501_v24, 5  ;;  %v5634_v53 = vsel %vm9676_vm13, %v5632_v42, %v5633_v20  ;;  %v8561_v24 = vrot.slane %v5511_v11, 9  ;;  %v5807_v20 = vld [vmem:[#allocation3 + $0x10] sm:$0xf]  ;;  %v5817_v11 = vld [vmem:[#allocation3 + $0x4c] sm:$0xf] }
 0x4b9   : > { %5693 = vrot.lane.b32.xlu2 %v5596_v62, %s8796_s27  ;;  %v5641_v40 = vsel %vm9676_vm13, %v5639_v1, %v5640_v27  ;;  %v5651_v62 = vrot.slane %v5506_v4, 5  ;;  %v5668_v27 = vrot.slane %v5513_v60, 5  ;;  %v5818_v60 = vld [vmem:[#allocation3 + $0x54] sm:$0xf] }
 0x4bb   : > { %v5363_v44 = vpop.permute.xlu0 %5362  ;;  %v5653_v37 = vrot.slane %v5651_v62, 4 }
 0x4bc   : > { %5448 = vst.msk [vmem:[#allocation5 + $0x2c] sm:$0xf] %vm5436_vm6, %v5363_v44  ;;  %v5505_v44 = vld [vmem:[#allocation3 + $0x90] sm:$0xe] }
 0x4bd   : > { %5697 = vrot.lane.b32.xlu1 %v5603_v13, %s8796_s27  ;;  %v8559_v26 = vrot.slane %v5505_v44, 9  ;;  %v4875_v13 = vld [vmem:[#allocation3 + $0xb8] sm:$0xf]  ;;  %v5655_v46 = vsel %vm9676_vm13, %v5653_v37, %v5654_v0  ;;  %v5806_v44 = vld [vmem:[#allocation3 + $0xc] sm:$0xf] }
 0x4be   : > { %4907 = vst.msk [vmem:[#allocation5 + $0x7c] sm:$0xf] %vm282_vm10, %v4875_v13  ;;  %v5811_v13 = vld [vmem:[#allocation3 + $0x28] sm:$0xf] }
 0x4bf   : > { %5701 = vrot.lane.b32.xlu0 %v5610_v22, %s8796_s27  ;;  %v5509_v22 = vld [vmem:[#allocation3 + $0xa0] sm:$0xf]  ;;  %v5652_v23 = vsel %vm9676_vm13, %v8559_v26, %v5651_v62  ;;  %v5808_v62 = vld [vmem:[#allocation3 + $0x18] sm:$0xf] }
 0x4c0   : > { %v5658_v2 = vrot.slane %v5509_v22, 5  ;;  %v5813_v22 = vld [vmem:[#allocation3 + $0x34] sm:$0xf] }
 0x4c1   : > { %5699 = vrot.lane.b32.xlu2 %v5606_v45, %s8796_s27  ;;  %v5646_v45 = vrot.slane %v5644_v36, 4  ;;  %v8783_v36 = vld [vmem:[%s12343_s2] ss:$0 sm:$0xff] }
 0x4c2   : > { %v5659_v51 = vsel %vm9676_vm13, %v8560_v14, %v5658_v2 }
 0x4c3   : > { %v5648_v32 = vsel %vm9676_vm13, %v5646_v45, %v5647_v57 }
 0x4c5   : > { %v5365_v63 = vpop.permute.xlu1 %5364  ;;  %5703 = vrot.lane.b32.xlu1 %v5613_v33, %s8796_s27 }
 0x4c6   : > { %5449 = vst.msk [vmem:[#allocation5 + $0x30] sm:$0xf] %vm5436_vm6, %v5365_v63  ;;  %v5660_v63 = vrot.slane %v5658_v2, 4 }
 0x4c7   : > { %5707 = vrot.lane.b32.xlu0 %v5620_v15, %s8796_s27 }
 0x4c8   : > { %v5662_v3 = vsel %vm9676_vm13, %v5660_v63, %v5661_v38  ;;  %v4837_v38 = vld [vmem:[#allocation3 + $0xc0] sm:$0xf] }
 0x4c9   : > { %5705 = vrot.lane.b32.xlu2 %v5617_v56, %s8796_s27  ;;  %v5514_v56 = vld [vmem:[#allocation3 + $0xb4] sm:$0xe] }
 0x4ca   : > { %v8562_v16 = vrot.slane %v5514_v56, 9 }
 0x4cd   : > { %v5373_v50 = vpop.permute.xlu2 %5372  ;;  %5709 = vrot.lane.b32.xlu1 %v5624_v12, %s8796_s27  ;;  %v5665_v12 = vrot.slane %v5512_v55, 5  ;;  %v5819_v55 = vld [vmem:[#allocation3 + $0x58] sm:$0xf] }
 0x4ce   : > { %5453 = vst.msk [vmem:[#allocation5 + $0x40] sm:$0xf] %vm5436_vm6, %v5373_v50  ;;  %v5672_v50 = vrot.slane %v5515_v58, 5 }
 0x4cf   : > { %5713 = vrot.lane.b32.xlu0 %v5631_v19, %s8796_s27  ;;  %v5666_v1 = vsel %vm9676_vm13, %v8561_v24, %v5665_v12  ;;  %v5667_v30 = vrot.slane %v5665_v12, 4 }
 0x4d0   : > { %v5673_v31 = vsel %vm9676_vm13, %v8562_v16, %v5672_v50 }
 0x4d1   : > { %5711 = vrot.lane.b32.xlu2 %v5627_v17, %s8796_s27 }
 0x4d5   : > { %v5369_v49 = vpop.permute.xlu0 %5368  ;;  %v5379_v29 = vpop.permute.xlu2 %5378  ;;  %5715 = vrot.lane.b32.xlu1 %v5634_v53, %s8796_s27 }
 0x4d6   : > { %5451 = vst.msk [vmem:[#allocation5 + $0x38] sm:$0xf] %vm5436_vm6, %v5369_v49  ;;  %v5516_v49 = vld [vmem:[#allocation3 + $0xbc] sm:$0x1] }
 0x4d7   : > { %5456 = vst.msk [vmem:[#allocation5 + $0x4c] sm:$0xf] %vm5436_vm6, %v5379_v29  ;;  %5719 = vrot.lane.b32.xlu0 %v5641_v40, %s8796_s27  ;;  %v5669_v29 = vsel %vm9676_vm13, %v5667_v30, %v5668_v27  ;;  %v5674_v40 = vrot.slane %v5672_v50, 4  ;;  %v5675_v41 = vrot.slane %v5516_v49, 5  ;;  %v5821_v27 = vld [vmem:[#allocation3 + $0x64] sm:$0xf] }
 0x4d9   : > { %5717 = vrot.lane.b32.xlu2 %v5638_v61, %s8796_s27  ;;  %v5676_v4 = vsel %vm9676_vm13, %v5674_v40, %v5675_v41  ;;  %v5824_v41 = vld [vmem:[#allocation3 + $0x78] sm:$0xf] }
 0x4db   : > { %v5371_v28 = vpop.permute.xlu1 %5370 }
 0x4dc   : > { %5452 = vst.msk [vmem:[#allocation5 + $0x3c] sm:$0xf] %vm5436_vm6, %v5371_v28 }
 0x4dd   : > { %v5385_v54 = vpop.permute.xlu2 %5384  ;;  %5721 = vrot.lane.b32.xlu1 %v5645_v25, %s8796_s27 }
 0x4de   : > { %5459 = vst.msk [vmem:[#allocation5 + $0x58] sm:$0xf] %vm5436_vm6, %v5385_v54 }
 0x4df   : > { %5725 = vrot.lane.b32.xlu0 %v5652_v23, %s8796_s27 }
 0x4e1   : > { %5723 = vrot.lane.b32.xlu2 %v5648_v32, %s8796_s27  ;;  %v5814_v32 = vld [vmem:[#allocation3 + $0x3c] sm:$0xf] }
 0x4e3   : > { %v5377_v15 = vpop.permute.xlu1 %5376 }
 0x4e4   : > { %5455 = vst.msk [vmem:[#allocation5 + $0x48] sm:$0xf] %vm5436_vm6, %v5377_v15 }
 0x4e5   : > { %v5391_v33 = vpop.permute.xlu2 %5390  ;;  %5727 = vrot.lane.b32.xlu1 %v5655_v46, %s8796_s27  ;;  %v5815_v46 = vld [vmem:[#allocation3 + $0x40] sm:$0xf] }
 0x4e6   : > { %5462 = vst.msk [vmem:[#allocation5 + $0x64] sm:$0xf] %vm5436_vm6, %v5391_v33 }
 0x4e7   : > { %5731 = vrot.lane.b32.xlu0 %v5662_v3, %s8796_s27 }
 0x4e9   : > { %v5375_v7 = vpop.permute.xlu0 %5374  ;;  %5729 = vrot.lane.b32.xlu2 %v5659_v51, %s8796_s27 }
 0x4ea   : > { %5454 = vst.msk [vmem:[#allocation5 + $0x44] sm:$0xf] %vm5436_vm6, %v5375_v7 }
 0x4eb   : > { %v5383_v19 = vpop.permute.xlu1 %5382 }
 0x4ec   : > { %5458 = vst.msk [vmem:[#allocation5 + $0x54] sm:$0xf] %vm5436_vm6, %v5383_v19 }
 0x4ed   : > { %v5397_v21 = vpop.permute.xlu2 %5396  ;;  %5733 = vrot.lane.b32.xlu1 %v5666_v1, %s8796_s27  ;;  %v5822_v1 = vld [vmem:[#allocation3 + $0x6c] sm:$0xf] }
 0x4ee   : > { %5465 = vst.msk [vmem:[#allocation5 + $0x70] sm:$0xf] %vm5436_vm6, %v5397_v21 }
 0x4ef   : > { %5737 = vrot.lane.b32.xlu0 %v5673_v31, %s8796_s27 }
 0x4f1   : > { %v5381_v17 = vpop.permute.xlu0 %5380  ;;  %5735 = vrot.lane.b32.xlu2 %v5669_v29, %s8796_s27  ;;  %v5823_v29 = vld [vmem:[#allocation3 + $0x70] sm:$0xf] }
 0x4f2   : > { %5457 = vst.msk [vmem:[#allocation5 + $0x50] sm:$0xf] %vm5436_vm6, %v5381_v17  ;;  %v5820_v17 = vld [vmem:[#allocation3 + $0x60] sm:$0xf] }
 0x4f3   : > { %v5389_v42 = vpop.permute.xlu1 %5388 }
 0x4f4   : > { %5461 = vst.msk [vmem:[#allocation5 + $0x60] sm:$0xf] %vm5436_vm6, %v5389_v42  ;;  %v5825_v42 = vld [vmem:[#allocation3 + $0x7c] sm:$0xf] }
 0x4f5   : > { %5739 = vrot.lane.b32.xlu1 %v5676_v4, %s8796_s27  ;;  %v5828_v4 = vld [vmem:[#allocation3 + $0x90] sm:$0xf] }
 0x4f7   : > { %5872 = vrot.lane.b32.xlu0 %v5807_v20, %s8798_s29 }
 0x4f9   : > { %v5387_v53 = vpop.permute.xlu0 %5386  ;;  %5870 = vrot.lane.b32.xlu2 %v5806_v44, %s8798_s29 }
 0x4fa   : > { %5460 = vst.msk [vmem:[#allocation5 + $0x5c] sm:$0xf] %vm5436_vm6, %v5387_v53 }
 0x4fb   : > { %v5395_v9 = vpop.permute.xlu1 %5394  ;;  %v5403_v39 = vpop.permute.xlu2 %5402 }
 0x4fc   : > { %5464 = vst.msk [vmem:[#allocation5 + $0x6c] sm:$0xf] %vm5436_vm6, %v5395_v9  ;;  %v4338_v61 = vpop.f32.mrf.mxu2  ;;  %v5826_v9 = vld [vmem:[#allocation3 + $0x84] sm:$0xf] }
 0x4fd   : > { %5468 = vst.msk [vmem:[#allocation5 + $0x7c] sm:$0xf] %vm5436_vm6, %v5403_v39  ;;  %5874 = vrot.lane.b32.xlu1 %v5808_v62, %s8798_s29  ;;  %v4339_v54 = vadd.f32 %v8783_v36, %v4338_v61  ;;  %v5827_v39 = vld [vmem:[#allocation3 + $0x88] sm:$0xf]  ;;  %v5831_v62 = vld [vmem:[#allocation3 + $0xa0] sm:$0xf] }
 0x4ff   : > { %5878 = vrot.lane.b32.xlu0 %v5810_v34, %s8798_s29  ;;  %v4373_v59 = vmax.f32 %v4339_v54, 0.0  ;;  %v5999_v54 = vld [vmem:[#allocation3 + $0xc] sm:$0xf] }
 0x501   : > { %v5393_v28 = vpop.permute.xlu0 %5392  ;;  %5876 = vrot.lane.b32.xlu2 %v5809_v48, %s8798_s29  ;;  %v4405_v2 = vpack.c.bf16 %v4373_v59, %v4373_v59  ;;  %v5829_v48 = vld [vmem:[#allocation3 + $0x94] sm:$0xf] }
 0x502   : > { %5463 = vst.msk [vmem:[#allocation5 + $0x68] sm:$0xf] %vm5436_vm6, %v5393_v28 }
 0x503   : > { %v5682_v26 = vpop.permute.xlu2 %5681  ;;  %v4663_v25 = vshrl.u32 %v4405_v2, 16  ;;  %v4666_v45 = vshll.u32 %v4405_v2, 16 }
 0x504   : > { %5776 = vst.msk [vmem:[#allocation5 + $0x8] sm:$0xf] %vm5773_vm14, %v5682_v26  ;;  %v4340_v57 = vpop.f32.mrf.mxu2  ;;  %v6002_v26 = vld [vmem:[#allocation3 + $0x18] sm:$0xf] }
 0x505   : > { %5880 = vrot.lane.b32.xlu1 %v5811_v13, %s8798_s29  ;;  %v4665_v15 = vrot.slane %v4663_v25, 7  ;;  %v4341_v5 = vadd.f32 %v8783_v36, %v4340_v57  ;;  %v5830_v36 = vld [vmem:[#allocation3 + $0x9c] sm:$0xf]  ;;  %v5834_v13 = vld [vmem:[#allocation3 + $0xb4] sm:$0xf]  ;;  %v6075_v59 = vshll.u32 %v6002_v26, 16 }
 0x506   : > { %v6051_v25 = vshll.u32 %v5999_v54, 16 }
 0x507   : > { %5884 = vrot.lane.b32.xlu0 %v5813_v22, %s8798_s29  ;;  %v4668_v33 = vor.u32 %v4666_v45, %v4665_v15  ;;  %v4374_v3 = vmax.f32 %v4341_v5, 0.0  ;;  %v4669_v50 = vrot.slane %v4665_v15, 4  ;;  %v5832_v45 = vld [vmem:[#allocation3 + $0xa8] sm:$0xf]  ;;  %v6077_v5 = vrot.slane %v6075_v59, 5 }
 0x509   : > { %v5399_v23 = vpop.permute.xlu0 %5398  ;;  %5882 = vrot.lane.b32.xlu2 %v5812_v18, %s8798_s29  ;;  %v4838_v35 = vsel %vm11029_vm12, %v4668_v33, %v4837_v38  ;;  %v4406_v58 = vpack.c.bf16 %v4374_v3, %v4374_v3  ;;  %v6048_v18 = vshrl.u32 %v5999_v54, 16 }
 0x50a   : > { %5466 = vst.msk [vmem:[#allocation5 + $0x74] sm:$0xf] %vm5436_vm6, %v5399_v23  ;;  %v6072_v23 = vshrl.u32 %v6002_v26, 16  ;;  %v6009_v26 = vld [vmem:[#allocation3 + $0x34] sm:$0xf] }
 0x50b   : > { %v5688_v63 = vpop.permute.xlu2 %5687  ;;  %4839 = vst [vmem:[#allocation3 + $0xc0] sm:$0xf] %v4838_v35  ;;  %v4671_v7 = vshrl.u32 %v4406_v58, 16  ;;  %v4674_v56 = vshll.u32 %v4406_v58, 16  ;;  %v6050_v38 = vrot.slane %v6048_v18, 4 }
 0x50c   : > { %5779 = vst.msk [vmem:[#allocation5 + $0x14] sm:$0xf] %vm5773_vm14, %v5688_v63  ;;  %v6003_v63 = vld [vmem:[#allocation3 + $0x1c] sm:$0xf]  ;;  %v6074_v15 = vrot.slane %v6072_v23, 4 }
 0x50d   : > { %5886 = vrot.lane.b32.xlu1 %v5814_v32, %s8798_s29  ;;  %v4673_v19 = vrot.slane %v4671_v7, 7  ;;  %v5833_v35 = vld [vmem:[#allocation3 + $0xac] sm:$0xf]  ;;  %v6012_v18 = vld [vmem:[#allocation3 + $0x40] sm:$0xf] }
 0x50f   : > { %5890 = vrot.lane.b32.xlu0 %v5816_v43, %s8798_s29  ;;  %v5401_v0 = vpop.permute.xlu1 %5400  ;;  %v4676_v16 = vor.u32 %v4674_v56, %v4673_v19  ;;  %v4678_v12 = vrot.slane %v4673_v19, 4  ;;  %v6000_v43 = vld [vmem:[#allocation3 + $0x10] sm:$0xf] }
 0x510   : > { %5467 = vst.msk [vmem:[#allocation5 + $0x78] sm:$0xf] %vm5436_vm6, %v5401_v0  ;;  %v6057_v33 = vshll.u32 %v6000_v43, 16  ;;  %v6061_v3 = vshrl.u32 %v6000_v43, 16  ;;  %v6006_v0 = vld [vmem:[#allocation3 + $0x28] sm:$0xf] }
 0x511   : > { %v5678_v37 = vpop.permute.xlu0 %5677  ;;  %5888 = vrot.lane.b32.xlu2 %v5815_v46, %s8798_s29  ;;  %v4677_v31 = vsel %vm9060_vm9, %v4669_v50, %v4676_v16  ;;  %v4842_v24 = vsel %vm11054_vm5, %v4678_v12, %v4841_v8  ;;  %v6081_v46 = vshll.u32 %v6003_v63, 16  ;;  %v6105_v7 = vshll.u32 %v6006_v0, 16 }
 0x512   : > { %5774 = vst.msk [vmem:[#allocation5] sm:$0xf] %vm5773_vm14, %v5678_v37  ;;  %v6053_v37 = vrot.slane %v6051_v25, 5  ;;  %v6109_v56 = vshrl.u32 %v6006_v0, 16  ;;  %v6059_v50 = vrot.slane %v6057_v33, 5  ;;  %v6063_v19 = vrot.slane %v6061_v3, 4 }
 0x513   : > { %v5694_v14 = vpop.permute.xlu2 %5693  ;;  %4840 = vst.msk [vmem:[#allocation3 + $0xc4] sm:$0xf] %vm282_vm10, %v4677_v31  ;;  %v6085_v8 = vshrl.u32 %v6003_v63, 16  ;;  %v6083_v12 = vrot.slane %v6081_v46, 5  ;;  %v11568_v31 = vrot.slane %v6105_v7, 5  ;;  %v6129_v63 = vshll.u32 %v6009_v26, 16 }
 0x514   : > { %5782 = vst.msk [vmem:[#allocation5 + $0x20] sm:$0xf] %vm5773_vm14, %v5694_v14  ;;  %v6078_v14 = vor.u32 %v6077_v5, %v6074_v15  ;;  %v6133_v15 = vshrl.u32 %v6009_v26, 16  ;;  %v6015_v5 = vld [vmem:[#allocation3 + $0x4c] sm:$0xf]  ;;  %vm5966_vm9 = vcmask 257216  }
 0x515   : > { %5892 = vrot.lane.b32.xlu1 %v5817_v11, %s8798_s29  ;;  %4843 = vst [vmem:[#allocation3 + $0xc8] sm:$0x1] %v4842_v24  ;;  %v5835_v11 = vld [vmem:[#allocation3 + $0xb8] sm:$0xf]  ;;  %v6111_v24 = vrot.slane %v6109_v56, 4  ;;  %v6153_v0 = vshll.u32 %v6012_v18, 16 }
 0x516   : > { %v6177_v7 = vshll.u32 %v6015_v5, 16  ;;  %v6181_v56 = vshrl.u32 %v6015_v5, 16  ;;  %v6024_v26 = vld [vmem:[#allocation3 + $0x70] sm:$0xf]  ;;  %v6021_v5 = vld [vmem:[#allocation3 + $0x64] sm:$0xf] }
 0x517   : > { %5896 = vrot.lane.b32.xlu0 %v5819_v55, %s8798_s29  ;;  %v5680_v21 = vpop.permute.xlu1 %5679 }
 0x518   : > { %5775 = vst.msk [vmem:[#allocation5 + $0x4] sm:$0xf] %vm5773_vm14, %v5680_v21  ;;  %v6001_v21 = vld [vmem:[#allocation3 + $0x14] sm:$0x1] }
 0x519   : > { %v5684_v51 = vpop.permute.xlu0 %5683  ;;  %5894 = vrot.lane.b32.xlu2 %v5818_v60, %s8798_s29  ;;  %v6005_v60 = vld [vmem:[#allocation3 + $0x24] sm:$0xf] }
 0x51a   : > { %5777 = vst.msk [vmem:[#allocation5 + $0xc] sm:$0xf] %vm5773_vm14, %v5684_v51  ;;  %v5837_v58 = vld [vmem:[#allocation3 + $0xc4] sm:$0xf]  ;;  %v6054_v51 = vor.u32 %v6053_v37, %v6050_v38 }
 0x51b   : > { %v5700_v30 = vpop.permute.xlu2 %5699 }
 0x51c   : > { %5785 = vst.msk [vmem:[#allocation5 + $0x2c] sm:$0xf] %vm5773_vm14, %v5700_v30  ;;  %v6079_v30 = vrot.slane %v6078_v14, 4  ;;  %v6157_v14 = vshrl.u32 %v6012_v18, 16 }
 0x51d   : > { %5898 = vrot.lane.b32.xlu1 %v5820_v17, %s8798_s29  ;;  %v6064_v17 = vor.u32 %v6063_v19, %v6059_v50  ;;  %v6135_v19 = vrot.slane %v6133_v15, 4 }
 0x51f   : > { %5902 = vrot.lane.b32.xlu0 %v5822_v1, %s8798_s29  ;;  %v5686_v47 = vpop.permute.xlu1 %5685 }
 0x520   : > { %5778 = vst.msk [vmem:[#allocation5 + $0x10] sm:$0xf] %vm5773_vm14, %v5686_v47  ;;  %v6004_v47 = vld [vmem:[#allocation3 + $0x20] sm:$0x1] }
 0x521   : > { %v5690_v52 = vpop.permute.xlu0 %5689  ;;  %5900 = vrot.lane.b32.xlu2 %v5821_v27, %s8798_s29  ;;  %v5836_v27 = vld [vmem:[#allocation3 + $0xc0] sm:$0xf] }
 0x522   : > { %5780 = vst.msk [vmem:[#allocation5 + $0x18] sm:$0xf] %vm5773_vm14, %v5690_v52  ;;  %v6007_v52 = vld [vmem:[#allocation3 + $0x2c] sm:$0x1] }
 0x523   : > { %v5706_v49 = vpop.permute.xlu2 %5705 }
 0x524   : > { %5788 = vst.msk [vmem:[#allocation5 + $0x38] sm:$0xf] %vm5773_vm14, %v5706_v49  ;;  %v6087_v49 = vrot.slane %v6085_v8, 4 }
 0x525   : > { %5904 = vrot.lane.b32.xlu1 %v5823_v29, %s8798_s29  ;;  %v6067_v29 = vshll.u32 %v6001_v21, 16  ;;  %v6010_v21 = vld [vmem:[#allocation3 + $0x38] sm:$0x1] }
 0x527   : > { %5908 = vrot.lane.b32.xlu0 %v5825_v42, %s8798_s29  ;;  %v5692_v20 = vpop.permute.xlu1 %5691  ;;  %v6055_v42 = vrot.slane %v6054_v51, 4  ;;  %v6069_v54 = vrot.slane %v6067_v29, 5  ;;  %v6139_v29 = vshll.u32 %v6010_v21, 16 }
 0x528   : > { %5781 = vst.msk [vmem:[#allocation5 + $0x1c] sm:$0xf] %vm5773_vm14, %v5692_v20  ;;  %v6099_v20 = vshll.u32 %v6005_v60, 16 }
 0x529   : > { %v5696_v40 = vpop.permute.xlu0 %5695  ;;  %5906 = vrot.lane.b32.xlu2 %v5824_v41, %s8798_s29  ;;  %v6011_v41 = vld [vmem:[#allocation3 + $0x3c] sm:$0xf] }
 0x52a   : > { %5783 = vst.msk [vmem:[#allocation5 + $0x24] sm:$0xf] %vm5773_vm14, %v5696_v40  ;;  %v6096_v40 = vshrl.u32 %v6005_v60, 16  ;;  %v6101_v23 = vrot.slane %v6099_v20, 5  ;;  %v11593_v60 = vrot.slane %v6177_v7, 5  ;;  %v6225_v7 = vshll.u32 %v6021_v5, 16 }
 0x52b   : > { %v5712_v53 = vpop.permute.xlu2 %5711 }
 0x52c   : > { %5791 = vst.msk [vmem:[#allocation5 + $0x44] sm:$0xf] %vm5773_vm14, %v5712_v53  ;;  %v6112_v53 = vor.u32 %v6111_v24, %v11568_v31 }
 0x52d   : > { %5910 = vrot.lane.b32.xlu1 %v5826_v9, %s8798_s29  ;;  %v6008_v9 = vld [vmem:[#allocation3 + $0x30] sm:$0xf] }
 0x52e   : > { %v6120_v59 = vshrl.u32 %v6008_v9, 16  ;;  %v6123_v25 = vshll.u32 %v6008_v9, 16 }
 0x52f   : > { %5914 = vrot.lane.b32.xlu0 %v5828_v4, %s8798_s29  ;;  %v5698_v34 = vpop.permute.xlu1 %5697  ;;  %v6084_v4 = vsel %vm8874_vm3, %v6079_v30, %v6083_v12  ;;  %v6014_v30 = vld [vmem:[#allocation3 + $0x48] sm:$0xf] }
 0x530   : > { %5784 = vst.msk [vmem:[#allocation5 + $0x28] sm:$0xf] %vm5773_vm14, %v5698_v34  ;;  %v6065_v34 = vrot.slane %v6064_v17, 4  ;;  %v6125_v46 = vrot.slane %v6123_v25, 5  ;;  %v6171_v20 = vshll.u32 %v6014_v30, 16 }
 0x531   : > { %v5702_v44 = vpop.permute.xlu0 %5701  ;;  %5912 = vrot.lane.b32.xlu2 %v5827_v39, %s8798_s29  ;;  %v6115_v39 = vshll.u32 %v6007_v52, 16 }
 0x532   : > { %5786 = vst.msk [vmem:[#allocation5 + $0x30] sm:$0xf] %vm5773_vm14, %v5702_v44  ;;  %v6070_v43 = vsel %vm8874_vm3, %v6065_v34, %v6069_v54  ;;  %v6141_v54 = vrot.slane %v6139_v29, 5 }
 0x533   : > { %v5718_v28 = vpop.permute.xlu2 %5717 }
 0x534   : > { %5794 = vst.msk [vmem:[#allocation5 + $0x50] sm:$0xf] %vm5773_vm14, %v5718_v28  ;;  %v6060_v28 = vsel %vm8874_vm3, %v6055_v42, %v6059_v50  ;;  %v6131_v50 = vrot.slane %v6129_v63, 5 }
 0x535   : > { %5916 = vrot.lane.b32.xlu1 %v5829_v48, %s8798_s29  ;;  %v6088_v48 = vor.u32 %v6087_v49, %v6083_v12  ;;  %v6155_v12 = vrot.slane %v6153_v0, 5  ;;  %v6016_v49 = vld [vmem:[#allocation3 + $0x50] sm:$0x1] }
 0x536   : > { %v6136_v52 = vor.u32 %v6135_v19, %v6131_v50  ;;  %v6023_v19 = vld [vmem:[#allocation3 + $0x6c] sm:$0xf] }
 0x537   : > { %5920 = vrot.lane.b32.xlu0 %v5831_v62, %s8798_s29  ;;  %v5704_v61 = vpop.permute.xlu1 %5703  ;;  %v6091_v62 = vshll.u32 %v6004_v47, 16  ;;  %v6159_v47 = vrot.slane %v6157_v14, 4 }
 0x538   : > { %5787 = vst.msk [vmem:[#allocation5 + $0x34] sm:$0xf] %vm5773_vm14, %v5704_v61  ;;  %v6147_v61 = vshll.u32 %v6011_v41, 16 }
 0x539   : > { %v5708_v22 = vpop.permute.xlu0 %5707  ;;  %5918 = vrot.lane.b32.xlu2 %v5830_v36, %s8798_s29  ;;  %v6093_v38 = vrot.slane %v6091_v62, 5  ;;  %v6160_v62 = vor.u32 %v6159_v47, %v6155_v12  ;;  %v6019_v47 = vld [vmem:[#allocation3 + $0x5c] sm:$0x1] }
 0x53a   : > { %5789 = vst.msk [vmem:[#allocation5 + $0x3c] sm:$0xf] %vm5773_vm14, %v5708_v22  ;;  %v6144_v22 = vshrl.u32 %v6011_v41, 16  ;;  %v6149_v33 = vrot.slane %v6147_v61, 5  ;;  %v6020_v41 = vld [vmem:[#allocation3 + $0x60] sm:$0xf] }
 0x53b   : > { %v5724_v2 = vpop.permute.xlu2 %5723  ;;  %v6219_v61 = vshll.u32 %v6020_v41, 16  ;;  %v6161_v15 = vrot.slane %v6160_v62, 4 }
 0x53c   : > { %5797 = vst.msk [vmem:[#allocation5 + $0x5c] sm:$0xf] %vm5773_vm14, %v5724_v2  ;;  %v6113_v2 = vrot.slane %v6112_v53, 4  ;;  %v6146_v37 = vrot.slane %v6144_v22, 4  ;;  %v6216_v22 = vshrl.u32 %v6020_v41, 16 }
 0x53d   : > { %5922 = vrot.lane.b32.xlu1 %v5832_v45, %s8798_s29  ;;  %v6029_v41 = vld [vmem:[#allocation3 + $0x84] sm:$0xf] }
 0x53e   : > { %v6150_v8 = vor.u32 %v6149_v33, %v6146_v37 }
 0x53f   : > { %5926 = vrot.lane.b32.xlu0 %v5834_v13, %s8798_s29  ;;  %v5710_v32 = vpop.permute.xlu1 %5709  ;;  %v6098_v13 = vrot.slane %v6096_v40, 4  ;;  %v6168_v40 = vshrl.u32 %v6014_v30, 16  ;;  %v6227_v30 = vrot.slane %v6225_v7, 5 }
 0x540   : > { %5790 = vst.msk [vmem:[#allocation5 + $0x40] sm:$0xf] %vm5773_vm14, %v5710_v32  ;;  %v6089_v32 = vrot.slane %v6088_v48, 4  ;;  %v6151_v42 = vrot.slane %v6150_v8, 4  ;;  %v6229_v8 = vshrl.u32 %v6021_v5, 16 }
 0x541   : > { %v5714_v57 = vpop.permute.xlu0 %5713  ;;  %5924 = vrot.lane.b32.xlu2 %v5833_v35, %s8798_s29  ;;  %v6102_v3 = vor.u32 %v6101_v23, %v6098_v13  ;;  %v6122_v35 = vrot.slane %v6120_v59, 4  ;;  %v6170_v23 = vrot.slane %v6168_v40, 4  ;;  %v6173_v59 = vrot.slane %v6171_v20, 5 }
 0x542   : > { %5792 = vst.msk [vmem:[#allocation5 + $0x48] sm:$0xf] %vm5773_vm14, %v5714_v57  ;;  %v6117_v57 = vrot.slane %v6115_v39, 5  ;;  %v6137_v39 = vrot.slane %v6136_v52, 4  ;;  %v6231_v20 = vrot.slane %v6229_v8, 4 }
 0x543   : > { %v5730_v55 = vpop.permute.xlu2 %5729  ;;  %v6126_v24 = vor.u32 %v6125_v46, %v6122_v35  ;;  %v6174_v0 = vor.u32 %v6173_v59, %v6170_v23  ;;  %v6249_v35 = vshll.u32 %v6024_v26, 16 }
 0x544   : > { %5800 = vst.msk [vmem:[#allocation5 + $0x68] sm:$0xf] %vm5773_vm14, %v5730_v55 }
 0x545   : > { %5928 = vrot.lane.b32.xlu1 %v5835_v11, %s8798_s29  ;;  %v6094_v11 = vsel %vm8874_vm3, %v6089_v32, %v6093_v38  ;;  %v6127_v53 = vrot.slane %v6126_v24, 4  ;;  %v6218_v32 = vrot.slane %v6216_v22, 4  ;;  %v6221_v38 = vrot.slane %v6219_v61, 5 }
 0x546   : > { %v11620_v21 = vrot.slane %v6249_v35, 5 }
 0x547   : > { %5932 = vrot.lane.b32.xlu0 %v5837_v58, %s8798_s29  ;;  %v5716_v1 = vpop.permute.xlu1 %5715  ;;  %v6118_v58 = vsel %vm8874_vm3, %v6113_v2, %v6117_v57  ;;  %v6132_v48 = vsel %vm8874_vm3, %v6127_v53, %v6131_v50  ;;  %v6018_v2 = vld [vmem:[#allocation3 + $0x58] sm:$0xf]  ;;  %v6142_v57 = vsel %vm8874_vm3, %v6137_v39, %v6141_v54  ;;  %v6243_v53 = vshll.u32 %v6023_v19, 16  ;;  %v6027_v54 = vld [vmem:[#allocation3 + $0x7c] sm:$0xf] }
 0x548   : > { %5793 = vst.msk [vmem:[#allocation5 + $0x4c] sm:$0xf] %vm5773_vm14, %v5716_v1  ;;  %v6183_v1 = vrot.slane %v6181_v56, 4  ;;  %v6201_v37 = vshll.u32 %v6018_v2, 16  ;;  %v6205_v33 = vshrl.u32 %v6018_v2, 16  ;;  %v6277_v5 = vshrl.u32 %v6027_v54, 16 }
 0x549   : > { %v5720_v16 = vpop.permute.xlu0 %5719  ;;  %5930 = vrot.lane.b32.xlu2 %v5836_v27, %s8798_s29  ;;  %v6026_v39 = vld [vmem:[#allocation3 + $0x78] sm:$0xf]  ;;  %v6245_v59 = vrot.slane %v6243_v53, 5  ;;  %s8801_s29 = smov 40  }
 0x54a   : > { %5795 = vst.msk [vmem:[#allocation5 + $0x54] sm:$0xf] %vm5773_vm14, %v5720_v16  ;;  %v6103_v16 = vrot.slane %v6102_v3, 4  ;;  %v6184_v9 = vor.u32 %v6183_v1, %v11593_v60  ;;  %v6175_v1 = vrot.slane %v6174_v0, 4  ;;  %v6264_v2 = vshrl.u32 %v6026_v39, 16 }
 0x54b   : > { %v5736_v44 = vpop.permute.xlu2 %5735 }
 0x54c   : > { %5803 = vst.msk [vmem:[#allocation5 + $0x74] sm:$0xf] %vm5773_vm14, %v5736_v44  ;;  %v6108_v27 = vsel %vm8874_vm3, %v6103_v16, %v11568_v31  ;;  %v6013_v44 = vld [vmem:[#allocation3 + $0x44] sm:$0x1]  ;;  %v6187_v31 = vshll.u32 %v6016_v49, 16  ;;  %v6185_v18 = vrot.slane %v6184_v9, 4  ;;  %v6180_v49 = vsel %vm8874_vm3, %v6175_v1, %v11593_v60 }
 0x54d   : > { %6431 = vrot.lane.b32.xlu1 %v6060_v28, %s8800_s6  ;;  %v6017_v28 = vld [vmem:[#allocation3 + $0x54] sm:$0xf]  ;;  %v6163_v13 = vshll.u32 %v6013_v44, 16  ;;  %v6207_v16 = vrot.slane %v6205_v33, 4  ;;  %v6022_v60 = vld [vmem:[#allocation3 + $0x68] sm:$0x1] }
 0x54e   : > { %v6192_v25 = vshrl.u32 %v6017_v28, 16  ;;  %v6189_v63 = vrot.slane %v6187_v31, 5 }
 0x54f   : > { %6435 = vrot.lane.b32.xlu0 %v6084_v4, %s8800_s6  ;;  %v5722_v45 = vpop.permute.xlu1 %5721  ;;  %v6156_v4 = vsel %vm8874_vm3, %v6151_v42, %v6155_v12  ;;  %v6165_v3 = vrot.slane %v6163_v13, 5  ;;  %v6240_v42 = vshrl.u32 %v6023_v19, 16 }
 0x550   : > { %5796 = vst.msk [vmem:[#allocation5 + $0x58] sm:$0xf] %vm5773_vm14, %v5722_v45  ;;  %v6195_v45 = vshll.u32 %v6017_v28, 16  ;;  %v6190_v46 = vsel %vm8874_vm3, %v6185_v18, %v6189_v63  ;;  %v6194_v56 = vrot.slane %v6192_v25, 4  ;;  %v6267_v18 = vshll.u32 %v6026_v39, 16 }
 0x551   : > { %v5726_v36 = vpop.permute.xlu0 %5725  ;;  %6433 = vrot.lane.b32.xlu2 %v6070_v43, %s8800_s6  ;;  %v6166_v50 = vsel %vm8874_vm3, %v6161_v15, %v6165_v3  ;;  %v6242_v28 = vrot.slane %v6240_v42, 4  ;;  %v6273_v15 = vshll.u32 %v6027_v54, 16 }
 0x552   : > { %5798 = vst.msk [vmem:[#allocation5 + $0x60] sm:$0xf] %vm5773_vm14, %v5726_v36 }
 0x553   : > { %v5871_v55 = vpop.permute.xlu2 %5870  ;;  %v6246_v35 = vor.u32 %v6245_v59, %v6242_v28  ;;  %v6275_v19 = vrot.slane %v6273_v15, 5  ;;  %v6039_v15 = vld [vmem:[#allocation3 + $0xac] sm:$0xf] }
 0x554   : > { %5967 = vst.msk [vmem:[#allocation5] sm:$0xf] %vm5966_vm9, %v5871_v55  ;;  %v6197_v55 = vrot.slane %v6195_v45, 5  ;;  %v6235_v45 = vshll.u32 %v6022_v60, 16  ;;  %v6035_v60 = vld [vmem:[#allocation3 + $0x9c] sm:$0xf] }
 0x555   : > { %6437 = vrot.lane.b32.xlu1 %v6094_v11, %s8800_s6  ;;  %v6222_v11 = vor.u32 %v6221_v38, %v6218_v32  ;;  %v6033_v32 = vld [vmem:[#allocation3 + $0x94] sm:$0xf]  ;;  %v6247_v1 = vrot.slane %v6246_v35, 4 }
 0x556   : > { %v6237_v7 = vrot.slane %v6235_v45, 5  ;;  %v6339_v45 = vshll.u32 %v6035_v60, 16 }
 0x557   : > { %6441 = vrot.lane.b32.xlu0 %v6118_v58, %s8800_s6  ;;  %v5728_v17 = vpop.permute.xlu1 %5727  ;;  %v6253_v58 = vshrl.u32 %v6024_v26, 16  ;;  %v6223_v29 = vrot.slane %v6222_v11, 4  ;;  %v6232_v26 = vor.u32 %v6231_v20, %v6227_v30  ;;  %v6279_v11 = vrot.slane %v6277_v5, 4 }
 0x558   : > { %5799 = vst.msk [vmem:[#allocation5 + $0x64] sm:$0xf] %vm5773_vm14, %v5728_v17  ;;  %v6198_v17 = vor.u32 %v6197_v55, %v6194_v56  ;;  %v6269_v56 = vrot.slane %v6267_v18, 5  ;;  %v6321_v55 = vshll.u32 %v6033_v32, 16  ;;  %v6252_v20 = vsel %vm8874_vm3, %v6247_v1, %v11620_v21 }
 0x559   : > { %v5732_v51 = vpop.permute.xlu0 %5731  ;;  %6439 = vrot.lane.b32.xlu2 %v6108_v27, %s8800_s6  ;;  %v6255_v24 = vrot.slane %v6253_v58, 4  ;;  %v6025_v27 = vld [vmem:[#allocation3 + $0x74] sm:$0x1]  ;;  %v6228_v9 = vsel %vm8874_vm3, %v6223_v29, %v6227_v30 }
 0x55a   : > { %5801 = vst.msk [vmem:[#allocation5 + $0x6c] sm:$0xf] %vm5773_vm14, %v5732_v51  ;;  %v6203_v51 = vrot.slane %v6201_v37, 5  ;;  %v6199_v44 = vrot.slane %v6198_v17, 4  ;;  %v6259_v62 = vshll.u32 %v6025_v27, 16  ;;  %v6233_v37 = vrot.slane %v6232_v26, 4 }
 0x55b   : > { %v5877_v34 = vpop.permute.xlu2 %5876  ;;  %v6032_v27 = vld [vmem:[#allocation3 + $0x90] sm:$0xf] }
 0x55c   : > { %5970 = vst.msk [vmem:[#allocation5 + $0xc] sm:$0xf] %vm5966_vm9, %v5877_v34  ;;  %v6208_v40 = vor.u32 %v6207_v16, %v6203_v51  ;;  %v6211_v34 = vshll.u32 %v6019_v47, 16  ;;  %v6204_v22 = vsel %vm8874_vm3, %v6199_v44, %v6203_v51  ;;  %v6261_v63 = vrot.slane %v6259_v62, 5 }
 0x55d   : > { %6443 = vrot.lane.b32.xlu1 %v6132_v48, %s8800_s6  ;;  %v6288_v48 = vshrl.u32 %v6029_v41, 16  ;;  %v6238_v8 = vsel %vm8874_vm3, %v6233_v37, %v6237_v7  ;;  %v6315_v44 = vshll.u32 %v6032_v27, 16  ;;  %v6341_v7 = vrot.slane %v6339_v45, 5 }
 0x55e   : > { %v6209_v61 = vrot.slane %v6208_v40, 4  ;;  %v6213_v25 = vrot.slane %v6211_v34, 5  ;;  %v6031_v40 = vld [vmem:[#allocation3 + $0x8c] sm:$0x1]  ;;  %v6038_v34 = vld [vmem:[#allocation3 + $0xa8] sm:$0xf] }
 0x55f   : > { %6447 = vrot.lane.b32.xlu0 %v6156_v4, %s8800_s6  ;;  %v5734_v43 = vpop.permute.xlu1 %5733  ;;  %v6256_v4 = vor.u32 %v6255_v24, %v11620_v21  ;;  %v6290_v33 = vrot.slane %v6288_v48, 4  ;;  %v6360_v54 = vshrl.u32 %v6038_v34, 16  ;;  %v6317_v18 = vrot.slane %v6315_v44, 5 }
 0x560   : > { %5802 = vst.msk [vmem:[#allocation5 + $0x70] sm:$0xf] %vm5773_vm14, %v5734_v43  ;;  %v6030_v43 = vld [vmem:[#allocation3 + $0x88] sm:$0xf]  ;;  %v6214_v38 = vsel %vm8874_vm3, %v6209_v61, %v6213_v25  ;;  %v6307_v61 = vshll.u32 %v6031_v40, 16  ;;  %v6336_v25 = vshrl.u32 %v6035_v60, 16 }
 0x561   : > { %v5738_v36 = vpop.permute.xlu0 %5737  ;;  %6445 = vrot.lane.b32.xlu2 %v6142_v57, %s8800_s6  ;;  %v6257_v23 = vrot.slane %v6256_v4, 4  ;;  %v6297_v58 = vshll.u32 %v6030_v43, 16  ;;  %v6301_v16 = vshrl.u32 %v6030_v43, 16  ;;  %v6034_v4 = vld [vmem:[#allocation3 + $0x98] sm:$0x1] }
 0x562   : > { %5804 = vst.msk [vmem:[#allocation5 + $0x78] sm:$0xf] %vm5773_vm14, %v5738_v36  ;;  %v6291_v36 = vshll.u32 %v6029_v41, 16  ;;  %v6309_v35 = vrot.slane %v6307_v61, 5 }
 0x563   : > { %v5883_v14 = vpop.permute.xlu2 %5882  ;;  %v6262_v0 = vsel %vm8874_vm3, %v6257_v23, %v6261_v63  ;;  %v6299_v30 = vrot.slane %v6297_v58, 5  ;;  %v6303_v53 = vrot.slane %v6301_v16, 4  ;;  %v6036_v23 = vld [vmem:[#allocation3 + $0xa0] sm:$0xf] }
 0x564   : > { %5973 = vst.msk [vmem:[#allocation5 + $0x18] sm:$0xf] %vm5966_vm9, %v5883_v14  ;;  %v6293_v3 = vrot.slane %v6291_v36, 5  ;;  %v6325_v14 = vshrl.u32 %v6033_v32, 16  ;;  %v6345_v5 = vshll.u32 %v6036_v23, 16  ;;  %v6349_v32 = vshrl.u32 %v6036_v23, 16 }
 0x565   : > { %6449 = vrot.lane.b32.xlu1 %v6166_v50, %s8800_s6  ;;  %v6304_v36 = vor.u32 %v6303_v53, %v6299_v30  ;;  %v6043_v53 = vld [vmem:[#allocation3 + $0xbc] sm:$0x1]  ;;  %v6045_v23 = vld [vmem:[#allocation3 + $0xc4] sm:$0xf] }
 0x566   : > { %v6294_v51 = vor.u32 %v6293_v3, %v6290_v33  ;;  %v6327_v47 = vrot.slane %v6325_v14, 4  ;;  %v6362_v3 = vrot.slane %v6360_v54, 4 }
 0x567   : > { %6453 = vrot.lane.b32.xlu0 %v6190_v46, %s8800_s6  ;;  %v5740_v52 = vpop.permute.xlu1 %5739  ;;  %v6266_v46 = vrot.slane %v6264_v2, 4  ;;  %v6305_v33 = vrot.slane %v6304_v36, 4 }
 0x568   : > { %5805 = vst.msk [vmem:[#allocation5 + $0x7c] sm:$0xf] %vm5773_vm14, %v5740_v52  ;;  %v11649_v52 = vrot.slane %v6321_v55, 5  ;;  %v6295_v41 = vrot.slane %v6294_v51, 4  ;;  %v6369_v55 = vshll.u32 %v6039_v15, 16  ;;  %v6351_v51 = vrot.slane %v6349_v32, 4 }
 0x569   : > { %v5873_v12 = vpop.permute.xlu0 %5872  ;;  %6451 = vrot.lane.b32.xlu2 %v6180_v49, %s8800_s6  ;;  %v6270_v17 = vor.u32 %v6269_v56, %v6266_v46  ;;  %v6280_v49 = vor.u32 %v6279_v11, %v6275_v19  ;;  %v6338_v46 = vrot.slane %v6336_v25, 4  ;;  %v6373_v11 = vshrl.u32 %v6039_v15, 16 }
 0x56a   : > { %5968 = vst.msk [vmem:[#allocation5 + $0x4] sm:$0xf] %vm5966_vm9, %v5873_v12  ;;  %v6028_v12 = vld [vmem:[#allocation3 + $0x80] sm:$0x1]  ;;  %v6300_v39 = vsel %vm8874_vm3, %v6295_v41, %v6299_v30  ;;  %v6328_v62 = vor.u32 %v6327_v47, %v11649_v52  ;;  %v6310_v16 = vsel %vm8874_vm3, %v6305_v33, %v6309_v35  ;;  %v6037_v30 = vld [vmem:[#allocation3 + $0xa4] sm:$0x1] }
 0x56b   : > { %v5889_v31 = vpop.permute.xlu2 %5888  ;;  %v6283_v29 = vshll.u32 %v6028_v12, 16  ;;  %v6281_v48 = vrot.slane %v6280_v49, 4  ;;  %v6342_v1 = vor.u32 %v6341_v7, %v6338_v46  ;;  %v6371_v47 = vrot.slane %v6369_v55, 5  ;;  %v6560_v35 = vld [vmem:[#allocation3 + $0xc] sm:$0xe] }
 0x56c   : > { %5976 = vst.msk [vmem:[#allocation5 + $0x24] sm:$0xf] %vm5966_vm9, %v5889_v31  ;;  %v6271_v31 = vrot.slane %v6270_v17, 4  ;;  %v6329_v43 = vrot.slane %v6328_v62, 4  ;;  %v6375_v40 = vrot.slane %v6373_v11, 4  ;;  %v6355_v44 = vshll.u32 %v6037_v30, 16 }
 0x56d   : > { %6455 = vrot.lane.b32.xlu1 %v6204_v22, %s8800_s6  ;;  %v6285_v21 = vrot.slane %v6283_v29, 5  ;;  %v6331_v22 = vshll.u32 %v6034_v4, 16  ;;  %v6417_v32 = vshll.u32 %v6045_v23, 16  ;;  %v8563_v11 = vrot.slane %v6560_v35, 9 }
 0x56e   : > { %v6276_v26 = vsel %vm8874_vm3, %v6271_v31, %v6275_v19 }
 0x56f   : > { %6459 = vrot.lane.b32.xlu0 %v6228_v9, %s8800_s6  ;;  %v5875_v57 = vpop.permute.xlu1 %5874  ;;  %v6312_v9 = vshrl.u32 %v6032_v27, 16  ;;  %v6286_v63 = vsel %vm8874_vm3, %v6281_v48, %v6285_v21  ;;  %v6333_v37 = vrot.slane %v6331_v22, 5  ;;  %v6403_v21 = vshll.u32 %v6043_v53, 16 }
 0x570   : > { %5969 = vst.msk [vmem:[#allocation5 + $0x8] sm:$0xf] %vm5966_vm9, %v5875_v57  ;;  %v6376_v22 = vor.u32 %v6375_v40, %v6371_v47 }
 0x571   : > { %v5879_v13 = vpop.permute.xlu0 %5878  ;;  %6457 = vrot.lane.b32.xlu2 %v6214_v38, %s8800_s6  ;;  %v6314_v2 = vrot.slane %v6312_v9, 4  ;;  %v6042_v38 = vld [vmem:[#allocation3 + $0xb8] sm:$0xf]  ;;  %v6334_v56 = vsel %vm8874_vm3, %v6329_v43, %v6333_v37  ;;  %v6343_v9 = vrot.slane %v6342_v1, 4 }
 0x572   : > { %5971 = vst.msk [vmem:[#allocation5 + $0x10] sm:$0xf] %vm5966_vm9, %v5879_v13  ;;  %v6363_v13 = vshll.u32 %v6038_v34, 16  ;;  %v6393_v14 = vshll.u32 %v6042_v38, 16  ;;  %v6044_v34 = vld [vmem:[#allocation3 + $0xc0] sm:$0xf] }
 0x573   : > { %v5895_v50 = vpop.permute.xlu2 %5894  ;;  %v6318_v58 = vor.u32 %v6317_v18, %v6314_v2  ;;  %v6411_v36 = vshll.u32 %v6044_v34, 16 }
 0x574   : > { %5979 = vst.msk [vmem:[#allocation5 + $0x30] sm:$0xf] %vm5966_vm9, %v5895_v50  ;;  %v6397_v50 = vshrl.u32 %v6042_v38, 16  ;;  %v11677_v27 = vrot.slane %v6393_v14, 5  ;;  %v6421_v38 = vshrl.u32 %v6045_v23, 16 }
 0x575   : > { %6461 = vrot.lane.b32.xlu1 %v6238_v8, %s8800_s6  ;;  %v6347_v8 = vrot.slane %v6345_v5, 5  ;;  %v6319_v17 = vrot.slane %v6318_v58, 4  ;;  %v6413_v5 = vrot.slane %v6411_v36, 5  ;;  %v6561_v58 = vld [vmem:[#allocation3 + $0x10] sm:$0xf] }
 0x576   : > { %v6423_v55 = vrot.slane %v6421_v38, 4 }
 0x577   : > { %6465 = vrot.lane.b32.xlu0 %v6262_v0, %s8800_s6  ;;  %v5881_v42 = vpop.permute.xlu1 %5880  ;;  %v6365_v0 = vrot.slane %v6363_v13, 5  ;;  %v6352_v29 = vor.u32 %v6351_v51, %v6347_v8  ;;  %v6324_v41 = vsel %vm8874_vm3, %v6319_v17, %v11649_v52  ;;  %v6040_v52 = vld [vmem:[#allocation3 + $0xb0] sm:$0x1]  ;;  %v6348_v61 = vsel %vm8874_vm3, %v6343_v9, %v6347_v8 }
 0x578   : > { %5972 = vst.msk [vmem:[#allocation5 + $0x14] sm:$0xf] %vm5966_vm9, %v5881_v42  ;;  %v6399_v42 = vrot.slane %v6397_v50, 4  ;;  %v6357_v13 = vrot.slane %v6355_v44, 5  ;;  %v6379_v2 = vshll.u32 %v6040_v52, 16  ;;  %v6658_v8 = vrot.slane %v6561_v58, 5 }
 0x579   : > { %v5885_v24 = vpop.permute.xlu0 %5884  ;;  %6463 = vrot.lane.b32.xlu2 %v6252_v20, %s8800_s6  ;;  %v6366_v12 = vor.u32 %v6365_v0, %v6362_v3  ;;  %v6041_v20 = vld [vmem:[#allocation3 + $0xb4] sm:$0xf]  ;;  %v6353_v48 = vrot.slane %v6352_v29, 4  ;;  %v6046_v50 = vld [vmem:[#allocation3 + $0xc8] sm:$0x1] }
 0x57a   : > { %5974 = vst.msk [vmem:[#allocation5 + $0x1c] sm:$0xf] %vm5966_vm9, %v5885_v24  ;;  %v6400_v31 = vor.u32 %v6399_v42, %v11677_v27  ;;  %v6384_v62 = vshrl.u32 %v6041_v20, 16  ;;  %v6387_v60 = vshll.u32 %v6041_v20, 16  ;;  %v6381_v33 = vrot.slane %v6379_v2, 5 }
 0x57b   : > { %v5901_v28 = vpop.permute.xlu2 %5900  ;;  %v6367_v4 = vrot.slane %v6366_v12, 4  ;;  %v6358_v43 = vsel %vm8874_vm3, %v6353_v48, %v6357_v13  ;;  %v6427_v30 = vshll.u32 %v6046_v50, 16  ;;  %v6659_v17 = vsel %vm9676_vm13, %v8563_v11, %v6658_v8  ;;  %v6565_v20 = vld [vmem:[#allocation3 + $0x20] sm:$0x1]  ;;  %v6569_v52 = vld [vmem:[#allocation3 + $0x30] sm:$0xe] }
 0x57c   : > { %5982 = vst.msk [vmem:[#allocation5 + $0x3c] sm:$0xf] %vm5966_vm9, %v5901_v28  ;;  %v6386_v18 = vrot.slane %v6384_v62, 4  ;;  %v6389_v25 = vrot.slane %v6387_v60, 5  ;;  %v6668_v44 = vrot.slane %v6565_v20, 5 }
 0x57d   : > { %6467 = vrot.lane.b32.xlu1 %v6276_v26, %s8800_s6  ;;  %v6408_v26 = vshrl.u32 %v6044_v34, 16  ;;  %v6660_v34 = vrot.slane %v6658_v8, 4  ;;  %v6563_v60 = vld [vmem:[#allocation3 + $0x18] sm:$0xe]  ;;  %v6573_v13 = vld [vmem:[#allocation3 + $0x40] sm:$0xf] }
 0x57e   : > { %v6390_v3 = vor.u32 %v6389_v25, %v6386_v18  ;;  %v6578_v11 = vld [vmem:[#allocation3 + $0x54] sm:$0xe]  ;;  %v6576_v8 = vld [vmem:[#allocation3 + $0x4c] sm:$0xf] }
 0x57f   : > { %6471 = vrot.lane.b32.xlu0 %v6300_v39, %s8800_s6  ;;  %v5887_v57 = vpop.permute.xlu1 %5886  ;;  %v6372_v39 = vsel %vm8874_vm3, %v6367_v4, %v6371_v47  ;;  %v6410_v15 = vrot.slane %v6408_v26, 4 }
 0x580   : > { %5975 = vst.msk [vmem:[#allocation5 + $0x20] sm:$0xf] %vm5966_vm9, %v5887_v57  ;;  %v6405_v57 = vrot.slane %v6403_v21, 5 }
 0x581   : > { %v5891_v59 = vpop.permute.xlu0 %5890  ;;  %6469 = vrot.lane.b32.xlu2 %v6286_v63, %s8800_s6  ;;  %v6377_v63 = vrot.slane %v6376_v22, 4  ;;  %v6414_v7 = vor.u32 %v6413_v5, %v6410_v15  ;;  %v6567_v22 = vld [vmem:[#allocation3 + $0x28] sm:$0xf] }
 0x582   : > { %5977 = vst.msk [vmem:[#allocation5 + $0x28] sm:$0xf] %vm5966_vm9, %v5891_v59  ;;  %v6401_v59 = vrot.slane %v6400_v31, 4  ;;  %v6672_v2 = vrot.slane %v6567_v22, 5  ;;  %v6588_v22 = vld [vmem:[#allocation3 + $0x7c] sm:$0xf] }
 0x583   : > { %v5907_v19 = vpop.permute.xlu2 %5906  ;;  %v6382_v46 = vsel %vm8874_vm3, %v6377_v63, %v6381_v33 }
 0x584   : > { %5985 = vst.msk [vmem:[#allocation5 + $0x48] sm:$0xf] %vm5966_vm9, %v5907_v19  ;;  %v6406_v37 = vsel %vm8874_vm3, %v6401_v59, %v6405_v57  ;;  %v6391_v19 = vrot.slane %v6390_v3, 4  ;;  %v8566_v59 = vrot.slane %v6569_v52, 9  ;;  %v6568_v57 = vld [vmem:[#allocation3 + $0x2c] sm:$0x1] }
 0x585   : > { %6473 = vrot.lane.b32.xlu1 %v6310_v16, %s8800_s6  ;;  %v6564_v16 = vld [vmem:[#allocation3 + $0x1c] sm:$0xf]  ;;  %v6674_v15 = vrot.slane %v6672_v2, 4  ;;  %v6675_v38 = vrot.slane %v6568_v57, 5  ;;  %v6571_v3 = vld [vmem:[#allocation3 + $0x38] sm:$0x1] }
 0x586   : > { %v6396_v12 = vsel %vm8874_vm3, %v6391_v19, %v11677_v27  ;;  %v6665_v47 = vrot.slane %v6564_v16, 5  ;;  %v6429_v27 = vrot.slane %v6427_v30, 5  ;;  %v6581_v52 = vld [vmem:[#allocation3 + $0x60] sm:$0xe] }
 0x587   : > { %6477 = vrot.lane.b32.xlu0 %v6334_v56, %s8800_s6  ;;  %v5893_v49 = vpop.permute.xlu1 %5892  ;;  %v6419_v56 = vrot.slane %v6417_v32, 5  ;;  %v6574_v32 = vld [vmem:[#allocation3 + $0x44] sm:$0x1] }
 0x588   : > { %5978 = vst.msk [vmem:[#allocation5 + $0x2c] sm:$0xf] %vm5966_vm9, %v5893_v49  ;;  %v6667_v4 = vrot.slane %v6665_v47, 4  ;;  %v6689_v35 = vrot.slane %v6574_v32, 5  ;;  %v6586_v32 = vld [vmem:[#allocation3 + $0x74] sm:$0x1] }
 0x589   : > { %v5897_v24 = vpop.permute.xlu0 %5896  ;;  %6475 = vrot.lane.b32.xlu2 %v6324_v41, %s8800_s6  ;;  %v6424_v1 = vor.u32 %v6423_v55, %v6419_v56  ;;  %v6562_v41 = vld [vmem:[#allocation3 + $0x14] sm:$0x1]  ;;  %v6572_v55 = vld [vmem:[#allocation3 + $0x3c] sm:$0xe] }
 0x58a   : > { %5980 = vst.msk [vmem:[#allocation5 + $0x34] sm:$0xf] %vm5966_vm9, %v5897_v24  ;;  %v6415_v24 = vrot.slane %v6414_v7, 4  ;;  %v6669_v31 = vsel %vm9676_vm13, %v6667_v4, %v6668_v44  ;;  %v6682_v7 = vrot.slane %v6571_v3, 5  ;;  %v6592_v3 = vld [vmem:[#allocation3 + $0x8c] sm:$0x1] }
 0x58b   : > { %v5913_v28 = vpop.permute.xlu2 %5912  ;;  %v6425_v29 = vrot.slane %v6424_v1, 4  ;;  %v6582_v1 = vld [vmem:[#allocation3 + $0x64] sm:$0xf] }
 0x58c   : > { %5988 = vst.msk [vmem:[#allocation5 + $0x54] sm:$0xf] %vm5966_vm9, %v5913_v28  ;;  %v6420_v49 = vsel %vm8874_vm3, %v6415_v24, %v6419_v56  ;;  %v6570_v28 = vld [vmem:[#allocation3 + $0x34] sm:$0xf]  ;;  %v6575_v24 = vld [vmem:[#allocation3 + $0x48] sm:$0xe] }
 0x58d   : > { %6479 = vrot.lane.b32.xlu1 %v6348_v61, %s8800_s6  ;;  %v6430_v9 = vsel %vm8874_vm3, %v6425_v29, %v6429_v27  ;;  %v8564_v61 = vrot.slane %v6563_v60, 9  ;;  %v6679_v26 = vrot.slane %v6570_v28, 5  ;;  %v6707_v29 = vrot.slane %v6582_v1, 5 }
 0x58f   : > { %6483 = vrot.lane.b32.xlu0 %v6372_v39, %s8800_s6  ;;  %v5899_v45 = vpop.permute.xlu1 %5898  ;;  %v6661_v39 = vrot.slane %v6562_v41, 5  ;;  %v6666_v23 = vsel %vm9676_vm13, %v8564_v61, %v6665_v47  ;;  %v6680_v18 = vsel %vm9676_vm13, %v8566_v59, %v6679_v26  ;;  %v6681_v58 = vrot.slane %v6679_v26, 4 }
 0x590   : > { %5981 = vst.msk [vmem:[#allocation5 + $0x38] sm:$0xf] %vm5966_vm9, %v5899_v45  ;;  %v6686_v45 = vrot.slane %v6573_v13, 5  ;;  %v6693_v47 = vrot.slane %v6576_v8, 5  ;;  %v6709_v44 = vrot.slane %v6707_v29, 4  ;;  %v8570_v13 = vrot.slane %v6581_v52, 9 }
 0x591   : > { %v5903_v54 = vpop.permute.xlu0 %5902  ;;  %6481 = vrot.lane.b32.xlu2 %v6358_v43, %s8800_s6  ;;  %v6662_v48 = vsel %vm9676_vm13, %v6660_v34, %v6661_v39  ;;  %v6683_v50 = vsel %vm9676_vm13, %v6681_v58, %v6682_v7  ;;  %v6580_v39 = vld [vmem:[#allocation3 + $0x5c] sm:$0x1]  ;;  %v6597_v8 = vld [vmem:[#allocation3 + $0xa0] sm:$0xf] }
 0x592   : > { %5983 = vst.msk [vmem:[#allocation5 + $0x40] sm:$0xf] %vm5966_vm9, %v5903_v54  ;;  %v6566_v54 = vld [vmem:[#allocation3 + $0x24] sm:$0xe]  ;;  %v6695_v41 = vrot.slane %v6693_v47, 4 }
 0x593   : > { %v5919_v0 = vpop.permute.xlu2 %5918  ;;  %v8565_v25 = vrot.slane %v6566_v54, 9  ;;  %v6585_v54 = vld [vmem:[#allocation3 + $0x70] sm:$0xf] }
 0x594   : > { %5991 = vst.msk [vmem:[#allocation5 + $0x60] sm:$0xf] %vm5966_vm9, %v5919_v0  ;;  %v6676_v0 = vsel %vm9676_vm13, %v6674_v15, %v6675_v38 }
 0x595   : > { %6485 = vrot.lane.b32.xlu1 %v6382_v46, %s8800_s6  ;;  %v6673_v63 = vsel %vm9676_vm13, %v8565_v25, %v6672_v2  ;;  %v6584_v2 = vld [vmem:[#allocation3 + $0x6c] sm:$0xe]  ;;  %v6708_v25 = vsel %vm9676_vm13, %v8570_v13, %v6707_v29 }
 0x597   : > { %6489 = vrot.lane.b32.xlu0 %v6406_v37, %s8800_s6  ;;  %v5905_v51 = vpop.permute.xlu1 %5904  ;;  %v6688_v37 = vrot.slane %v6686_v45, 4 }
 0x598   : > { %5984 = vst.msk [vmem:[#allocation5 + $0x44] sm:$0xf] %vm5966_vm9, %v5905_v51  ;;  %v8567_v51 = vrot.slane %v6572_v55, 9 }
 0x599   : > { %v5909_v14 = vpop.permute.xlu0 %5908  ;;  %6487 = vrot.lane.b32.xlu2 %v6396_v12, %s8800_s6  ;;  %v6690_v46 = vsel %vm9676_vm13, %v6688_v37, %v6689_v35 }
 0x59a   : > { %5986 = vst.msk [vmem:[#allocation5 + $0x4c] sm:$0xf] %vm5966_vm9, %v5909_v14  ;;  %v6579_v14 = vld [vmem:[#allocation3 + $0x58] sm:$0xf]  ;;  %v6687_v30 = vsel %vm9676_vm13, %v8567_v51, %v6686_v45 }
 0x59b   : > { %v5925_v42 = vpop.permute.xlu2 %5924  ;;  %v6700_v16 = vrot.slane %v6579_v14, 5 }
 0x59c   : > { %5994 = vst.msk [vmem:[#allocation5 + $0x6c] sm:$0xf] %vm5966_vm9, %v5925_v42 }
 0x59d   : > { %6491 = vrot.lane.b32.xlu1 %v6420_v49, %s8800_s6  ;;  %v8568_v49 = vrot.slane %v6575_v24, 9  ;;  %v6702_v60 = vrot.slane %v6700_v16, 4  ;;  %v6594_v24 = vld [vmem:[#allocation3 + $0x94] sm:$0xf] }
 0x59e   : > { %v6735_v29 = vrot.slane %v6594_v24, 5  ;;  %v6899_v24 = vld [vmem:[#allocation3 + $0x1c] sm:$0xf] }
 0x59f   : > { %6768 = vrot.lane.b32.xlu0 %v6659_v17, %s8801_s29  ;;  %v5911_v53 = vpop.permute.xlu1 %5910  ;;  %v8569_v17 = vrot.slane %v6578_v11, 9  ;;  %v6694_v20 = vsel %vm9676_vm13, %v8568_v49, %v6693_v47  ;;  %v6590_v11 = vld [vmem:[#allocation3 + $0x84] sm:$0xe]  ;;  %v6593_v47 = vld [vmem:[#allocation3 + $0x90] sm:$0xe] }
 0x5a0   : > { %5987 = vst.msk [vmem:[#allocation5 + $0x50] sm:$0xf] %vm5966_vm9, %v5911_v53  ;;  %v6583_v53 = vld [vmem:[#allocation3 + $0x68] sm:$0x1]  ;;  %v8573_v1 = vrot.slane %v6590_v11, 9 }
 0x5a1   : > { %v5915_v40 = vpop.permute.xlu0 %5914  ;;  %6493 = vrot.lane.b32.xlu2 %v6430_v9, %s8800_s6  ;;  %v6701_v42 = vsel %vm9676_vm13, %v8569_v17, %v6700_v16  ;;  %s8802_s6 = smov 48   ;;  %v7678_v11 = vld [vmem:[#allocation3 + $0x80] sm:$0x1] }
 0x5a2   : > { %5989 = vst.msk [vmem:[#allocation5 + $0x58] sm:$0xf] %vm5966_vm9, %v5915_v40  ;;  %v6577_v40 = vld [vmem:[#allocation3 + $0x50] sm:$0x1] }
 0x5a3   : > { %v5931_v62 = vpop.permute.xlu2 %5930  ;;  %v6696_v9 = vrot.slane %v6577_v40, 5  ;;  %v8574_v40 = vrot.slane %v6593_v47, 9 }
 0x5a4   : > { %5997 = vst.msk [vmem:[#allocation5 + $0x78] sm:$0xf] %vm5966_vm9, %v5931_v62  ;;  %v6710_v62 = vrot.slane %v6583_v53, 5 }
 0x5a5   : > { %6770 = vrot.lane.b32.xlu1 %v6662_v48, %s8801_s29  ;;  %v6703_v48 = vrot.slane %v6580_v39, 5  ;;  %v6736_v53 = vsel %vm9676_vm13, %v8574_v40, %v6735_v29 }
 0x5a6   : > { %v6711_v28 = vsel %vm9676_vm13, %v6709_v44, %v6710_v62 }
 0x5a7   : > { %6774 = vrot.lane.b32.xlu0 %v6669_v31, %s8801_s29  ;;  %v5917_v36 = vpop.permute.xlu1 %5916  ;;  %v6697_v31 = vsel %vm9676_vm13, %v6695_v41, %v6696_v9  ;;  %v6704_v61 = vsel %vm9676_vm13, %v6702_v60, %v6703_v48  ;;  %v6595_v41 = vld [vmem:[#allocation3 + $0x98] sm:$0x1]  ;;  %v6737_v9 = vrot.slane %v6735_v29, 4 }
 0x5a8   : > { %5990 = vst.msk [vmem:[#allocation5 + $0x5c] sm:$0xf] %vm5966_vm9, %v5917_v36  ;;  %v6587_v36 = vld [vmem:[#allocation3 + $0x78] sm:$0xe]  ;;  %v6738_v39 = vrot.slane %v6595_v41, 5 }
 0x5a9   : > { %v5921_v21 = vpop.permute.xlu0 %5920  ;;  %6772 = vrot.lane.b32.xlu2 %v6666_v23, %s8801_s29  ;;  %v6721_v23 = vrot.slane %v6588_v22, 5  ;;  %v8572_v45 = vrot.slane %v6587_v36, 9 }
 0x5aa   : > { %5992 = vst.msk [vmem:[#allocation5 + $0x64] sm:$0xf] %vm5966_vm9, %v5921_v21  ;;  %v6739_v48 = vsel %vm9676_vm13, %v6737_v9, %v6738_v39  ;;  %v7093_v9 = vld [vmem:[#allocation3 + $0x20] sm:$0x1] }
 0x5ab   : > { %v6434_v43 = vpop.permute.xlu2 %6433  ;;  %v6722_v57 = vsel %vm9676_vm13, %v8572_v45, %v6721_v23  ;;  %v6723_v55 = vrot.slane %v6721_v23, 4  ;;  %v7677_v23 = vld [vmem:[#allocation3 + $0x7c] sm:$0xf]  ;;  %v7676_v45 = vld [vmem:[#allocation3 + $0x78] sm:$0xe] }
 0x5ac   : > { %6529 = vst.msk [vmem:[#allocation5 + $0x4] sm:$0xf] %vm6527_vm15, %v6434_v43  ;;  %v6714_v43 = vrot.slane %v6585_v54, 5 }
 0x5ad   : > { %6776 = vrot.lane.b32.xlu1 %v6673_v63, %s8801_s29  ;;  %v8571_v63 = vrot.slane %v6584_v2, 9 }
 0x5ae   : > { %v6716_v37 = vrot.slane %v6714_v43, 4 }
 0x5af   : > { %6780 = vrot.lane.b32.xlu0 %v6680_v18, %s8801_s29  ;;  %v5923_v33 = vpop.permute.xlu1 %5922  ;;  %v6591_v18 = vld [vmem:[#allocation3 + $0x88] sm:$0xf]  ;;  %v6715_v38 = vsel %vm9676_vm13, %v8571_v63, %v6714_v43  ;;  %v7806_v43 = vrot.slane %v7677_v23, 5  ;;  %v7654_v23 = vld [vmem:[#allocation3 + $0x20] sm:$0x1] }
 0x5b0   : > { %5993 = vst.msk [vmem:[#allocation5 + $0x68] sm:$0xf] %vm5966_vm9, %v5923_v33  ;;  %v6728_v15 = vrot.slane %v6591_v18, 5 }
 0x5b1   : > { %v5927_v5 = vpop.permute.xlu0 %5926  ;;  %6778 = vrot.lane.b32.xlu2 %v6676_v0, %s8801_s29  ;;  %v6717_v0 = vrot.slane %v6586_v32, 5  ;;  %v8587_v32 = vrot.slane %v7676_v45, 9  ;;  %v6917_v45 = vld [vmem:[#allocation3 + $0x88] sm:$0xf] }
 0x5b2   : > { %5995 = vst.msk [vmem:[#allocation5 + $0x70] sm:$0xf] %vm5966_vm9, %v5927_v5  ;;  %v6730_v35 = vrot.slane %v6728_v15, 4 }
 0x5b3   : > { %v6440_v56 = vpop.permute.xlu2 %6439  ;;  %v6718_v7 = vsel %vm9676_vm13, %v6716_v37, %v6717_v0  ;;  %v7807_v37 = vsel %vm9676_vm13, %v8587_v32, %v7806_v43 }
 0x5b4   : > { %6532 = vst.msk [vmem:[#allocation5 + $0x10] sm:$0xf] %vm6527_vm15, %v6440_v56  ;;  %v6731_v56 = vrot.slane %v6592_v3, 5 }
 0x5b5   : > { %6782 = vrot.lane.b32.xlu1 %v6683_v50, %s8801_s29 }
 0x5b6   : > { %v6732_v14 = vsel %vm9676_vm13, %v6730_v35, %v6731_v56  ;;  %v7091_v35 = vld [vmem:[#allocation3 + $0x18] sm:$0xf]  ;;  %v7092_v56 = vld [vmem:[#allocation3 + $0x1c] sm:$0xf] }
 0x5b7   : > { %6786 = vrot.lane.b32.xlu0 %v6690_v46, %s8801_s29  ;;  %v5929_v12 = vpop.permute.xlu1 %5928  ;;  %v6589_v46 = vld [vmem:[#allocation3 + $0x80] sm:$0x1] }
 0x5b8   : > { %5996 = vst.msk [vmem:[#allocation5 + $0x74] sm:$0xf] %vm5966_vm9, %v5929_v12  ;;  %v6724_v50 = vrot.slane %v6589_v46, 5  ;;  %v6596_v12 = vld [vmem:[#allocation3 + $0x9c] sm:$0xe] }
 0x5b9   : > { %v5933_v19 = vpop.permute.xlu0 %5932  ;;  %6784 = vrot.lane.b32.xlu2 %v6687_v30, %s8801_s29  ;;  %v6742_v30 = vrot.slane %v6597_v8, 5  ;;  %v8575_v49 = vrot.slane %v6596_v12, 9  ;;  %v7153_v12 = vshrl.u32 %v7092_v56, 16 }
 0x5ba   : > { %5998 = vst.msk [vmem:[#allocation5 + $0x7c] sm:$0xf] %vm5966_vm9, %v5933_v19  ;;  %v6725_v51 = vsel %vm9676_vm13, %v6723_v55, %v6724_v50  ;;  %v7143_v50 = vshll.u32 %v7091_v35, 16 }
 0x5bb   : > { %v6446_v27 = vpop.permute.xlu2 %6445 }
 0x5bc   : > { %6535 = vst.msk [vmem:[#allocation5 + $0x1c] sm:$0xf] %vm6527_vm15, %v6446_v27  ;;  %v6743_v27 = vsel %vm9676_vm13, %v8575_v49, %v6742_v30 }
 0x5bd   : > { %6788 = vrot.lane.b32.xlu1 %v6694_v20, %s8801_s29 }
 0x5bf   : > { %6792 = vrot.lane.b32.xlu0 %v6701_v42, %s8801_s29  ;;  %v6432_v34 = vpop.permute.xlu1 %6431  ;;  %v6729_v42 = vsel %vm9676_vm13, %v8573_v1, %v6728_v15  ;;  %v7117_v15 = vld [vmem:[#allocation3 + $0x80] sm:$0x1]  ;;  %v7809_v1 = vrot.slane %v7678_v11, 5 }
 0x5c0   : > { %6528 = vst.msk [vmem:[#allocation5] sm:$0xf] %vm6527_vm15, %v6432_v34  ;;  %v7116_v34 = vld [vmem:[#allocation3 + $0x7c] sm:$0xf]  ;;  %v7351_v3 = vshll.u32 %v7117_v15, 16 }
 0x5c1   : > { %v6436_v4 = vpop.permute.xlu0 %6435  ;;  %6790 = vrot.lane.b32.xlu2 %v6697_v31, %s8801_s29  ;;  %v7341_v52 = vshll.u32 %v7116_v34, 16  ;;  %v7345_v22 = vshrl.u32 %v7116_v34, 16 }
 0x5c2   : > { %6530 = vst.msk [vmem:[#allocation5 + $0x8] sm:$0xf] %vm6527_vm15, %v6436_v4  ;;  %v7115_v4 = vld [vmem:[#allocation3 + $0x78] sm:$0xf]  ;;  %v7353_v55 = vrot.slane %v7351_v3, 5 }
 0x5c3   : > { %v6452_v21 = vpop.permute.xlu2 %6451  ;;  %v7332_v31 = vshrl.u32 %v7115_v4, 16  ;;  %v7335_v62 = vshll.u32 %v7115_v4, 16  ;;  %v7343_v2 = vrot.slane %v7341_v52, 5  ;;  %v7347_v18 = vrot.slane %v7345_v22, 4  ;;  %v7679_v3 = vld [vmem:[#allocation3 + $0x84] sm:$0xe] }
 0x5c4   : > { %6538 = vst.msk [vmem:[#allocation5 + $0x28] sm:$0xf] %vm6527_vm15, %v6452_v21  ;;  %v6744_v21 = vrot.slane %v6742_v30, 4 }
 0x5c5   : > { %6794 = vrot.lane.b32.xlu1 %v6704_v61, %s8801_s29  ;;  %v6915_v61 = vld [vmem:[#allocation3 + $0x7c] sm:$0xf]  ;;  %v7334_v36 = vrot.slane %v7332_v31, 4  ;;  %v7337_v54 = vrot.slane %v7335_v62, 5 }
 0x5c7   : > { %6798 = vrot.lane.b32.xlu0 %v6711_v28, %s8801_s29  ;;  %v6438_v59 = vpop.permute.xlu1 %6437  ;;  %v6598_v28 = vld [vmem:[#allocation3 + $0xa4] sm:$0x1] }
 0x5c8   : > { %6531 = vst.msk [vmem:[#allocation5 + $0xc] sm:$0xf] %vm6527_vm15, %v6438_v59 }
 0x5c9   : > { %v6442_v26 = vpop.permute.xlu0 %6441  ;;  %6796 = vrot.lane.b32.xlu2 %v6708_v25, %s8801_s29 }
 0x5ca   : > { %6533 = vst.msk [vmem:[#allocation5 + $0x14] sm:$0xf] %vm6527_vm15, %v6442_v26  ;;  %v6745_v26 = vrot.slane %v6598_v28, 5 }
 0x5cb   : > { %v6458_v5 = vpop.permute.xlu2 %6457 }
 0x5cc   : > { %6541 = vst.msk [vmem:[#allocation5 + $0x34] sm:$0xf] %vm6527_vm15, %v6458_v5  ;;  %v6746_v59 = vsel %vm9676_vm13, %v6744_v21, %v6745_v26  ;;  %v6914_v5 = vld [vmem:[#allocation3 + $0x78] sm:$0xf] }
 0x5cd   : > { %6800 = vrot.lane.b32.xlu1 %v6715_v38, %s8801_s29  ;;  %v7348_v38 = vor.u32 %v7347_v18, %v7343_v2 }
 0x5cf   : > { %6804 = vrot.lane.b32.xlu0 %v6722_v57, %s8801_s29  ;;  %v6444_v58 = vpop.permute.xlu1 %6443  ;;  %v7338_v57 = vor.u32 %v7337_v54, %v7334_v36  ;;  %v7349_v46 = vrot.slane %v7348_v38, 4 }
 0x5d0   : > { %6534 = vst.msk [vmem:[#allocation5 + $0x18] sm:$0xf] %vm6527_vm15, %v6444_v58 }
 0x5d1   : > { %v6448_v33 = vpop.permute.xlu0 %6447  ;;  %6802 = vrot.lane.b32.xlu2 %v6718_v7, %s8801_s29  ;;  %v7354_v8 = vsel %vm8874_vm3, %v7349_v46, %v7353_v55  ;;  %v7120_v46 = vld [vmem:[#allocation3 + $0x8c] sm:$0x1] }
 0x5d2   : > { %6536 = vst.msk [vmem:[#allocation5 + $0x20] sm:$0xf] %vm6527_vm15, %v6448_v33  ;;  %v7339_v33 = vrot.slane %v7338_v57, 4 }
 0x5d3   : > { %v6464_v19 = vpop.permute.xlu2 %6463 }
 0x5d4   : > { %6544 = vst.msk [vmem:[#allocation5 + $0x40] sm:$0xf] %vm6527_vm15, %v6464_v19  ;;  %v7344_v58 = vsel %vm8874_vm3, %v7339_v33, %v7343_v2 }
 0x5d5   : > { %6806 = vrot.lane.b32.xlu1 %v6725_v51, %s8801_s29  ;;  %v7808_v51 = vrot.slane %v7806_v43, 4  ;;  %v7753_v43 = vrot.slane %v7654_v23, 5 }
 0x5d7   : > { %6810 = vrot.lane.b32.xlu0 %v6732_v14, %s8801_s29  ;;  %v6450_v17 = vpop.permute.xlu1 %6449  ;;  %v7140_v14 = vshrl.u32 %v7091_v35, 16  ;;  %v7810_v49 = vsel %vm9676_vm13, %v7808_v51, %v7809_v1 }
 0x5d8   : > { %6537 = vst.msk [vmem:[#allocation5 + $0x24] sm:$0xf] %vm6527_vm15, %v6450_v17  ;;  %v7145_v17 = vrot.slane %v7143_v50, 5 }
 0x5d9   : > { %v6454_v16 = vpop.permute.xlu0 %6453  ;;  %6808 = vrot.lane.b32.xlu2 %v6729_v42, %s8801_s29  ;;  %v7142_v30 = vrot.slane %v7140_v14, 4  ;;  %v7653_v42 = vld [vmem:[#allocation3 + $0x1c] sm:$0xf] }
 0x5da   : > { %6539 = vst.msk [vmem:[#allocation5 + $0x2c] sm:$0xf] %vm6527_vm15, %v6454_v16  ;;  %v7149_v16 = vshll.u32 %v7092_v56, 16  ;;  %v7750_v41 = vrot.slane %v7653_v42, 5  ;;  %v8588_v56 = vrot.slane %v7679_v3, 9 }
 0x5db   : > { %v6470_v20 = vpop.permute.xlu2 %6469  ;;  %v7146_v4 = vor.u32 %v7145_v17, %v7142_v30  ;;  %v7681_v42 = vld [vmem:[#allocation3 + $0x8c] sm:$0x1]  ;;  %v6919_v3 = vld [vmem:[#allocation3 + $0x94] sm:$0xf] }
 0x5dc   : > { %6547 = vst.msk [vmem:[#allocation5 + $0x4c] sm:$0xf] %vm6527_vm15, %v6470_v20  ;;  %v7151_v29 = vrot.slane %v7149_v16, 5  ;;  %v7652_v20 = vld [vmem:[#allocation3 + $0x18] sm:$0xe]  ;;  %v7752_v2 = vrot.slane %v7750_v41, 4 }
 0x5dd   : > { %6812 = vrot.lane.b32.xlu1 %v6736_v53, %s8801_s29  ;;  %v8579_v34 = vrot.slane %v7652_v20, 9  ;;  %v7147_v62 = vrot.slane %v7146_v4, 4  ;;  %v6901_v20 = vld [vmem:[#allocation3 + $0x28] sm:$0xf] }
 0x5de   : > { %v7754_v32 = vsel %vm9676_vm13, %v7752_v2, %v7753_v43 }
 0x5df   : > { %6816 = vrot.lane.b32.xlu0 %v6743_v27, %s8801_s29  ;;  %v6456_v60 = vpop.permute.xlu1 %6455  ;;  %v7155_v27 = vrot.slane %v7153_v12, 4  ;;  %v7751_v31 = vsel %vm9676_vm13, %v8579_v34, %v7750_v41  ;;  %v7152_v21 = vsel %vm8874_vm3, %v7147_v62, %v7151_v29  ;;  %v7816_v41 = vrot.slane %v7681_v42, 5 }
 0x5e0   : > { %6540 = vst.msk [vmem:[#allocation5 + $0x30] sm:$0xf] %vm6527_vm15, %v6456_v60  ;;  %v7159_v60 = vshll.u32 %v7093_v9, 16 }
 0x5e1   : > { %v6460_v44 = vpop.permute.xlu0 %6459  ;;  %6814 = vrot.lane.b32.xlu2 %v6739_v48, %s8801_s29  ;;  %v7156_v39 = vor.u32 %v7155_v27, %v7151_v29  ;;  %v7118_v48 = vld [vmem:[#allocation3 + $0x84] sm:$0xf] }
 0x5e2   : > { %6542 = vst.msk [vmem:[#allocation5 + $0x38] sm:$0xf] %vm6527_vm15, %v6460_v44  ;;  %v6898_v44 = vld [vmem:[#allocation3 + $0x18] sm:$0xf]  ;;  %v7161_v26 = vrot.slane %v7159_v60, 5  ;;  %v7356_v36 = vshrl.u32 %v7118_v48, 16 }
 0x5e3   : > { %v6476_v13 = vpop.permute.xlu2 %6475  ;;  %v7157_v52 = vrot.slane %v7156_v39, 4  ;;  %v7359_v54 = vshll.u32 %v7118_v48, 16  ;;  %v7655_v60 = vld [vmem:[#allocation3 + $0x24] sm:$0xe] }
 0x5e4   : > { %6550 = vst.msk [vmem:[#allocation5 + $0x58] sm:$0xf] %vm6527_vm15, %v6476_v13  ;;  %v7358_v57 = vrot.slane %v7356_v36, 4 }
 0x5e5   : > { %6818 = vrot.lane.b32.xlu1 %v6746_v59, %s8801_s29  ;;  %v7162_v59 = vsel %vm8874_vm3, %v7157_v52, %v7161_v26  ;;  %v7096_v52 = vld [vmem:[#allocation3 + $0x2c] sm:$0x1] }
 0x5e7   : > { %6996 = vrot.lane.b32.xlu0 %v6915_v61, %s8802_s6  ;;  %v6462_v63 = vpop.permute.xlu1 %6461  ;;  %v7119_v61 = vld [vmem:[#allocation3 + $0x88] sm:$0xf] }
 0x5e8   : > { %6543 = vst.msk [vmem:[#allocation5 + $0x3c] sm:$0xf] %vm6527_vm15, %v6462_v63  ;;  %v7365_v18 = vshll.u32 %v7119_v61, 16  ;;  %v7361_v63 = vrot.slane %v7359_v54, 5 }
 0x5e9   : > { %v6466_v25 = vpop.permute.xlu0 %6465  ;;  %6994 = vrot.lane.b32.xlu2 %v6914_v5, %s8802_s6  ;;  %v7680_v5 = vld [vmem:[#allocation3 + $0x88] sm:$0xf] }
 0x5ea   : > { %6545 = vst.msk [vmem:[#allocation5 + $0x44] sm:$0xf] %vm6527_vm15, %v6466_v25  ;;  %v7369_v25 = vshrl.u32 %v7119_v61, 16  ;;  %v7367_v38 = vrot.slane %v7365_v18, 5  ;;  %v7362_v35 = vor.u32 %v7361_v63, %v7358_v57  ;;  %v8580_v61 = vrot.slane %v7655_v60, 9  ;;  %v8742_v60 = vld [vmem:[%s12344_s3 + $0x38] sm:$0xff] }
 0x5eb   : > { %v6482_v0 = vpop.permute.xlu2 %6481  ;;  %8751 = vmatpush.bf16.msra.mxu3 %v8742_v60  ;;  %8185 = vmatpush.bf16.msra.mxu1 %v8742_v60 }
 0x5ec   : > { %6553 = vst.msk [vmem:[#allocation5 + $0x64] sm:$0xf] %vm6527_vm15, %v6482_v0  ;;  %v7813_v0 = vrot.slane %v7680_v5, 5  ;;  %v7363_v50 = vrot.slane %v7362_v35, 4  ;;  %v7657_v5 = vld [vmem:[#allocation3 + $0x2c] sm:$0x1] }
 0x5ed   : > { %7555 = vrot.lane.b32.xlu1 %v7344_v58, %s8804_s10 }
 0x5ee   : > { %v7814_v14 = vsel %vm9676_vm13, %v8588_v56, %v7813_v0  ;;  %v7368_v51 = vsel %vm8874_vm3, %v7363_v50, %v7367_v38  ;;  %v7815_v29 = vrot.slane %v7813_v0, 4  ;;  %v7760_v0 = vrot.slane %v7657_v5, 5 }
 0x5ef   : > { %7892 = vrot.lane.b32.xlu0 %v7807_v37, %s8803_s9  ;;  %v6468_v19 = vpop.permute.xlu1 %6467  ;;  %v7371_v37 = vrot.slane %v7369_v25, 4 }
 0x5f0   : > { %6546 = vst.msk [vmem:[#allocation5 + $0x48] sm:$0xf] %vm6527_vm15, %v6468_v19  ;;  %v7375_v19 = vshll.u32 %v7120_v46, 16  ;;  %v7817_v34 = vsel %vm9676_vm13, %v7815_v29, %v7816_v41 }
 0x5f1   : > { %v6472_v7 = vpop.permute.xlu0 %6471  ;;  %7557 = vrot.lane.b32.xlu2 %v7354_v8, %s8804_s10  ;;  %v7372_v55 = vor.u32 %v7371_v37, %v7367_v38  ;;  %v7094_v8 = vld [vmem:[#allocation3 + $0x24] sm:$0xf] }
 0x5f2   : > { %6548 = vst.msk [vmem:[#allocation5 + $0x50] sm:$0xf] %vm6527_vm15, %v6472_v7  ;;  %v6916_v7 = vld [vmem:[#allocation3 + $0x84] sm:$0xf]  ;;  %v7377_v1 = vrot.slane %v7375_v19, 5  ;;  %v7164_v30 = vshrl.u32 %v7094_v8, 16 }
 0x5f3   : > { %v6488_v47 = vpop.permute.xlu2 %6487  ;;  %v7373_v16 = vrot.slane %v7372_v55, 4  ;;  %v7167_v17 = vshll.u32 %v7094_v8, 16  ;;  %v7682_v19 = vld [vmem:[#allocation3 + $0x90] sm:$0xe] }
 0x5f4   : > { %6556 = vst.msk [vmem:[#allocation5 + $0x70] sm:$0xf] %vm6527_vm15, %v6488_v47  ;;  %v7166_v4 = vrot.slane %v7164_v30, 4 }
 0x5f5   : > { %7894 = vrot.lane.b32.xlu1 %v7810_v49, %s8803_s9  ;;  %v7378_v49 = vsel %vm8874_vm3, %v7373_v16, %v7377_v1  ;;  %v7123_v16 = vld [vmem:[#allocation3 + $0x98] sm:$0x1] }
 0x5f7   : > { %6964 = vrot.lane.b32.xlu0 %v6899_v24, %s8802_s6  ;;  %v6474_v53 = vpop.permute.xlu1 %6473  ;;  %v7095_v24 = vld [vmem:[#allocation3 + $0x28] sm:$0xf] }
 0x5f8   : > { %6549 = vst.msk [vmem:[#allocation5 + $0x54] sm:$0xf] %vm6527_vm15, %v6474_v53  ;;  %v7173_v27 = vshll.u32 %v7095_v24, 16  ;;  %v7169_v53 = vrot.slane %v7167_v17, 5 }
 0x5f9   : > { %v6478_v40 = vpop.permute.xlu0 %6477  ;;  %6962 = vrot.lane.b32.xlu2 %v6898_v44, %s8802_s6  ;;  %v7656_v44 = vld [vmem:[#allocation3 + $0x28] sm:$0xf] }
 0x5fa   : > { %6551 = vst.msk [vmem:[#allocation5 + $0x5c] sm:$0xf] %vm6527_vm15, %v6478_v40  ;;  %v7177_v40 = vshrl.u32 %v7095_v24, 16  ;;  %v7175_v39 = vrot.slane %v7173_v27, 5  ;;  %v7170_v48 = vor.u32 %v7169_v53, %v7166_v4  ;;  %v8589_v24 = vrot.slane %v7682_v19, 9 }
 0x5fb   : > { %v6494_v28 = vpop.permute.xlu2 %6493 }
 0x5fc   : > { %6559 = vst.msk [vmem:[#allocation5 + $0x7c] sm:$0xf] %vm6527_vm15, %v6494_v28  ;;  %v7757_v28 = vrot.slane %v7656_v44, 5  ;;  %v7171_v54 = vrot.slane %v7170_v48, 4  ;;  %v7684_v44 = vld [vmem:[#allocation3 + $0x98] sm:$0x1] }
 0x5fd   : > { %7523 = vrot.lane.b32.xlu1 %v7152_v21, %s8804_s10  ;;  %v7823_v48 = vrot.slane %v7684_v44, 5  ;;  %v6920_v44 = vld [vmem:[#allocation3 + $0x9c] sm:$0xf] }
 0x5fe   : > { %v7758_v36 = vsel %vm9676_vm13, %v8580_v61, %v7757_v28  ;;  %v7176_v2 = vsel %vm8874_vm3, %v7171_v54, %v7175_v39  ;;  %v7759_v38 = vrot.slane %v7757_v28, 4  ;;  %v6903_v28 = vld [vmem:[#allocation3 + $0x34] sm:$0xf] }
 0x5ff   : > { %7860 = vrot.lane.b32.xlu0 %v7751_v31, %s8803_s9  ;;  %v6480_v13 = vpop.permute.xlu1 %6479  ;;  %v7179_v31 = vrot.slane %v7177_v40, 4  ;;  %v7659_v61 = vld [vmem:[#allocation3 + $0x34] sm:$0xf] }
 0x600   : > { %6552 = vst.msk [vmem:[#allocation5 + $0x60] sm:$0xf] %vm6527_vm15, %v6480_v13  ;;  %v7183_v13 = vshll.u32 %v7096_v52, 16  ;;  %v7761_v56 = vsel %vm9676_vm13, %v7759_v38, %v7760_v0 }
 0x601   : > { %v6484_v22 = vpop.permute.xlu0 %6483  ;;  %7525 = vrot.lane.b32.xlu2 %v7162_v59, %s8804_s10  ;;  %v7180_v26 = vor.u32 %v7179_v31, %v7175_v39  ;;  %v7121_v59 = vld [vmem:[#allocation3 + $0x90] sm:$0xf] }
 0x602   : > { %6554 = vst.msk [vmem:[#allocation5 + $0x68] sm:$0xf] %vm6527_vm15, %v6484_v22  ;;  %v6900_v22 = vld [vmem:[#allocation3 + $0x24] sm:$0xf]  ;;  %v7185_v43 = vrot.slane %v7183_v13, 5  ;;  %v7380_v57 = vshrl.u32 %v7121_v59, 16 }
 0x603   : > { %v6773_v15 = vpop.permute.xlu2 %6772  ;;  %v7181_v18 = vrot.slane %v7180_v26, 4  ;;  %v7383_v63 = vshll.u32 %v7121_v59, 16  ;;  %v7764_v59 = vrot.slane %v7659_v61, 5 }
 0x604   : > { %6867 = vst.msk [vmem:[#allocation5 + $0x8] sm:$0xf] %vm6864_vm0, %v6773_v15  ;;  %v7382_v35 = vrot.slane %v7380_v57, 4 }
 0x605   : > { %7862 = vrot.lane.b32.xlu1 %v7754_v32, %s8803_s9  ;;  %v7186_v32 = vsel %vm8874_vm3, %v7181_v18, %v7185_v43  ;;  %v8741_v18 = vld [vmem:[%s12344_s3 + $0x30] sm:$0xff]  ;;  %v6902_v43 = vld [vmem:[#allocation3 + $0x30] sm:$0xf] }
 0x606   : > { %8752 = vmatpush.bf16.msra.mxu3 %v8741_v18  ;;  %8186 = vmatpush.bf16.msra.mxu1 %v8741_v18 }
 0x607   : > { %7000 = vrot.lane.b32.xlu0 %v6917_v45, %s8802_s6  ;;  %v6486_v58 = vpop.permute.xlu1 %6485  ;;  %v7122_v45 = vld [vmem:[#allocation3 + $0x94] sm:$0xf] }
 0x608   : > { %6555 = vst.msk [vmem:[#allocation5 + $0x6c] sm:$0xf] %vm6527_vm15, %v6486_v58  ;;  %v7389_v37 = vshll.u32 %v7122_v45, 16  ;;  %v7385_v58 = vrot.slane %v7383_v63, 5 }
 0x609   : > { %v6490_v33 = vpop.permute.xlu0 %6489  ;;  %6998 = vrot.lane.b32.xlu2 %v6916_v7, %s8802_s6  ;;  %v7683_v7 = vld [vmem:[#allocation3 + $0x94] sm:$0xf] }
 0x60a   : > { %6557 = vst.msk [vmem:[#allocation5 + $0x74] sm:$0xf] %vm6527_vm15, %v6490_v33  ;;  %v7393_v33 = vshrl.u32 %v7122_v45, 16  ;;  %v7391_v55 = vrot.slane %v7389_v37, 5  ;;  %v7386_v8 = vor.u32 %v7385_v58, %v7382_v35  ;;  %v7099_v45 = vld [vmem:[#allocation3 + $0x38] sm:$0x1] }
 0x60b   : > { %v6779_v11 = vpop.permute.xlu2 %6778  ;;  %v7207_v38 = vshll.u32 %v7099_v45, 16  ;;  %v7125_v58 = vld [vmem:[#allocation3 + $0xa0] sm:$0xf] }
 0x60c   : > { %6870 = vst.msk [vmem:[#allocation5 + $0x14] sm:$0xf] %vm6864_vm0, %v6779_v11  ;;  %v7820_v11 = vrot.slane %v7683_v7, 5  ;;  %v7387_v17 = vrot.slane %v7386_v8, 4  ;;  %v7413_v8 = vshll.u32 %v7125_v58, 16 }
 0x60d   : > { %7559 = vrot.lane.b32.xlu1 %v7368_v51, %s8804_s10  ;;  %v7209_v7 = vrot.slane %v7207_v38, 5  ;;  %v7662_v38 = vld [vmem:[#allocation3 + $0x40] sm:$0xf] }
 0x60e   : > { %v7821_v30 = vsel %vm9676_vm13, %v8589_v24, %v7820_v11  ;;  %v7392_v29 = vsel %vm8874_vm3, %v7387_v17, %v7391_v55  ;;  %v7822_v39 = vrot.slane %v7820_v11, 4  ;;  %v7766_v11 = vrot.slane %v7764_v59, 4 }
 0x60f   : > { %7896 = vrot.lane.b32.xlu0 %v7814_v14, %s8803_s9  ;;  %v6492_v47 = vpop.permute.xlu1 %6491  ;;  %v7395_v14 = vrot.slane %v7393_v33, 4  ;;  %v7124_v33 = vld [vmem:[#allocation3 + $0x9c] sm:$0xf] }
 0x610   : > { %6558 = vst.msk [vmem:[#allocation5 + $0x78] sm:$0xf] %vm6527_vm15, %v6492_v47  ;;  %v7399_v47 = vshll.u32 %v7123_v16, 16  ;;  %v7824_v26 = vsel %vm9676_vm13, %v7822_v39, %v7823_v48  ;;  %v8738_v16 = vld [vmem:[%s12344_s3 + $0x18] sm:$0xff] }
 0x611   : > { %v6769_v12 = vpop.permute.xlu0 %6768  ;;  %7561 = vrot.lane.b32.xlu2 %v7378_v49, %s8804_s10  ;;  %v7396_v1 = vor.u32 %v7395_v14, %v7391_v55  ;;  %v7097_v49 = vld [vmem:[#allocation3 + $0x30] sm:$0xf]  ;;  %v7407_v55 = vshll.u32 %v7124_v33, 16 }
 0x612   : > { %6865 = vst.msk [vmem:[#allocation5] sm:$0xf] %vm6864_vm0, %v6769_v12  ;;  %v6918_v12 = vld [vmem:[#allocation3 + $0x90] sm:$0xf]  ;;  %v7401_v41 = vrot.slane %v7399_v47, 5  ;;  %v7188_v4 = vshrl.u32 %v7097_v49, 16 }
 0x613   : > { %v6785_v9 = vpop.permute.xlu2 %6784  ;;  %v7397_v27 = vrot.slane %v7396_v1, 4  ;;  %v7191_v53 = vshll.u32 %v7097_v49, 16  ;;  %v7686_v47 = vld [vmem:[#allocation3 + $0xa0] sm:$0xf]  ;;  %v7415_v49 = vrot.slane %v7413_v8, 5 }
 0x614   : > { %6873 = vst.msk [vmem:[#allocation5 + $0x20] sm:$0xf] %vm6864_vm0, %v6785_v9 }
 0x615   : > { %7898 = vrot.lane.b32.xlu1 %v7817_v34, %s8803_s9  ;;  %v7402_v34 = vsel %vm8874_vm3, %v7397_v27, %v7401_v41  ;;  %v7193_v52 = vrot.slane %v7191_v53, 5  ;;  %v7126_v53 = vld [vmem:[#allocation3 + $0xa4] sm:$0x1] }
 0x617   : > { %6968 = vrot.lane.b32.xlu0 %v6901_v20, %s8802_s6  ;;  %v6771_v21 = vpop.permute.xlu1 %6770  ;;  %v7098_v20 = vld [vmem:[#allocation3 + $0x34] sm:$0xf] }
 0x618   : > { %6866 = vst.msk [vmem:[#allocation5 + $0x4] sm:$0xf] %vm6864_vm0, %v6771_v21  ;;  %v7197_v31 = vshll.u32 %v7098_v20, 16  ;;  %v7190_v21 = vrot.slane %v7188_v4, 4 }
 0x619   : > { %v6775_v62 = vpop.permute.xlu0 %6774  ;;  %6966 = vrot.lane.b32.xlu2 %v6900_v22, %s8802_s6 }
 0x61a   : > { %6868 = vst.msk [vmem:[#allocation5 + $0xc] sm:$0xf] %vm6864_vm0, %v6775_v62  ;;  %v7201_v62 = vshrl.u32 %v7098_v20, 16  ;;  %v7827_v20 = vrot.slane %v7686_v47, 5 }
 0x61b   : > { %v6791_v23 = vpop.permute.xlu2 %6790 }
 0x61c   : > { %6876 = vst.msk [vmem:[#allocation5 + $0x2c] sm:$0xf] %vm6864_vm0, %v6791_v23  ;;  %v7203_v54 = vrot.slane %v7201_v62, 4  ;;  %v7658_v23 = vld [vmem:[#allocation3 + $0x30] sm:$0xe] }
 0x61d   : > { %7527 = vrot.lane.b32.xlu1 %v7176_v2, %s8804_s10  ;;  %v7194_v2 = vor.u32 %v7193_v52, %v7190_v21  ;;  %v8581_v57 = vrot.slane %v7658_v23, 9  ;;  %v7100_v21 = vld [vmem:[#allocation3 + $0x3c] sm:$0xf] }
 0x61e   : > { %v7215_v23 = vshll.u32 %v7100_v21, 16 }
 0x61f   : > { %7864 = vrot.lane.b32.xlu0 %v7758_v36, %s8803_s9  ;;  %v6777_v15 = vpop.permute.xlu1 %6776  ;;  %v7199_v36 = vrot.slane %v7197_v31, 5  ;;  %v7765_v5 = vsel %vm9676_vm13, %v8581_v57, %v7764_v59  ;;  %v8736_v31 = vld [vmem:[%s12344_s3 + $0x8] sm:$0xff]  ;;  %v6905_v57 = vld [vmem:[#allocation3 + $0x40] sm:$0xf] }
 0x620   : > { %6869 = vst.msk [vmem:[#allocation5 + $0x10] sm:$0xf] %vm6864_vm0, %v6777_v15  ;;  %v8740_v15 = vld [vmem:[%s12344_s3 + $0x28] sm:$0xff] }
 0x621   : > { %v6781_v25 = vpop.permute.xlu0 %6780  ;;  %7529 = vrot.lane.b32.xlu2 %v7186_v32, %s8804_s10  ;;  %v7204_v63 = vor.u32 %v7203_v54, %v7199_v36  ;;  %v7195_v32 = vrot.slane %v7194_v2, 4  ;;  %8753 = vmatpush.bf16.msra.mxu3 %v8740_v15  ;;  %v7687_v2 = vld [vmem:[#allocation3 + $0xa4] sm:$0x1] }
 0x622   : > { %6871 = vst.msk [vmem:[#allocation5 + $0x18] sm:$0xf] %vm6864_vm0, %v6781_v25  ;;  %8187 = vmatpush.bf16.msra.mxu1 %v8740_v15 }
 0x623   : > { %v6797_v46 = vpop.permute.xlu2 %6796  ;;  %v7205_v0 = vrot.slane %v7204_v63, 4  ;;  %v7830_v63 = vrot.slane %v7687_v2, 5 }
 0x624   : > { %6879 = vst.msk [vmem:[#allocation5 + $0x38] sm:$0xf] %vm6864_vm0, %v6797_v46  ;;  %v8739_v46 = vld [vmem:[%s12344_s3 + $0x20] sm:$0xff] }
 0x625   : > { %7866 = vrot.lane.b32.xlu1 %v7761_v56, %s8803_s9  ;;  %v7404_v56 = vshrl.u32 %v7124_v33, 16  ;;  %v7210_v19 = vsel %vm8874_vm3, %v7205_v0, %v7209_v7  ;;  %8754 = vmatpush.bf16.msra.mxu3 %v8739_v46 }
 0x626   : > { %8188 = vmatpush.bf16.msra.mxu1 %v8739_v46 }
 0x627   : > { %7004 = vrot.lane.b32.xlu0 %v6919_v3, %s8802_s6  ;;  %v6783_v51 = vpop.permute.xlu1 %6782  ;;  %v7200_v3 = vsel %vm8874_vm3, %v7195_v32, %v7199_v36  ;;  %v7406_v1 = vrot.slane %v7404_v56, 4  ;;  %v8735_v36 = vld [vmem:[%s12344_s3] sm:$0xff]  ;;  %v7102_v56 = vld [vmem:[#allocation3 + $0x44] sm:$0x1] }
 0x628   : > { %6872 = vst.msk [vmem:[#allocation5 + $0x1c] sm:$0xf] %vm6864_vm0, %v6783_v51  ;;  %v7417_v51 = vshrl.u32 %v7125_v58, 16  ;;  %v7771_v58 = vrot.slane %v7662_v38, 5  ;;  %v7231_v8 = vshll.u32 %v7102_v56, 16 }
 0x629   : > { %v6787_v50 = vpop.permute.xlu0 %6786  ;;  %7002 = vrot.lane.b32.xlu2 %v6918_v12, %s8802_s6  ;;  %v6921_v12 = vld [vmem:[#allocation3 + $0xa0] sm:$0xf]  ;;  %8755 = vmatpush.bf16.msra.mxu3 %v8738_v16 }
 0x62a   : > { %6874 = vst.msk [vmem:[#allocation5 + $0x24] sm:$0xf] %vm6864_vm0, %v6787_v50  ;;  %v7660_v50 = vld [vmem:[#allocation3 + $0x38] sm:$0x1]  ;;  %8189 = vmatpush.bf16.msra.mxu1 %v8738_v16  ;;  %v7127_v16 = vld [vmem:[#allocation3 + $0xa8] sm:$0xf] }
 0x62b   : > { %v6803_v42 = vpop.permute.xlu2 %6802  ;;  %v7767_v24 = vrot.slane %v7660_v50, 5  ;;  %v7428_v47 = vshrl.u32 %v7127_v16, 16 }
 0x62c   : > { %6882 = vst.msk [vmem:[#allocation5 + $0x44] sm:$0xf] %vm6864_vm0, %v6803_v42 }
 0x62d   : > { %7563 = vrot.lane.b32.xlu1 %v7392_v29, %s8804_s10  ;;  %v7768_v42 = vsel %vm9676_vm13, %v7766_v11, %v7767_v24  ;;  %v7419_v29 = vrot.slane %v7417_v51, 4 }
 0x62f   : > { %7900 = vrot.lane.b32.xlu0 %v7821_v30, %s8803_s9  ;;  %v6789_v9 = vpop.permute.xlu1 %6788  ;;  %v7409_v30 = vrot.slane %v7407_v55, 5  ;;  %v7420_v39 = vor.u32 %v7419_v29, %v7415_v49  ;;  %v6904_v55 = vld [vmem:[#allocation3 + $0x3c] sm:$0xf]  ;;  %v7663_v29 = vld [vmem:[#allocation3 + $0x44] sm:$0x1] }
 0x630   : > { %6875 = vst.msk [vmem:[#allocation5 + $0x28] sm:$0xf] %vm6864_vm0, %v6789_v9  ;;  %v8737_v9 = vld [vmem:[%s12344_s3 + $0x10] sm:$0xff] }
 0x631   : > { %v6793_v40 = vpop.permute.xlu0 %6792  ;;  %7565 = vrot.lane.b32.xlu2 %v7402_v34, %s8804_s10  ;;  %v7410_v41 = vor.u32 %v7409_v30, %v7406_v1  ;;  %8756 = vmatpush.bf16.msra.mxu3 %v8737_v9  ;;  %v7128_v30 = vld [vmem:[#allocation3 + $0xac] sm:$0xf] }
 0x632   : > { %6877 = vst.msk [vmem:[#allocation5 + $0x30] sm:$0xf] %vm6864_vm0, %v6793_v40  ;;  %v7685_v40 = vld [vmem:[#allocation3 + $0x9c] sm:$0xe]  ;;  %8190 = vmatpush.bf16.msra.mxu1 %v8737_v9  ;;  %v7430_v9 = vrot.slane %v7428_v47, 4 }
 0x633   : > { %v6809_v22 = vpop.permute.xlu2 %6808  ;;  %v8590_v34 = vrot.slane %v7685_v40, 9  ;;  %v7411_v60 = vrot.slane %v7410_v41, 4  ;;  %v7773_v40 = vrot.slane %v7771_v58, 4  ;;  %v7441_v41 = vshrl.u32 %v7128_v30, 16 }
 0x634   : > { %6885 = vst.msk [vmem:[#allocation5 + $0x50] sm:$0xf] %vm6864_vm0, %v6809_v22  ;;  %v7421_v22 = vrot.slane %v7420_v39, 4  ;;  %v7689_v39 = vld [vmem:[#allocation3 + $0xac] sm:$0xf] }
 0x635   : > { %7902 = vrot.lane.b32.xlu1 %v7824_v26, %s8803_s9  ;;  %v7828_v62 = vsel %vm9676_vm13, %v8590_v34, %v7827_v20  ;;  %v7416_v52 = vsel %vm8874_vm3, %v7411_v60, %v7415_v49  ;;  %v7101_v26 = vld [vmem:[#allocation3 + $0x40] sm:$0xf]  ;;  %8757 = vmatpush.bf16.msra.mxu3 %v8736_v31  ;;  %v7443_v60 = vrot.slane %v7441_v41, 4 }
 0x636   : > { %8191 = vmatpush.bf16.msra.mxu1 %v8736_v31  ;;  %v7221_v45 = vshll.u32 %v7101_v26, 16 }
 0x637   : > { %6972 = vrot.lane.b32.xlu0 %v6903_v28, %s8802_s6  ;;  %v6795_v25 = vpop.permute.xlu1 %6794  ;;  %v7423_v28 = vshll.u32 %v7126_v53, 16  ;;  %v7774_v53 = vrot.slane %v7663_v29, 5 }
 0x638   : > { %6878 = vst.msk [vmem:[#allocation5 + $0x34] sm:$0xf] %vm6864_vm0, %v6795_v25  ;;  %v7829_v25 = vrot.slane %v7827_v20, 4  ;;  %v7223_v33 = vrot.slane %v7221_v45, 5  ;;  %v7437_v20 = vshll.u32 %v7128_v30, 16 }
 0x639   : > { %v6799_v13 = vpop.permute.xlu0 %6798  ;;  %6970 = vrot.lane.b32.xlu2 %v6902_v43, %s8802_s6  ;;  %v7425_v54 = vrot.slane %v7423_v28, 5  ;;  %v7225_v43 = vshrl.u32 %v7101_v26, 16  ;;  %8758 = vmatpush.bf16.msra.mxu3 %v8735_v36  ;;  %v7775_v31 = vsel %vm9676_vm13, %v7773_v40, %v7774_v53  ;;  %v6922_v26 = vld [vmem:[#allocation3 + $0xa8] sm:$0xf]  ;;  %v6600_v30 = vld [vmem:[#allocation3 + $0xac] sm:$0xf] }
 0x63a   : > { %6880 = vst.msk [vmem:[#allocation5 + $0x3c] sm:$0xf] %vm6864_vm0, %v6799_v13  ;;  %v7212_v13 = vshrl.u32 %v7100_v21, 16  ;;  %8192 = vmatpush.bf16.msra.mxu1 %v8735_v36  ;;  %v7834_v21 = vrot.slane %v7689_v39, 5  ;;  %v6601_v39 = vld [vmem:[#allocation3 + $0xb0] sm:$0x1] }
 0x63b   : > { %v6815_v37 = vpop.permute.xlu2 %6814  ;;  %v7426_v18 = vsel %vm8874_vm3, %v7421_v22, %v7425_v54 }
 0x63c   : > { %6888 = vst.msk [vmem:[#allocation5 + $0x5c] sm:$0xf] %vm6864_vm0, %v6815_v37  ;;  %v7214_v15 = vrot.slane %v7212_v13, 4  ;;  %v7831_v37 = vsel %vm9676_vm13, %v7829_v25, %v7830_v63 }
 0x63d   : > { %7531 = vrot.lane.b32.xlu1 %v7200_v3, %s8804_s10  ;;  %v7227_v3 = vrot.slane %v7225_v43, 4 }
 0x63f   : > { %7868 = vrot.lane.b32.xlu0 %v7765_v5, %s8803_s9  ;;  %v6801_v14 = vpop.permute.xlu1 %6800  ;;  %v7217_v5 = vrot.slane %v7215_v23, 5  ;;  %v7228_v50 = vor.u32 %v7227_v3, %v7223_v33  ;;  %v7836_v3 = vrot.slane %v7834_v21, 4 }
 0x640   : > { %6881 = vst.msk [vmem:[#allocation5 + $0x40] sm:$0xf] %vm6864_vm0, %v6801_v14 }
 0x641   : > { %v6805_v35 = vpop.permute.xlu0 %6804  ;;  %7533 = vrot.lane.b32.xlu2 %v7210_v19, %s8804_s10  ;;  %v7218_v46 = vor.u32 %v7217_v5, %v7214_v15  ;;  %v7229_v24 = vrot.slane %v7228_v50, 4 }
 0x642   : > { %6883 = vst.msk [vmem:[#allocation5 + $0x48] sm:$0xf] %vm6864_vm0, %v6805_v35  ;;  %v7661_v35 = vld [vmem:[#allocation3 + $0x3c] sm:$0xe] }
 0x643   : > { %v6995_v17 = vpop.permute.xlu2 %6994  ;;  %v8582_v14 = vrot.slane %v7661_v35, 9  ;;  %v7219_v11 = vrot.slane %v7218_v46, 4 }
 0x644   : > { %7075 = vst.msk [vmem:[#allocation5 + $0x40] sm:$0xf] %vm7058_vm1, %v6995_v17  ;;  %v7233_v17 = vrot.slane %v7231_v8, 5 }
 0x645   : > { %7870 = vrot.lane.b32.xlu1 %v7768_v42, %s8803_s9  ;;  %v7772_v19 = vsel %vm9676_vm13, %v8582_v14, %v7771_v58  ;;  %v7431_v42 = vshll.u32 %v7127_v16, 16  ;;  %v6907_v58 = vld [vmem:[#allocation3 + $0x4c] sm:$0xf] }
 0x646   : > { %v7665_v14 = vld [vmem:[#allocation3 + $0x4c] sm:$0xf] }
 0x647   : > { %7008 = vrot.lane.b32.xlu0 %v6921_v12, %s8802_s6  ;;  %v6807_v4 = vpop.permute.xlu1 %6806  ;;  %v7224_v12 = vsel %vm8874_vm3, %v7219_v11, %v7223_v33  ;;  %v7778_v16 = vrot.slane %v7665_v14, 5 }
 0x648   : > { %6884 = vst.msk [vmem:[#allocation5 + $0x4c] sm:$0xf] %vm6864_vm0, %v6807_v4  ;;  %v6923_v4 = vld [vmem:[#allocation3 + $0xac] sm:$0xf] }
 0x649   : > { %v6811_v27 = vpop.permute.xlu0 %6810  ;;  %7006 = vrot.lane.b32.xlu2 %v6920_v44, %s8802_s6  ;;  %v7433_v44 = vrot.slane %v7431_v42, 5 }
 0x64a   : > { %6886 = vst.msk [vmem:[#allocation5 + $0x54] sm:$0xf] %vm6864_vm0, %v6811_v27  ;;  %v7234_v27 = vsel %vm8874_vm3, %v7229_v24, %v7233_v17  ;;  %v6906_v17 = vld [vmem:[#allocation3 + $0x48] sm:$0xf] }
 0x64b   : > { %v7558_v48 = vpop.permute.xlu2 %7557 }
 0x64d   : > { %7567 = vrot.lane.b32.xlu1 %v7416_v52, %s8804_s10  ;;  %v7434_v52 = vor.u32 %v7433_v44, %v7430_v9 }
 0x64f   : > { %7904 = vrot.lane.b32.xlu0 %v7828_v62, %s8803_s9  ;;  %v6813_v59 = vpop.permute.xlu1 %6812  ;;  %v7439_v62 = vrot.slane %v7437_v20, 5  ;;  %v7435_v23 = vrot.slane %v7434_v52, 4  ;;  %v6749_v20 = vrot.slane %v6600_v30, 5  ;;  %v7131_v52 = vld [vmem:[#allocation3 + $0xb8] sm:$0xf] }
 0x650   : > { %6887 = vst.msk [vmem:[#allocation5 + $0x58] sm:$0xf] %vm6864_vm0, %v6813_v59 }
 0x651   : > { %v6817_v61 = vpop.permute.xlu0 %6816  ;;  %7569 = vrot.lane.b32.xlu2 %v7426_v18, %s8804_s10  ;;  %v7444_v54 = vor.u32 %v7443_v60, %v7439_v62  ;;  %v7103_v18 = vld [vmem:[#allocation3 + $0x48] sm:$0xf]  ;;  %v7440_v25 = vsel %vm8874_vm3, %v7435_v23, %v7439_v62  ;;  %v6751_v62 = vrot.slane %v6749_v20, 4  ;;  %v7461_v23 = vshll.u32 %v7131_v52, 16 }
 0x652   : > { %6889 = vst.msk [vmem:[#allocation5 + $0x60] sm:$0xf] %vm6864_vm0, %v6817_v61  ;;  %v7129_v61 = vld [vmem:[#allocation3 + $0xb0] sm:$0x1]  ;;  %v7236_v15 = vshrl.u32 %v7103_v18, 16  ;;  %v7239_v5 = vshll.u32 %v7103_v18, 16 }
 0x653   : > { %v6963_v32 = vpop.permute.xlu2 %6962  ;;  %v7447_v59 = vshll.u32 %v7129_v61, 16  ;;  %v7445_v45 = vrot.slane %v7444_v54, 4  ;;  %v6752_v61 = vrot.slane %v6601_v39, 5 }
 0x654   : > { %7059 = vst.msk [vmem:[#allocation5] sm:$0xf] %vm7058_vm1, %v6963_v32  ;;  %v7241_v56 = vrot.slane %v7239_v5, 5  ;;  %v7692_v5 = vld [vmem:[#allocation3 + $0xb8] sm:$0xf] }
 0x655   : > { %7906 = vrot.lane.b32.xlu1 %v7831_v37, %s8803_s9  ;;  %v7449_v63 = vrot.slane %v7447_v59, 5  ;;  %v7690_v37 = vld [vmem:[#allocation3 + $0xb0] sm:$0x1]  ;;  %v6753_v54 = vsel %vm9676_vm13, %v6751_v62, %v6752_v61 }
 0x656   : > { %v7837_v46 = vrot.slane %v7690_v37, 5 }
 0x657   : > { %6976 = vrot.lane.b32.xlu0 %v6905_v57, %s8802_s6  ;;  %v6819_v7 = vpop.permute.xlu1 %6818  ;;  %v7104_v57 = vld [vmem:[#allocation3 + $0x4c] sm:$0xf]  ;;  %v7450_v33 = vsel %vm8874_vm3, %v7445_v45, %v7449_v63  ;;  %v7465_v45 = vshrl.u32 %v7131_v52, 16  ;;  %v7463_v63 = vrot.slane %v7461_v23, 5  ;;  %v6908_v52 = vld [vmem:[#allocation3 + $0x54] sm:$0xf] }
 0x658   : > { %6890 = vst.msk [vmem:[#allocation5 + $0x64] sm:$0xf] %vm6864_vm0, %v6819_v7  ;;  %v7249_v35 = vshrl.u32 %v7104_v57, 16  ;;  %v7238_v7 = vrot.slane %v7236_v15, 4  ;;  %v7838_v50 = vsel %vm9676_vm13, %v7836_v3, %v7837_v46 }
 0x659   : > { %v6997_v0 = vpop.permute.xlu0 %6996  ;;  %6974 = vrot.lane.b32.xlu2 %v6904_v55, %s8802_s6  ;;  %v7467_v37 = vrot.slane %v7465_v45, 4 }
 0x65a   : > { %7076 = vst.msk [vmem:[#allocation5 + $0x44] sm:$0xf] %vm7058_vm1, %v6997_v0  ;;  %v7245_v0 = vshll.u32 %v7104_v57, 16  ;;  %v7251_v11 = vrot.slane %v7249_v35, 4 }
 0x65b   : > { %7637 = vst.msk [vmem:[#allocation5 + $0x44] sm:$0xf] %vm7619_vm2, %v7558_v48  ;;  %v7526_v51 = vpop.permute.xlu2 %7525  ;;  %v7688_v48 = vld [vmem:[#allocation3 + $0xa8] sm:$0xe] }
 0x65c   : > { %v8591_v36 = vrot.slane %v7688_v48, 9  ;;  %v7666_v48 = vld [vmem:[#allocation3 + $0x50] sm:$0x1] }
 0x65d   : > { %7535 = vrot.lane.b32.xlu1 %v7224_v12, %s8804_s10  ;;  %v7242_v12 = vor.u32 %v7241_v56, %v7238_v7  ;;  %v6924_v56 = vld [vmem:[#allocation3 + $0xb4] sm:$0xf] }
 0x65e   : > { %v7835_v13 = vsel %vm9676_vm13, %v8591_v36, %v7834_v21  ;;  %v7780_v21 = vrot.slane %v7778_v16, 4 }
 0x65f   : > { %7872 = vrot.lane.b32.xlu0 %v7772_v19, %s8803_s9  ;;  %v7556_v49 = vpop.permute.xlu1 %7555  ;;  %v7247_v19 = vrot.slane %v7245_v0, 5  ;;  %v7841_v0 = vrot.slane %v7692_v5, 5  ;;  %v7667_v5 = vld [vmem:[#allocation3 + $0x54] sm:$0xe] }
 0x660   : > { %7636 = vst.msk [vmem:[#allocation5 + $0x40] sm:$0xf] %vm7619_vm2, %v7556_v49  ;;  %v7130_v49 = vld [vmem:[#allocation3 + $0xb4] sm:$0xf] }
 0x661   : > { %v7893_v1 = vpop.permute.xlu0 %7892  ;;  %7537 = vrot.lane.b32.xlu2 %v7234_v27, %s8804_s10  ;;  %v7252_v42 = vor.u32 %v7251_v11, %v7247_v19  ;;  %v7243_v27 = vrot.slane %v7242_v12, 4  ;;  %v7452_v9 = vshrl.u32 %v7130_v49, 16  ;;  %v7455_v44 = vshll.u32 %v7130_v49, 16 }
 0x662   : > { %7973 = vst.msk [vmem:[#allocation5 + $0x40] sm:$0xf] %vm7956_vm4, %v7893_v1  ;;  %v7105_v1 = vld [vmem:[#allocation3 + $0x50] sm:$0x1] }
 0x663   : > { %v6999_v34 = vpop.permute.xlu2 %6998  ;;  %v7255_v40 = vshll.u32 %v7105_v1, 16  ;;  %v7253_v53 = vrot.slane %v7252_v42, 4  ;;  %v7457_v36 = vrot.slane %v7455_v44, 5  ;;  %v6925_v1 = vld [vmem:[#allocation3 + $0xb8] sm:$0xf] }
 0x664   : > { %7077 = vst.msk [vmem:[#allocation5 + $0x48] sm:$0xf] %vm7058_vm1, %v6999_v34 }
 0x665   : > { %7874 = vrot.lane.b32.xlu1 %v7775_v31, %s8803_s9  ;;  %v7257_v31 = vrot.slane %v7255_v40, 5 }
 0x667   : > { %7012 = vrot.lane.b32.xlu0 %v6923_v4, %s8802_s6  ;;  %v7895_v22 = vpop.permute.xlu1 %7894  ;;  %v7248_v4 = vsel %vm8874_vm3, %v7243_v27, %v7247_v19  ;;  %v7843_v19 = vrot.slane %v7841_v0, 4  ;;  %v7691_v27 = vld [vmem:[#allocation3 + $0xb4] sm:$0xe] }
 0x668   : > { %7974 = vst.msk [vmem:[#allocation5 + $0x44] sm:$0xf] %vm7956_vm4, %v7895_v22  ;;  %v7258_v22 = vsel %vm8874_vm3, %v7253_v53, %v7257_v31  ;;  %v8592_v53 = vrot.slane %v7691_v27, 9 }
 0x669   : > { %v6965_v28 = vpop.permute.xlu0 %6964  ;;  %7010 = vrot.lane.b32.xlu2 %v6922_v26, %s8802_s6  ;;  %v7454_v26 = vrot.slane %v7452_v9, 4 }
 0x66a   : > { %7060 = vst.msk [vmem:[#allocation5 + $0x4] sm:$0xf] %vm7058_vm1, %v6965_v28  ;;  %v7842_v39 = vsel %vm9676_vm13, %v8592_v53, %v7841_v0 }
 0x66b   : > { %7621 = vst.msk [vmem:[#allocation5 + $0x4] sm:$0xf] %vm7619_vm2, %v7526_v51  ;;  %v7562_v2 = vpop.permute.xlu2 %7561  ;;  %v7664_v51 = vld [vmem:[#allocation3 + $0x48] sm:$0xe] }
 0x66c   : > { %v8583_v47 = vrot.slane %v7664_v51, 9 }
 0x66d   : > { %7571 = vrot.lane.b32.xlu1 %v7440_v25, %s8804_s10  ;;  %v7458_v25 = vor.u32 %v7457_v36, %v7454_v26  ;;  %v7669_v26 = vld [vmem:[#allocation3 + $0x5c] sm:$0x1] }
 0x66e   : > { %v7779_v29 = vsel %vm9676_vm13, %v8583_v47, %v7778_v16  ;;  %v7107_v16 = vld [vmem:[#allocation3 + $0x58] sm:$0xf] }
 0x66f   : > { %7908 = vrot.lane.b32.xlu0 %v7835_v13, %s8803_s9  ;;  %v7524_v32 = vpop.permute.xlu1 %7523  ;;  %v8727_v38 = vld [vmem:[#allocation5 + $0x40] sm:$0xff]  ;;  %v7781_v13 = vrot.slane %v7666_v48, 5  ;;  %v7269_v49 = vshll.u32 %v7107_v16, 16 }
 0x670   : > { %7620 = vst.msk [vmem:[#allocation5] sm:$0xf] %vm7619_vm2, %v7524_v32  ;;  %8233 = vmatmul.bf16.vlgmr.msra.gmra.mxu3 %v8727_v38  ;;  %v7459_v38 = vrot.slane %v7458_v25, 4 }
 0x671   : > { %v7861_v43 = vpop.permute.xlu0 %7860  ;;  %7573 = vrot.lane.b32.xlu2 %v7450_v33, %s8804_s10  ;;  %v7782_v18 = vsel %vm9676_vm13, %v7780_v21, %v7781_v13  ;;  %v7106_v33 = vld [vmem:[#allocation3 + $0x54] sm:$0xf]  ;;  %v7271_v9 = vrot.slane %v7269_v49, 5  ;;  %v7108_v21 = vld [vmem:[#allocation3 + $0x5c] sm:$0x1] }
 0x672   : > { %7957 = vst.msk [vmem:[#allocation5] sm:$0xf] %vm7956_vm4, %v7861_v43  ;;  %v7464_v3 = vsel %vm8874_vm3, %v7459_v38, %v7463_v63  ;;  %v7260_v46 = vshrl.u32 %v7106_v33, 16  ;;  %v7263_v7 = vshll.u32 %v7106_v33, 16  ;;  %v7133_v33 = vld [vmem:[#allocation3 + $0xc0] sm:$0xf] }
 0x673   : > { %v6967_v55 = vpop.permute.xlu2 %6966 }
 0x674   : > { %7061 = vst.msk [vmem:[#allocation5 + $0x8] sm:$0xf] %vm7058_vm1, %v6967_v55  ;;  %v7468_v55 = vor.u32 %v7467_v37, %v7463_v63  ;;  %v7262_v12 = vrot.slane %v7260_v46, 4  ;;  %v6603_v37 = vld [vmem:[#allocation3 + $0xb8] sm:$0xf] }
 0x675   : > { %7910 = vrot.lane.b32.xlu1 %v7838_v50, %s8803_s9  ;;  %v7693_v50 = vld [vmem:[#allocation3 + $0xbc] sm:$0x1]  ;;  %v6602_v46 = vld [vmem:[#allocation3 + $0xb4] sm:$0xe] }
 0x676   : > { %v7844_v30 = vrot.slane %v7693_v50, 5  ;;  %v7479_v50 = vshll.u32 %v7133_v33, 16 }
 0x677   : > { %6980 = vrot.lane.b32.xlu0 %v6907_v58, %s8802_s6  ;;  %v7863_v24 = vpop.permute.xlu1 %7862  ;;  %v7132_v58 = vld [vmem:[#allocation3 + $0xbc] sm:$0x1] }
 0x678   : > { %7958 = vst.msk [vmem:[#allocation5 + $0x4] sm:$0xf] %vm7956_vm4, %v7863_v24  ;;  %v7471_v11 = vshll.u32 %v7132_v58, 16  ;;  %v7265_v24 = vrot.slane %v7263_v7, 5  ;;  %v7845_v47 = vsel %vm9676_vm13, %v7843_v19, %v7844_v30  ;;  %v7135_v7 = vld [vmem:[#allocation3 + $0xc8] sm:$0x1] }
 0x679   : > { %v7001_v8 = vpop.permute.xlu0 %7000  ;;  %6978 = vrot.lane.b32.xlu2 %v6906_v17, %s8802_s6  ;;  %v7469_v17 = vrot.slane %v7468_v55, 4  ;;  %v6756_v55 = vrot.slane %v6603_v37, 5  ;;  %v6926_v19 = vld [vmem:[#allocation3 + $0xc0] sm:$0xf] }
 0x67a   : > { %7078 = vst.msk [vmem:[#allocation5 + $0x4c] sm:$0xf] %vm7058_vm1, %v7001_v8  ;;  %v7473_v42 = vrot.slane %v7471_v11, 5  ;;  %v8577_v11 = vrot.slane %v6602_v46, 9 }
 0x67b   : > { %7639 = vst.msk [vmem:[#allocation5 + $0x4c] sm:$0xf] %vm7619_vm2, %v7562_v2  ;;  %v7530_v41 = vpop.permute.xlu2 %7529  ;;  %v6599_v2 = vld [vmem:[#allocation3 + $0xa8] sm:$0xe] }
 0x67c   : > { %v8576_v57 = vrot.slane %v6599_v2, 9  ;;  %v7474_v40 = vsel %vm8874_vm3, %v7469_v17, %v7473_v42  ;;  %v6909_v2 = vld [vmem:[#allocation3 + $0x58] sm:$0xf]  ;;  %v7481_v17 = vrot.slane %v7479_v50, 5  ;;  %v7671_v50 = vld [vmem:[#allocation3 + $0x64] sm:$0xf] }
 0x67d   : > { %7539 = vrot.lane.b32.xlu1 %v7248_v4, %s8804_s10 }
 0x67e   : > { %v6750_v32 = vsel %vm9676_vm13, %v8576_v57, %v6749_v20  ;;  %v7266_v20 = vor.u32 %v7265_v24, %v7262_v12  ;;  %v6604_v12 = vld [vmem:[#allocation3 + $0xbc] sm:$0x1]  ;;  %v6757_v24 = vsel %vm9676_vm13, %v8577_v11, %v6756_v55 }
 0x67f   : > { %7876 = vrot.lane.b32.xlu0 %v7779_v29, %s8803_s9  ;;  %v7560_v60 = vpop.permute.xlu1 %7559  ;;  %v8719_v28 = vld [vmem:[#allocation5] sm:$0xff]  ;;  %v6759_v42 = vrot.slane %v6604_v12, 5  ;;  %v7136_v12 = vld [vmem:[#allocation3 + $0xcc] sm:$0xf] }
 0x680   : > { %7638 = vst.msk [vmem:[#allocation5 + $0x48] sm:$0xf] %vm7619_vm2, %v7560_v60  ;;  %8193 = vmatmul.bf16.vlgmr.msra.gmra.mxu1 %v8719_v28  ;;  %v7267_v31 = vrot.slane %v7266_v20, 4  ;;  %v7110_v20 = vld [vmem:[#allocation3 + $0x64] sm:$0xf] }
 0x681   : > { %v7897_v34 = vpop.permute.xlu0 %7896  ;;  %7541 = vrot.lane.b32.xlu2 %v7258_v22, %s8804_s10 }
 0x682   : > { %7975 = vst.msk [vmem:[#allocation5 + $0x48] sm:$0xf] %vm7956_vm4, %v7897_v34  ;;  %v7668_v34 = vld [vmem:[#allocation3 + $0x58] sm:$0xf]  ;;  %v7272_v60 = vsel %vm8874_vm3, %v7267_v31, %v7271_v9 }
 0x683   : > { %v7003_v59 = vpop.permute.xlu2 %7002  ;;  %v7785_v28 = vrot.slane %v7668_v34, 5 }
 0x684   : > { %7079 = vst.msk [vmem:[#allocation5 + $0x50] sm:$0xf] %vm7058_vm1, %v7003_v59  ;;  %v7134_v59 = vld [vmem:[#allocation3 + $0xc4] sm:$0xf] }
 0x685   : > { %7878 = vrot.lane.b32.xlu1 %v7782_v18, %s8803_s9  ;;  %v7787_v36 = vrot.slane %v7785_v28, 4  ;;  %v7788_v18 = vrot.slane %v7669_v26, 5  ;;  %v7485_v57 = vshll.u32 %v7134_v59, 16  ;;  %v7489_v63 = vshrl.u32 %v7134_v59, 16 }
 0x687   : > { %6822 = vrot.lane.b32.xlu0 %v6753_v54, %s8801_s29  ;;  %v7899_v15 = vpop.permute.xlu1 %7898  ;;  %v7279_v54 = vshll.u32 %v7108_v21, 16  ;;  %v7789_v45 = vsel %vm9676_vm13, %v7787_v36, %v7788_v18  ;;  %v7487_v0 = vrot.slane %v7485_v57, 5 }
 0x688   : > { %7976 = vst.msk [vmem:[#allocation5 + $0x4c] sm:$0xf] %vm7956_vm4, %v7899_v15 }
 0x689   : > { %v6969_v43 = vpop.permute.xlu0 %6968  ;;  %6820 = vrot.lane.b32.xlu2 %v6750_v32, %s8801_s29 }
 0x68a   : > { %7062 = vst.msk [vmem:[#allocation5 + $0xc] sm:$0xf] %vm7058_vm1, %v6969_v43  ;;  %v7281_v43 = vrot.slane %v7279_v54, 5  ;;  %v7696_v54 = vld [vmem:[#allocation3 + $0xc8] sm:$0x1] }
 0x68b   : > { %7623 = vst.msk [vmem:[#allocation5 + $0xc] sm:$0xf] %vm7619_vm2, %v7530_v41  ;;  %v7566_v35 = vpop.permute.xlu2 %7565  ;;  %v7273_v41 = vshrl.u32 %v7107_v16, 16  ;;  %v7851_v57 = vrot.slane %v7696_v54, 5 }
 0x68d   : > { %7014 = vrot.lane.b32.xlu1 %v6924_v56, %s8802_s6  ;;  %v7275_v62 = vrot.slane %v7273_v41, 4 }
 0x68f   : > { %7575 = vrot.lane.b32.xlu0 %v7464_v3, %s8804_s10  ;;  %v7528_v8 = vpop.permute.xlu1 %7527  ;;  %v8728_v51 = vld [vmem:[#allocation5 + $0x48] sm:$0xff]  ;;  %v7276_v22 = vor.u32 %v7275_v62, %v7271_v9  ;;  %v8584_v3 = vrot.slane %v7667_v5, 9  ;;  %v7293_v9 = vshll.u32 %v7110_v20, 16 }
 0x690   : > { %7622 = vst.msk [vmem:[#allocation5 + $0x8] sm:$0xf] %vm7619_vm2, %v7528_v8  ;;  %8238 = vmatmul.bf16.gmra.mxu3 %v8728_v51  ;;  %v7495_v51 = vshll.u32 %v7135_v7, 16  ;;  %v6605_v7 = vld [vmem:[#allocation3 + $0xc0] sm:$0xe] }
 0x691   : > { %v7865_v14 = vpop.permute.xlu0 %7864  ;;  %7016 = vrot.lane.b32.xlu2 %v6925_v1, %s8802_s6  ;;  %v7277_v25 = vrot.slane %v7276_v22, 4  ;;  %v7786_v56 = vsel %vm9676_vm13, %v8584_v3, %v7785_v28  ;;  %v6758_v1 = vrot.slane %v6756_v55, 4  ;;  %v7695_v28 = vld [vmem:[#allocation3 + $0xc4] sm:$0xf]  ;;  %v7109_v22 = vld [vmem:[#allocation3 + $0x60] sm:$0xf] }
 0x692   : > { %7959 = vst.msk [vmem:[#allocation5 + $0x8] sm:$0xf] %vm7956_vm4, %v7865_v14  ;;  %v7476_v14 = vshrl.u32 %v7133_v33, 16  ;;  %v7848_v36 = vrot.slane %v7695_v28, 5  ;;  %v7287_v18 = vshll.u32 %v7109_v22, 16  ;;  %v8578_v11 = vrot.slane %v6605_v7, 9 }
 0x693   : > { %v6971_v29 = vpop.permute.xlu2 %6970  ;;  %v7282_v32 = vsel %vm8874_vm3, %v7277_v25, %v7281_v43  ;;  %v6760_v41 = vsel %vm9676_vm13, %v6758_v1, %v6759_v42  ;;  %v6911_v55 = vld [vmem:[#allocation3 + $0x64] sm:$0xf]  ;;  %v7792_v1 = vrot.slane %v7671_v50, 5  ;;  %v7500_v42 = vshrl.u32 %v7136_v12, 16  ;;  %v6929_v28 = vld [vmem:[#allocation3 + $0xd0] sm:$0xf] }
 0x694   : > { %7063 = vst.msk [vmem:[#allocation5 + $0x10] sm:$0xf] %vm7058_vm1, %v6971_v29  ;;  %v7478_v30 = vrot.slane %v7476_v14, 4  ;;  %v7497_v29 = vrot.slane %v7495_v51, 5  ;;  %v7850_v43 = vrot.slane %v7848_v36, 4 }
 0x695   : > { %7577 = vrot.lane.b32.xlu1 %v7474_v40, %s8804_s10 }
 0x696   : > { %v7852_v3 = vsel %vm9676_vm13, %v7850_v43, %v7851_v57 }
 0x697   : > { %7914 = vrot.lane.b32.xlu0 %v7845_v47, %s8803_s9  ;;  %v7867_v44 = vpop.permute.xlu1 %7866 }
 0x698   : > { %7960 = vst.msk [vmem:[#allocation5 + $0xc] sm:$0xf] %vm7956_vm4, %v7867_v44  ;;  %v7297_v44 = vshrl.u32 %v7110_v20, 16  ;;  %v7794_v20 = vrot.slane %v7792_v1, 4 }
 0x699   : > { %v7005_v4 = vpop.permute.xlu0 %7004  ;;  %7912 = vrot.lane.b32.xlu2 %v7842_v39, %s8803_s9  ;;  %v6927_v39 = vld [vmem:[#allocation3 + $0xc4] sm:$0xf] }
 0x69a   : > { %7080 = vst.msk [vmem:[#allocation5 + $0x54] sm:$0xf] %vm7058_vm1, %v7005_v4  ;;  %v7482_v4 = vor.u32 %v7481_v17, %v7478_v30  ;;  %v7299_v21 = vrot.slane %v7297_v44, 4 }
 0x69b   : > { %7641 = vst.msk [vmem:[#allocation5 + $0x54] sm:$0xf] %vm7619_vm2, %v7566_v35  ;;  %v7534_v48 = vpop.permute.xlu2 %7533  ;;  %v7491_v35 = vrot.slane %v7489_v63, 4 }
 0x69c   : > { %v7483_v31 = vrot.slane %v7482_v4, 4 }
 0x69d   : > { %6982 = vrot.lane.b32.xlu1 %v6908_v52, %s8802_s6  ;;  %v7492_v8 = vor.u32 %v7491_v35, %v7487_v0 }
 0x69f   : > { %7543 = vrot.lane.b32.xlu0 %v7272_v60, %s8804_s10  ;;  %v7564_v13 = vpop.permute.xlu1 %7563  ;;  %v8720_v23 = vld [vmem:[#allocation5 + $0x8] sm:$0xff]  ;;  %v7493_v49 = vrot.slane %v7492_v8, 4 }
 0x6a0   : > { %7640 = vst.msk [vmem:[#allocation5 + $0x50] sm:$0xf] %vm7619_vm2, %v7564_v13  ;;  %8198 = vmatmul.bf16.gmra.mxu1 %v8720_v23  ;;  %v7694_v60 = vld [vmem:[#allocation3 + $0xc0] sm:$0xe]  ;;  %v7111_v13 = vld [vmem:[#allocation3 + $0x68] sm:$0x1] }
 0x6a1   : > { %v7901_v61 = vpop.permute.xlu0 %7900  ;;  %6984 = vrot.lane.b32.xlu2 %v6909_v2, %s8802_s6  ;;  %v7498_v53 = vsel %vm8874_vm3, %v7493_v49, %v7497_v29  ;;  %v8593_v26 = vrot.slane %v7694_v60, 9  ;;  %v6910_v23 = vld [vmem:[#allocation3 + $0x60] sm:$0xf]  ;;  %v7284_v2 = vshrl.u32 %v7109_v22, 16  ;;  %v7303_v63 = vshll.u32 %v7111_v13, 16 }
 0x6a2   : > { %7977 = vst.msk [vmem:[#allocation5 + $0x50] sm:$0xf] %vm7956_vm4, %v7901_v61  ;;  %v7488_v61 = vsel %vm8874_vm3, %v7483_v31, %v7487_v0  ;;  %v7503_v49 = vshll.u32 %v7136_v12, 16  ;;  %v7698_v22 = vld [vmem:[#allocation3 + $0xd0] sm:$0xf] }
 0x6a3   : > { %v7007_v15 = vpop.permute.xlu2 %7006  ;;  %v7305_v0 = vrot.slane %v7303_v63, 5  ;;  %v7138_v13 = vld [vmem:[#allocation3 + $0xd4] sm:$0x1] }
 0x6a4   : > { %7081 = vst.msk [vmem:[#allocation5 + $0x58] sm:$0xf] %vm7058_vm1, %v7007_v15  ;;  %v7505_v44 = vrot.slane %v7503_v49, 5  ;;  %v7519_v57 = vshll.u32 %v7138_v13, 16 }
 0x6a5   : > { %7545 = vrot.lane.b32.xlu1 %v7282_v32, %s8804_s10  ;;  %v7286_v32 = vrot.slane %v7284_v2, 4  ;;  %v7855_v2 = vrot.slane %v7698_v22, 5 }
 0x6a7   : > { %7882 = vrot.lane.b32.xlu0 %v7789_v45, %s8803_s9  ;;  %v7903_v58 = vpop.permute.xlu1 %7902  ;;  %v7849_v45 = vsel %vm9676_vm13, %v8593_v26, %v7848_v36  ;;  %v7857_v7 = vrot.slane %v7855_v2, 4 }
 0x6a8   : > { %7978 = vst.msk [vmem:[#allocation5 + $0x54] sm:$0xf] %vm7956_vm4, %v7903_v58 }
 0x6a9   : > { %v6973_v38 = vpop.permute.xlu0 %6972  ;;  %7880 = vrot.lane.b32.xlu2 %v7786_v56, %s8803_s9  ;;  %v6606_v56 = vld [vmem:[#allocation3 + $0xc4] sm:$0xf] }
 0x6aa   : > { %7064 = vst.msk [vmem:[#allocation5 + $0x14] sm:$0xf] %vm7058_vm1, %v6973_v38  ;;  %v7289_v38 = vrot.slane %v7287_v18, 5  ;;  %v6763_v8 = vrot.slane %v6606_v56, 5 }
 0x6ab   : > { %7625 = vst.msk [vmem:[#allocation5 + $0x14] sm:$0xf] %vm7619_vm2, %v7534_v48  ;;  %v7570_v16 = vpop.permute.xlu2 %7569  ;;  %v7295_v48 = vrot.slane %v7293_v9, 5  ;;  %v7502_v9 = vrot.slane %v7500_v42, 4  ;;  %v7673_v42 = vld [vmem:[#allocation3 + $0x6c] sm:$0xe] }
 0x6ac   : > { %v7290_v58 = vor.u32 %v7289_v38, %v7286_v32  ;;  %v6764_v30 = vsel %vm9676_vm13, %v8578_v11, %v6763_v8  ;;  %v7521_v38 = vrot.slane %v7519_v57, 5 }
 0x6ad   : > { %6824 = vrot.lane.b32.xlu1 %v6757_v24, %s8801_s29  ;;  %v7300_v59 = vor.u32 %v7299_v21, %v7295_v48 }
 0x6af   : > { %7018 = vrot.lane.b32.xlu0 %v6926_v19, %s8802_s6  ;;  %v7532_v27 = vpop.permute.xlu1 %7531  ;;  %v8729_v40 = vld [vmem:[#allocation5 + $0x50] sm:$0xff]  ;;  %v7301_v5 = vrot.slane %v7300_v59, 4  ;;  %v7291_v19 = vrot.slane %v7290_v58, 4 }
 0x6b0   : > { %7624 = vst.msk [vmem:[#allocation5 + $0x10] sm:$0xf] %vm7619_vm2, %v7532_v27  ;;  %8243 = vmatmul.bf16.gmra.mxu3 %v8729_v40  ;;  %v7137_v27 = vld [vmem:[#allocation3 + $0xd0] sm:$0xf] }
 0x6b1   : > { %v7869_v47 = vpop.permute.xlu0 %7868  ;;  %6826 = vrot.lane.b32.xlu2 %v6760_v41, %s8801_s29  ;;  %v7306_v35 = vsel %vm8874_vm3, %v7301_v5, %v7305_v0  ;;  %v7296_v24 = vsel %vm8874_vm3, %v7291_v19, %v7295_v48  ;;  %v6765_v48 = vrot.slane %v6763_v8, 4  ;;  %v6913_v8 = vld [vmem:[#allocation3 + $0x70] sm:$0xf] }
 0x6b2   : > { %7961 = vst.msk [vmem:[#allocation5 + $0x10] sm:$0xf] %vm7956_vm4, %v7869_v47  ;;  %v7672_v47 = vld [vmem:[#allocation3 + $0x68] sm:$0x1] }
 0x6b3   : > { %v6975_v34 = vpop.permute.xlu2 %6974  ;;  %v7795_v4 = vrot.slane %v7672_v47, 5 }
 0x6b4   : > { %7065 = vst.msk [vmem:[#allocation5 + $0x18] sm:$0xf] %vm7058_vm1, %v6975_v34  ;;  %v7509_v34 = vshll.u32 %v7137_v27, 16 }
 0x6b5   : > { %7020 = vrot.lane.b32.xlu1 %v6927_v39, %s8802_s6  ;;  %v7513_v39 = vshrl.u32 %v7137_v27, 16  ;;  %v7796_v60 = vsel %vm9676_vm13, %v7794_v20, %v7795_v4  ;;  %v6912_v20 = vld [vmem:[#allocation3 + $0x6c] sm:$0xf] }
 0x6b6   : > { %v7511_v26 = vrot.slane %v7509_v34, 5 }
 0x6b7   : > { %7581 = vrot.lane.b32.xlu0 %v7498_v53, %s8804_s10  ;;  %v7871_v52 = vpop.permute.xlu1 %7870  ;;  %v6607_v53 = vld [vmem:[#allocation3 + $0xc8] sm:$0x1]  ;;  %v7515_v36 = vrot.slane %v7513_v39, 4 }
 0x6b8   : > { %7962 = vst.msk [vmem:[#allocation5 + $0x14] sm:$0xf] %vm7956_vm4, %v7871_v52  ;;  %v6766_v21 = vrot.slane %v6607_v53, 5  ;;  %v7697_v52 = vld [vmem:[#allocation3 + $0xcc] sm:$0xe] }
 0x6b9   : > { %v7009_v62 = vpop.permute.xlu0 %7008  ;;  %7579 = vrot.lane.b32.xlu2 %v7488_v61, %s8804_s10  ;;  %v7506_v61 = vor.u32 %v7505_v44, %v7502_v9  ;;  %v8594_v59 = vrot.slane %v7697_v52, 9  ;;  %v7516_v43 = vor.u32 %v7515_v36, %v7511_v26 }
 0x6ba   : > { %7082 = vst.msk [vmem:[#allocation5 + $0x5c] sm:$0xf] %vm7058_vm1, %v7009_v62 }
 0x6bb   : > { %7643 = vst.msk [vmem:[#allocation5 + $0x5c] sm:$0xf] %vm7619_vm2, %v7570_v16  ;;  %v7538_v25 = vpop.permute.xlu2 %7537  ;;  %v7670_v16 = vld [vmem:[#allocation3 + $0x60] sm:$0xe]  ;;  %v7517_v32 = vrot.slane %v7516_v43, 4 }
 0x6bc   : > { %v8585_v17 = vrot.slane %v7670_v16, 9 }
 0x6bd   : > { %7916 = vrot.lane.b32.xlu1 %v7849_v45, %s8803_s9  ;;  %v7507_v45 = vrot.slane %v7506_v61, 4  ;;  %v12188_v61 = vld [vmem:[%s12345_s4] ss:$0 sm:$0xff] }
 0x6be   : > { %v7793_v40 = vsel %vm9676_vm13, %v8585_v17, %v7792_v1  ;;  %v7674_v1 = vld [vmem:[#allocation3 + $0x70] sm:$0xf] }
 0x6bf   : > { %6986 = vrot.lane.b32.xlu0 %v6910_v23, %s8802_s6  ;;  %v7568_v37 = vpop.permute.xlu1 %7567  ;;  %v8721_v33 = vld [vmem:[#allocation5 + $0x10] sm:$0xff]  ;;  %v6767_v23 = vsel %vm9676_vm13, %v6765_v48, %v6766_v21  ;;  %v7512_v5 = vsel %vm8874_vm3, %v7507_v45, %v7511_v26  ;;  %v7799_v49 = vrot.slane %v7674_v1, 5  ;;  %v7675_v21 = vld [vmem:[#allocation3 + $0x74] sm:$0x1] }
 0x6c0   : > { %7642 = vst.msk [vmem:[#allocation5 + $0x58] sm:$0xf] %vm7619_vm2, %v7568_v37  ;;  %8203 = vmatmul.bf16.gmra.mxu1 %v8721_v33  ;;  %v7112_v37 = vld [vmem:[#allocation3 + $0x6c] sm:$0xf]  ;;  %v7802_v26 = vrot.slane %v7675_v21, 5 }
 0x6c1   : > { %v7905_v15 = vpop.permute.xlu0 %7904  ;;  %7918 = vrot.lane.b32.xlu2 %v7852_v3, %s8803_s9  ;;  %v7699_v3 = vld [vmem:[#allocation3 + $0xd4] sm:$0x1]  ;;  %v7308_v58 = vshrl.u32 %v7112_v37, 16  ;;  %v7801_v22 = vrot.slane %v7799_v49, 4 }
 0x6c2   : > { %7979 = vst.msk [vmem:[#allocation5 + $0x58] sm:$0xf] %vm7956_vm4, %v7905_v15  ;;  %v7856_v15 = vsel %vm9676_vm13, %v8594_v59, %v7855_v2  ;;  %v7858_v56 = vrot.slane %v7699_v3, 5 }
 0x6c3   : > { %v7011_v46 = vpop.permute.xlu2 %7010  ;;  %v7310_v16 = vrot.slane %v7308_v58, 4 }
 0x6c4   : > { %7083 = vst.msk [vmem:[#allocation5 + $0x60] sm:$0xf] %vm7058_vm1, %v7011_v46  ;;  %v7522_v46 = vsel %vm8874_vm3, %v7517_v32, %v7521_v38 }
 0x6c5   : > { %6988 = vrot.lane.b32.xlu1 %v6911_v55, %s8802_s6  ;;  %v7311_v55 = vshll.u32 %v7112_v37, 16 }
 0x6c7   : > { %7549 = vrot.lane.b32.xlu0 %v7306_v35, %s8804_s10  ;;  %v7907_v51 = vpop.permute.xlu1 %7906  ;;  %v7113_v35 = vld [vmem:[#allocation3 + $0x70] sm:$0xf]  ;;  %v7313_v12 = vrot.slane %v7311_v55, 5 }
 0x6c8   : > { %7980 = vst.msk [vmem:[#allocation5 + $0x5c] sm:$0xf] %vm7956_vm4, %v7907_v51  ;;  %v7317_v19 = vshll.u32 %v7113_v35, 16  ;;  %v7321_v11 = vshrl.u32 %v7113_v35, 16  ;;  %v7859_v51 = vsel %vm9676_vm13, %v7857_v7, %v7858_v56 }
 0x6c9   : > { %v6977_v14 = vpop.permute.xlu0 %6976  ;;  %7547 = vrot.lane.b32.xlu2 %v7296_v24, %s8804_s10 }
 0x6ca   : > { %7066 = vst.msk [vmem:[#allocation5 + $0x1c] sm:$0xf] %vm7058_vm1, %v6977_v14  ;;  %v7323_v17 = vrot.slane %v7321_v11, 4 }
 0x6cb   : > { %7627 = vst.msk [vmem:[#allocation5 + $0x1c] sm:$0xf] %vm7619_vm2, %v7538_v25  ;;  %v7574_v29 = vpop.permute.xlu2 %7573  ;;  %v6928_v25 = vld [vmem:[#allocation3 + $0xcc] sm:$0xf] }
 0x6cd   : > { %7884 = vrot.lane.b32.xlu1 %v7793_v40, %s8803_s9  ;;  %v7114_v40 = vld [vmem:[#allocation3 + $0x74] sm:$0x1] }
 0x6ce   : > { %v7327_v44 = vshll.u32 %v7114_v40, 16 }
 0x6cf   : > { %6828 = vrot.lane.b32.xlu0 %v6764_v30, %s8801_s29  ;;  %v7536_v31 = vpop.permute.xlu1 %7535  ;;  %v8730_v62 = vld [vmem:[#allocation5 + $0x58] sm:$0xff]  ;;  %v7319_v30 = vrot.slane %v7317_v19, 5 }
 0x6d0   : > { %7626 = vst.msk [vmem:[#allocation5 + $0x18] sm:$0xf] %vm7619_vm2, %v7536_v31  ;;  %8248 = vmatmul.bf16.gmra.mxu3 %v8730_v62 }
 0x6d1   : > { %v7873_v41 = vpop.permute.xlu0 %7872  ;;  %7886 = vrot.lane.b32.xlu2 %v7796_v60, %s8803_s9  ;;  %v7324_v4 = vor.u32 %v7323_v17, %v7319_v30  ;;  %v7329_v60 = vrot.slane %v7327_v44, 5 }
 0x6d2   : > { %7963 = vst.msk [vmem:[#allocation5 + $0x18] sm:$0xf] %vm7956_vm4, %v7873_v41  ;;  %v8586_v41 = vrot.slane %v7673_v42, 9 }
 0x6d3   : > { %v6979_v54 = vpop.permute.xlu2 %6978  ;;  %v7325_v31 = vrot.slane %v7324_v4, 4 }
 0x6d4   : > { %7067 = vst.msk [vmem:[#allocation5 + $0x20] sm:$0xf] %vm7058_vm1, %v6979_v54  ;;  %v7800_v53 = vsel %vm9676_vm13, %v8586_v41, %v7799_v49  ;;  %v7803_v54 = vsel %vm9676_vm13, %v7801_v22, %v7802_v26 }
 0x6d5   : > { %6830 = vrot.lane.b32.xlu1 %v6767_v23, %s8801_s29  ;;  %v7330_v52 = vsel %vm8874_vm3, %v7325_v31, %v7329_v60 }
 0x6d7   : > { %7024 = vrot.lane.b32.xlu0 %v6929_v28, %s8802_s6  ;;  %v7875_v63 = vpop.permute.xlu1 %7874 }
 0x6d8   : > { %7964 = vst.msk [vmem:[#allocation5 + $0x1c] sm:$0xf] %vm7956_vm4, %v7875_v63 }
 0x6d9   : > { %v7013_v18 = vpop.permute.xlu0 %7012  ;;  %7022 = vrot.lane.b32.xlu2 %v6928_v25, %s8802_s6 }
 0x6da   : > { %7084 = vst.msk [vmem:[#allocation5 + $0x64] sm:$0xf] %vm7058_vm1, %v7013_v18 }
 0x6db   : > { %7645 = vst.msk [vmem:[#allocation5 + $0x64] sm:$0xf] %vm7619_vm2, %v7574_v29  ;;  %v7542_v33 = vpop.permute.xlu2 %7541  ;;  %v7314_v29 = vor.u32 %v7313_v12, %v7310_v16 }
 0x6dd   : > { %7583 = vrot.lane.b32.xlu1 %v7512_v5, %s8804_s10  ;;  %v7315_v9 = vrot.slane %v7314_v29, 4 }
 0x6df   : > { %7920 = vrot.lane.b32.xlu0 %v7856_v15, %s8803_s9  ;;  %v7572_v14 = vpop.permute.xlu1 %7571  ;;  %v8722_v50 = vld [vmem:[#allocation5 + $0x18] sm:$0xff]  ;;  %v7320_v39 = vsel %vm8874_vm3, %v7315_v9, %v7319_v30  ;;  %vm8306_vm3 = vcmask 64512  }
 0x6e0   : > { %7644 = vst.msk [vmem:[#allocation5 + $0x60] sm:$0xf] %vm7619_vm2, %v7572_v14  ;;  %8208 = vmatmul.bf16.gmra.mxu1 %v8722_v50 }
 0x6e1   : > { %v7909_v0 = vpop.permute.xlu0 %7908  ;;  %7585 = vrot.lane.b32.xlu2 %v7522_v46, %s8804_s10 }
 0x6e2   : > { %7981 = vst.msk [vmem:[#allocation5 + $0x60] sm:$0xf] %vm7956_vm4, %v7909_v0 }
 0x6e3   : > { %v6821_v24 = vpop.permute.xlu2 %6820 }
 0x6e4   : > { %6891 = vst.msk [vmem:[#allocation5 + $0x68] sm:$0xf] %vm6864_vm0, %v6821_v24 }
 0x6e5   : > { %7922 = vrot.lane.b32.xlu1 %v7859_v51, %s8803_s9 }
 0x6e7   : > { %6992 = vrot.lane.b32.xlu0 %v6913_v8, %s8802_s6  ;;  %v7911_v27 = vpop.permute.xlu1 %7910 }
 0x6e8   : > { %7982 = vst.msk [vmem:[#allocation5 + $0x64] sm:$0xf] %vm7956_vm4, %v7911_v27 }
 0x6e9   : > { %v6981_v47 = vpop.permute.xlu0 %6980  ;;  %6990 = vrot.lane.b32.xlu2 %v6912_v20, %s8802_s6 }
 0x6ea   : > { %7068 = vst.msk [vmem:[#allocation5 + $0x24] sm:$0xf] %vm7058_vm1, %v6981_v47 }
 0x6eb   : > { %7629 = vst.msk [vmem:[#allocation5 + $0x24] sm:$0xf] %vm7619_vm2, %v7542_v33  ;;  %v7017_v34 = vpop.permute.xlu2 %7016 }
 0x6ed   : > { %7551 = vrot.lane.b32.xlu1 %v7320_v39, %s8804_s10 }
 0x6ef   : > { %7888 = vrot.lane.b32.xlu0 %v7800_v53, %s8803_s9  ;;  %v7540_v28 = vpop.permute.xlu1 %7539  ;;  %v8731_v48 = vld [vmem:[#allocation5 + $0x60] sm:$0xff] }
 0x6f0   : > { %7628 = vst.msk [vmem:[#allocation5 + $0x20] sm:$0xf] %vm7619_vm2, %v7540_v28  ;;  %8253 = vmatmul.bf16.gmra.mxu3 %v8731_v48 }
 0x6f1   : > { %v7877_v62 = vpop.permute.xlu0 %7876  ;;  %7553 = vrot.lane.b32.xlu2 %v7330_v52, %s8804_s10  ;;  %s12199_s10 = scalar_lea.vmem %s12346_s5, %s8693_s21 }
 0x6f2   : > { %7965 = vst.msk [vmem:[#allocation5 + $0x20] sm:$0xf] %vm7956_vm4, %v7877_v62 }
 0x6f3   : > { %v7913_v36 = vpop.permute.xlu2 %7912  ;;  %v8234_v13 = vpop.f32.mrf.mxu3 }
 0x6f4   : > { %v8235_v10 = vadd.f32 %v12188_v61, %v8234_v13 }
 0x6f5   : > { %7890 = vrot.lane.b32.xlu1 %v7803_v54, %s8803_s9 }
 0x6f6   : > { %v8290_v59 = vmax.f32 %v8235_v10, 0.0 }
 0x6f7   : > { %v7879_v6 = vpop.permute.xlu1 %7878 }
 0x6f8   : > { %7966 = vst.msk [vmem:[#allocation5 + $0x24] sm:$0xf] %vm7956_vm4, %v7879_v6 }
 0x6f9   : > { %v6823_v23 = vpop.permute.xlu0 %6822  ;;  %8323 = vst.msk [vmem:[%s12199_s10 + $0x80] sm:$0xff] %vm8306_vm3, %v8290_v59 }
 0x6fa   : > { %6892 = vst.msk [vmem:[#allocation5 + $0x6c] sm:$0xf] %vm6864_vm0, %v6823_v23 }
 0x6fb   : > { %7086 = vst.msk [vmem:[#allocation5 + $0x6c] sm:$0xf] %vm7058_vm1, %v7017_v34  ;;  %v6985_v2 = vpop.permute.xlu2 %6984  ;;  %v8236_v18 = vpop.f32.mrf.mxu3 }
 0x6fc   : > { %7070 = vst.msk [vmem:[#allocation5 + $0x2c] sm:$0xf] %vm7058_vm1, %v6985_v2  ;;  %v8237_v25 = vadd.f32 %v12188_v61, %v8236_v18 }
 0x6fd   : > { %v8194_v43 = vpop.f32.mrf.mxu1 }
 0x6fe   : > { %v8291_v57 = vmax.f32 %v8237_v25, 0.0  ;;  %v8195_v15 = vadd.f32 %v12188_v61, %v8194_v43 }
 0x6ff   : > { %v7015_v63 = vpop.permute.xlu1 %7014  ;;  %v8723_v5 = vld [vmem:[#allocation5 + $0x20] sm:$0xff] }
 0x700   : > { %7085 = vst.msk [vmem:[#allocation5 + $0x68] sm:$0xf] %vm7058_vm1, %v7015_v63  ;;  %v8274_v32 = vmax.f32 %v8195_v15, 0.0  ;;  %8213 = vmatmul.bf16.gmra.mxu1 %v8723_v5 }
 0x701   : > { %v7576_v45 = vpop.permute.xlu0 %7575  ;;  %8324 = vst.msk [vmem:[%s12199_s10 + $0x88] sm:$0xff] %vm8306_vm3, %v8291_v57 }
 0x702   : > { %7646 = vst.msk [vmem:[#allocation5 + $0x68] sm:$0xf] %vm7619_vm2, %v7576_v45 }
 0x703   : > { %7983 = vst.msk [vmem:[#allocation5 + $0x68] sm:$0xf] %vm7956_vm4, %v7913_v36  ;;  %v7881_v38 = vpop.permute.xlu2 %7880 }
 0x704   : > { %8307 = vst.msk [vmem:[%s12199_s10] sm:$0xff] %vm8306_vm3, %v8274_v32 }
 0x705   : > { %v8196_v33 = vpop.f32.mrf.mxu1 }
 0x706   : > { %v8197_v0 = vadd.f32 %v12188_v61, %v8196_v33 }
 0x707   : > { %v7578_v3 = vpop.permute.xlu1 %7577 }
 0x708   : > { %7647 = vst.msk [vmem:[#allocation5 + $0x6c] sm:$0xf] %vm7619_vm2, %v7578_v3  ;;  %v8275_v35 = vmax.f32 %v8197_v0, 0.0 }
 0x709   : > { %v7915_v37 = vpop.permute.xlu0 %7914 }
 0x70a   : > { %7984 = vst.msk [vmem:[#allocation5 + $0x6c] sm:$0xf] %vm7956_vm4, %v7915_v37 }
 0x70b   : > { %8308 = vst.msk [vmem:[%s12199_s10 + $0x8] sm:$0xff] %vm8306_vm3, %v8275_v35  ;;  %v6827_v58 = vpop.permute.xlu2 %6826 }
 0x70c   : > { %6894 = vst.msk [vmem:[#allocation5 + $0x74] sm:$0xf] %vm6864_vm0, %v6827_v58 }
 0x70f   : > { %v6983_v7 = vpop.permute.xlu1 %6982 }
 0x710   : > { %7069 = vst.msk [vmem:[#allocation5 + $0x28] sm:$0xf] %vm7058_vm1, %v6983_v7 }
 0x711   : > { %v7544_v46 = vpop.permute.xlu0 %7543  ;;  %v8732_v56 = vld [vmem:[#allocation5 + $0x68] sm:$0xff] }
 0x712   : > { %7630 = vst.msk [vmem:[#allocation5 + $0x28] sm:$0xf] %vm7619_vm2, %v7544_v46  ;;  %8258 = vmatmul.bf16.gmra.mxu3 %v8732_v56 }
 0x713   : > { %7967 = vst.msk [vmem:[#allocation5 + $0x28] sm:$0xf] %vm7956_vm4, %v7881_v38  ;;  %v7580_v55 = vpop.permute.xlu2 %7579  ;;  %v8239_v14 = vpop.f32.mrf.mxu3 }
 0x714   : > { %v8240_v50 = vadd.f32 %v12188_v61, %v8239_v14 }
 0x716   : > { %v8292_v11 = vmax.f32 %v8240_v50, 0.0 }
 0x717   : > { %v7546_v8 = vpop.permute.xlu1 %7545 }
 0x718   : > { %7631 = vst.msk [vmem:[#allocation5 + $0x2c] sm:$0xf] %vm7619_vm2, %v7546_v8 }
 0x719   : > { %v7883_v19 = vpop.permute.xlu0 %7882  ;;  %8325 = vst.msk [vmem:[%s12199_s10 + $0x90] sm:$0xff] %vm8306_vm3, %v8292_v11 }
 0x71a   : > { %7968 = vst.msk [vmem:[#allocation5 + $0x2c] sm:$0xf] %vm7956_vm4, %v7883_v19 }
 0x71b   : > { %v7919_v51 = vpop.permute.xlu2 %7918  ;;  %v8241_v16 = vpop.f32.mrf.mxu3 }
 0x71c   : > { %v8242_v12 = vadd.f32 %v12188_v61, %v8241_v16 }
 0x71d   : > { %v8199_v1 = vpop.f32.mrf.mxu1 }
 0x71e   : > { %v8293_v30 = vmax.f32 %v8242_v12, 0.0  ;;  %v8200_v47 = vadd.f32 %v12188_v61, %v8199_v1 }
 0x71f   : > { %v6825_v17 = vpop.permute.xlu1 %6824 }
 0x720   : > { %6893 = vst.msk [vmem:[#allocation5 + $0x70] sm:$0xf] %vm6864_vm0, %v6825_v17  ;;  %v8276_v42 = vmax.f32 %v8200_v47, 0.0 }
 0x721   : > { %v7019_v24 = vpop.permute.xlu0 %7018  ;;  %8326 = vst.msk [vmem:[%s12199_s10 + $0x98] sm:$0xff] %vm8306_vm3, %v8293_v30  ;;  %v8724_v49 = vld [vmem:[#allocation5 + $0x28] sm:$0xff] }
 0x722   : > { %7087 = vst.msk [vmem:[#allocation5 + $0x70] sm:$0xf] %vm7058_vm1, %v7019_v24  ;;  %8218 = vmatmul.bf16.gmra.mxu1 %v8724_v49 }
 0x723   : > { %7648 = vst.msk [vmem:[#allocation5 + $0x70] sm:$0xf] %vm7619_vm2, %v7580_v55  ;;  %v7548_v29 = vpop.permute.xlu2 %7547 }
 0x724   : > { %8309 = vst.msk [vmem:[%s12199_s10 + $0x10] sm:$0xff] %vm8306_vm3, %v8276_v42 }
 0x725   : > { %v8201_v40 = vpop.f32.mrf.mxu1 }
 0x726   : > { %v8202_v41 = vadd.f32 %v12188_v61, %v8201_v40 }
 0x727   : > { %v7021_v20 = vpop.permute.xlu1 %7020 }
 0x728   : > { %7088 = vst.msk [vmem:[#allocation5 + $0x74] sm:$0xf] %vm7058_vm1, %v7021_v20  ;;  %v8277_v4 = vmax.f32 %v8202_v41, 0.0 }
 0x729   : > { %v7582_v27 = vpop.permute.xlu0 %7581 }
 0x72a   : > { %7649 = vst.msk [vmem:[#allocation5 + $0x74] sm:$0xf] %vm7619_vm2, %v7582_v27 }
 0x72b   : > { %7986 = vst.msk [vmem:[#allocation5 + $0x74] sm:$0xf] %vm7956_vm4, %v7919_v51  ;;  %v7887_v53 = vpop.permute.xlu2 %7886 }
 0x72c   : > { %8310 = vst.msk [vmem:[%s12199_s10 + $0x18] sm:$0xff] %vm8306_vm3, %v8277_v4 }
 0x72f   : > { %v7917_v44 = vpop.permute.xlu1 %7916 }
 0x730   : > { %7985 = vst.msk [vmem:[#allocation5 + $0x70] sm:$0xf] %vm7956_vm4, %v7917_v44 }
 0x731   : > { %v6987_v9 = vpop.permute.xlu0 %6986 }
 0x732   : > { %7071 = vst.msk [vmem:[#allocation5 + $0x30] sm:$0xf] %vm7058_vm1, %v6987_v9 }
 0x733   : > { %7632 = vst.msk [vmem:[#allocation5 + $0x30] sm:$0xf] %vm7619_vm2, %v7548_v29  ;;  %v7023_v34 = vpop.permute.xlu2 %7022  ;;  %v8244_v39 = vpop.f32.mrf.mxu3 }
 0x734   : > { %v8245_v31 = vadd.f32 %v12188_v61, %v8244_v39 }
 0x736   : > { %v8294_v60 = vmax.f32 %v8245_v31, 0.0 }
 0x737   : > { %v6989_v28 = vpop.permute.xlu1 %6988  ;;  %v8733_v48 = vld [vmem:[#allocation5 + $0x70] sm:$0xff] }
 0x738   : > { %7072 = vst.msk [vmem:[#allocation5 + $0x34] sm:$0xf] %vm7058_vm1, %v6989_v28  ;;  %8263 = vmatmul.bf16.gmra.mxu3 %v8733_v48 }
 0x739   : > { %v7550_v62 = vpop.permute.xlu0 %7549  ;;  %8327 = vst.msk [vmem:[%s12199_s10 + $0xa0] sm:$0xff] %vm8306_vm3, %v8294_v60 }
 0x73a   : > { %7633 = vst.msk [vmem:[#allocation5 + $0x34] sm:$0xf] %vm7619_vm2, %v7550_v62 }
 0x73b   : > { %7970 = vst.msk [vmem:[#allocation5 + $0x34] sm:$0xf] %vm7956_vm4, %v7887_v53  ;;  %v7586_v21 = vpop.permute.xlu2 %7585  ;;  %v8246_v52 = vpop.f32.mrf.mxu3 }
 0x73c   : > { %v8247_v22 = vadd.f32 %v12188_v61, %v8246_v52 }
 0x73d   : > { %v8204_v36 = vpop.f32.mrf.mxu1 }
 0x73e   : > { %v8295_v54 = vmax.f32 %v8247_v22, 0.0  ;;  %v8205_v10 = vadd.f32 %v12188_v61, %v8204_v36 }
 0x73f   : > { %v7885_v13 = vpop.permute.xlu1 %7884 }
 0x740   : > { %7969 = vst.msk [vmem:[#allocation5 + $0x30] sm:$0xf] %vm7956_vm4, %v7885_v13  ;;  %v8278_v23 = vmax.f32 %v8205_v10, 0.0 }
 0x741   : > { %v6829_v26 = vpop.permute.xlu0 %6828  ;;  %8328 = vst.msk [vmem:[%s12199_s10 + $0xa8] sm:$0xff] %vm8306_vm3, %v8295_v54 }
 0x742   : > { %6895 = vst.msk [vmem:[#allocation5 + $0x78] sm:$0xf] %vm6864_vm0, %v6829_v26 }
 0x743   : > { %7089 = vst.msk [vmem:[#allocation5 + $0x78] sm:$0xf] %vm7058_vm1, %v7023_v34  ;;  %v6991_v59 = vpop.permute.xlu2 %6990 }
 0x744   : > { %8311 = vst.msk [vmem:[%s12199_s10 + $0x20] sm:$0xff] %vm8306_vm3, %v8278_v23 }
 0x745   : > { %7073 = vst.msk [vmem:[#allocation5 + $0x38] sm:$0xf] %vm7058_vm1, %v6991_v59  ;;  %v8206_v2 = vpop.f32.mrf.mxu1 }
 0x746   : > { %v8207_v25 = vadd.f32 %v12188_v61, %v8206_v2 }
 0x747   : > { %v6831_v18 = vpop.permute.xlu1 %6830  ;;  %v8725_v45 = vld [vmem:[#allocation5 + $0x30] sm:$0xff] }
 0x748   : > { %6896 = vst.msk [vmem:[#allocation5 + $0x7c] sm:$0xf] %vm6864_vm0, %v6831_v18  ;;  %v8279_v43 = vmax.f32 %v8207_v25, 0.0  ;;  %8223 = vmatmul.bf16.gmra.mxu1 %v8725_v45 }
 0x749   : > { %v7025_v6 = vpop.permute.xlu0 %7024 }
 0x74a   : > { %7090 = vst.msk [vmem:[#allocation5 + $0x7c] sm:$0xf] %vm7058_vm1, %v7025_v6 }
 0x74b   : > { %7651 = vst.msk [vmem:[#allocation5 + $0x7c] sm:$0xf] %vm7619_vm2, %v7586_v21  ;;  %v7554_v38 = vpop.permute.xlu2 %7553 }
 0x74c   : > { %8312 = vst.msk [vmem:[%s12199_s10 + $0x28] sm:$0xff] %vm8306_vm3, %v8279_v43 }
 0x74f   : > { %v7584_v63 = vpop.permute.xlu1 %7583 }
 0x750   : > { %7650 = vst.msk [vmem:[#allocation5 + $0x78] sm:$0xf] %vm7619_vm2, %v7584_v63 }
 0x751   : > { %v7921_v57 = vpop.permute.xlu0 %7920 }
 0x752   : > { %7987 = vst.msk [vmem:[#allocation5 + $0x78] sm:$0xf] %vm7956_vm4, %v7921_v57 }
 0x753   : > { %v8249_v15 = vpop.f32.mrf.mxu3 }
 0x754   : > { %v8250_v5 = vadd.f32 %v12188_v61, %v8249_v15 }
 0x756   : > { %v8296_v37 = vmax.f32 %v8250_v5, 0.0 }
 0x757   : > { %v7923_v33 = vpop.permute.xlu1 %7922 }
 0x758   : > { %7988 = vst.msk [vmem:[#allocation5 + $0x7c] sm:$0xf] %vm7956_vm4, %v7923_v33 }
 0x759   : > { %v6993_v32 = vpop.permute.xlu0 %6992  ;;  %8329 = vst.msk [vmem:[%s12199_s10 + $0xb0] sm:$0xff] %vm8306_vm3, %v8296_v37 }
 0x75a   : > { %7074 = vst.msk [vmem:[#allocation5 + $0x3c] sm:$0xf] %vm7058_vm1, %v6993_v32 }
 0x75b   : > { %7635 = vst.msk [vmem:[#allocation5 + $0x3c] sm:$0xf] %vm7619_vm2, %v7554_v38  ;;  %v8251_v3 = vpop.f32.mrf.mxu3 }
 0x75c   : > { %v8252_v0 = vadd.f32 %v12188_v61, %v8251_v3 }
 0x75d   : > { %v8209_v35 = vpop.f32.mrf.mxu1 }
 0x75e   : > { %v8297_v58 = vmax.f32 %v8252_v0, 0.0  ;;  %v8210_v7 = vadd.f32 %v12188_v61, %v8209_v35 }
 0x75f   : > { %v7552_v46 = vpop.permute.xlu1 %7551  ;;  %v8734_v56 = vld [vmem:[#allocation5 + $0x78] sm:$0xff] }
 0x760   : > { %7634 = vst.msk [vmem:[#allocation5 + $0x38] sm:$0xf] %vm7619_vm2, %v7552_v46  ;;  %v8280_v14 = vmax.f32 %v8210_v7, 0.0  ;;  %8268 = vmatmul.bf16.gmra.mxu3 %v8734_v56 }
 0x761   : > { %8330 = vst.msk [vmem:[%s12199_s10 + $0xb8] sm:$0xff] %vm8306_vm3, %v8297_v58  ;;  %v7889_v55 = vpop.permute.xlu0 %7888 }
 0x762   : > { %7971 = vst.msk [vmem:[#allocation5 + $0x38] sm:$0xf] %vm7956_vm4, %v7889_v55 }
 0x763   : > { %8313 = vst.msk [vmem:[%s12199_s10 + $0x30] sm:$0xff] %vm8306_vm3, %v8280_v14 }
 0x765   : > { %v8211_v50 = vpop.f32.mrf.mxu1 }
 0x766   : > { %v8212_v11 = vadd.f32 %v12188_v61, %v8211_v50 }
 0x767   : > { %v7891_v19 = vpop.permute.xlu1 %7890 }
 0x768   : > { %7972 = vst.msk [vmem:[#allocation5 + $0x3c] sm:$0xf] %vm7956_vm4, %v7891_v19  ;;  %v8281_v8 = vmax.f32 %v8212_v11, 0.0 }
 0x76a   : > { %8314 = vst.msk [vmem:[%s12199_s10 + $0x38] sm:$0xff] %vm8306_vm3, %v8281_v8 }
 0x76f   : > { %v8726_v51 = vld [vmem:[#allocation5 + $0x38] sm:$0xff] }
 0x770   : > { %8228 = vmatmul.bf16.gmra.mxu1 %v8726_v51 }
 0x773   : > { %v8254_v16 = vpop.f32.mrf.mxu3 }
 0x774   : > { %v8255_v12 = vadd.f32 %v12188_v61, %v8254_v16 }
 0x776   : > { %v8298_v24 = vmax.f32 %v8255_v12, 0.0 }
 0x778   : > { %8331 = vst.msk [vmem:[%s12199_s10 + $0xc0] sm:$0xff] %vm8306_vm3, %v8298_v24 }
 0x77b   : > { %v8256_v1 = vpop.f32.mrf.mxu3 }
 0x77c   : > { %v8257_v30 = vadd.f32 %v12188_v61, %v8256_v1 }
 0x77d   : > { %v8214_v17 = vpop.f32.mrf.mxu1 }
 0x77e   : > { %v8299_v47 = vmax.f32 %v8257_v30, 0.0  ;;  %v8215_v42 = vadd.f32 %v12188_v61, %v8214_v17 }
 0x780   : > { %8332 = vst.msk [vmem:[%s12199_s10 + $0xc8] sm:$0xff] %vm8306_vm3, %v8299_v47  ;;  %v8282_v49 = vmax.f32 %v8215_v42, 0.0 }
 0x782   : > { %8315 = vst.msk [vmem:[%s12199_s10 + $0x40] sm:$0xff] %vm8306_vm3, %v8282_v49 }
 0x785   : > { %v8216_v29 = vpop.f32.mrf.mxu1 }
 0x786   : > { %v8217_v27 = vadd.f32 %v12188_v61, %v8216_v29 }
 0x788   : > { %v8283_v40 = vmax.f32 %v8217_v27, 0.0 }
 0x78a   : > { %8316 = vst.msk [vmem:[%s12199_s10 + $0x48] sm:$0xff] %vm8306_vm3, %v8283_v40 }
 0x795   : > { %v8259_v20 = vpop.f32.mrf.mxu3 }
 0x796   : > { %v8260_v41 = vadd.f32 %v12188_v61, %v8259_v20 }
 0x798   : > { %v8300_v4 = vmax.f32 %v8260_v41, 0.0 }
 0x79a   : > { %8333 = vst.msk [vmem:[%s12199_s10 + $0xd0] sm:$0xff] %vm8306_vm3, %v8300_v4 }
 0x79d   : > { %v8261_v53 = vpop.f32.mrf.mxu3 }
 0x79e   : > { %v8262_v9 = vadd.f32 %v12188_v61, %v8261_v53 }
 0x79f   : > { %v8219_v34 = vpop.f32.mrf.mxu1 }
 0x7a0   : > { %v8301_v44 = vmax.f32 %v8262_v9, 0.0  ;;  %v8220_v39 = vadd.f32 %v12188_v61, %v8219_v34 }
 0x7a2   : > { %8334 = vst.msk [vmem:[%s12199_s10 + $0xd8] sm:$0xff] %vm8306_vm3, %v8301_v44  ;;  %v8284_v31 = vmax.f32 %v8220_v39, 0.0 }
 0x7a4   : > { %8317 = vst.msk [vmem:[%s12199_s10 + $0x50] sm:$0xff] %vm8306_vm3, %v8284_v31 }
 0x7a7   : > { %v8221_v62 = vpop.f32.mrf.mxu1 }
 0x7a8   : > { %v8222_v60 = vadd.f32 %v12188_v61, %v8221_v62 }
 0x7aa   : > { %v8285_v28 = vmax.f32 %v8222_v60, 0.0 }
 0x7ac   : > { %8318 = vst.msk [vmem:[%s12199_s10 + $0x58] sm:$0xff] %vm8306_vm3, %v8285_v28 }
 0x7bb   : > { %v8264_v48 = vpop.f32.mrf.mxu3 }
 0x7bc   : > { %v8265_v21 = vadd.f32 %v12188_v61, %v8264_v48 }
 0x7be   : > { %v8302_v52 = vmax.f32 %v8265_v21, 0.0 }
 0x7c0   : > { %8335 = vst.msk [vmem:[%s12199_s10 + $0xe0] sm:$0xff] %vm8306_vm3, %v8302_v52 }
 0x7c3   : > { %v8266_v22 = vpop.f32.mrf.mxu3 }
 0x7c4   : > { %v8267_v26 = vadd.f32 %v12188_v61, %v8266_v22 }
 0x7c5   : > { %v8224_v36 = vpop.f32.mrf.mxu1 }
 0x7c6   : > { %v8303_v54 = vmax.f32 %v8267_v26, 0.0  ;;  %v8225_v13 = vadd.f32 %v12188_v61, %v8224_v36 }
 0x7c8   : > { %8336 = vst.msk [vmem:[%s12199_s10 + $0xe8] sm:$0xff] %vm8306_vm3, %v8303_v54  ;;  %v8286_v10 = vmax.f32 %v8225_v13, 0.0 }
 0x7ca   : > { %8319 = vst.msk [vmem:[%s12199_s10 + $0x60] sm:$0xff] %vm8306_vm3, %v8286_v10 }
 0x7cd   : > { %v8226_v23 = vpop.f32.mrf.mxu1 }
 0x7ce   : > { %v8227_v59 = vadd.f32 %v12188_v61, %v8226_v23 }
 0x7d0   : > { %v8287_v6 = vmax.f32 %v8227_v59, 0.0 }
 0x7d2   : > { %8320 = vst.msk [vmem:[%s12199_s10 + $0x68] sm:$0xff] %vm8306_vm3, %v8287_v6 }
 0x7e3   : > { %v8269_v2 = vpop.f32.mrf.mxu3 }
 0x7e4   : > { %v8270_v18 = vadd.f32 %v12188_v61, %v8269_v2 }
 0x7e6   : > { %v8304_v25 = vmax.f32 %v8270_v18, 0.0 }
 0x7e8   : > { %8337 = vst.msk [vmem:[%s12199_s10 + $0xf0] sm:$0xff] %vm8306_vm3, %v8304_v25 }
 0x7eb   : > { %v8271_v45 = vpop.f32.mrf.mxu3 }
 0x7ec   : > { %v8272_v43 = vadd.f32 %v12188_v61, %v8271_v45 }
 0x7ed   : > { %v8229_v57 = vpop.f32.mrf.mxu1 }
 0x7ee   : > { %v8305_v63 = vmax.f32 %v8272_v43, 0.0  ;;  %v8230_v15 = vadd.f32 %v12188_v61, %v8229_v57 }
 0x7f0   : > { %8338 = vst.msk [vmem:[%s12199_s10 + $0xf8] sm:$0xff] %vm8306_vm3, %v8305_v63  ;;  %v8288_v5 = vmax.f32 %v8230_v15, 0.0 }
 0x7f2   : > { %8321 = vst.msk [vmem:[%s12199_s10 + $0x70] sm:$0xff] %vm8306_vm3, %v8288_v5 }
 0x7f5   : > { %v8231_v32 = vpop.f32.mrf.mxu1 }
 0x7f6   : > { %v8232_v38 = vadd.f32 %v12188_v61, %v8231_v32 }
 0x7f8   : > { %v8289_v37 = vmax.f32 %v8232_v38, 0.0 }
 0x7fa   : > { %8322 = vst.msk [vmem:[%s12199_s10 + $0x78] sm:$0xff] %vm8306_vm3, %v8289_v37 }
 0x7fb PF: > { %s15_s18 = sadd.s32 1, %s8790_s18  }
 0x7fc   : > { %p12_p4 = scmp.ge.s32.totalorder %s15_s18, 4  }
 0x7fe   :  { %14 = sbr.rel (!%p12_p4) target bundleno = 1 (0x1), region = 74 }

</bundles_post_ra>
